<compile_context>
chip_gen: v7x
topology: tpu7x:2x2x1
jax: 0.10.0
libtpu: 0.0.40
codegen_flags: <defaults>
</compile_context>

<pallas_src>
import inspect
import math
from functools import partial

import jax
import jax.numpy as jnp
from jax.experimental import pallas as pl
from jax.experimental.pallas import tpu as pltpu

_BF16 = jnp.bfloat16


def _bf16(x):
    return x.astype(_BF16)


# ------------------------- in-kernel building blocks -------------------------

def _linear(x_bf16, w_ref, b_ref):
    """x @ W + b; bf16 MXU operands, f32 accumulation, f32 bias."""
    return jnp.dot(x_bf16, w_ref[...], preferred_element_type=jnp.float32) + b_ref[...]


def _layer_norm(x, g_ref, b_ref, eps=1e-5):
    # Single-pass statistics: E[x] and E[x^2] are independent reductions
    # (var = E[x^2] - E[x]^2) instead of two dependent XLU sweeps.
    xf = x.astype(jnp.float32)
    mean = jnp.mean(xf, axis=-1, keepdims=True)
    mean_sq = jnp.mean(xf * xf, axis=-1, keepdims=True)
    var = mean_sq - mean * mean
    inv = jax.lax.rsqrt(var + eps)
    return (xf - mean) * inv * g_ref[...] + b_ref[...]


def _mha(qp, kp, vp, num_heads):
    """Multi-head SDPA with the head dim as a dot_general batch dim.

    No per-head lane slicing / concatenate.  Softmax math stays f32; the
    normalisation uses the EUP reciprocal instead of a VALU divide.
    """
    nq, dint = qp.shape
    nk = kp.shape[0]
    dh = dint // num_heads
    scale = 1.0 / math.sqrt(dh)

    q3 = _bf16(qp).reshape(nq, num_heads, dh)
    k3 = _bf16(kp).reshape(nk, num_heads, dh)
    v3 = _bf16(vp).reshape(nk, num_heads, dh)

    s = jnp.einsum("qhd,khd->hqk", q3, k3,
                   preferred_element_type=jnp.float32) * scale
    m = jnp.max(s, axis=-1, keepdims=True)
    e = jnp.exp(s - m)
    l = jnp.sum(e, axis=-1, keepdims=True)
    p = e * pl.reciprocal(l, approx=True)      # EUP slot, not a VALU divide
    o = jnp.einsum("hqk,khd->qhd", _bf16(p), v3,
                   preferred_element_type=jnp.float32)
    return o.reshape(nq, dint)


def _attention(ap, q_in, k_in, v_in, num_heads):
    qp = _linear(_bf16(q_in), ap["wq"], ap["bq"])
    kp = _linear(_bf16(k_in), ap["wk"], ap["bk"])
    vp = _linear(_bf16(v_in), ap["wv"], ap["bv"])
    o = _mha(qp, kp, vp, num_heads)
    return _linear(_bf16(o), ap["wo"], ap["bo"])


def _block(lp, queries, keys, query_pe, key_pe, num_heads, skip_first_layer_pe):
    # (1) self attention on the sparse tokens
    if skip_first_layer_pe:
        queries = _attention(lp["self_attn"], queries, queries, queries, num_heads)
    else:
        q = queries + query_pe
        queries = queries + _attention(lp["self_attn"], q, q, queries, num_heads)
    queries = _layer_norm(queries, lp["norm1_g"], lp["norm1_b"])

    # keys + key_pe computed once, reused by steps (2) and (4) (keys do not
    # change in between).  Its two big (HW, C) projections — t2i key-proj and
    # i2t query-proj — are fused into one (C, 2*Dint) matmul so the 256-wide
    # MXU on v6e/v7x is fully filled.
    kk_bf16 = _bf16(keys + key_pe)
    dint = lp["cross_t2i"]["wo"].shape[0]
    kq = _linear(kk_bf16, lp["w_kk_fused"], lp["b_kk_fused"])   # (HW, 2*Dint)
    k_t2i = kq[:, :dint]
    q_i2t = kq[:, dint:]

    # (2) cross attention: tokens -> image
    t2i = lp["cross_t2i"]
    q = queries + query_pe
    qp = _linear(_bf16(q), t2i["wq"], t2i["bq"])
    vp = _linear(_bf16(keys), t2i["wv"], t2i["bv"])
    o = _mha(qp, k_t2i, vp, num_heads)
    queries = queries + _linear(_bf16(o), t2i["wo"], t2i["bo"])
    queries = _layer_norm(queries, lp["norm2_g"], lp["norm2_b"])

    # (3) MLP on tokens (Linear -> ReLU -> Linear)
    h = jnp.maximum(_linear(_bf16(queries), lp["mlp_w1"], lp["mlp_b1"]), 0.0)
    queries = queries + _linear(_bf16(h), lp["mlp_w2"], lp["mlp_b2"])
    queries = _layer_norm(queries, lp["norm3_g"], lp["norm3_b"])

    # (4) cross attention: image -> tokens (q_i2t already computed above)
    i2t = lp["cross_i2t"]
    q = queries + query_pe
    kp = _linear(_bf16(q), i2t["wk"], i2t["bk"])
    vp = _linear(_bf16(queries), i2t["wv"], i2t["bv"])
    o = _mha(q_i2t, kp, vp, num_heads)
    keys = keys + _linear(_bf16(o), i2t["wo"], i2t["bo"])
    keys = _layer_norm(keys, lp["norm4_g"], lp["norm4_b"])
    return queries, keys


def _make_kernel(treedef, n_params, num_heads, depth):
    def kernel(*refs):
        img_ref, pe_ref, pts_ref = refs[0], refs[1], refs[2]
        param_refs = refs[3:3 + n_params]
        q_out_ref = refs[3 + n_params]
        k_out_ref = refs[4 + n_params]

        # Unflatten into a pytree of *refs*: every weight is read at its use
        # site so Mosaic keeps them as VMEM matmul operands (short live ranges).
        p = jax.tree_util.tree_unflatten(treedef, list(param_refs))

        keys = img_ref[...].astype(jnp.float32)      # residual stream stays f32
        key_pe = pe_ref[...].astype(jnp.float32)
        query_pe = pts_ref[...].astype(jnp.float32)
        queries = query_pe                           # queries start == point_embedding

        for i in range(depth):                       # unrolled; weights stay in VMEM
            queries, keys = _block(p["layers"][i], queries, keys,
                                   query_pe, key_pe, num_heads,
                                   skip_first_layer_pe=(i == 0))

        # final token -> image attention + final LayerNorm
        q = queries + query_pe
        kk = keys + key_pe
        queries = queries + _attention(p["final_attn"], q, kk, keys, num_heads)
        queries = _layer_norm(queries, p["norm_final_g"], p["norm_final_b"])

        q_out_ref[...] = queries.astype(q_out_ref.dtype)
        k_out_ref[...] = keys.astype(k_out_ref.dtype)

    return kernel


# --------------------------------- wrapper ----------------------------------

def _supports_pipeline_mode():
    if not hasattr(pl, "Buffered"):
        return False
    try:
        return "pipeline_mode" in inspect.signature(pl.BlockSpec).parameters
    except (TypeError, ValueError):
        return False


def _pick_vmem_limit_bytes():
    # Per-generation VMEM budget with headroom (v7x only has 64 MiB per core).
    try:
        cap = getattr(pltpu.get_tpu_info(), "vmem_capacity_bytes", None)
        if cap:
            return int(min(cap * 0.8, 100 * 1024 * 1024))
    except Exception:
        pass
    return 48 * 1024 * 1024


def two_way_transformer_forward(kparams, image_embedding, image_pe,
                                point_embedding, num_heads):
    B, C, H, W = image_embedding.shape
    HW = H * W
    Nq = point_embedding.shape[1]

    # NCHW -> token-major relayout fused with the bf16 downcast: the XLA
    # transpose writes half the bytes and every per-grid-step input DMA moves
    # half the bytes.  In-kernel residual / LayerNorm math is upcast to f32.
    img = image_embedding.reshape(B, C, HW).transpose(0, 2, 1).astype(_BF16)
    pe = image_pe.reshape(B, C, HW).transpose(0, 2, 1).astype(_BF16)

    flat_params, treedef = jax.tree_util.tree_flatten(kparams)
    depth = len(kparams["layers"])
    kernel = _make_kernel(treedef, len(flat_params), num_heads, depth)

    use_buffered = _supports_pipeline_mode()

    def _batched(shape):
        nd = len(shape)
        return pl.BlockSpec((None,) + tuple(shape[1:]),
                            lambda b, _nd=nd: (b,) + (0,) * (_nd - 1))

    def _weight(shape):
        nd = len(shape)
        idx = lambda b, _nd=nd: (0,) * _nd
        if use_buffered:
            # Weights never change across the batch grid: one VMEM buffer
            # (no double-buffering) halves the resident weight footprint.
            return pl.BlockSpec(tuple(shape), idx, pipeline_mode=pl.Buffered(1))
        return pl.BlockSpec(tuple(shape), idx)

    in_specs = ([_batched(img.shape), _batched(pe.shape),
                 _batched(point_embedding.shape)]
                + [_weight(p.shape) for p in flat_params])
    out_specs = [_batched((B, Nq, C)), _batched((B, HW, C))]
    out_shape = [jax.ShapeDtypeStruct((B, Nq, C), jnp.float32),
                 jax.ShapeDtypeStruct((B, HW, C), jnp.float32)]

    # TODO(synk): for B == 1 on v7x, add a second "parallel" grid axis over HW
    # tiles (online-softmax for the t2i reduction) so both TensorCores get
    # keys-side work; a batch-only grid leaves one core idle.
    q_out, k_out = pl.pallas_call(
        kernel,
        grid=(B,),                      # batch grid; "parallel" -> megacore split
        in_specs=in_specs,
        out_specs=out_specs,
        out_shape=out_shape,
        compiler_params=pltpu.CompilerParams(
            dimension_semantics=("parallel",),
            vmem_limit_bytes=_pick_vmem_limit_bytes()),
    )(img, pe, point_embedding, *flat_params)
    return q_out, k_out


# --------------------------- parameter creation ------------------------------

def init_linear_params(key, din, dout):
    kw, kb = jax.random.split(key)
    # weights stored pre-transposed: (Din, Dout)
    w = jax.random.normal(kw, (din, dout), jnp.float32) / math.sqrt(din)
    b = jax.random.normal(kb, (1, dout), jnp.float32) * 0.01
    return w, b


def init_attention_params(key, embedding_dim, downsample_rate=1, kv_in_dim=None):
    kv_in_dim = embedding_dim if kv_in_dim is None else kv_in_dim
    internal_dim = embedding_dim // downsample_rate
    kq, kk, kv, ko = jax.random.split(key, 4)
    wq, bq = init_linear_params(kq, embedding_dim, internal_dim)
    wk, bk = init_linear_params(kk, kv_in_dim, internal_dim)
    wv, bv = init_linear_params(kv, kv_in_dim, internal_dim)
    wo, bo = init_linear_params(ko, internal_dim, embedding_dim)
    return dict(wq=wq, bq=bq, wk=wk, bk=bk, wv=wv, bv=bv, wo=wo, bo=bo)


def init_block_params(key, embedding_dim, mlp_dim, attention_downsample_rate=2):
    ks = jax.random.split(key, 5)
    w1, b1 = init_linear_params(ks[3], embedding_dim, mlp_dim)
    w2, b2 = init_linear_params(ks[4], mlp_dim, embedding_dim)
    ones = jnp.ones((1, embedding_dim), jnp.float32)
    zeros = jnp.zeros((1, embedding_dim), jnp.float32)
    return dict(
        self_attn=init_attention_params(ks[0], embedding_dim, downsample_rate=1),
        cross_t2i=init_attention_params(ks[1], embedding_dim,
                                        downsample_rate=attention_downsample_rate),
        cross_i2t=init_attention_params(ks[2], embedding_dim,
                                        downsample_rate=attention_downsample_rate),
        mlp_w1=w1, mlp_b1=b1, mlp_w2=w2, mlp_b2=b2,
        norm1_g=ones, norm1_b=zeros, norm2_g=ones, norm2_b=zeros,
        norm3_g=ones, norm3_b=zeros, norm4_g=ones, norm4_b=zeros,
    )


def init_two_way_transformer(key, depth, embedding_dim, mlp_dim,
                             attention_downsample_rate=2):
    keys = jax.random.split(key, depth + 1)
    layers = [
        init_block_params(keys[i], embedding_dim, mlp_dim, attention_downsample_rate)
        for i in range(depth)
    ]
    final_attn = init_attention_params(
        keys[depth], embedding_dim, downsample_rate=attention_downsample_rate)
    return dict(
        layers=layers,
        final_attn=final_attn,
        norm_final_g=jnp.ones((1, embedding_dim), jnp.float32),
        norm_final_b=jnp.zeros((1, embedding_dim), jnp.float32),
    )


def _cast_attn_weights(ap, drop=()):
    out = {}
    for name in ("q", "k", "v", "o"):
        if name in drop:
            continue
        out["w" + name] = ap["w" + name].astype(_BF16)
        out["b" + name] = ap["b" + name]
    return out


def prepare_kernel_params(params):
    """Kernel-side parameter layout: matmul weights in bf16, biases / LayerNorm
    params in f32, plus a per-layer fused [t2i.k_proj | i2t.q_proj] weight for
    the shared (keys + key_pe) operand."""
    layers = []
    for lp in params["layers"]:
        t2i, i2t = lp["cross_t2i"], lp["cross_i2t"]
        layers.append(dict(
            self_attn=_cast_attn_weights(lp["self_attn"]),
            cross_t2i=_cast_attn_weights(t2i, drop=("k",)),
            cross_i2t=_cast_attn_weights(i2t, drop=("q",)),
            w_kk_fused=jnp.concatenate([t2i["wk"], i2t["wq"]], axis=1).astype(_BF16),
            b_kk_fused=jnp.concatenate([t2i["bk"], i2t["bq"]], axis=1),
            mlp_w1=lp["mlp_w1"].astype(_BF16), mlp_b1=lp["mlp_b1"],
            mlp_w2=lp["mlp_w2"].astype(_BF16), mlp_b2=lp["mlp_b2"],
            norm1_g=lp["norm1_g"], norm1_b=lp["norm1_b"],
            norm2_g=lp["norm2_g"], norm2_b=lp["norm2_b"],
            norm3_g=lp["norm3_g"], norm3_b=lp["norm3_b"],
            norm4_g=lp["norm4_g"], norm4_b=lp["norm4_b"],
        ))
    return dict(
        layers=layers,
        final_attn=_cast_attn_weights(params["final_attn"]),
        norm_final_g=params["norm_final_g"],
        norm_final_b=params["norm_final_b"],
    )


# ----------------------------------- main ------------------------------------

if __name__ == "__main__":
    depth = 2
    embedding_dim = 32
    num_heads = 2
    mlp_dim = 64
    B, H, W = 2, 8, 8
    n_points = 8

    key = jax.random.PRNGKey(0)
    k_img, k_pe, k_pts, k_params = jax.random.split(key, 4)

    image_embedding = jax.random.normal(k_img, (B, embedding_dim, H, W), jnp.float32)
    image_pe = jax.random.normal(k_pe, (B, embedding_dim, H, W), jnp.float32)
    point_embedding = jax.random.normal(k_pts, (B, n_points, embedding_dim),
                                        jnp.float32)

    params = init_two_way_transformer(k_params, depth, embedding_dim, mlp_dim)
    kparams = prepare_kernel_params(params)        # one-time bf16 cast + fusion

    fwd = jax.jit(partial(two_way_transformer_forward, num_heads=num_heads))
    queries, keys = fwd(kparams, image_embedding, image_pe, point_embedding)
    queries, keys = jax.block_until_ready((queries, keys))

    assert queries.shape == (B, n_points, embedding_dim)
    assert keys.shape == (B, H * W, embedding_dim)
    assert jnp.all(jnp.isfinite(queries)) and jnp.all(jnp.isfinite(keys))
    print("KERNEL_OK")
</pallas_src>

<mosaic_0001>
module attributes {stable_mosaic.version = 11 : i64} {
  func.func @kernel(%arg0: i32, %arg1: memref<1x64x32xbf16, #tpu.memory_space<vmem>>, %arg2: memref<1x64x32xbf16, #tpu.memory_space<vmem>>, %arg3: memref<1x8x32xf32, #tpu.memory_space<vmem>>, %arg4: memref<1x16xf32, #tpu.memory_space<vmem>>, %arg5: memref<1x32xf32, #tpu.memory_space<vmem>>, %arg6: memref<1x16xf32, #tpu.memory_space<vmem>>, %arg7: memref<1x16xf32, #tpu.memory_space<vmem>>, %arg8: memref<32x16xbf16, #tpu.memory_space<vmem>>, %arg9: memref<16x32xbf16, #tpu.memory_space<vmem>>, %arg10: memref<32x16xbf16, #tpu.memory_space<vmem>>, %arg11: memref<32x16xbf16, #tpu.memory_space<vmem>>, %arg12: memref<1x32xf32, #tpu.memory_space<vmem>>, %arg13: memref<1x16xf32, #tpu.memory_space<vmem>>, %arg14: memref<1x32xf32, #tpu.memory_space<vmem>>, %arg15: memref<1x16xf32, #tpu.memory_space<vmem>>, %arg16: memref<32x16xbf16, #tpu.memory_space<vmem>>, %arg17: memref<16x32xbf16, #tpu.memory_space<vmem>>, %arg18: memref<32x16xbf16, #tpu.memory_space<vmem>>, %arg19: memref<1x32xf32, #tpu.memory_space<vmem>>, %arg20: memref<1x16xf32, #tpu.memory_space<vmem>>, %arg21: memref<1x16xf32, #tpu.memory_space<vmem>>, %arg22: memref<16x32xbf16, #tpu.memory_space<vmem>>, %arg23: memref<32x16xbf16, #tpu.memory_space<vmem>>, %arg24: memref<32x16xbf16, #tpu.memory_space<vmem>>, %arg25: memref<1x64xf32, #tpu.memory_space<vmem>>, %arg26: memref<1x32xf32, #tpu.memory_space<vmem>>, %arg27: memref<32x64xbf16, #tpu.memory_space<vmem>>, %arg28: memref<64x32xbf16, #tpu.memory_space<vmem>>, %arg29: memref<1x32xf32, #tpu.memory_space<vmem>>, %arg30: memref<1x32xf32, #tpu.memory_space<vmem>>, %arg31: memref<1x32xf32, #tpu.memory_space<vmem>>, %arg32: memref<1x32xf32, #tpu.memory_space<vmem>>, %arg33: memref<1x32xf32, #tpu.memory_space<vmem>>, %arg34: memref<1x32xf32, #tpu.memory_space<vmem>>, %arg35: memref<1x32xf32, #tpu.memory_space<vmem>>, %arg36: memref<1x32xf32, #tpu.memory_space<vmem>>, %arg37: memref<1x32xf32, #tpu.memory_space<vmem>>, %arg38: memref<1x32xf32, #tpu.memory_space<vmem>>, %arg39: memref<1x32xf32, #tpu.memory_space<vmem>>, %arg40: memref<1x32xf32, #tpu.memory_space<vmem>>, %arg41: memref<32x32xbf16, #tpu.memory_space<vmem>>, %arg42: memref<32x32xbf16, #tpu.memory_space<vmem>>, %arg43: memref<32x32xbf16, #tpu.memory_space<vmem>>, %arg44: memref<32x32xbf16, #tpu.memory_space<vmem>>, %arg45: memref<32x32xbf16, #tpu.memory_space<vmem>>, %arg46: memref<1x32xf32, #tpu.memory_space<vmem>>, %arg47: memref<1x16xf32, #tpu.memory_space<vmem>>, %arg48: memref<1x32xf32, #tpu.memory_space<vmem>>, %arg49: memref<1x16xf32, #tpu.memory_space<vmem>>, %arg50: memref<32x16xbf16, #tpu.memory_space<vmem>>, %arg51: memref<16x32xbf16, #tpu.memory_space<vmem>>, %arg52: memref<32x16xbf16, #tpu.memory_space<vmem>>, %arg53: memref<1x32xf32, #tpu.memory_space<vmem>>, %arg54: memref<1x16xf32, #tpu.memory_space<vmem>>, %arg55: memref<1x16xf32, #tpu.memory_space<vmem>>, %arg56: memref<16x32xbf16, #tpu.memory_space<vmem>>, %arg57: memref<32x16xbf16, #tpu.memory_space<vmem>>, %arg58: memref<32x16xbf16, #tpu.memory_space<vmem>>, %arg59: memref<1x64xf32, #tpu.memory_space<vmem>>, %arg60: memref<1x32xf32, #tpu.memory_space<vmem>>, %arg61: memref<32x64xbf16, #tpu.memory_space<vmem>>, %arg62: memref<64x32xbf16, #tpu.memory_space<vmem>>, %arg63: memref<1x32xf32, #tpu.memory_space<vmem>>, %arg64: memref<1x32xf32, #tpu.memory_space<vmem>>, %arg65: memref<1x32xf32, #tpu.memory_space<vmem>>, %arg66: memref<1x32xf32, #tpu.memory_space<vmem>>, %arg67: memref<1x32xf32, #tpu.memory_space<vmem>>, %arg68: memref<1x32xf32, #tpu.memory_space<vmem>>, %arg69: memref<1x32xf32, #tpu.memory_space<vmem>>, %arg70: memref<1x32xf32, #tpu.memory_space<vmem>>, %arg71: memref<1x32xf32, #tpu.memory_space<vmem>>, %arg72: memref<1x32xf32, #tpu.memory_space<vmem>>, %arg73: memref<1x32xf32, #tpu.memory_space<vmem>>, %arg74: memref<1x32xf32, #tpu.memory_space<vmem>>, %arg75: memref<32x32xbf16, #tpu.memory_space<vmem>>, %arg76: memref<32x32xbf16, #tpu.memory_space<vmem>>, %arg77: memref<32x32xbf16, #tpu.memory_space<vmem>>, %arg78: memref<32x32xbf16, #tpu.memory_space<vmem>>, %arg79: memref<32x32xbf16, #tpu.memory_space<vmem>>, %arg80: memref<1x32xf32, #tpu.memory_space<vmem>>, %arg81: memref<1x32xf32, #tpu.memory_space<vmem>>, %arg82: memref<1x8x32xf32, #tpu.memory_space<vmem>>, %arg83: memref<1x64x32xf32, #tpu.memory_space<vmem>>) attributes {dimension_semantics = [#tpu.dimension_semantics<parallel>], iteration_bounds = array<i64: 2>, scalar_prefetch = 0 : i64, scratch_operands = 0 : i64, tpu.core_type = #tpu.core_type<tc>, window_params = [{transform_indices = @transform_0, window_bounds = array<i64: 1, 64, 32>}, {transform_indices = @transform_1, window_bounds = array<i64: 1, 64, 32>}, {transform_indices = @transform_2, window_bounds = array<i64: 1, 8, 32>}, {pipeline_mode = #tpu.pipeline_mode<synchronous>, transform_indices = @transform_3, window_bounds = array<i64: 1, 16>}, {pipeline_mode = #tpu.pipeline_mode<synchronous>, transform_indices = @transform_4, window_bounds = array<i64: 1, 32>}, {pipeline_mode = #tpu.pipeline_mode<synchronous>, transform_indices = @transform_5, window_bounds = array<i64: 1, 16>}, {pipeline_mode = #tpu.pipeline_mode<synchronous>, transform_indices = @transform_6, window_bounds = array<i64: 1, 16>}, {pipeline_mode = #tpu.pipeline_mode<synchronous>, transform_indices = @transform_7, window_bounds = array<i64: 32, 16>}, {pipeline_mode = #tpu.pipeline_mode<synchronous>, transform_indices = @transform_8, window_bounds = array<i64: 16, 32>}, {pipeline_mode = #tpu.pipeline_mode<synchronous>, transform_indices = @transform_9, window_bounds = array<i64: 32, 16>}, {pipeline_mode = #tpu.pipeline_mode<synchronous>, transform_indices = @transform_10, window_bounds = array<i64: 32, 16>}, {pipeline_mode = #tpu.pipeline_mode<synchronous>, transform_indices = @transform_11, window_bounds = array<i64: 1, 32>}, {pipeline_mode = #tpu.pipeline_mode<synchronous>, transform_indices = @transform_12, window_bounds = array<i64: 1, 16>}, {pipeline_mode = #tpu.pipeline_mode<synchronous>, transform_indices = @transform_13, window_bounds = array<i64: 1, 32>}, {pipeline_mode = #tpu.pipeline_mode<synchronous>, transform_indices = @transform_14, window_bounds = array<i64: 1, 16>}, {pipeline_mode = #tpu.pipeline_mode<synchronous>, transform_indices = @transform_15, window_bounds = array<i64: 32, 16>}, {pipeline_mode = #tpu.pipeline_mode<synchronous>, transform_indices = @transform_16, window_bounds = array<i64: 16, 32>}, {pipeline_mode = #tpu.pipeline_mode<synchronous>, transform_indices = @transform_17, window_bounds = array<i64: 32, 16>}, {pipeline_mode = #tpu.pipeline_mode<synchronous>, transform_indices = @transform_18, window_bounds = array<i64: 1, 32>}, {pipeline_mode = #tpu.pipeline_mode<synchronous>, transform_indices = @transform_19, window_bounds = array<i64: 1, 16>}, {pipeline_mode = #tpu.pipeline_mode<synchronous>, transform_indices = @transform_20, window_bounds = array<i64: 1, 16>}, {pipeline_mode = #tpu.pipeline_mode<synchronous>, transform_indices = @transform_21, window_bounds = array<i64: 16, 32>}, {pipeline_mode = #tpu.pipeline_mode<synchronous>, transform_indices = @transform_22, window_bounds = array<i64: 32, 16>}, {pipeline_mode = #tpu.pipeline_mode<synchronous>, transform_indices = @transform_23, window_bounds = array<i64: 32, 16>}, {pipeline_mode = #tpu.pipeline_mode<synchronous>, transform_indices = @transform_24, window_bounds = array<i64: 1, 64>}, {pipeline_mode = #tpu.pipeline_mode<synchronous>, transform_indices = @transform_25, window_bounds = array<i64: 1, 32>}, {pipeline_mode = #tpu.pipeline_mode<synchronous>, transform_indices = @transform_26, window_bounds = array<i64: 32, 64>}, {pipeline_mode = #tpu.pipeline_mode<synchronous>, transform_indices = @transform_27, window_bounds = array<i64: 64, 32>}, {pipeline_mode = #tpu.pipeline_mode<synchronous>, transform_indices = @transform_28, window_bounds = array<i64: 1, 32>}, {pipeline_mode = #tpu.pipeline_mode<synchronous>, transform_indices = @transform_29, window_bounds = array<i64: 1, 32>}, {pipeline_mode = #tpu.pipeline_mode<synchronous>, transform_indices = @transform_30, window_bounds = array<i64: 1, 32>}, {pipeline_mode = #tpu.pipeline_mode<synchronous>, transform_indices = @transform_31, window_bounds = array<i64: 1, 32>}, {pipeline_mode = #tpu.pipeline_mode<synchronous>, transform_indices = @transform_32, window_bounds = array<i64: 1, 32>}, {pipeline_mode = #tpu.pipeline_mode<synchronous>, transform_indices = @transform_33, window_bounds = array<i64: 1, 32>}, {pipeline_mode = #tpu.pipeline_mode<synchronous>, transform_indices = @transform_34, window_bounds = array<i64: 1, 32>}, {pipeline_mode = #tpu.pipeline_mode<synchronous>, transform_indices = @transform_35, window_bounds = array<i64: 1, 32>}, {pipeline_mode = #tpu.pipeline_mode<synchronous>, transform_indices = @transform_36, window_bounds = array<i64: 1, 32>}, {pipeline_mode = #tpu.pipeline_mode<synchronous>, transform_indices = @transform_37, window_bounds = array<i64: 1, 32>}, {pipeline_mode = #tpu.pipeline_mode<synchronous>, transform_indices = @transform_38, window_bounds = array<i64: 1, 32>}, {pipeline_mode = #tpu.pipeline_mode<synchronous>, transform_indices = @transform_39, window_bounds = array<i64: 1, 32>}, {pipeline_mode = #tpu.pipeline_mode<synchronous>, transform_indices = @transform_40, window_bounds = array<i64: 32, 32>}, {pipeline_mode = #tpu.pipeline_mode<synchronous>, transform_indices = @transform_41, window_bounds = array<i64: 32, 32>}, {pipeline_mode = #tpu.pipeline_mode<synchronous>, transform_indices = @transform_42, window_bounds = array<i64: 32, 32>}, {pipeline_mode = #tpu.pipeline_mode<synchronous>, transform_indices = @transform_43, window_bounds = array<i64: 32, 32>}, {pipeline_mode = #tpu.pipeline_mode<synchronous>, transform_indices = @transform_44, window_bounds = array<i64: 32, 32>}, {pipeline_mode = #tpu.pipeline_mode<synchronous>, transform_indices = @transform_45, window_bounds = array<i64: 1, 32>}, {pipeline_mode = #tpu.pipeline_mode<synchronous>, transform_indices = @transform_46, window_bounds = array<i64: 1, 16>}, {pipeline_mode = #tpu.pipeline_mode<synchronous>, transform_indices = @transform_47, window_bounds = array<i64: 1, 32>}, {pipeline_mode = #tpu.pipeline_mode<synchronous>, transform_indices = @transform_48, window_bounds = array<i64: 1, 16>}, {pipeline_mode = #tpu.pipeline_mode<synchronous>, transform_indices = @transform_49, window_bounds = array<i64: 32, 16>}, {pipeline_mode = #tpu.pipeline_mode<synchronous>, transform_indices = @transform_50, window_bounds = array<i64: 16, 32>}, {pipeline_mode = #tpu.pipeline_mode<synchronous>, transform_indices = @transform_51, window_bounds = array<i64: 32, 16>}, {pipeline_mode = #tpu.pipeline_mode<synchronous>, transform_indices = @transform_52, window_bounds = array<i64: 1, 32>}, {pipeline_mode = #tpu.pipeline_mode<synchronous>, transform_indices = @transform_53, window_bounds = array<i64: 1, 16>}, {pipeline_mode = #tpu.pipeline_mode<synchronous>, transform_indices = @transform_54, window_bounds = array<i64: 1, 16>}, {pipeline_mode = #tpu.pipeline_mode<synchronous>, transform_indices = @transform_55, window_bounds = array<i64: 16, 32>}, {pipeline_mode = #tpu.pipeline_mode<synchronous>, transform_indices = @transform_56, window_bounds = array<i64: 32, 16>}, {pipeline_mode = #tpu.pipeline_mode<synchronous>, transform_indices = @transform_57, window_bounds = array<i64: 32, 16>}, {pipeline_mode = #tpu.pipeline_mode<synchronous>, transform_indices = @transform_58, window_bounds = array<i64: 1, 64>}, {pipeline_mode = #tpu.pipeline_mode<synchronous>, transform_indices = @transform_59, window_bounds = array<i64: 1, 32>}, {pipeline_mode = #tpu.pipeline_mode<synchronous>, transform_indices = @transform_60, window_bounds = array<i64: 32, 64>}, {pipeline_mode = #tpu.pipeline_mode<synchronous>, transform_indices = @transform_61, window_bounds = array<i64: 64, 32>}, {pipeline_mode = #tpu.pipeline_mode<synchronous>, transform_indices = @transform_62, window_bounds = array<i64: 1, 32>}, {pipeline_mode = #tpu.pipeline_mode<synchronous>, transform_indices = @transform_63, window_bounds = array<i64: 1, 32>}, {pipeline_mode = #tpu.pipeline_mode<synchronous>, transform_indices = @transform_64, window_bounds = array<i64: 1, 32>}, {pipeline_mode = #tpu.pipeline_mode<synchronous>, transform_indices = @transform_65, window_bounds = array<i64: 1, 32>}, {pipeline_mode = #tpu.pipeline_mode<synchronous>, transform_indices = @transform_66, window_bounds = array<i64: 1, 32>}, {pipeline_mode = #tpu.pipeline_mode<synchronous>, transform_indices = @transform_67, window_bounds = array<i64: 1, 32>}, {pipeline_mode = #tpu.pipeline_mode<synchronous>, transform_indices = @transform_68, window_bounds = array<i64: 1, 32>}, {pipeline_mode = #tpu.pipeline_mode<synchronous>, transform_indices = @transform_69, window_bounds = array<i64: 1, 32>}, {pipeline_mode = #tpu.pipeline_mode<synchronous>, transform_indices = @transform_70, window_bounds = array<i64: 1, 32>}, {pipeline_mode = #tpu.pipeline_mode<synchronous>, transform_indices = @transform_71, window_bounds = array<i64: 1, 32>}, {pipeline_mode = #tpu.pipeline_mode<synchronous>, transform_indices = @transform_72, window_bounds = array<i64: 1, 32>}, {pipeline_mode = #tpu.pipeline_mode<synchronous>, transform_indices = @transform_73, window_bounds = array<i64: 1, 32>}, {pipeline_mode = #tpu.pipeline_mode<synchronous>, transform_indices = @transform_74, window_bounds = array<i64: 32, 32>}, {pipeline_mode = #tpu.pipeline_mode<synchronous>, transform_indices = @transform_75, window_bounds = array<i64: 32, 32>}, {pipeline_mode = #tpu.pipeline_mode<synchronous>, transform_indices = @transform_76, window_bounds = array<i64: 32, 32>}, {pipeline_mode = #tpu.pipeline_mode<synchronous>, transform_indices = @transform_77, window_bounds = array<i64: 32, 32>}, {pipeline_mode = #tpu.pipeline_mode<synchronous>, transform_indices = @transform_78, window_bounds = array<i64: 32, 32>}, {pipeline_mode = #tpu.pipeline_mode<synchronous>, transform_indices = @transform_79, window_bounds = array<i64: 1, 32>}, {pipeline_mode = #tpu.pipeline_mode<synchronous>, transform_indices = @transform_80, window_bounds = array<i64: 1, 32>}, {transform_indices = @transform_81, window_bounds = array<i64: 1, 8, 32>}, {transform_indices = @transform_82, window_bounds = array<i64: 1, 64, 32>}]} {
    %c0 = arith.constant 0 : index
    %c0_0 = arith.constant 0 : index
    %c0_1 = arith.constant 0 : index
    %0 = vector.load %arg1[%c0, %c0_0, %c0_1] : memref<1x64x32xbf16, #tpu.memory_space<vmem>>, vector<1x64x32xbf16>
    %1 = vector.shape_cast %0 : vector<1x64x32xbf16> to vector<64x32xbf16>
    %2 = arith.extf %1 : vector<64x32xbf16> to vector<64x32xf32>
    %c0_2 = arith.constant 0 : index
    %c0_3 = arith.constant 0 : index
    %c0_4 = arith.constant 0 : index
    %3 = vector.load %arg2[%c0_2, %c0_3, %c0_4] : memref<1x64x32xbf16, #tpu.memory_space<vmem>>, vector<1x64x32xbf16>
    %4 = vector.shape_cast %3 : vector<1x64x32xbf16> to vector<64x32xbf16>
    %5 = arith.extf %4 : vector<64x32xbf16> to vector<64x32xf32>
    %c0_5 = arith.constant 0 : index
    %c0_6 = arith.constant 0 : index
    %c0_7 = arith.constant 0 : index
    %6 = vector.load %arg3[%c0_5, %c0_6, %c0_7] : memref<1x8x32xf32, #tpu.memory_space<vmem>>, vector<1x8x32xf32>
    %7 = vector.shape_cast %6 : vector<1x8x32xf32> to vector<8x32xf32>
    %8 = arith.truncf %7 : vector<8x32xf32> to vector<8x32xbf16>
    %c0_8 = arith.constant 0 : index
    %c0_9 = arith.constant 0 : index
    %9 = vector.load %arg43[%c0_8, %c0_9] : memref<32x32xbf16, #tpu.memory_space<vmem>>, vector<32x32xbf16>
    %cst = arith.constant dense<0.000000e+00> : vector<8x32xf32>
    %10 = tpu.matmul %8, %9, %cst {dimension_numbers = #tpu.dot_dimension_numbers<[1], [0], [0], [1], [0, 0, 1, 1], [], []>} : vector<8x32xbf16>, vector<32x32xbf16>, vector<8x32xf32> -> vector<8x32xf32>
    %c0_10 = arith.constant 0 : index
    %c0_11 = arith.constant 0 : index
    %11 = vector.load %arg39[%c0_10, %c0_11] : memref<1x32xf32, #tpu.memory_space<vmem>>, vector<1x32xf32>
    %12 = vector.broadcast %11 : vector<1x32xf32> to vector<8x32xf32>
    %13 = arith.addf %10, %12 : vector<8x32xf32>
    %14 = arith.truncf %7 : vector<8x32xf32> to vector<8x32xbf16>
    %c0_12 = arith.constant 0 : index
    %c0_13 = arith.constant 0 : index
    %15 = vector.load %arg41[%c0_12, %c0_13] : memref<32x32xbf16, #tpu.memory_space<vmem>>, vector<32x32xbf16>
    %cst_14 = arith.constant dense<0.000000e+00> : vector<8x32xf32>
    %16 = tpu.matmul %14, %15, %cst_14 {dimension_numbers = #tpu.dot_dimension_numbers<[1], [0], [0], [1], [0, 0, 1, 1], [], []>} : vector<8x32xbf16>, vector<32x32xbf16>, vector<8x32xf32> -> vector<8x32xf32>
    %c0_15 = arith.constant 0 : index
    %c0_16 = arith.constant 0 : index
    %17 = vector.load %arg37[%c0_15, %c0_16] : memref<1x32xf32, #tpu.memory_space<vmem>>, vector<1x32xf32>
    %18 = vector.broadcast %17 : vector<1x32xf32> to vector<8x32xf32>
    %19 = arith.addf %16, %18 : vector<8x32xf32>
    %20 = arith.truncf %7 : vector<8x32xf32> to vector<8x32xbf16>
    %c0_17 = arith.constant 0 : index
    %c0_18 = arith.constant 0 : index
    %21 = vector.load %arg44[%c0_17, %c0_18] : memref<32x32xbf16, #tpu.memory_space<vmem>>, vector<32x32xbf16>
    %cst_19 = arith.constant dense<0.000000e+00> : vector<8x32xf32>
    %22 = tpu.matmul %20, %21, %cst_19 {dimension_numbers = #tpu.dot_dimension_numbers<[1], [0], [0], [1], [0, 0, 1, 1], [], []>} : vector<8x32xbf16>, vector<32x32xbf16>, vector<8x32xf32> -> vector<8x32xf32>
    %c0_20 = arith.constant 0 : index
    %c0_21 = arith.constant 0 : index
    %23 = vector.load %arg40[%c0_20, %c0_21] : memref<1x32xf32, #tpu.memory_space<vmem>>, vector<1x32xf32>
    %24 = vector.broadcast %23 : vector<1x32xf32> to vector<8x32xf32>
    %25 = arith.addf %22, %24 : vector<8x32xf32>
    %26 = arith.truncf %13 : vector<8x32xf32> to vector<8x32xbf16>
    %27 = vector.shape_cast %26 : vector<8x32xbf16> to vector<8x2x16xbf16>
    %28 = arith.truncf %19 : vector<8x32xf32> to vector<8x32xbf16>
    %29 = vector.shape_cast %28 : vector<8x32xbf16> to vector<8x2x16xbf16>
    %30 = arith.truncf %25 : vector<8x32xf32> to vector<8x32xbf16>
    %31 = vector.shape_cast %30 : vector<8x32xbf16> to vector<8x2x16xbf16>
    "tpu.trace_start"() <{level = 10 : i32, message = "qhd,khd->hqk"}> : () -> ()
    %cst_22 = arith.constant dense<0.000000e+00> : vector<2x8x8xf32>
    %32 = tpu.matmul %27, %29, %cst_22 {dimension_numbers = #tpu.dot_dimension_numbers<[2], [2], [0], [0], [0, 1, 0, 0, 1, 0], [1], [1]>} : vector<8x2x16xbf16>, vector<8x2x16xbf16>, vector<2x8x8xf32> -> vector<2x8x8xf32>
    "tpu.trace_stop"() : () -> ()
    %cst_23 = arith.constant 2.500000e-01 : f32
    %33 = vector.broadcast %cst_23 : f32 to vector<2x8x8xf32>
    %34 = arith.mulf %32, %33 : vector<2x8x8xf32>
    %cst_24 = arith.constant dense<0xFF800000> : vector<2x8xf32>
    %35 = vector.multi_reduction <maximumf>, %34, %cst_24 [2] : vector<2x8x8xf32> to vector<2x8xf32>
    %36 = vector.shape_cast %35 : vector<2x8xf32> to vector<2x8x1xf32>
    %37 = vector.broadcast %36 : vector<2x8x1xf32> to vector<2x8x8xf32>
    %38 = arith.subf %34, %37 : vector<2x8x8xf32>
    %39 = math.exp %38 : vector<2x8x8xf32>
    %cst_25 = arith.constant dense<0.000000e+00> : vector<2x8xf32>
    %40 = vector.multi_reduction <add>, %39, %cst_25 [2] : vector<2x8x8xf32> to vector<2x8xf32>
    %41 = vector.shape_cast %40 : vector<2x8xf32> to vector<2x8x1xf32>
    %42 = tpu.reciprocal %41 {approx = true} : vector<2x8x1xf32> -> vector<2x8x1xf32>
    %43 = vector.broadcast %42 : vector<2x8x1xf32> to vector<2x8x8xf32>
    %44 = arith.mulf %39, %43 : vector<2x8x8xf32>
    %45 = arith.truncf %44 : vector<2x8x8xf32> to vector<2x8x8xbf16>
    "tpu.trace_start"() <{level = 10 : i32, message = "hqk,khd->qhd"}> : () -> ()
    %cst_26 = arith.constant dense<0.000000e+00> : vector<2x16x8xf32>
    %46 = tpu.matmul %31, %45, %cst_26 {dimension_numbers = #tpu.dot_dimension_numbers<[0], [2], [2], [1], [0, 1, 0, 2, 1, 1], [1], [0]>} : vector<8x2x16xbf16>, vector<2x8x8xbf16>, vector<2x16x8xf32> -> vector<2x16x8xf32>
    %47 = tpu.transpose %46, [2, 0, 1] : vector<2x16x8xf32> -> vector<8x2x16xf32>
    "tpu.trace_stop"() : () -> ()
    %48 = vector.shape_cast %47 : vector<8x2x16xf32> to vector<8x32xf32>
    %49 = arith.truncf %48 : vector<8x32xf32> to vector<8x32xbf16>
    %c0_27 = arith.constant 0 : index
    %c0_28 = arith.constant 0 : index
    %50 = vector.load %arg42[%c0_27, %c0_28] : memref<32x32xbf16, #tpu.memory_space<vmem>>, vector<32x32xbf16>
    %cst_29 = arith.constant dense<0.000000e+00> : vector<8x32xf32>
    %51 = tpu.matmul %49, %50, %cst_29 {dimension_numbers = #tpu.dot_dimension_numbers<[1], [0], [0], [1], [0, 0, 1, 1], [], []>} : vector<8x32xbf16>, vector<32x32xbf16>, vector<8x32xf32> -> vector<8x32xf32>
    %c0_30 = arith.constant 0 : index
    %c0_31 = arith.constant 0 : index
    %52 = vector.load %arg38[%c0_30, %c0_31] : memref<1x32xf32, #tpu.memory_space<vmem>>, vector<1x32xf32>
    %53 = vector.broadcast %52 : vector<1x32xf32> to vector<8x32xf32>
    %54 = arith.addf %51, %53 : vector<8x32xf32>
    %cst_32 = arith.constant dense<0.000000e+00> : vector<8xf32>
    %55 = vector.multi_reduction <add>, %54, %cst_32 [1] : vector<8x32xf32> to vector<8xf32>
    %56 = vector.shape_cast %55 : vector<8xf32> to vector<8x1xf32>
    %cst_33 = arith.constant 3.200000e+01 : f32
    %57 = vector.broadcast %cst_33 : f32 to vector<8x1xf32>
    %58 = arith.divf %56, %57 : vector<8x1xf32>
    %59 = arith.mulf %54, %54 : vector<8x32xf32>
    %cst_34 = arith.constant dense<0.000000e+00> : vector<8xf32>
    %60 = vector.multi_reduction <add>, %59, %cst_34 [1] : vector<8x32xf32> to vector<8xf32>
    %61 = vector.shape_cast %60 : vector<8xf32> to vector<8x1xf32>
    %cst_35 = arith.constant 3.200000e+01 : f32
    %62 = vector.broadcast %cst_35 : f32 to vector<8x1xf32>
    %63 = arith.divf %61, %62 : vector<8x1xf32>
    %64 = arith.mulf %58, %58 : vector<8x1xf32>
    %65 = arith.subf %63, %64 : vector<8x1xf32>
    %cst_36 = arith.constant 9.99999974E-6 : f32
    %66 = vector.broadcast %cst_36 : f32 to vector<8x1xf32>
    %67 = arith.addf %65, %66 : vector<8x1xf32>
    %68 = math.rsqrt %67 : vector<8x1xf32>
    %69 = vector.broadcast %58 : vector<8x1xf32> to vector<8x32xf32>
    %70 = arith.subf %54, %69 : vector<8x32xf32>
    %71 = vector.broadcast %68 : vector<8x1xf32> to vector<8x32xf32>
    %72 = arith.mulf %70, %71 : vector<8x32xf32>
    %c0_37 = arith.constant 0 : index
    %c0_38 = arith.constant 0 : index
    %73 = vector.load %arg30[%c0_37, %c0_38] : memref<1x32xf32, #tpu.memory_space<vmem>>, vector<1x32xf32>
    %74 = vector.broadcast %73 : vector<1x32xf32> to vector<8x32xf32>
    %75 = arith.mulf %72, %74 : vector<8x32xf32>
    %c0_39 = arith.constant 0 : index
    %c0_40 = arith.constant 0 : index
    %76 = vector.load %arg29[%c0_39, %c0_40] : memref<1x32xf32, #tpu.memory_space<vmem>>, vector<1x32xf32>
    %77 = vector.broadcast %76 : vector<1x32xf32> to vector<8x32xf32>
    %78 = arith.addf %75, %77 : vector<8x32xf32>
    %79 = arith.addf %2, %5 : vector<64x32xf32>
    %80 = arith.truncf %79 : vector<64x32xf32> to vector<64x32xbf16>
    %c0_41 = arith.constant 0 : index
    %c0_42 = arith.constant 0 : index
    %81 = vector.load %arg45[%c0_41, %c0_42] : memref<32x32xbf16, #tpu.memory_space<vmem>>, vector<32x32xbf16>
    %cst_43 = arith.constant dense<0.000000e+00> : vector<64x32xf32>
    %82 = tpu.matmul %80, %81, %cst_43 {dimension_numbers = #tpu.dot_dimension_numbers<[1], [0], [0], [1], [0, 0, 1, 1], [], []>} : vector<64x32xbf16>, vector<32x32xbf16>, vector<64x32xf32> -> vector<64x32xf32>
    %c0_44 = arith.constant 0 : index
    %c0_45 = arith.constant 0 : index
    %83 = vector.load %arg12[%c0_44, %c0_45] : memref<1x32xf32, #tpu.memory_space<vmem>>, vector<1x32xf32>
    %84 = vector.broadcast %83 : vector<1x32xf32> to vector<64x32xf32>
    %85 = arith.addf %82, %84 : vector<64x32xf32>
    %86 = vector.extract_strided_slice %85 {offsets = [0, 0], sizes = [64, 16], strides = [1, 1]} : vector<64x32xf32> to vector<64x16xf32>
    %87 = vector.extract_strided_slice %85 {offsets = [0, 16], sizes = [64, 16], strides = [1, 1]} : vector<64x32xf32> to vector<64x16xf32>
    %88 = arith.addf %78, %7 : vector<8x32xf32>
    %89 = arith.truncf %88 : vector<8x32xf32> to vector<8x32xbf16>
    %c0_46 = arith.constant 0 : index
    %c0_47 = arith.constant 0 : index
    %90 = vector.load %arg23[%c0_46, %c0_47] : memref<32x16xbf16, #tpu.memory_space<vmem>>, vector<32x16xbf16>
    %cst_48 = arith.constant dense<0.000000e+00> : vector<8x16xf32>
    %91 = tpu.matmul %89, %90, %cst_48 {dimension_numbers = #tpu.dot_dimension_numbers<[1], [0], [0], [1], [0, 0, 1, 1], [], []>} : vector<8x32xbf16>, vector<32x16xbf16>, vector<8x16xf32> -> vector<8x16xf32>
    %c0_49 = arith.constant 0 : index
    %c0_50 = arith.constant 0 : index
    %92 = vector.load %arg20[%c0_49, %c0_50] : memref<1x16xf32, #tpu.memory_space<vmem>>, vector<1x16xf32>
    %93 = vector.broadcast %92 : vector<1x16xf32> to vector<8x16xf32>
    %94 = arith.addf %91, %93 : vector<8x16xf32>
    %95 = arith.truncf %2 : vector<64x32xf32> to vector<64x32xbf16>
    %c0_51 = arith.constant 0 : index
    %c0_52 = arith.constant 0 : index
    %96 = vector.load %arg24[%c0_51, %c0_52] : memref<32x16xbf16, #tpu.memory_space<vmem>>, vector<32x16xbf16>
    %cst_53 = arith.constant dense<0.000000e+00> : vector<64x16xf32>
    %97 = tpu.matmul %95, %96, %cst_53 {dimension_numbers = #tpu.dot_dimension_numbers<[1], [0], [0], [1], [0, 0, 1, 1], [], []>} : vector<64x32xbf16>, vector<32x16xbf16>, vector<64x16xf32> -> vector<64x16xf32>
    %c0_54 = arith.constant 0 : index
    %c0_55 = arith.constant 0 : index
    %98 = vector.load %arg21[%c0_54, %c0_55] : memref<1x16xf32, #tpu.memory_space<vmem>>, vector<1x16xf32>
    %99 = vector.broadcast %98 : vector<1x16xf32> to vector<64x16xf32>
    %100 = arith.addf %97, %99 : vector<64x16xf32>
    %101 = arith.truncf %94 : vector<8x16xf32> to vector<8x16xbf16>
    %102 = vector.shape_cast %101 : vector<8x16xbf16> to vector<8x2x8xbf16>
    %103 = arith.truncf %86 : vector<64x16xf32> to vector<64x16xbf16>
    %104 = vector.shape_cast %103 : vector<64x16xbf16> to vector<64x2x8xbf16>
    %105 = arith.truncf %100 : vector<64x16xf32> to vector<64x16xbf16>
    %106 = vector.shape_cast %105 : vector<64x16xbf16> to vector<64x2x8xbf16>
    "tpu.trace_start"() <{level = 10 : i32, message = "qhd,khd->hqk"}> : () -> ()
    %cst_56 = arith.constant dense<0.000000e+00> : vector<2x8x64xf32>
    %107 = tpu.matmul %102, %104, %cst_56 {dimension_numbers = #tpu.dot_dimension_numbers<[2], [2], [0], [0], [0, 1, 0, 0, 1, 0], [1], [1]>} : vector<8x2x8xbf16>, vector<64x2x8xbf16>, vector<2x8x64xf32> -> vector<2x8x64xf32>
    "tpu.trace_stop"() : () -> ()
    %cst_57 = arith.constant 0.353553385 : f32
    %108 = vector.broadcast %cst_57 : f32 to vector<2x8x64xf32>
    %109 = arith.mulf %107, %108 : vector<2x8x64xf32>
    %cst_58 = arith.constant dense<0xFF800000> : vector<2x8xf32>
    %110 = vector.multi_reduction <maximumf>, %109, %cst_58 [2] : vector<2x8x64xf32> to vector<2x8xf32>
    %111 = vector.shape_cast %110 : vector<2x8xf32> to vector<2x8x1xf32>
    %112 = vector.broadcast %111 : vector<2x8x1xf32> to vector<2x8x64xf32>
    %113 = arith.subf %109, %112 : vector<2x8x64xf32>
    %114 = math.exp %113 : vector<2x8x64xf32>
    %cst_59 = arith.constant dense<0.000000e+00> : vector<2x8xf32>
    %115 = vector.multi_reduction <add>, %114, %cst_59 [2] : vector<2x8x64xf32> to vector<2x8xf32>
    %116 = vector.shape_cast %115 : vector<2x8xf32> to vector<2x8x1xf32>
    %117 = tpu.reciprocal %116 {approx = true} : vector<2x8x1xf32> -> vector<2x8x1xf32>
    %118 = vector.broadcast %117 : vector<2x8x1xf32> to vector<2x8x64xf32>
    %119 = arith.mulf %114, %118 : vector<2x8x64xf32>
    %120 = arith.truncf %119 : vector<2x8x64xf32> to vector<2x8x64xbf16>
    "tpu.trace_start"() <{level = 10 : i32, message = "hqk,khd->qhd"}> : () -> ()
    %cst_60 = arith.constant dense<0.000000e+00> : vector<2x8x8xf32>
    %121 = tpu.matmul %106, %120, %cst_60 {dimension_numbers = #tpu.dot_dimension_numbers<[0], [2], [2], [1], [0, 1, 0, 2, 1, 1], [1], [0]>} : vector<64x2x8xbf16>, vector<2x8x64xbf16>, vector<2x8x8xf32> -> vector<2x8x8xf32>
    %122 = tpu.transpose %121, [2, 0, 1] : vector<2x8x8xf32> -> vector<8x2x8xf32>
    "tpu.trace_stop"() : () -> ()
    %123 = vector.shape_cast %122 : vector<8x2x8xf32> to vector<8x16xf32>
    %124 = arith.truncf %123 : vector<8x16xf32> to vector<8x16xbf16>
    %c0_61 = arith.constant 0 : index
    %c0_62 = arith.constant 0 : index
    %125 = vector.load %arg22[%c0_61, %c0_62] : memref<16x32xbf16, #tpu.memory_space<vmem>>, vector<16x32xbf16>
    %cst_63 = arith.constant dense<0.000000e+00> : vector<8x32xf32>
    %126 = tpu.matmul %124, %125, %cst_63 {dimension_numbers = #tpu.dot_dimension_numbers<[1], [0], [0], [1], [0, 0, 1, 1], [], []>} : vector<8x16xbf16>, vector<16x32xbf16>, vector<8x32xf32> -> vector<8x32xf32>
    %c0_64 = arith.constant 0 : index
    %c0_65 = arith.constant 0 : index
    %127 = vector.load %arg19[%c0_64, %c0_65] : memref<1x32xf32, #tpu.memory_space<vmem>>, vector<1x32xf32>
    %128 = vector.broadcast %127 : vector<1x32xf32> to vector<8x32xf32>
    %129 = arith.addf %126, %128 : vector<8x32xf32>
    %130 = arith.addf %78, %129 : vector<8x32xf32>
    %cst_66 = arith.constant dense<0.000000e+00> : vector<8xf32>
    %131 = vector.multi_reduction <add>, %130, %cst_66 [1] : vector<8x32xf32> to vector<8xf32>
    %132 = vector.shape_cast %131 : vector<8xf32> to vector<8x1xf32>
    %cst_67 = arith.constant 3.200000e+01 : f32
    %133 = vector.broadcast %cst_67 : f32 to vector<8x1xf32>
    %134 = arith.divf %132, %133 : vector<8x1xf32>
    %135 = arith.mulf %130, %130 : vector<8x32xf32>
    %cst_68 = arith.constant dense<0.000000e+00> : vector<8xf32>
    %136 = vector.multi_reduction <add>, %135, %cst_68 [1] : vector<8x32xf32> to vector<8xf32>
    %137 = vector.shape_cast %136 : vector<8xf32> to vector<8x1xf32>
    %cst_69 = arith.constant 3.200000e+01 : f32
    %138 = vector.broadcast %cst_69 : f32 to vector<8x1xf32>
    %139 = arith.divf %137, %138 : vector<8x1xf32>
    %140 = arith.mulf %134, %134 : vector<8x1xf32>
    %141 = arith.subf %139, %140 : vector<8x1xf32>
    %cst_70 = arith.constant 9.99999974E-6 : f32
    %142 = vector.broadcast %cst_70 : f32 to vector<8x1xf32>
    %143 = arith.addf %141, %142 : vector<8x1xf32>
    %144 = math.rsqrt %143 : vector<8x1xf32>
    %145 = vector.broadcast %134 : vector<8x1xf32> to vector<8x32xf32>
    %146 = arith.subf %130, %145 : vector<8x32xf32>
    %147 = vector.broadcast %144 : vector<8x1xf32> to vector<8x32xf32>
    %148 = arith.mulf %146, %147 : vector<8x32xf32>
    %c0_71 = arith.constant 0 : index
    %c0_72 = arith.constant 0 : index
    %149 = vector.load %arg32[%c0_71, %c0_72] : memref<1x32xf32, #tpu.memory_space<vmem>>, vector<1x32xf32>
    %150 = vector.broadcast %149 : vector<1x32xf32> to vector<8x32xf32>
    %151 = arith.mulf %148, %150 : vector<8x32xf32>
    %c0_73 = arith.constant 0 : index
    %c0_74 = arith.constant 0 : index
    %152 = vector.load %arg31[%c0_73, %c0_74] : memref<1x32xf32, #tpu.memory_space<vmem>>, vector<1x32xf32>
    %153 = vector.broadcast %152 : vector<1x32xf32> to vector<8x32xf32>
    %154 = arith.addf %151, %153 : vector<8x32xf32>
    %155 = arith.truncf %154 : vector<8x32xf32> to vector<8x32xbf16>
    %c0_75 = arith.constant 0 : index
    %c0_76 = arith.constant 0 : index
    %156 = vector.load %arg27[%c0_75, %c0_76] : memref<32x64xbf16, #tpu.memory_space<vmem>>, vector<32x64xbf16>
    %cst_77 = arith.constant dense<0.000000e+00> : vector<8x64xf32>
    %157 = tpu.matmul %155, %156, %cst_77 {dimension_numbers = #tpu.dot_dimension_numbers<[1], [0], [0], [1], [0, 0, 1, 1], [], []>} : vector<8x32xbf16>, vector<32x64xbf16>, vector<8x64xf32> -> vector<8x64xf32>
    %c0_78 = arith.constant 0 : index
    %c0_79 = arith.constant 0 : index
    %158 = vector.load %arg25[%c0_78, %c0_79] : memref<1x64xf32, #tpu.memory_space<vmem>>, vector<1x64xf32>
    %159 = vector.broadcast %158 : vector<1x64xf32> to vector<8x64xf32>
    %160 = arith.addf %157, %159 : vector<8x64xf32>
    %cst_80 = arith.constant 0.000000e+00 : f32
    %161 = vector.broadcast %cst_80 : f32 to vector<8x64xf32>
    %162 = arith.maximumf %160, %161 : vector<8x64xf32>
    %163 = arith.truncf %162 : vector<8x64xf32> to vector<8x64xbf16>
    %c0_81 = arith.constant 0 : index
    %c0_82 = arith.constant 0 : index
    %164 = vector.load %arg28[%c0_81, %c0_82] : memref<64x32xbf16, #tpu.memory_space<vmem>>, vector<64x32xbf16>
    %cst_83 = arith.constant dense<0.000000e+00> : vector<8x32xf32>
    %165 = tpu.matmul %163, %164, %cst_83 {dimension_numbers = #tpu.dot_dimension_numbers<[1], [0], [0], [1], [0, 0, 1, 1], [], []>} : vector<8x64xbf16>, vector<64x32xbf16>, vector<8x32xf32> -> vector<8x32xf32>
    %c0_84 = arith.constant 0 : index
    %c0_85 = arith.constant 0 : index
    %166 = vector.load %arg26[%c0_84, %c0_85] : memref<1x32xf32, #tpu.memory_space<vmem>>, vector<1x32xf32>
    %167 = vector.broadcast %166 : vector<1x32xf32> to vector<8x32xf32>
    %168 = arith.addf %165, %167 : vector<8x32xf32>
    %169 = arith.addf %154, %168 : vector<8x32xf32>
    %cst_86 = arith.constant dense<0.000000e+00> : vector<8xf32>
    %170 = vector.multi_reduction <add>, %169, %cst_86 [1] : vector<8x32xf32> to vector<8xf32>
    %171 = vector.shape_cast %170 : vector<8xf32> to vector<8x1xf32>
    %cst_87 = arith.constant 3.200000e+01 : f32
    %172 = vector.broadcast %cst_87 : f32 to vector<8x1xf32>
    %173 = arith.divf %171, %172 : vector<8x1xf32>
    %174 = arith.mulf %169, %169 : vector<8x32xf32>
    %cst_88 = arith.constant dense<0.000000e+00> : vector<8xf32>
    %175 = vector.multi_reduction <add>, %174, %cst_88 [1] : vector<8x32xf32> to vector<8xf32>
    %176 = vector.shape_cast %175 : vector<8xf32> to vector<8x1xf32>
    %cst_89 = arith.constant 3.200000e+01 : f32
    %177 = vector.broadcast %cst_89 : f32 to vector<8x1xf32>
    %178 = arith.divf %176, %177 : vector<8x1xf32>
    %179 = arith.mulf %173, %173 : vector<8x1xf32>
    %180 = arith.subf %178, %179 : vector<8x1xf32>
    %cst_90 = arith.constant 9.99999974E-6 : f32
    %181 = vector.broadcast %cst_90 : f32 to vector<8x1xf32>
    %182 = arith.addf %180, %181 : vector<8x1xf32>
    %183 = math.rsqrt %182 : vector<8x1xf32>
    %184 = vector.broadcast %173 : vector<8x1xf32> to vector<8x32xf32>
    %185 = arith.subf %169, %184 : vector<8x32xf32>
    %186 = vector.broadcast %183 : vector<8x1xf32> to vector<8x32xf32>
    %187 = arith.mulf %185, %186 : vector<8x32xf32>
    %c0_91 = arith.constant 0 : index
    %c0_92 = arith.constant 0 : index
    %188 = vector.load %arg34[%c0_91, %c0_92] : memref<1x32xf32, #tpu.memory_space<vmem>>, vector<1x32xf32>
    %189 = vector.broadcast %188 : vector<1x32xf32> to vector<8x32xf32>
    %190 = arith.mulf %187, %189 : vector<8x32xf32>
    %c0_93 = arith.constant 0 : index
    %c0_94 = arith.constant 0 : index
    %191 = vector.load %arg33[%c0_93, %c0_94] : memref<1x32xf32, #tpu.memory_space<vmem>>, vector<1x32xf32>
    %192 = vector.broadcast %191 : vector<1x32xf32> to vector<8x32xf32>
    %193 = arith.addf %190, %192 : vector<8x32xf32>
    %194 = arith.addf %193, %7 : vector<8x32xf32>
    %195 = arith.truncf %194 : vector<8x32xf32> to vector<8x32xbf16>
    %c0_95 = arith.constant 0 : index
    %c0_96 = arith.constant 0 : index
    %196 = vector.load %arg16[%c0_95, %c0_96] : memref<32x16xbf16, #tpu.memory_space<vmem>>, vector<32x16xbf16>
    %cst_97 = arith.constant dense<0.000000e+00> : vector<8x16xf32>
    %197 = tpu.matmul %195, %196, %cst_97 {dimension_numbers = #tpu.dot_dimension_numbers<[1], [0], [0], [1], [0, 0, 1, 1], [], []>} : vector<8x32xbf16>, vector<32x16xbf16>, vector<8x16xf32> -> vector<8x16xf32>
    %c0_98 = arith.constant 0 : index
    %c0_99 = arith.constant 0 : index
    %198 = vector.load %arg13[%c0_98, %c0_99] : memref<1x16xf32, #tpu.memory_space<vmem>>, vector<1x16xf32>
    %199 = vector.broadcast %198 : vector<1x16xf32> to vector<8x16xf32>
    %200 = arith.addf %197, %199 : vector<8x16xf32>
    %201 = arith.truncf %193 : vector<8x32xf32> to vector<8x32xbf16>
    %c0_100 = arith.constant 0 : index
    %c0_101 = arith.constant 0 : index
    %202 = vector.load %arg18[%c0_100, %c0_101] : memref<32x16xbf16, #tpu.memory_space<vmem>>, vector<32x16xbf16>
    %cst_102 = arith.constant dense<0.000000e+00> : vector<8x16xf32>
    %203 = tpu.matmul %201, %202, %cst_102 {dimension_numbers = #tpu.dot_dimension_numbers<[1], [0], [0], [1], [0, 0, 1, 1], [], []>} : vector<8x32xbf16>, vector<32x16xbf16>, vector<8x16xf32> -> vector<8x16xf32>
    %c0_103 = arith.constant 0 : index
    %c0_104 = arith.constant 0 : index
    %204 = vector.load %arg15[%c0_103, %c0_104] : memref<1x16xf32, #tpu.memory_space<vmem>>, vector<1x16xf32>
    %205 = vector.broadcast %204 : vector<1x16xf32> to vector<8x16xf32>
    %206 = arith.addf %203, %205 : vector<8x16xf32>
    %207 = arith.truncf %87 : vector<64x16xf32> to vector<64x16xbf16>
    %208 = vector.shape_cast %207 : vector<64x16xbf16> to vector<64x2x8xbf16>
    %209 = arith.truncf %200 : vector<8x16xf32> to vector<8x16xbf16>
    %210 = vector.shape_cast %209 : vector<8x16xbf16> to vector<8x2x8xbf16>
    %211 = arith.truncf %206 : vector<8x16xf32> to vector<8x16xbf16>
    %212 = vector.shape_cast %211 : vector<8x16xbf16> to vector<8x2x8xbf16>
    "tpu.trace_start"() <{level = 10 : i32, message = "qhd,khd->hqk"}> : () -> ()
    %cst_105 = arith.constant dense<0.000000e+00> : vector<2x64x8xf32>
    %213 = tpu.matmul %208, %210, %cst_105 {dimension_numbers = #tpu.dot_dimension_numbers<[2], [2], [0], [0], [0, 1, 0, 0, 1, 0], [1], [1]>} : vector<64x2x8xbf16>, vector<8x2x8xbf16>, vector<2x64x8xf32> -> vector<2x64x8xf32>
    "tpu.trace_stop"() : () -> ()
    %cst_106 = arith.constant 0.353553385 : f32
    %214 = vector.broadcast %cst_106 : f32 to vector<2x64x8xf32>
    %215 = arith.mulf %213, %214 : vector<2x64x8xf32>
    %cst_107 = arith.constant dense<0xFF800000> : vector<2x64xf32>
    %216 = vector.multi_reduction <maximumf>, %215, %cst_107 [2] : vector<2x64x8xf32> to vector<2x64xf32>
    %217 = vector.shape_cast %216 : vector<2x64xf32> to vector<2x64x1xf32>
    %218 = vector.broadcast %217 : vector<2x64x1xf32> to vector<2x64x8xf32>
    %219 = arith.subf %215, %218 : vector<2x64x8xf32>
    %220 = math.exp %219 : vector<2x64x8xf32>
    %cst_108 = arith.constant dense<0.000000e+00> : vector<2x64xf32>
    %221 = vector.multi_reduction <add>, %220, %cst_108 [2] : vector<2x64x8xf32> to vector<2x64xf32>
    %222 = vector.shape_cast %221 : vector<2x64xf32> to vector<2x64x1xf32>
    %223 = tpu.reciprocal %222 {approx = true} : vector<2x64x1xf32> -> vector<2x64x1xf32>
    %224 = vector.broadcast %223 : vector<2x64x1xf32> to vector<2x64x8xf32>
    %225 = arith.mulf %220, %224 : vector<2x64x8xf32>
    %226 = arith.truncf %225 : vector<2x64x8xf32> to vector<2x64x8xbf16>
    "tpu.trace_start"() <{level = 10 : i32, message = "hqk,khd->qhd"}> : () -> ()
    %cst_109 = arith.constant dense<0.000000e+00> : vector<2x8x64xf32>
    %227 = tpu.matmul %212, %226, %cst_109 {dimension_numbers = #tpu.dot_dimension_numbers<[0], [2], [2], [1], [0, 1, 0, 2, 1, 1], [1], [0]>} : vector<8x2x8xbf16>, vector<2x64x8xbf16>, vector<2x8x64xf32> -> vector<2x8x64xf32>
    %228 = tpu.transpose %227, [2, 0, 1] : vector<2x8x64xf32> -> vector<64x2x8xf32>
    "tpu.trace_stop"() : () -> ()
    %229 = vector.shape_cast %228 : vector<64x2x8xf32> to vector<64x16xf32>
    %230 = arith.truncf %229 : vector<64x16xf32> to vector<64x16xbf16>
    %c0_110 = arith.constant 0 : index
    %c0_111 = arith.constant 0 : index
    %231 = vector.load %arg17[%c0_110, %c0_111] : memref<16x32xbf16, #tpu.memory_space<vmem>>, vector<16x32xbf16>
    %cst_112 = arith.constant dense<0.000000e+00> : vector<64x32xf32>
    %232 = tpu.matmul %230, %231, %cst_112 {dimension_numbers = #tpu.dot_dimension_numbers<[1], [0], [0], [1], [0, 0, 1, 1], [], []>} : vector<64x16xbf16>, vector<16x32xbf16>, vector<64x32xf32> -> vector<64x32xf32>
    %c0_113 = arith.constant 0 : index
    %c0_114 = arith.constant 0 : index
    %233 = vector.load %arg14[%c0_113, %c0_114] : memref<1x32xf32, #tpu.memory_space<vmem>>, vector<1x32xf32>
    %234 = vector.broadcast %233 : vector<1x32xf32> to vector<64x32xf32>
    %235 = arith.addf %232, %234 : vector<64x32xf32>
    %236 = arith.addf %2, %235 : vector<64x32xf32>
    %cst_115 = arith.constant dense<0.000000e+00> : vector<64xf32>
    %237 = vector.multi_reduction <add>, %236, %cst_115 [1] : vector<64x32xf32> to vector<64xf32>
    %238 = vector.shape_cast %237 : vector<64xf32> to vector<64x1xf32>
    %cst_116 = arith.constant 3.200000e+01 : f32
    %239 = vector.broadcast %cst_116 : f32 to vector<64x1xf32>
    %240 = arith.divf %238, %239 : vector<64x1xf32>
    %241 = arith.mulf %236, %236 : vector<64x32xf32>
    %cst_117 = arith.constant dense<0.000000e+00> : vector<64xf32>
    %242 = vector.multi_reduction <add>, %241, %cst_117 [1] : vector<64x32xf32> to vector<64xf32>
    %243 = vector.shape_cast %242 : vector<64xf32> to vector<64x1xf32>
    %cst_118 = arith.constant 3.200000e+01 : f32
    %244 = vector.broadcast %cst_118 : f32 to vector<64x1xf32>
    %245 = arith.divf %243, %244 : vector<64x1xf32>
    %246 = arith.mulf %240, %240 : vector<64x1xf32>
    %247 = arith.subf %245, %246 : vector<64x1xf32>
    %cst_119 = arith.constant 9.99999974E-6 : f32
    %248 = vector.broadcast %cst_119 : f32 to vector<64x1xf32>
    %249 = arith.addf %247, %248 : vector<64x1xf32>
    %250 = math.rsqrt %249 : vector<64x1xf32>
    %251 = vector.broadcast %240 : vector<64x1xf32> to vector<64x32xf32>
    %252 = arith.subf %236, %251 : vector<64x32xf32>
    %253 = vector.broadcast %250 : vector<64x1xf32> to vector<64x32xf32>
    %254 = arith.mulf %252, %253 : vector<64x32xf32>
    %c0_120 = arith.constant 0 : index
    %c0_121 = arith.constant 0 : index
    %255 = vector.load %arg36[%c0_120, %c0_121] : memref<1x32xf32, #tpu.memory_space<vmem>>, vector<1x32xf32>
    %256 = vector.broadcast %255 : vector<1x32xf32> to vector<64x32xf32>
    %257 = arith.mulf %254, %256 : vector<64x32xf32>
    %c0_122 = arith.constant 0 : index
    %c0_123 = arith.constant 0 : index
    %258 = vector.load %arg35[%c0_122, %c0_123] : memref<1x32xf32, #tpu.memory_space<vmem>>, vector<1x32xf32>
    %259 = vector.broadcast %258 : vector<1x32xf32> to vector<64x32xf32>
    %260 = arith.addf %257, %259 : vector<64x32xf32>
    %261 = arith.addf %193, %7 : vector<8x32xf32>
    %262 = arith.truncf %261 : vector<8x32xf32> to vector<8x32xbf16>
    %c0_124 = arith.constant 0 : index
    %c0_125 = arith.constant 0 : index
    %263 = vector.load %arg77[%c0_124, %c0_125] : memref<32x32xbf16, #tpu.memory_space<vmem>>, vector<32x32xbf16>
    %cst_126 = arith.constant dense<0.000000e+00> : vector<8x32xf32>
    %264 = tpu.matmul %262, %263, %cst_126 {dimension_numbers = #tpu.dot_dimension_numbers<[1], [0], [0], [1], [0, 0, 1, 1], [], []>} : vector<8x32xbf16>, vector<32x32xbf16>, vector<8x32xf32> -> vector<8x32xf32>
    %c0_127 = arith.constant 0 : index
    %c0_128 = arith.constant 0 : index
    %265 = vector.load %arg73[%c0_127, %c0_128] : memref<1x32xf32, #tpu.memory_space<vmem>>, vector<1x32xf32>
    %266 = vector.broadcast %265 : vector<1x32xf32> to vector<8x32xf32>
    %267 = arith.addf %264, %266 : vector<8x32xf32>
    %268 = arith.truncf %261 : vector<8x32xf32> to vector<8x32xbf16>
    %c0_129 = arith.constant 0 : index
    %c0_130 = arith.constant 0 : index
    %269 = vector.load %arg75[%c0_129, %c0_130] : memref<32x32xbf16, #tpu.memory_space<vmem>>, vector<32x32xbf16>
    %cst_131 = arith.constant dense<0.000000e+00> : vector<8x32xf32>
    %270 = tpu.matmul %268, %269, %cst_131 {dimension_numbers = #tpu.dot_dimension_numbers<[1], [0], [0], [1], [0, 0, 1, 1], [], []>} : vector<8x32xbf16>, vector<32x32xbf16>, vector<8x32xf32> -> vector<8x32xf32>
    %c0_132 = arith.constant 0 : index
    %c0_133 = arith.constant 0 : index
    %271 = vector.load %arg71[%c0_132, %c0_133] : memref<1x32xf32, #tpu.memory_space<vmem>>, vector<1x32xf32>
    %272 = vector.broadcast %271 : vector<1x32xf32> to vector<8x32xf32>
    %273 = arith.addf %270, %272 : vector<8x32xf32>
    %274 = arith.truncf %193 : vector<8x32xf32> to vector<8x32xbf16>
    %c0_134 = arith.constant 0 : index
    %c0_135 = arith.constant 0 : index
    %275 = vector.load %arg78[%c0_134, %c0_135] : memref<32x32xbf16, #tpu.memory_space<vmem>>, vector<32x32xbf16>
    %cst_136 = arith.constant dense<0.000000e+00> : vector<8x32xf32>
    %276 = tpu.matmul %274, %275, %cst_136 {dimension_numbers = #tpu.dot_dimension_numbers<[1], [0], [0], [1], [0, 0, 1, 1], [], []>} : vector<8x32xbf16>, vector<32x32xbf16>, vector<8x32xf32> -> vector<8x32xf32>
    %c0_137 = arith.constant 0 : index
    %c0_138 = arith.constant 0 : index
    %277 = vector.load %arg74[%c0_137, %c0_138] : memref<1x32xf32, #tpu.memory_space<vmem>>, vector<1x32xf32>
    %278 = vector.broadcast %277 : vector<1x32xf32> to vector<8x32xf32>
    %279 = arith.addf %276, %278 : vector<8x32xf32>
    %280 = arith.truncf %267 : vector<8x32xf32> to vector<8x32xbf16>
    %281 = vector.shape_cast %280 : vector<8x32xbf16> to vector<8x2x16xbf16>
    %282 = arith.truncf %273 : vector<8x32xf32> to vector<8x32xbf16>
    %283 = vector.shape_cast %282 : vector<8x32xbf16> to vector<8x2x16xbf16>
    %284 = arith.truncf %279 : vector<8x32xf32> to vector<8x32xbf16>
    %285 = vector.shape_cast %284 : vector<8x32xbf16> to vector<8x2x16xbf16>
    "tpu.trace_start"() <{level = 10 : i32, message = "qhd,khd->hqk"}> : () -> ()
    %cst_139 = arith.constant dense<0.000000e+00> : vector<2x8x8xf32>
    %286 = tpu.matmul %281, %283, %cst_139 {dimension_numbers = #tpu.dot_dimension_numbers<[2], [2], [0], [0], [0, 1, 0, 0, 1, 0], [1], [1]>} : vector<8x2x16xbf16>, vector<8x2x16xbf16>, vector<2x8x8xf32> -> vector<2x8x8xf32>
    "tpu.trace_stop"() : () -> ()
    %cst_140 = arith.constant 2.500000e-01 : f32
    %287 = vector.broadcast %cst_140 : f32 to vector<2x8x8xf32>
    %288 = arith.mulf %286, %287 : vector<2x8x8xf32>
    %cst_141 = arith.constant dense<0xFF800000> : vector<2x8xf32>
    %289 = vector.multi_reduction <maximumf>, %288, %cst_141 [2] : vector<2x8x8xf32> to vector<2x8xf32>
    %290 = vector.shape_cast %289 : vector<2x8xf32> to vector<2x8x1xf32>
    %291 = vector.broadcast %290 : vector<2x8x1xf32> to vector<2x8x8xf32>
    %292 = arith.subf %288, %291 : vector<2x8x8xf32>
    %293 = math.exp %292 : vector<2x8x8xf32>
    %cst_142 = arith.constant dense<0.000000e+00> : vector<2x8xf32>
    %294 = vector.multi_reduction <add>, %293, %cst_142 [2] : vector<2x8x8xf32> to vector<2x8xf32>
    %295 = vector.shape_cast %294 : vector<2x8xf32> to vector<2x8x1xf32>
    %296 = tpu.reciprocal %295 {approx = true} : vector<2x8x1xf32> -> vector<2x8x1xf32>
    %297 = vector.broadcast %296 : vector<2x8x1xf32> to vector<2x8x8xf32>
    %298 = arith.mulf %293, %297 : vector<2x8x8xf32>
    %299 = arith.truncf %298 : vector<2x8x8xf32> to vector<2x8x8xbf16>
    "tpu.trace_start"() <{level = 10 : i32, message = "hqk,khd->qhd"}> : () -> ()
    %cst_143 = arith.constant dense<0.000000e+00> : vector<2x16x8xf32>
    %300 = tpu.matmul %285, %299, %cst_143 {dimension_numbers = #tpu.dot_dimension_numbers<[0], [2], [2], [1], [0, 1, 0, 2, 1, 1], [1], [0]>} : vector<8x2x16xbf16>, vector<2x8x8xbf16>, vector<2x16x8xf32> -> vector<2x16x8xf32>
    %301 = tpu.transpose %300, [2, 0, 1] : vector<2x16x8xf32> -> vector<8x2x16xf32>
    "tpu.trace_stop"() : () -> ()
    %302 = vector.shape_cast %301 : vector<8x2x16xf32> to vector<8x32xf32>
    %303 = arith.truncf %302 : vector<8x32xf32> to vector<8x32xbf16>
    %c0_144 = arith.constant 0 : index
    %c0_145 = arith.constant 0 : index
    %304 = vector.load %arg76[%c0_144, %c0_145] : memref<32x32xbf16, #tpu.memory_space<vmem>>, vector<32x32xbf16>
    %cst_146 = arith.constant dense<0.000000e+00> : vector<8x32xf32>
    %305 = tpu.matmul %303, %304, %cst_146 {dimension_numbers = #tpu.dot_dimension_numbers<[1], [0], [0], [1], [0, 0, 1, 1], [], []>} : vector<8x32xbf16>, vector<32x32xbf16>, vector<8x32xf32> -> vector<8x32xf32>
    %c0_147 = arith.constant 0 : index
    %c0_148 = arith.constant 0 : index
    %306 = vector.load %arg72[%c0_147, %c0_148] : memref<1x32xf32, #tpu.memory_space<vmem>>, vector<1x32xf32>
    %307 = vector.broadcast %306 : vector<1x32xf32> to vector<8x32xf32>
    %308 = arith.addf %305, %307 : vector<8x32xf32>
    %309 = arith.addf %193, %308 : vector<8x32xf32>
    %cst_149 = arith.constant dense<0.000000e+00> : vector<8xf32>
    %310 = vector.multi_reduction <add>, %309, %cst_149 [1] : vector<8x32xf32> to vector<8xf32>
    %311 = vector.shape_cast %310 : vector<8xf32> to vector<8x1xf32>
    %cst_150 = arith.constant 3.200000e+01 : f32
    %312 = vector.broadcast %cst_150 : f32 to vector<8x1xf32>
    %313 = arith.divf %311, %312 : vector<8x1xf32>
    %314 = arith.mulf %309, %309 : vector<8x32xf32>
    %cst_151 = arith.constant dense<0.000000e+00> : vector<8xf32>
    %315 = vector.multi_reduction <add>, %314, %cst_151 [1] : vector<8x32xf32> to vector<8xf32>
    %316 = vector.shape_cast %315 : vector<8xf32> to vector<8x1xf32>
    %cst_152 = arith.constant 3.200000e+01 : f32
    %317 = vector.broadcast %cst_152 : f32 to vector<8x1xf32>
    %318 = arith.divf %316, %317 : vector<8x1xf32>
    %319 = arith.mulf %313, %313 : vector<8x1xf32>
    %320 = arith.subf %318, %319 : vector<8x1xf32>
    %cst_153 = arith.constant 9.99999974E-6 : f32
    %321 = vector.broadcast %cst_153 : f32 to vector<8x1xf32>
    %322 = arith.addf %320, %321 : vector<8x1xf32>
    %323 = math.rsqrt %322 : vector<8x1xf32>
    %324 = vector.broadcast %313 : vector<8x1xf32> to vector<8x32xf32>
    %325 = arith.subf %309, %324 : vector<8x32xf32>
    %326 = vector.broadcast %323 : vector<8x1xf32> to vector<8x32xf32>
    %327 = arith.mulf %325, %326 : vector<8x32xf32>
    %c0_154 = arith.constant 0 : index
    %c0_155 = arith.constant 0 : index
    %328 = vector.load %arg64[%c0_154, %c0_155] : memref<1x32xf32, #tpu.memory_space<vmem>>, vector<1x32xf32>
    %329 = vector.broadcast %328 : vector<1x32xf32> to vector<8x32xf32>
    %330 = arith.mulf %327, %329 : vector<8x32xf32>
    %c0_156 = arith.constant 0 : index
    %c0_157 = arith.constant 0 : index
    %331 = vector.load %arg63[%c0_156, %c0_157] : memref<1x32xf32, #tpu.memory_space<vmem>>, vector<1x32xf32>
    %332 = vector.broadcast %331 : vector<1x32xf32> to vector<8x32xf32>
    %333 = arith.addf %330, %332 : vector<8x32xf32>
    %334 = arith.addf %260, %5 : vector<64x32xf32>
    %335 = arith.truncf %334 : vector<64x32xf32> to vector<64x32xbf16>
    %c0_158 = arith.constant 0 : index
    %c0_159 = arith.constant 0 : index
    %336 = vector.load %arg79[%c0_158, %c0_159] : memref<32x32xbf16, #tpu.memory_space<vmem>>, vector<32x32xbf16>
    %cst_160 = arith.constant dense<0.000000e+00> : vector<64x32xf32>
    %337 = tpu.matmul %335, %336, %cst_160 {dimension_numbers = #tpu.dot_dimension_numbers<[1], [0], [0], [1], [0, 0, 1, 1], [], []>} : vector<64x32xbf16>, vector<32x32xbf16>, vector<64x32xf32> -> vector<64x32xf32>
    %c0_161 = arith.constant 0 : index
    %c0_162 = arith.constant 0 : index
    %338 = vector.load %arg46[%c0_161, %c0_162] : memref<1x32xf32, #tpu.memory_space<vmem>>, vector<1x32xf32>
    %339 = vector.broadcast %338 : vector<1x32xf32> to vector<64x32xf32>
    %340 = arith.addf %337, %339 : vector<64x32xf32>
    %341 = vector.extract_strided_slice %340 {offsets = [0, 0], sizes = [64, 16], strides = [1, 1]} : vector<64x32xf32> to vector<64x16xf32>
    %342 = vector.extract_strided_slice %340 {offsets = [0, 16], sizes = [64, 16], strides = [1, 1]} : vector<64x32xf32> to vector<64x16xf32>
    %343 = arith.addf %333, %7 : vector<8x32xf32>
    %344 = arith.truncf %343 : vector<8x32xf32> to vector<8x32xbf16>
    %c0_163 = arith.constant 0 : index
    %c0_164 = arith.constant 0 : index
    %345 = vector.load %arg57[%c0_163, %c0_164] : memref<32x16xbf16, #tpu.memory_space<vmem>>, vector<32x16xbf16>
    %cst_165 = arith.constant dense<0.000000e+00> : vector<8x16xf32>
    %346 = tpu.matmul %344, %345, %cst_165 {dimension_numbers = #tpu.dot_dimension_numbers<[1], [0], [0], [1], [0, 0, 1, 1], [], []>} : vector<8x32xbf16>, vector<32x16xbf16>, vector<8x16xf32> -> vector<8x16xf32>
    %c0_166 = arith.constant 0 : index
    %c0_167 = arith.constant 0 : index
    %347 = vector.load %arg54[%c0_166, %c0_167] : memref<1x16xf32, #tpu.memory_space<vmem>>, vector<1x16xf32>
    %348 = vector.broadcast %347 : vector<1x16xf32> to vector<8x16xf32>
    %349 = arith.addf %346, %348 : vector<8x16xf32>
    %350 = arith.truncf %260 : vector<64x32xf32> to vector<64x32xbf16>
    %c0_168 = arith.constant 0 : index
    %c0_169 = arith.constant 0 : index
    %351 = vector.load %arg58[%c0_168, %c0_169] : memref<32x16xbf16, #tpu.memory_space<vmem>>, vector<32x16xbf16>
    %cst_170 = arith.constant dense<0.000000e+00> : vector<64x16xf32>
    %352 = tpu.matmul %350, %351, %cst_170 {dimension_numbers = #tpu.dot_dimension_numbers<[1], [0], [0], [1], [0, 0, 1, 1], [], []>} : vector<64x32xbf16>, vector<32x16xbf16>, vector<64x16xf32> -> vector<64x16xf32>
    %c0_171 = arith.constant 0 : index
    %c0_172 = arith.constant 0 : index
    %353 = vector.load %arg55[%c0_171, %c0_172] : memref<1x16xf32, #tpu.memory_space<vmem>>, vector<1x16xf32>
    %354 = vector.broadcast %353 : vector<1x16xf32> to vector<64x16xf32>
    %355 = arith.addf %352, %354 : vector<64x16xf32>
    %356 = arith.truncf %349 : vector<8x16xf32> to vector<8x16xbf16>
    %357 = vector.shape_cast %356 : vector<8x16xbf16> to vector<8x2x8xbf16>
    %358 = arith.truncf %341 : vector<64x16xf32> to vector<64x16xbf16>
    %359 = vector.shape_cast %358 : vector<64x16xbf16> to vector<64x2x8xbf16>
    %360 = arith.truncf %355 : vector<64x16xf32> to vector<64x16xbf16>
    %361 = vector.shape_cast %360 : vector<64x16xbf16> to vector<64x2x8xbf16>
    "tpu.trace_start"() <{level = 10 : i32, message = "qhd,khd->hqk"}> : () -> ()
    %cst_173 = arith.constant dense<0.000000e+00> : vector<2x8x64xf32>
    %362 = tpu.matmul %357, %359, %cst_173 {dimension_numbers = #tpu.dot_dimension_numbers<[2], [2], [0], [0], [0, 1, 0, 0, 1, 0], [1], [1]>} : vector<8x2x8xbf16>, vector<64x2x8xbf16>, vector<2x8x64xf32> -> vector<2x8x64xf32>
    "tpu.trace_stop"() : () -> ()
    %cst_174 = arith.constant 0.353553385 : f32
    %363 = vector.broadcast %cst_174 : f32 to vector<2x8x64xf32>
    %364 = arith.mulf %362, %363 : vector<2x8x64xf32>
    %cst_175 = arith.constant dense<0xFF800000> : vector<2x8xf32>
    %365 = vector.multi_reduction <maximumf>, %364, %cst_175 [2] : vector<2x8x64xf32> to vector<2x8xf32>
    %366 = vector.shape_cast %365 : vector<2x8xf32> to vector<2x8x1xf32>
    %367 = vector.broadcast %366 : vector<2x8x1xf32> to vector<2x8x64xf32>
    %368 = arith.subf %364, %367 : vector<2x8x64xf32>
    %369 = math.exp %368 : vector<2x8x64xf32>
    %cst_176 = arith.constant dense<0.000000e+00> : vector<2x8xf32>
    %370 = vector.multi_reduction <add>, %369, %cst_176 [2] : vector<2x8x64xf32> to vector<2x8xf32>
    %371 = vector.shape_cast %370 : vector<2x8xf32> to vector<2x8x1xf32>
    %372 = tpu.reciprocal %371 {approx = true} : vector<2x8x1xf32> -> vector<2x8x1xf32>
    %373 = vector.broadcast %372 : vector<2x8x1xf32> to vector<2x8x64xf32>
    %374 = arith.mulf %369, %373 : vector<2x8x64xf32>
    %375 = arith.truncf %374 : vector<2x8x64xf32> to vector<2x8x64xbf16>
    "tpu.trace_start"() <{level = 10 : i32, message = "hqk,khd->qhd"}> : () -> ()
    %cst_177 = arith.constant dense<0.000000e+00> : vector<2x8x8xf32>
    %376 = tpu.matmul %361, %375, %cst_177 {dimension_numbers = #tpu.dot_dimension_numbers<[0], [2], [2], [1], [0, 1, 0, 2, 1, 1], [1], [0]>} : vector<64x2x8xbf16>, vector<2x8x64xbf16>, vector<2x8x8xf32> -> vector<2x8x8xf32>
    %377 = tpu.transpose %376, [2, 0, 1] : vector<2x8x8xf32> -> vector<8x2x8xf32>
    "tpu.trace_stop"() : () -> ()
    %378 = vector.shape_cast %377 : vector<8x2x8xf32> to vector<8x16xf32>
    %379 = arith.truncf %378 : vector<8x16xf32> to vector<8x16xbf16>
    %c0_178 = arith.constant 0 : index
    %c0_179 = arith.constant 0 : index
    %380 = vector.load %arg56[%c0_178, %c0_179] : memref<16x32xbf16, #tpu.memory_space<vmem>>, vector<16x32xbf16>
    %cst_180 = arith.constant dense<0.000000e+00> : vector<8x32xf32>
    %381 = tpu.matmul %379, %380, %cst_180 {dimension_numbers = #tpu.dot_dimension_numbers<[1], [0], [0], [1], [0, 0, 1, 1], [], []>} : vector<8x16xbf16>, vector<16x32xbf16>, vector<8x32xf32> -> vector<8x32xf32>
    %c0_181 = arith.constant 0 : index
    %c0_182 = arith.constant 0 : index
    %382 = vector.load %arg53[%c0_181, %c0_182] : memref<1x32xf32, #tpu.memory_space<vmem>>, vector<1x32xf32>
    %383 = vector.broadcast %382 : vector<1x32xf32> to vector<8x32xf32>
    %384 = arith.addf %381, %383 : vector<8x32xf32>
    %385 = arith.addf %333, %384 : vector<8x32xf32>
    %cst_183 = arith.constant dense<0.000000e+00> : vector<8xf32>
    %386 = vector.multi_reduction <add>, %385, %cst_183 [1] : vector<8x32xf32> to vector<8xf32>
    %387 = vector.shape_cast %386 : vector<8xf32> to vector<8x1xf32>
    %cst_184 = arith.constant 3.200000e+01 : f32
    %388 = vector.broadcast %cst_184 : f32 to vector<8x1xf32>
    %389 = arith.divf %387, %388 : vector<8x1xf32>
    %390 = arith.mulf %385, %385 : vector<8x32xf32>
    %cst_185 = arith.constant dense<0.000000e+00> : vector<8xf32>
    %391 = vector.multi_reduction <add>, %390, %cst_185 [1] : vector<8x32xf32> to vector<8xf32>
    %392 = vector.shape_cast %391 : vector<8xf32> to vector<8x1xf32>
    %cst_186 = arith.constant 3.200000e+01 : f32
    %393 = vector.broadcast %cst_186 : f32 to vector<8x1xf32>
    %394 = arith.divf %392, %393 : vector<8x1xf32>
    %395 = arith.mulf %389, %389 : vector<8x1xf32>
    %396 = arith.subf %394, %395 : vector<8x1xf32>
    %cst_187 = arith.constant 9.99999974E-6 : f32
    %397 = vector.broadcast %cst_187 : f32 to vector<8x1xf32>
    %398 = arith.addf %396, %397 : vector<8x1xf32>
    %399 = math.rsqrt %398 : vector<8x1xf32>
    %400 = vector.broadcast %389 : vector<8x1xf32> to vector<8x32xf32>
    %401 = arith.subf %385, %400 : vector<8x32xf32>
    %402 = vector.broadcast %399 : vector<8x1xf32> to vector<8x32xf32>
    %403 = arith.mulf %401, %402 : vector<8x32xf32>
    %c0_188 = arith.constant 0 : index
    %c0_189 = arith.constant 0 : index
    %404 = vector.load %arg66[%c0_188, %c0_189] : memref<1x32xf32, #tpu.memory_space<vmem>>, vector<1x32xf32>
    %405 = vector.broadcast %404 : vector<1x32xf32> to vector<8x32xf32>
    %406 = arith.mulf %403, %405 : vector<8x32xf32>
    %c0_190 = arith.constant 0 : index
    %c0_191 = arith.constant 0 : index
    %407 = vector.load %arg65[%c0_190, %c0_191] : memref<1x32xf32, #tpu.memory_space<vmem>>, vector<1x32xf32>
    %408 = vector.broadcast %407 : vector<1x32xf32> to vector<8x32xf32>
    %409 = arith.addf %406, %408 : vector<8x32xf32>
    %410 = arith.truncf %409 : vector<8x32xf32> to vector<8x32xbf16>
    %c0_192 = arith.constant 0 : index
    %c0_193 = arith.constant 0 : index
    %411 = vector.load %arg61[%c0_192, %c0_193] : memref<32x64xbf16, #tpu.memory_space<vmem>>, vector<32x64xbf16>
    %cst_194 = arith.constant dense<0.000000e+00> : vector<8x64xf32>
    %412 = tpu.matmul %410, %411, %cst_194 {dimension_numbers = #tpu.dot_dimension_numbers<[1], [0], [0], [1], [0, 0, 1, 1], [], []>} : vector<8x32xbf16>, vector<32x64xbf16>, vector<8x64xf32> -> vector<8x64xf32>
    %c0_195 = arith.constant 0 : index
    %c0_196 = arith.constant 0 : index
    %413 = vector.load %arg59[%c0_195, %c0_196] : memref<1x64xf32, #tpu.memory_space<vmem>>, vector<1x64xf32>
    %414 = vector.broadcast %413 : vector<1x64xf32> to vector<8x64xf32>
    %415 = arith.addf %412, %414 : vector<8x64xf32>
    %cst_197 = arith.constant 0.000000e+00 : f32
    %416 = vector.broadcast %cst_197 : f32 to vector<8x64xf32>
    %417 = arith.maximumf %415, %416 : vector<8x64xf32>
    %418 = arith.truncf %417 : vector<8x64xf32> to vector<8x64xbf16>
    %c0_198 = arith.constant 0 : index
    %c0_199 = arith.constant 0 : index
    %419 = vector.load %arg62[%c0_198, %c0_199] : memref<64x32xbf16, #tpu.memory_space<vmem>>, vector<64x32xbf16>
    %cst_200 = arith.constant dense<0.000000e+00> : vector<8x32xf32>
    %420 = tpu.matmul %418, %419, %cst_200 {dimension_numbers = #tpu.dot_dimension_numbers<[1], [0], [0], [1], [0, 0, 1, 1], [], []>} : vector<8x64xbf16>, vector<64x32xbf16>, vector<8x32xf32> -> vector<8x32xf32>
    %c0_201 = arith.constant 0 : index
    %c0_202 = arith.constant 0 : index
    %421 = vector.load %arg60[%c0_201, %c0_202] : memref<1x32xf32, #tpu.memory_space<vmem>>, vector<1x32xf32>
    %422 = vector.broadcast %421 : vector<1x32xf32> to vector<8x32xf32>
    %423 = arith.addf %420, %422 : vector<8x32xf32>
    %424 = arith.addf %409, %423 : vector<8x32xf32>
    %cst_203 = arith.constant dense<0.000000e+00> : vector<8xf32>
    %425 = vector.multi_reduction <add>, %424, %cst_203 [1] : vector<8x32xf32> to vector<8xf32>
    %426 = vector.shape_cast %425 : vector<8xf32> to vector<8x1xf32>
    %cst_204 = arith.constant 3.200000e+01 : f32
    %427 = vector.broadcast %cst_204 : f32 to vector<8x1xf32>
    %428 = arith.divf %426, %427 : vector<8x1xf32>
    %429 = arith.mulf %424, %424 : vector<8x32xf32>
    %cst_205 = arith.constant dense<0.000000e+00> : vector<8xf32>
    %430 = vector.multi_reduction <add>, %429, %cst_205 [1] : vector<8x32xf32> to vector<8xf32>
    %431 = vector.shape_cast %430 : vector<8xf32> to vector<8x1xf32>
    %cst_206 = arith.constant 3.200000e+01 : f32
    %432 = vector.broadcast %cst_206 : f32 to vector<8x1xf32>
    %433 = arith.divf %431, %432 : vector<8x1xf32>
    %434 = arith.mulf %428, %428 : vector<8x1xf32>
    %435 = arith.subf %433, %434 : vector<8x1xf32>
    %cst_207 = arith.constant 9.99999974E-6 : f32
    %436 = vector.broadcast %cst_207 : f32 to vector<8x1xf32>
    %437 = arith.addf %435, %436 : vector<8x1xf32>
    %438 = math.rsqrt %437 : vector<8x1xf32>
    %439 = vector.broadcast %428 : vector<8x1xf32> to vector<8x32xf32>
    %440 = arith.subf %424, %439 : vector<8x32xf32>
    %441 = vector.broadcast %438 : vector<8x1xf32> to vector<8x32xf32>
    %442 = arith.mulf %440, %441 : vector<8x32xf32>
    %c0_208 = arith.constant 0 : index
    %c0_209 = arith.constant 0 : index
    %443 = vector.load %arg68[%c0_208, %c0_209] : memref<1x32xf32, #tpu.memory_space<vmem>>, vector<1x32xf32>
    %444 = vector.broadcast %443 : vector<1x32xf32> to vector<8x32xf32>
    %445 = arith.mulf %442, %444 : vector<8x32xf32>
    %c0_210 = arith.constant 0 : index
    %c0_211 = arith.constant 0 : index
    %446 = vector.load %arg67[%c0_210, %c0_211] : memref<1x32xf32, #tpu.memory_space<vmem>>, vector<1x32xf32>
    %447 = vector.broadcast %446 : vector<1x32xf32> to vector<8x32xf32>
    %448 = arith.addf %445, %447 : vector<8x32xf32>
    %449 = arith.addf %448, %7 : vector<8x32xf32>
    %450 = arith.truncf %449 : vector<8x32xf32> to vector<8x32xbf16>
    %c0_212 = arith.constant 0 : index
    %c0_213 = arith.constant 0 : index
    %451 = vector.load %arg50[%c0_212, %c0_213] : memref<32x16xbf16, #tpu.memory_space<vmem>>, vector<32x16xbf16>
    %cst_214 = arith.constant dense<0.000000e+00> : vector<8x16xf32>
    %452 = tpu.matmul %450, %451, %cst_214 {dimension_numbers = #tpu.dot_dimension_numbers<[1], [0], [0], [1], [0, 0, 1, 1], [], []>} : vector<8x32xbf16>, vector<32x16xbf16>, vector<8x16xf32> -> vector<8x16xf32>
    %c0_215 = arith.constant 0 : index
    %c0_216 = arith.constant 0 : index
    %453 = vector.load %arg47[%c0_215, %c0_216] : memref<1x16xf32, #tpu.memory_space<vmem>>, vector<1x16xf32>
    %454 = vector.broadcast %453 : vector<1x16xf32> to vector<8x16xf32>
    %455 = arith.addf %452, %454 : vector<8x16xf32>
    %456 = arith.truncf %448 : vector<8x32xf32> to vector<8x32xbf16>
    %c0_217 = arith.constant 0 : index
    %c0_218 = arith.constant 0 : index
    %457 = vector.load %arg52[%c0_217, %c0_218] : memref<32x16xbf16, #tpu.memory_space<vmem>>, vector<32x16xbf16>
    %cst_219 = arith.constant dense<0.000000e+00> : vector<8x16xf32>
    %458 = tpu.matmul %456, %457, %cst_219 {dimension_numbers = #tpu.dot_dimension_numbers<[1], [0], [0], [1], [0, 0, 1, 1], [], []>} : vector<8x32xbf16>, vector<32x16xbf16>, vector<8x16xf32> -> vector<8x16xf32>
    %c0_220 = arith.constant 0 : index
    %c0_221 = arith.constant 0 : index
    %459 = vector.load %arg49[%c0_220, %c0_221] : memref<1x16xf32, #tpu.memory_space<vmem>>, vector<1x16xf32>
    %460 = vector.broadcast %459 : vector<1x16xf32> to vector<8x16xf32>
    %461 = arith.addf %458, %460 : vector<8x16xf32>
    %462 = arith.truncf %342 : vector<64x16xf32> to vector<64x16xbf16>
    %463 = vector.shape_cast %462 : vector<64x16xbf16> to vector<64x2x8xbf16>
    %464 = arith.truncf %455 : vector<8x16xf32> to vector<8x16xbf16>
    %465 = vector.shape_cast %464 : vector<8x16xbf16> to vector<8x2x8xbf16>
    %466 = arith.truncf %461 : vector<8x16xf32> to vector<8x16xbf16>
    %467 = vector.shape_cast %466 : vector<8x16xbf16> to vector<8x2x8xbf16>
    "tpu.trace_start"() <{level = 10 : i32, message = "qhd,khd->hqk"}> : () -> ()
    %cst_222 = arith.constant dense<0.000000e+00> : vector<2x64x8xf32>
    %468 = tpu.matmul %463, %465, %cst_222 {dimension_numbers = #tpu.dot_dimension_numbers<[2], [2], [0], [0], [0, 1, 0, 0, 1, 0], [1], [1]>} : vector<64x2x8xbf16>, vector<8x2x8xbf16>, vector<2x64x8xf32> -> vector<2x64x8xf32>
    "tpu.trace_stop"() : () -> ()
    %cst_223 = arith.constant 0.353553385 : f32
    %469 = vector.broadcast %cst_223 : f32 to vector<2x64x8xf32>
    %470 = arith.mulf %468, %469 : vector<2x64x8xf32>
    %cst_224 = arith.constant dense<0xFF800000> : vector<2x64xf32>
    %471 = vector.multi_reduction <maximumf>, %470, %cst_224 [2] : vector<2x64x8xf32> to vector<2x64xf32>
    %472 = vector.shape_cast %471 : vector<2x64xf32> to vector<2x64x1xf32>
    %473 = vector.broadcast %472 : vector<2x64x1xf32> to vector<2x64x8xf32>
    %474 = arith.subf %470, %473 : vector<2x64x8xf32>
    %475 = math.exp %474 : vector<2x64x8xf32>
    %cst_225 = arith.constant dense<0.000000e+00> : vector<2x64xf32>
    %476 = vector.multi_reduction <add>, %475, %cst_225 [2] : vector<2x64x8xf32> to vector<2x64xf32>
    %477 = vector.shape_cast %476 : vector<2x64xf32> to vector<2x64x1xf32>
    %478 = tpu.reciprocal %477 {approx = true} : vector<2x64x1xf32> -> vector<2x64x1xf32>
    %479 = vector.broadcast %478 : vector<2x64x1xf32> to vector<2x64x8xf32>
    %480 = arith.mulf %475, %479 : vector<2x64x8xf32>
    %481 = arith.truncf %480 : vector<2x64x8xf32> to vector<2x64x8xbf16>
    "tpu.trace_start"() <{level = 10 : i32, message = "hqk,khd->qhd"}> : () -> ()
    %cst_226 = arith.constant dense<0.000000e+00> : vector<2x8x64xf32>
    %482 = tpu.matmul %467, %481, %cst_226 {dimension_numbers = #tpu.dot_dimension_numbers<[0], [2], [2], [1], [0, 1, 0, 2, 1, 1], [1], [0]>} : vector<8x2x8xbf16>, vector<2x64x8xbf16>, vector<2x8x64xf32> -> vector<2x8x64xf32>
    %483 = tpu.transpose %482, [2, 0, 1] : vector<2x8x64xf32> -> vector<64x2x8xf32>
    "tpu.trace_stop"() : () -> ()
    %484 = vector.shape_cast %483 : vector<64x2x8xf32> to vector<64x16xf32>
    %485 = arith.truncf %484 : vector<64x16xf32> to vector<64x16xbf16>
    %c0_227 = arith.constant 0 : index
    %c0_228 = arith.constant 0 : index
    %486 = vector.load %arg51[%c0_227, %c0_228] : memref<16x32xbf16, #tpu.memory_space<vmem>>, vector<16x32xbf16>
    %cst_229 = arith.constant dense<0.000000e+00> : vector<64x32xf32>
    %487 = tpu.matmul %485, %486, %cst_229 {dimension_numbers = #tpu.dot_dimension_numbers<[1], [0], [0], [1], [0, 0, 1, 1], [], []>} : vector<64x16xbf16>, vector<16x32xbf16>, vector<64x32xf32> -> vector<64x32xf32>
    %c0_230 = arith.constant 0 : index
    %c0_231 = arith.constant 0 : index
    %488 = vector.load %arg48[%c0_230, %c0_231] : memref<1x32xf32, #tpu.memory_space<vmem>>, vector<1x32xf32>
    %489 = vector.broadcast %488 : vector<1x32xf32> to vector<64x32xf32>
    %490 = arith.addf %487, %489 : vector<64x32xf32>
    %491 = arith.addf %260, %490 : vector<64x32xf32>
    %cst_232 = arith.constant dense<0.000000e+00> : vector<64xf32>
    %492 = vector.multi_reduction <add>, %491, %cst_232 [1] : vector<64x32xf32> to vector<64xf32>
    %493 = vector.shape_cast %492 : vector<64xf32> to vector<64x1xf32>
    %cst_233 = arith.constant 3.200000e+01 : f32
    %494 = vector.broadcast %cst_233 : f32 to vector<64x1xf32>
    %495 = arith.divf %493, %494 : vector<64x1xf32>
    %496 = arith.mulf %491, %491 : vector<64x32xf32>
    %cst_234 = arith.constant dense<0.000000e+00> : vector<64xf32>
    %497 = vector.multi_reduction <add>, %496, %cst_234 [1] : vector<64x32xf32> to vector<64xf32>
    %498 = vector.shape_cast %497 : vector<64xf32> to vector<64x1xf32>
    %cst_235 = arith.constant 3.200000e+01 : f32
    %499 = vector.broadcast %cst_235 : f32 to vector<64x1xf32>
    %500 = arith.divf %498, %499 : vector<64x1xf32>
    %501 = arith.mulf %495, %495 : vector<64x1xf32>
    %502 = arith.subf %500, %501 : vector<64x1xf32>
    %cst_236 = arith.constant 9.99999974E-6 : f32
    %503 = vector.broadcast %cst_236 : f32 to vector<64x1xf32>
    %504 = arith.addf %502, %503 : vector<64x1xf32>
    %505 = math.rsqrt %504 : vector<64x1xf32>
    %506 = vector.broadcast %495 : vector<64x1xf32> to vector<64x32xf32>
    %507 = arith.subf %491, %506 : vector<64x32xf32>
    %508 = vector.broadcast %505 : vector<64x1xf32> to vector<64x32xf32>
    %509 = arith.mulf %507, %508 : vector<64x32xf32>
    %c0_237 = arith.constant 0 : index
    %c0_238 = arith.constant 0 : index
    %510 = vector.load %arg70[%c0_237, %c0_238] : memref<1x32xf32, #tpu.memory_space<vmem>>, vector<1x32xf32>
    %511 = vector.broadcast %510 : vector<1x32xf32> to vector<64x32xf32>
    %512 = arith.mulf %509, %511 : vector<64x32xf32>
    %c0_239 = arith.constant 0 : index
    %c0_240 = arith.constant 0 : index
    %513 = vector.load %arg69[%c0_239, %c0_240] : memref<1x32xf32, #tpu.memory_space<vmem>>, vector<1x32xf32>
    %514 = vector.broadcast %513 : vector<1x32xf32> to vector<64x32xf32>
    %515 = arith.addf %512, %514 : vector<64x32xf32>
    %516 = arith.addf %448, %7 : vector<8x32xf32>
    %517 = arith.addf %515, %5 : vector<64x32xf32>
    %518 = arith.truncf %516 : vector<8x32xf32> to vector<8x32xbf16>
    %c0_241 = arith.constant 0 : index
    %c0_242 = arith.constant 0 : index
    %519 = vector.load %arg10[%c0_241, %c0_242] : memref<32x16xbf16, #tpu.memory_space<vmem>>, vector<32x16xbf16>
    %cst_243 = arith.constant dense<0.000000e+00> : vector<8x16xf32>
    %520 = tpu.matmul %518, %519, %cst_243 {dimension_numbers = #tpu.dot_dimension_numbers<[1], [0], [0], [1], [0, 0, 1, 1], [], []>} : vector<8x32xbf16>, vector<32x16xbf16>, vector<8x16xf32> -> vector<8x16xf32>
    %c0_244 = arith.constant 0 : index
    %c0_245 = arith.constant 0 : index
    %521 = vector.load %arg6[%c0_244, %c0_245] : memref<1x16xf32, #tpu.memory_space<vmem>>, vector<1x16xf32>
    %522 = vector.broadcast %521 : vector<1x16xf32> to vector<8x16xf32>
    %523 = arith.addf %520, %522 : vector<8x16xf32>
    %524 = arith.truncf %517 : vector<64x32xf32> to vector<64x32xbf16>
    %c0_246 = arith.constant 0 : index
    %c0_247 = arith.constant 0 : index
    %525 = vector.load %arg8[%c0_246, %c0_247] : memref<32x16xbf16, #tpu.memory_space<vmem>>, vector<32x16xbf16>
    %cst_248 = arith.constant dense<0.000000e+00> : vector<64x16xf32>
    %526 = tpu.matmul %524, %525, %cst_248 {dimension_numbers = #tpu.dot_dimension_numbers<[1], [0], [0], [1], [0, 0, 1, 1], [], []>} : vector<64x32xbf16>, vector<32x16xbf16>, vector<64x16xf32> -> vector<64x16xf32>
    %c0_249 = arith.constant 0 : index
    %c0_250 = arith.constant 0 : index
    %527 = vector.load %arg4[%c0_249, %c0_250] : memref<1x16xf32, #tpu.memory_space<vmem>>, vector<1x16xf32>
    %528 = vector.broadcast %527 : vector<1x16xf32> to vector<64x16xf32>
    %529 = arith.addf %526, %528 : vector<64x16xf32>
    %530 = arith.truncf %515 : vector<64x32xf32> to vector<64x32xbf16>
    %c0_251 = arith.constant 0 : index
    %c0_252 = arith.constant 0 : index
    %531 = vector.load %arg11[%c0_251, %c0_252] : memref<32x16xbf16, #tpu.memory_space<vmem>>, vector<32x16xbf16>
    %cst_253 = arith.constant dense<0.000000e+00> : vector<64x16xf32>
    %532 = tpu.matmul %530, %531, %cst_253 {dimension_numbers = #tpu.dot_dimension_numbers<[1], [0], [0], [1], [0, 0, 1, 1], [], []>} : vector<64x32xbf16>, vector<32x16xbf16>, vector<64x16xf32> -> vector<64x16xf32>
    %c0_254 = arith.constant 0 : index
    %c0_255 = arith.constant 0 : index
    %533 = vector.load %arg7[%c0_254, %c0_255] : memref<1x16xf32, #tpu.memory_space<vmem>>, vector<1x16xf32>
    %534 = vector.broadcast %533 : vector<1x16xf32> to vector<64x16xf32>
    %535 = arith.addf %532, %534 : vector<64x16xf32>
    %536 = arith.truncf %523 : vector<8x16xf32> to vector<8x16xbf16>
    %537 = vector.shape_cast %536 : vector<8x16xbf16> to vector<8x2x8xbf16>
    %538 = arith.truncf %529 : vector<64x16xf32> to vector<64x16xbf16>
    %539 = vector.shape_cast %538 : vector<64x16xbf16> to vector<64x2x8xbf16>
    %540 = arith.truncf %535 : vector<64x16xf32> to vector<64x16xbf16>
    %541 = vector.shape_cast %540 : vector<64x16xbf16> to vector<64x2x8xbf16>
    "tpu.trace_start"() <{level = 10 : i32, message = "qhd,khd->hqk"}> : () -> ()
    %cst_256 = arith.constant dense<0.000000e+00> : vector<2x8x64xf32>
    %542 = tpu.matmul %537, %539, %cst_256 {dimension_numbers = #tpu.dot_dimension_numbers<[2], [2], [0], [0], [0, 1, 0, 0, 1, 0], [1], [1]>} : vector<8x2x8xbf16>, vector<64x2x8xbf16>, vector<2x8x64xf32> -> vector<2x8x64xf32>
    "tpu.trace_stop"() : () -> ()
    %cst_257 = arith.constant 0.353553385 : f32
    %543 = vector.broadcast %cst_257 : f32 to vector<2x8x64xf32>
    %544 = arith.mulf %542, %543 : vector<2x8x64xf32>
    %cst_258 = arith.constant dense<0xFF800000> : vector<2x8xf32>
    %545 = vector.multi_reduction <maximumf>, %544, %cst_258 [2] : vector<2x8x64xf32> to vector<2x8xf32>
    %546 = vector.shape_cast %545 : vector<2x8xf32> to vector<2x8x1xf32>
    %547 = vector.broadcast %546 : vector<2x8x1xf32> to vector<2x8x64xf32>
    %548 = arith.subf %544, %547 : vector<2x8x64xf32>
    %549 = math.exp %548 : vector<2x8x64xf32>
    %cst_259 = arith.constant dense<0.000000e+00> : vector<2x8xf32>
    %550 = vector.multi_reduction <add>, %549, %cst_259 [2] : vector<2x8x64xf32> to vector<2x8xf32>
    %551 = vector.shape_cast %550 : vector<2x8xf32> to vector<2x8x1xf32>
    %552 = tpu.reciprocal %551 {approx = true} : vector<2x8x1xf32> -> vector<2x8x1xf32>
    %553 = vector.broadcast %552 : vector<2x8x1xf32> to vector<2x8x64xf32>
    %554 = arith.mulf %549, %553 : vector<2x8x64xf32>
    %555 = arith.truncf %554 : vector<2x8x64xf32> to vector<2x8x64xbf16>
    "tpu.trace_start"() <{level = 10 : i32, message = "hqk,khd->qhd"}> : () -> ()
    %cst_260 = arith.constant dense<0.000000e+00> : vector<2x8x8xf32>
    %556 = tpu.matmul %541, %555, %cst_260 {dimension_numbers = #tpu.dot_dimension_numbers<[0], [2], [2], [1], [0, 1, 0, 2, 1, 1], [1], [0]>} : vector<64x2x8xbf16>, vector<2x8x64xbf16>, vector<2x8x8xf32> -> vector<2x8x8xf32>
    %557 = tpu.transpose %556, [2, 0, 1] : vector<2x8x8xf32> -> vector<8x2x8xf32>
    "tpu.trace_stop"() : () -> ()
    %558 = vector.shape_cast %557 : vector<8x2x8xf32> to vector<8x16xf32>
    %559 = arith.truncf %558 : vector<8x16xf32> to vector<8x16xbf16>
    %c0_261 = arith.constant 0 : index
    %c0_262 = arith.constant 0 : index
    %560 = vector.load %arg9[%c0_261, %c0_262] : memref<16x32xbf16, #tpu.memory_space<vmem>>, vector<16x32xbf16>
    %cst_263 = arith.constant dense<0.000000e+00> : vector<8x32xf32>
    %561 = tpu.matmul %559, %560, %cst_263 {dimension_numbers = #tpu.dot_dimension_numbers<[1], [0], [0], [1], [0, 0, 1, 1], [], []>} : vector<8x16xbf16>, vector<16x32xbf16>, vector<8x32xf32> -> vector<8x32xf32>
    %c0_264 = arith.constant 0 : index
    %c0_265 = arith.constant 0 : index
    %562 = vector.load %arg5[%c0_264, %c0_265] : memref<1x32xf32, #tpu.memory_space<vmem>>, vector<1x32xf32>
    %563 = vector.broadcast %562 : vector<1x32xf32> to vector<8x32xf32>
    %564 = arith.addf %561, %563 : vector<8x32xf32>
    %565 = arith.addf %448, %564 : vector<8x32xf32>
    %cst_266 = arith.constant dense<0.000000e+00> : vector<8xf32>
    %566 = vector.multi_reduction <add>, %565, %cst_266 [1] : vector<8x32xf32> to vector<8xf32>
    %567 = vector.shape_cast %566 : vector<8xf32> to vector<8x1xf32>
    %cst_267 = arith.constant 3.200000e+01 : f32
    %568 = vector.broadcast %cst_267 : f32 to vector<8x1xf32>
    %569 = arith.divf %567, %568 : vector<8x1xf32>
    %570 = arith.mulf %565, %565 : vector<8x32xf32>
    %cst_268 = arith.constant dense<0.000000e+00> : vector<8xf32>
    %571 = vector.multi_reduction <add>, %570, %cst_268 [1] : vector<8x32xf32> to vector<8xf32>
    %572 = vector.shape_cast %571 : vector<8xf32> to vector<8x1xf32>
    %cst_269 = arith.constant 3.200000e+01 : f32
    %573 = vector.broadcast %cst_269 : f32 to vector<8x1xf32>
    %574 = arith.divf %572, %573 : vector<8x1xf32>
    %575 = arith.mulf %569, %569 : vector<8x1xf32>
    %576 = arith.subf %574, %575 : vector<8x1xf32>
    %cst_270 = arith.constant 9.99999974E-6 : f32
    %577 = vector.broadcast %cst_270 : f32 to vector<8x1xf32>
    %578 = arith.addf %576, %577 : vector<8x1xf32>
    %579 = math.rsqrt %578 : vector<8x1xf32>
    %580 = vector.broadcast %569 : vector<8x1xf32> to vector<8x32xf32>
    %581 = arith.subf %565, %580 : vector<8x32xf32>
    %582 = vector.broadcast %579 : vector<8x1xf32> to vector<8x32xf32>
    %583 = arith.mulf %581, %582 : vector<8x32xf32>
    %c0_271 = arith.constant 0 : index
    %c0_272 = arith.constant 0 : index
    %584 = vector.load %arg81[%c0_271, %c0_272] : memref<1x32xf32, #tpu.memory_space<vmem>>, vector<1x32xf32>
    %585 = vector.broadcast %584 : vector<1x32xf32> to vector<8x32xf32>
    %586 = arith.mulf %583, %585 : vector<8x32xf32>
    %c0_273 = arith.constant 0 : index
    %c0_274 = arith.constant 0 : index
    %587 = vector.load %arg80[%c0_273, %c0_274] : memref<1x32xf32, #tpu.memory_space<vmem>>, vector<1x32xf32>
    %588 = vector.broadcast %587 : vector<1x32xf32> to vector<8x32xf32>
    %589 = arith.addf %586, %588 : vector<8x32xf32>
    %c0_275 = arith.constant 0 : index
    %c0_276 = arith.constant 0 : index
    %c0_277 = arith.constant 0 : index
    %590 = vector.load %arg82[%c0_275, %c0_276, %c0_277] : memref<1x8x32xf32, #tpu.memory_space<vmem>>, vector<1x8x32xf32>
    %591 = vector.shape_cast %590 : vector<1x8x32xf32> to vector<8x32xf32>
    %592 = vector.shape_cast %589 : vector<8x32xf32> to vector<1x8x32xf32>
    tpu.vector_store %arg82[%c0_275, %c0_276, %c0_277], %592 {strides = array<i32>} : memref<1x8x32xf32, #tpu.memory_space<vmem>>, vector<1x8x32xf32>,
    %c0_278 = arith.constant 0 : index
    %c0_279 = arith.constant 0 : index
    %c0_280 = arith.constant 0 : index
    %593 = vector.load %arg83[%c0_278, %c0_279, %c0_280] : memref<1x64x32xf32, #tpu.memory_space<vmem>>, vector<1x64x32xf32>
    %594 = vector.shape_cast %593 : vector<1x64x32xf32> to vector<64x32xf32>
    %595 = vector.shape_cast %515 : vector<64x32xf32> to vector<1x64x32xf32>
    tpu.vector_store %arg83[%c0_278, %c0_279, %c0_280], %595 {strides = array<i32>} : memref<1x64x32xf32, #tpu.memory_space<vmem>>, vector<1x64x32xf32>,
    return
  }
  func.func @transform_0(%arg0: i32) -> (i32, i32, i32) {
    %c0_i32 = arith.constant 0 : i32
    %c0_i32_0 = arith.constant 0 : i32
    %c0_i32_1 = arith.constant 0 : i32
    return %arg0, %c0_i32, %c0_i32_0 : i32, i32, i32
  }
  func.func @transform_1(%arg0: i32) -> (i32, i32, i32) {
    %c0_i32 = arith.constant 0 : i32
    %c0_i32_0 = arith.constant 0 : i32
    %c0_i32_1 = arith.constant 0 : i32
    return %arg0, %c0_i32, %c0_i32_0 : i32, i32, i32
  }
  func.func @transform_2(%arg0: i32) -> (i32, i32, i32) {
    %c0_i32 = arith.constant 0 : i32
    %c0_i32_0 = arith.constant 0 : i32
    %c0_i32_1 = arith.constant 0 : i32
    return %arg0, %c0_i32, %c0_i32_0 : i32, i32, i32
  }
  func.func @transform_3(%arg0: i32) -> (i32, i32) {
    %c0_i32 = arith.constant 0 : i32
    %c0_i32_0 = arith.constant 0 : i32
    %c0_i32_1 = arith.constant 0 : i32
    return %c0_i32, %c0_i32_0 : i32, i32
  }
  func.func @transform_4(%arg0: i32) -> (i32, i32) {
    %c0_i32 = arith.constant 0 : i32
    %c0_i32_0 = arith.constant 0 : i32
    %c0_i32_1 = arith.constant 0 : i32
    return %c0_i32, %c0_i32_0 : i32, i32
  }
  func.func @transform_5(%arg0: i32) -> (i32, i32) {
    %c0_i32 = arith.constant 0 : i32
    %c0_i32_0 = arith.constant 0 : i32
    %c0_i32_1 = arith.constant 0 : i32
    return %c0_i32, %c0_i32_0 : i32, i32
  }
  func.func @transform_6(%arg0: i32) -> (i32, i32) {
    %c0_i32 = arith.constant 0 : i32
    %c0_i32_0 = arith.constant 0 : i32
    %c0_i32_1 = arith.constant 0 : i32
    return %c0_i32, %c0_i32_0 : i32, i32
  }
  func.func @transform_7(%arg0: i32) -> (i32, i32) {
    %c0_i32 = arith.constant 0 : i32
    %c0_i32_0 = arith.constant 0 : i32
    %c0_i32_1 = arith.constant 0 : i32
    return %c0_i32, %c0_i32_0 : i32, i32
  }
  func.func @transform_8(%arg0: i32) -> (i32, i32) {
    %c0_i32 = arith.constant 0 : i32
    %c0_i32_0 = arith.constant 0 : i32
    %c0_i32_1 = arith.constant 0 : i32
    return %c0_i32, %c0_i32_0 : i32, i32
  }
  func.func @transform_9(%arg0: i32) -> (i32, i32) {
    %c0_i32 = arith.constant 0 : i32
    %c0_i32_0 = arith.constant 0 : i32
    %c0_i32_1 = arith.constant 0 : i32
    return %c0_i32, %c0_i32_0 : i32, i32
  }
  func.func @transform_10(%arg0: i32) -> (i32, i32) {
    %c0_i32 = arith.constant 0 : i32
    %c0_i32_0 = arith.constant 0 : i32
    %c0_i32_1 = arith.constant 0 : i32
    return %c0_i32, %c0_i32_0 : i32, i32
  }
  func.func @transform_11(%arg0: i32) -> (i32, i32) {
    %c0_i32 = arith.constant 0 : i32
    %c0_i32_0 = arith.constant 0 : i32
    %c0_i32_1 = arith.constant 0 : i32
    return %c0_i32, %c0_i32_0 : i32, i32
  }
  func.func @transform_12(%arg0: i32) -> (i32, i32) {
    %c0_i32 = arith.constant 0 : i32
    %c0_i32_0 = arith.constant 0 : i32
    %c0_i32_1 = arith.constant 0 : i32
    return %c0_i32, %c0_i32_0 : i32, i32
  }
  func.func @transform_13(%arg0: i32) -> (i32, i32) {
    %c0_i32 = arith.constant 0 : i32
    %c0_i32_0 = arith.constant 0 : i32
    %c0_i32_1 = arith.constant 0 : i32
    return %c0_i32, %c0_i32_0 : i32, i32
  }
  func.func @transform_14(%arg0: i32) -> (i32, i32) {
    %c0_i32 = arith.constant 0 : i32
    %c0_i32_0 = arith.constant 0 : i32
    %c0_i32_1 = arith.constant 0 : i32
    return %c0_i32, %c0_i32_0 : i32, i32
  }
  func.func @transform_15(%arg0: i32) -> (i32, i32) {
    %c0_i32 = arith.constant 0 : i32
    %c0_i32_0 = arith.constant 0 : i32
    %c0_i32_1 = arith.constant 0 : i32
    return %c0_i32, %c0_i32_0 : i32, i32
  }
  func.func @transform_16(%arg0: i32) -> (i32, i32) {
    %c0_i32 = arith.constant 0 : i32
    %c0_i32_0 = arith.constant 0 : i32
    %c0_i32_1 = arith.constant 0 : i32
    return %c0_i32, %c0_i32_0 : i32, i32
  }
  func.func @transform_17(%arg0: i32) -> (i32, i32) {
    %c0_i32 = arith.constant 0 : i32
    %c0_i32_0 = arith.constant 0 : i32
    %c0_i32_1 = arith.constant 0 : i32
    return %c0_i32, %c0_i32_0 : i32, i32
  }
  func.func @transform_18(%arg0: i32) -> (i32, i32) {
    %c0_i32 = arith.constant 0 : i32
    %c0_i32_0 = arith.constant 0 : i32
    %c0_i32_1 = arith.constant 0 : i32
    return %c0_i32, %c0_i32_0 : i32, i32
  }
  func.func @transform_19(%arg0: i32) -> (i32, i32) {
    %c0_i32 = arith.constant 0 : i32
    %c0_i32_0 = arith.constant 0 : i32
    %c0_i32_1 = arith.constant 0 : i32
    return %c0_i32, %c0_i32_0 : i32, i32
  }
  func.func @transform_20(%arg0: i32) -> (i32, i32) {
    %c0_i32 = arith.constant 0 : i32
    %c0_i32_0 = arith.constant 0 : i32
    %c0_i32_1 = arith.constant 0 : i32
    return %c0_i32, %c0_i32_0 : i32, i32
  }
  func.func @transform_21(%arg0: i32) -> (i32, i32) {
    %c0_i32 = arith.constant 0 : i32
    %c0_i32_0 = arith.constant 0 : i32
    %c0_i32_1 = arith.constant 0 : i32
    return %c0_i32, %c0_i32_0 : i32, i32
  }
  func.func @transform_22(%arg0: i32) -> (i32, i32) {
    %c0_i32 = arith.constant 0 : i32
    %c0_i32_0 = arith.constant 0 : i32
    %c0_i32_1 = arith.constant 0 : i32
    return %c0_i32, %c0_i32_0 : i32, i32
  }
  func.func @transform_23(%arg0: i32) -> (i32, i32) {
    %c0_i32 = arith.constant 0 : i32
    %c0_i32_0 = arith.constant 0 : i32
    %c0_i32_1 = arith.constant 0 : i32
    return %c0_i32, %c0_i32_0 : i32, i32
  }
  func.func @transform_24(%arg0: i32) -> (i32, i32) {
    %c0_i32 = arith.constant 0 : i32
    %c0_i32_0 = arith.constant 0 : i32
    %c0_i32_1 = arith.constant 0 : i32
    return %c0_i32, %c0_i32_0 : i32, i32
  }
  func.func @transform_25(%arg0: i32) -> (i32, i32) {
    %c0_i32 = arith.constant 0 : i32
    %c0_i32_0 = arith.constant 0 : i32
    %c0_i32_1 = arith.constant 0 : i32
    return %c0_i32, %c0_i32_0 : i32, i32
  }
  func.func @transform_26(%arg0: i32) -> (i32, i32) {
    %c0_i32 = arith.constant 0 : i32
    %c0_i32_0 = arith.constant 0 : i32
    %c0_i32_1 = arith.constant 0 : i32
    return %c0_i32, %c0_i32_0 : i32, i32
  }
  func.func @transform_27(%arg0: i32) -> (i32, i32) {
    %c0_i32 = arith.constant 0 : i32
    %c0_i32_0 = arith.constant 0 : i32
    %c0_i32_1 = arith.constant 0 : i32
    return %c0_i32, %c0_i32_0 : i32, i32
  }
  func.func @transform_28(%arg0: i32) -> (i32, i32) {
    %c0_i32 = arith.constant 0 : i32
    %c0_i32_0 = arith.constant 0 : i32
    %c0_i32_1 = arith.constant 0 : i32
    return %c0_i32, %c0_i32_0 : i32, i32
  }
  func.func @transform_29(%arg0: i32) -> (i32, i32) {
    %c0_i32 = arith.constant 0 : i32
    %c0_i32_0 = arith.constant 0 : i32
    %c0_i32_1 = arith.constant 0 : i32
    return %c0_i32, %c0_i32_0 : i32, i32
  }
  func.func @transform_30(%arg0: i32) -> (i32, i32) {
    %c0_i32 = arith.constant 0 : i32
    %c0_i32_0 = arith.constant 0 : i32
    %c0_i32_1 = arith.constant 0 : i32
    return %c0_i32, %c0_i32_0 : i32, i32
  }
  func.func @transform_31(%arg0: i32) -> (i32, i32) {
    %c0_i32 = arith.constant 0 : i32
    %c0_i32_0 = arith.constant 0 : i32
    %c0_i32_1 = arith.constant 0 : i32
    return %c0_i32, %c0_i32_0 : i32, i32
  }
  func.func @transform_32(%arg0: i32) -> (i32, i32) {
    %c0_i32 = arith.constant 0 : i32
    %c0_i32_0 = arith.constant 0 : i32
    %c0_i32_1 = arith.constant 0 : i32
    return %c0_i32, %c0_i32_0 : i32, i32
  }
  func.func @transform_33(%arg0: i32) -> (i32, i32) {
    %c0_i32 = arith.constant 0 : i32
    %c0_i32_0 = arith.constant 0 : i32
    %c0_i32_1 = arith.constant 0 : i32
    return %c0_i32, %c0_i32_0 : i32, i32
  }
  func.func @transform_34(%arg0: i32) -> (i32, i32) {
    %c0_i32 = arith.constant 0 : i32
    %c0_i32_0 = arith.constant 0 : i32
    %c0_i32_1 = arith.constant 0 : i32
    return %c0_i32, %c0_i32_0 : i32, i32
  }
  func.func @transform_35(%arg0: i32) -> (i32, i32) {
    %c0_i32 = arith.constant 0 : i32
    %c0_i32_0 = arith.constant 0 : i32
    %c0_i32_1 = arith.constant 0 : i32
    return %c0_i32, %c0_i32_0 : i32, i32
  }
  func.func @transform_36(%arg0: i32) -> (i32, i32) {
    %c0_i32 = arith.constant 0 : i32
    %c0_i32_0 = arith.constant 0 : i32
    %c0_i32_1 = arith.constant 0 : i32
    return %c0_i32, %c0_i32_0 : i32, i32
  }
  func.func @transform_37(%arg0: i32) -> (i32, i32) {
    %c0_i32 = arith.constant 0 : i32
    %c0_i32_0 = arith.constant 0 : i32
    %c0_i32_1 = arith.constant 0 : i32
    return %c0_i32, %c0_i32_0 : i32, i32
  }
  func.func @transform_38(%arg0: i32) -> (i32, i32) {
    %c0_i32 = arith.constant 0 : i32
    %c0_i32_0 = arith.constant 0 : i32
    %c0_i32_1 = arith.constant 0 : i32
    return %c0_i32, %c0_i32_0 : i32, i32
  }
  func.func @transform_39(%arg0: i32) -> (i32, i32) {
    %c0_i32 = arith.constant 0 : i32
    %c0_i32_0 = arith.constant 0 : i32
    %c0_i32_1 = arith.constant 0 : i32
    return %c0_i32, %c0_i32_0 : i32, i32
  }
  func.func @transform_40(%arg0: i32) -> (i32, i32) {
    %c0_i32 = arith.constant 0 : i32
    %c0_i32_0 = arith.constant 0 : i32
    %c0_i32_1 = arith.constant 0 : i32
    return %c0_i32, %c0_i32_0 : i32, i32
  }
  func.func @transform_41(%arg0: i32) -> (i32, i32) {
    %c0_i32 = arith.constant 0 : i32
    %c0_i32_0 = arith.constant 0 : i32
    %c0_i32_1 = arith.constant 0 : i32
    return %c0_i32, %c0_i32_0 : i32, i32
  }
  func.func @transform_42(%arg0: i32) -> (i32, i32) {
    %c0_i32 = arith.constant 0 : i32
    %c0_i32_0 = arith.constant 0 : i32
    %c0_i32_1 = arith.constant 0 : i32
    return %c0_i32, %c0_i32_0 : i32, i32
  }
  func.func @transform_43(%arg0: i32) -> (i32, i32) {
    %c0_i32 = arith.constant 0 : i32
    %c0_i32_0 = arith.constant 0 : i32
    %c0_i32_1 = arith.constant 0 : i32
    return %c0_i32, %c0_i32_0 : i32, i32
  }
  func.func @transform_44(%arg0: i32) -> (i32, i32) {
    %c0_i32 = arith.constant 0 : i32
    %c0_i32_0 = arith.constant 0 : i32
    %c0_i32_1 = arith.constant 0 : i32
    return %c0_i32, %c0_i32_0 : i32, i32
  }
  func.func @transform_45(%arg0: i32) -> (i32, i32) {
    %c0_i32 = arith.constant 0 : i32
    %c0_i32_0 = arith.constant 0 : i32
    %c0_i32_1 = arith.constant 0 : i32
    return %c0_i32, %c0_i32_0 : i32, i32
  }
  func.func @transform_46(%arg0: i32) -> (i32, i32) {
    %c0_i32 = arith.constant 0 : i32
    %c0_i32_0 = arith.constant 0 : i32
    %c0_i32_1 = arith.constant 0 : i32
    return %c0_i32, %c0_i32_0 : i32, i32
  }
  func.func @transform_47(%arg0: i32) -> (i32, i32) {
    %c0_i32 = arith.constant 0 : i32
    %c0_i32_0 = arith.constant 0 : i32
    %c0_i32_1 = arith.constant 0 : i32
    return %c0_i32, %c0_i32_0 : i32, i32
  }
  func.func @transform_48(%arg0: i32) -> (i32, i32) {
    %c0_i32 = arith.constant 0 : i32
    %c0_i32_0 = arith.constant 0 : i32
    %c0_i32_1 = arith.constant 0 : i32
    return %c0_i32, %c0_i32_0 : i32, i32
  }
  func.func @transform_49(%arg0: i32) -> (i32, i32) {
    %c0_i32 = arith.constant 0 : i32
    %c0_i32_0 = arith.constant 0 : i32
    %c0_i32_1 = arith.constant 0 : i32
    return %c0_i32, %c0_i32_0 : i32, i32
  }
  func.func @transform_50(%arg0: i32) -> (i32, i32) {
    %c0_i32 = arith.constant 0 : i32
    %c0_i32_0 = arith.constant 0 : i32
    %c0_i32_1 = arith.constant 0 : i32
    return %c0_i32, %c0_i32_0 : i32, i32
  }
  func.func @transform_51(%arg0: i32) -> (i32, i32) {
    %c0_i32 = arith.constant 0 : i32
    %c0_i32_0 = arith.constant 0 : i32
    %c0_i32_1 = arith.constant 0 : i32
    return %c0_i32, %c0_i32_0 : i32, i32
  }
  func.func @transform_52(%arg0: i32) -> (i32, i32) {
    %c0_i32 = arith.constant 0 : i32
    %c0_i32_0 = arith.constant 0 : i32
    %c0_i32_1 = arith.constant 0 : i32
    return %c0_i32, %c0_i32_0 : i32, i32
  }
  func.func @transform_53(%arg0: i32) -> (i32, i32) {
    %c0_i32 = arith.constant 0 : i32
    %c0_i32_0 = arith.constant 0 : i32
    %c0_i32_1 = arith.constant 0 : i32
    return %c0_i32, %c0_i32_0 : i32, i32
  }
  func.func @transform_54(%arg0: i32) -> (i32, i32) {
    %c0_i32 = arith.constant 0 : i32
    %c0_i32_0 = arith.constant 0 : i32
    %c0_i32_1 = arith.constant 0 : i32
    return %c0_i32, %c0_i32_0 : i32, i32
  }
  func.func @transform_55(%arg0: i32) -> (i32, i32) {
    %c0_i32 = arith.constant 0 : i32
    %c0_i32_0 = arith.constant 0 : i32
    %c0_i32_1 = arith.constant 0 : i32
    return %c0_i32, %c0_i32_0 : i32, i32
  }
  func.func @transform_56(%arg0: i32) -> (i32, i32) {
    %c0_i32 = arith.constant 0 : i32
    %c0_i32_0 = arith.constant 0 : i32
    %c0_i32_1 = arith.constant 0 : i32
    return %c0_i32, %c0_i32_0 : i32, i32
  }
  func.func @transform_57(%arg0: i32) -> (i32, i32) {
    %c0_i32 = arith.constant 0 : i32
    %c0_i32_0 = arith.constant 0 : i32
    %c0_i32_1 = arith.constant 0 : i32
    return %c0_i32, %c0_i32_0 : i32, i32
  }
  func.func @transform_58(%arg0: i32) -> (i32, i32) {
    %c0_i32 = arith.constant 0 : i32
    %c0_i32_0 = arith.constant 0 : i32
    %c0_i32_1 = arith.constant 0 : i32
    return %c0_i32, %c0_i32_0 : i32, i32
  }
  func.func @transform_59(%arg0: i32) -> (i32, i32) {
    %c0_i32 = arith.constant 0 : i32
    %c0_i32_0 = arith.constant 0 : i32
    %c0_i32_1 = arith.constant 0 : i32
    return %c0_i32, %c0_i32_0 : i32, i32
  }
  func.func @transform_60(%arg0: i32) -> (i32, i32) {
    %c0_i32 = arith.constant 0 : i32
    %c0_i32_0 = arith.constant 0 : i32
    %c0_i32_1 = arith.constant 0 : i32
    return %c0_i32, %c0_i32_0 : i32, i32
  }
  func.func @transform_61(%arg0: i32) -> (i32, i32) {
    %c0_i32 = arith.constant 0 : i32
    %c0_i32_0 = arith.constant 0 : i32
    %c0_i32_1 = arith.constant 0 : i32
    return %c0_i32, %c0_i32_0 : i32, i32
  }
  func.func @transform_62(%arg0: i32) -> (i32, i32) {
    %c0_i32 = arith.constant 0 : i32
    %c0_i32_0 = arith.constant 0 : i32
    %c0_i32_1 = arith.constant 0 : i32
    return %c0_i32, %c0_i32_0 : i32, i32
  }
  func.func @transform_63(%arg0: i32) -> (i32, i32) {
    %c0_i32 = arith.constant 0 : i32
    %c0_i32_0 = arith.constant 0 : i32
    %c0_i32_1 = arith.constant 0 : i32
    return %c0_i32, %c0_i32_0 : i32, i32
  }
  func.func @transform_64(%arg0: i32) -> (i32, i32) {
    %c0_i32 = arith.constant 0 : i32
    %c0_i32_0 = arith.constant 0 : i32
    %c0_i32_1 = arith.constant 0 : i32
    return %c0_i32, %c0_i32_0 : i32, i32
  }
  func.func @transform_65(%arg0: i32) -> (i32, i32) {
    %c0_i32 = arith.constant 0 : i32
    %c0_i32_0 = arith.constant 0 : i32
    %c0_i32_1 = arith.constant 0 : i32
    return %c0_i32, %c0_i32_0 : i32, i32
  }
  func.func @transform_66(%arg0: i32) -> (i32, i32) {
    %c0_i32 = arith.constant 0 : i32
    %c0_i32_0 = arith.constant 0 : i32
    %c0_i32_1 = arith.constant 0 : i32
    return %c0_i32, %c0_i32_0 : i32, i32
  }
  func.func @transform_67(%arg0: i32) -> (i32, i32) {
    %c0_i32 = arith.constant 0 : i32
    %c0_i32_0 = arith.constant 0 : i32
    %c0_i32_1 = arith.constant 0 : i32
    return %c0_i32, %c0_i32_0 : i32, i32
  }
  func.func @transform_68(%arg0: i32) -> (i32, i32) {
    %c0_i32 = arith.constant 0 : i32
    %c0_i32_0 = arith.constant 0 : i32
    %c0_i32_1 = arith.constant 0 : i32
    return %c0_i32, %c0_i32_0 : i32, i32
  }
  func.func @transform_69(%arg0: i32) -> (i32, i32) {
    %c0_i32 = arith.constant 0 : i32
    %c0_i32_0 = arith.constant 0 : i32
    %c0_i32_1 = arith.constant 0 : i32
    return %c0_i32, %c0_i32_0 : i32, i32
  }
  func.func @transform_70(%arg0: i32) -> (i32, i32) {
    %c0_i32 = arith.constant 0 : i32
    %c0_i32_0 = arith.constant 0 : i32
    %c0_i32_1 = arith.constant 0 : i32
    return %c0_i32, %c0_i32_0 : i32, i32
  }
  func.func @transform_71(%arg0: i32) -> (i32, i32) {
    %c0_i32 = arith.constant 0 : i32
    %c0_i32_0 = arith.constant 0 : i32
    %c0_i32_1 = arith.constant 0 : i32
    return %c0_i32, %c0_i32_0 : i32, i32
  }
  func.func @transform_72(%arg0: i32) -> (i32, i32) {
    %c0_i32 = arith.constant 0 : i32
    %c0_i32_0 = arith.constant 0 : i32
    %c0_i32_1 = arith.constant 0 : i32
    return %c0_i32, %c0_i32_0 : i32, i32
  }
  func.func @transform_73(%arg0: i32) -> (i32, i32) {
    %c0_i32 = arith.constant 0 : i32
    %c0_i32_0 = arith.constant 0 : i32
    %c0_i32_1 = arith.constant 0 : i32
    return %c0_i32, %c0_i32_0 : i32, i32
  }
  func.func @transform_74(%arg0: i32) -> (i32, i32) {
    %c0_i32 = arith.constant 0 : i32
    %c0_i32_0 = arith.constant 0 : i32
    %c0_i32_1 = arith.constant 0 : i32
    return %c0_i32, %c0_i32_0 : i32, i32
  }
  func.func @transform_75(%arg0: i32) -> (i32, i32) {
    %c0_i32 = arith.constant 0 : i32
    %c0_i32_0 = arith.constant 0 : i32
    %c0_i32_1 = arith.constant 0 : i32
    return %c0_i32, %c0_i32_0 : i32, i32
  }
  func.func @transform_76(%arg0: i32) -> (i32, i32) {
    %c0_i32 = arith.constant 0 : i32
    %c0_i32_0 = arith.constant 0 : i32
    %c0_i32_1 = arith.constant 0 : i32
    return %c0_i32, %c0_i32_0 : i32, i32
  }
  func.func @transform_77(%arg0: i32) -> (i32, i32) {
    %c0_i32 = arith.constant 0 : i32
    %c0_i32_0 = arith.constant 0 : i32
    %c0_i32_1 = arith.constant 0 : i32
    return %c0_i32, %c0_i32_0 : i32, i32
  }
  func.func @transform_78(%arg0: i32) -> (i32, i32) {
    %c0_i32 = arith.constant 0 : i32
    %c0_i32_0 = arith.constant 0 : i32
    %c0_i32_1 = arith.constant 0 : i32
    return %c0_i32, %c0_i32_0 : i32, i32
  }
  func.func @transform_79(%arg0: i32) -> (i32, i32) {
    %c0_i32 = arith.constant 0 : i32
    %c0_i32_0 = arith.constant 0 : i32
    %c0_i32_1 = arith.constant 0 : i32
    return %c0_i32, %c0_i32_0 : i32, i32
  }
  func.func @transform_80(%arg0: i32) -> (i32, i32) {
    %c0_i32 = arith.constant 0 : i32
    %c0_i32_0 = arith.constant 0 : i32
    %c0_i32_1 = arith.constant 0 : i32
    return %c0_i32, %c0_i32_0 : i32, i32
  }
  func.func @transform_81(%arg0: i32) -> (i32, i32, i32) {
    %c0_i32 = arith.constant 0 : i32
    %c0_i32_0 = arith.constant 0 : i32
    %c0_i32_1 = arith.constant 0 : i32
    return %arg0, %c0_i32, %c0_i32_0 : i32, i32, i32
  }
  func.func @transform_82(%arg0: i32) -> (i32, i32, i32) {
    %c0_i32 = arith.constant 0 : i32
    %c0_i32_0 = arith.constant 0 : i32
    %c0_i32_1 = arith.constant 0 : i32
    return %arg0, %c0_i32, %c0_i32_0 : i32, i32, i32
  }
}

</mosaic_0001>

<bundles_post_ra>
// kernel: two_way_transformer_forward.1
= control target key start
LH: loop header
LB: loop body
LE: loop exit
PB: predicated region body
PF: predicated region fallthrough
CT: control target
= control target key end

     0   :  { %s14525_s6 = smov 1   ;;  %s14526_s10 = smov 2   ;;  %s17535_s0 = inlined_call_operand.smem [shape: u32[83], index: -1, kind: input, shape index: {}] }
   0x1   :  { %s14653_s5 = sld [smem:[%s17535_s0]]   ;;  %s14527_s14 = smov 3  }
   0x2   :  { %s14658_s9 = sld [smem:[%s17535_s0 + %s14525_s6]]   ;;  %s14528_s18 = smov 4  }
   0x3   :  { %s14663_s13 = sld [smem:[%s17535_s0 + %s14526_s10]]   ;;  %s14529_s22 = smov 5  }
   0x4   :  { %s14668_s17 = sld [smem:[%s17535_s0 + %s14527_s14]]   ;;  %s14530_s26 = smov 6  }
   0x5   :  { %s14673_s21 = sld [smem:[%s17535_s0 + %s14528_s18]]   ;;  %s14531_s30 = smov 7  }
   0x6   :  { %s14678_s25 = sld [smem:[%s17535_s0 + %s14529_s22]]   ;;  %s14532_s4 = smov 8  }
   0x7   :  { %17637 = sst [smem:[#allocation64_spill]] %s14653_s5  ;;  %s14533_s10 = smov 9  }
   0x8   :  { %17638 = sst [smem:[#allocation65_spill]] %s14658_s9  ;;  %s14534_s15 = smov 10  }
   0x9   :  { %17639 = sst [smem:[#allocation66_spill]] %s14663_s13  ;;  %s14535_s20 = smov 11  }
   0xa   :  { %17640 = sst [smem:[#allocation67_spill]] %s14668_s17  ;;  %s14537_s1 = smov 13  }
   0xb   :  { %17641 = sst [smem:[#allocation68_spill]] %s14673_s21  ;;  %s14538_s7 = smov 14  }
   0xc   :  { %17642 = sst [smem:[#allocation69_spill]] %s14678_s25  ;;  %s14540_s22 = smov 16  }
   0xd   :  { %s14683_s29 = sld [smem:[%s17535_s0 + %s14530_s26]]   ;;  %s14536_s26 = smov 12  }
   0xe   :  { %s14688_s3 = sld [smem:[%s17535_s0 + %s14531_s30]]   ;;  %s14541_s28 = smov 17  }
   0xf   :  { %s14693_s8 = sld [smem:[%s17535_s0 + %s14532_s4]]  }
  0x10   :  { %s14698_s14 = sld [smem:[%s17535_s0 + %s14533_s10]]  }
  0x11   :  { %s14703_s19 = sld [smem:[%s17535_s0 + %s14534_s15]]   ;;  %s14539_s15 = smov 15  }
  0x12   :  { %s14708_s24 = sld [smem:[%s17535_s0 + %s14535_s20]]  }
  0x13   :  { %17643 = sst [smem:[#allocation70_spill]] %s14683_s29 }
  0x14   :  { %17644 = sst [smem:[#allocation71_spill]] %s14688_s3 }
  0x15   :  { %17645 = sst [smem:[#allocation72_spill]] %s14693_s8 }
  0x16   :  { %17646 = sst [smem:[#allocation73_spill]] %s14698_s14 }
  0x17   :  { %17647 = sst [smem:[#allocation74_spill]] %s14703_s19 }
  0x18   :  { %17648 = sst [smem:[#allocation75_spill]] %s14708_s24 }
  0x19   :  { %s14713_s30 = sld [smem:[%s17535_s0 + %s14536_s26]]  }
  0x1a   :  { %s14718_s6 = sld [smem:[%s17535_s0 + %s14537_s1]]  }
  0x1b   :  { %s14723_s12 = sld [smem:[%s17535_s0 + %s14538_s7]]   ;;  %s14542_s7 = smov 18  }
  0x1c   :  { %s14728_s20 = sld [smem:[%s17535_s0 + %s14539_s15]]   ;;  %s14543_s15 = smov 19  }
  0x1d   :  { %s14733_s27 = sld [smem:[%s17535_s0 + %s14540_s22]]   ;;  %s14544_s22 = smov 20  }
  0x1e   :  { %s14738_s4 = sld [smem:[%s17535_s0 + %s14541_s28]]   ;;  %s14545_s28 = smov 21  }
  0x1f   :  { %17649 = sst [smem:[#allocation76_spill]] %s14713_s30 }
  0x20   :  { %17650 = sst [smem:[#allocation77_spill]] %s14718_s6 }
  0x21   :  { %17651 = sst [smem:[#allocation78_spill]] %s14723_s12 }
  0x22   :  { %17652 = sst [smem:[#allocation79_spill]] %s14728_s20 }
  0x23   :  { %17653 = sst [smem:[#allocation80_spill]] %s14733_s27 }
  0x24   :  { %17654 = sst [smem:[#allocation81_spill]] %s14738_s4 }
  0x25   :  { %s14743_s21 = sld [smem:[%s17535_s0 + %s14542_s7]]   ;;  %s14546_s7 = smov 22  }
  0x26   :  { %s14748_s8 = sld [smem:[%s17535_s0 + %s14543_s15]]   ;;  %s14547_s15 = smov 23  }
  0x27   :  { %s14753_s25 = sld [smem:[%s17535_s0 + %s14544_s22]]   ;;  %s14548_s22 = smov 24  }
  0x28   :  { %s14758_s17 = sld [smem:[%s17535_s0 + %s14545_s28]]   ;;  %s14549_s28 = smov 25  }
  0x29   :  { %s14763_s29 = sld [smem:[%s17535_s0 + %s14546_s7]]   ;;  %s14550_s7 = smov 26  }
  0x2a   :  { %s14768_s3 = sld [smem:[%s17535_s0 + %s14547_s15]]   ;;  %s14551_s15 = smov 27  }
  0x2b   :  { %17655 = sst [smem:[#allocation82_spill]] %s14743_s21 }
  0x2c   :  { %17656 = sst [smem:[#allocation83_spill]] %s14748_s8 }
  0x2d   :  { %17657 = sst [smem:[#allocation84_spill]] %s14753_s25 }
  0x2e   :  { %17658 = sst [smem:[#allocation85_spill]] %s14758_s17 }
  0x2f   :  { %17659 = sst [smem:[#allocation86_spill]] %s14763_s29 }
  0x30   :  { %17660 = sst [smem:[#allocation87_spill]] %s14768_s3 }
  0x31   :  { %s14773_s19 = sld [smem:[%s17535_s0 + %s14548_s22]]   ;;  %s14552_s22 = smov 28  }
  0x32   :  { %s14778_s14 = sld [smem:[%s17535_s0 + %s14549_s28]]   ;;  %s14553_s28 = smov 29  }
  0x33   :  { %s14783_s6 = sld [smem:[%s17535_s0 + %s14550_s7]]   ;;  %s14554_s7 = smov 30  }
  0x34   :  { %s14788_s27 = sld [smem:[%s17535_s0 + %s14551_s15]]   ;;  %s14555_s15 = smov 31  }
  0x35   :  { %s14793_s12 = sld [smem:[%s17535_s0 + %s14552_s22]]   ;;  %s14556_s22 = smov 32  }
  0x36   :  { %s14798_s30 = sld [smem:[%s17535_s0 + %s14553_s28]]   ;;  %s14557_s28 = smov 33  }
  0x37   :  { %17661 = sst [smem:[#allocation88_spill]] %s14773_s19 }
  0x38   :  { %17662 = sst [smem:[#allocation89_spill]] %s14778_s14 }
  0x39   :  { %17663 = sst [smem:[#allocation90_spill]] %s14783_s6 }
  0x3a   :  { %17664 = sst [smem:[#allocation91_spill]] %s14788_s27 }
  0x3b   :  { %17665 = sst [smem:[#allocation92_spill]] %s14793_s12 }
  0x3c   :  { %17666 = sst [smem:[#allocation93_spill]] %s14798_s30 }
  0x3d   :  { %s14803_s4 = sld [smem:[%s17535_s0 + %s14554_s7]]   ;;  %s14558_s7 = smov 34  }
  0x3e   :  { %s14808_s20 = sld [smem:[%s17535_s0 + %s14555_s15]]   ;;  %s14559_s15 = smov 35  }
  0x3f   :  { %s14813_s14 = sld [smem:[%s17535_s0 + %s14556_s22]]   ;;  %s14560_s22 = smov 36  }
  0x40   :  { %s14818_s19 = sld [smem:[%s17535_s0 + %s14557_s28]]   ;;  %s14561_s28 = smov 37  }
  0x43   :  { %17667 = sst [smem:[#allocation94_spill]] %s14803_s4 }
  0x44   :  { %17668 = sst [smem:[#allocation95_spill]] %s14808_s20 }
  0x45   :  { %17669 = sst [smem:[#allocation96_spill]] %s14813_s14 }
  0x46   :  { %17670 = sst [smem:[#allocation97_spill]] %s14818_s19 }
  0x47   :  { %s14823_s4 = sld [smem:[%s17535_s0 + %s14558_s7]]   ;;  %s14562_s7 = smov 38  }
  0x48   :  { %s14828_s20 = sld [smem:[%s17535_s0 + %s14559_s15]]   ;;  %s14563_s15 = smov 39  }
  0x49   :  { %s14833_s14 = sld [smem:[%s17535_s0 + %s14560_s22]]   ;;  %s14564_s22 = smov 40  }
  0x4a   :  { %s14838_s19 = sld [smem:[%s17535_s0 + %s14561_s28]]   ;;  %s14565_s28 = smov 41  }
  0x4b   :  { %s14843_s27 = sld [smem:[%s17535_s0 + %s14562_s7]]   ;;  %s14566_s7 = smov 42  }
  0x4c   :  { %s14848_s6 = sld [smem:[%s17535_s0 + %s14563_s15]]   ;;  %s14567_s15 = smov 43  }
  0x4d   :  { %17671 = sst [smem:[#allocation98_spill]] %s14823_s4 }
  0x4e   :  { %17672 = sst [smem:[#allocation99_spill]] %s14828_s20 }
  0x4f   :  { %17673 = sst [smem:[#allocation100_spill]] %s14833_s14 }
  0x50   :  { %17674 = sst [smem:[#allocation101_spill]] %s14838_s19 }
  0x51   :  { %17675 = sst [smem:[#allocation102_spill]] %s14843_s27 }
  0x52   :  { %17676 = sst [smem:[#allocation103_spill]] %s14848_s6 }
  0x53   :  { %s14853_s21 = sld [smem:[%s17535_s0 + %s14564_s22]]   ;;  %s14568_s22 = smov 44  }
  0x54   :  { %s14858_s17 = sld [smem:[%s17535_s0 + %s14565_s28]]   ;;  %s14569_s28 = smov 45  }
  0x55   :  { %s14863_s25 = sld [smem:[%s17535_s0 + %s14566_s7]]   ;;  %s14570_s7 = smov 46  }
  0x56   :  { %s14868_s8 = sld [smem:[%s17535_s0 + %s14567_s15]]   ;;  %s14571_s15 = smov 47  }
  0x57   :  { %s14873_s3 = sld [smem:[%s17535_s0 + %s14568_s22]]   ;;  %s14572_s22 = smov 48  }
  0x58   :  { %s14878_s12 = sld [smem:[%s17535_s0 + %s14569_s28]]   ;;  %s14573_s28 = smov 49  }
  0x59   :  { %17677 = sst [smem:[#allocation104_spill]] %s14853_s21 }
  0x5a   :  { %17678 = sst [smem:[#allocation105_spill]] %s14858_s17 }
  0x5b   :  { %17679 = sst [smem:[#allocation106_spill]] %s14863_s25 }
  0x5c   :  { %17680 = sst [smem:[#allocation107_spill]] %s14868_s8 }
  0x5d   :  { %17681 = sst [smem:[#allocation108_spill]] %s14873_s3 }
  0x5e   :  { %17682 = sst [smem:[#allocation109_spill]] %s14878_s12 }
  0x5f   :  { %s14883_s30 = sld [smem:[%s17535_s0 + %s14570_s7]]   ;;  %s14574_s7 = smov 50  }
  0x60   :  { %s14888_s24 = sld [smem:[%s17535_s0 + %s14571_s15]]   ;;  %s14575_s15 = smov 51  }
  0x61   :  { %s14893_s29 = sld [smem:[%s17535_s0 + %s14572_s22]]   ;;  %s14576_s22 = smov 52  }
  0x62   :  { %s14898_s9 = sld [smem:[%s17535_s0 + %s14573_s28]]   ;;  %s14577_s28 = smov 53  }
  0x63   :  { %s14903_s5 = sld [smem:[%s17535_s0 + %s14574_s7]]   ;;  %s14578_s7 = smov 54  }
  0x64   :  { %s14908_s3 = sld [smem:[%s17535_s0 + %s14575_s15]]   ;;  %s14579_s15 = smov 55  }
  0x65   :  { %s14913_s17 = sld [smem:[%s17535_s0 + %s14576_s22]]   ;;  %s14580_s22 = smov 56  }
  0x66   :  { %17683 = sst [smem:[#allocation110_spill]] %s14888_s24 }
  0x67   :  { %s14933_s8 = sld [smem:[%s17535_s0 + %s14580_s22]]   ;;  %s14584_s22 = smov 60  }
  0x68   :  { %17684 = sst [smem:[#allocation111_spill]] %s14898_s9 }
  0x69   :  { %17685 = sst [smem:[#allocation112_spill]] %s14903_s5 }
  0x6a   :  { %17686 = sst [smem:[#allocation113_spill]] %s14908_s3 }
  0x6b   :  { %17687 = sst [smem:[#allocation114_spill]] %s14913_s17 }
  0x6c   :  { %s14918_s9 = sld [smem:[%s17535_s0 + %s14577_s28]]   ;;  %s14581_s28 = smov 57  }
  0x6d   :  { %s14923_s5 = sld [smem:[%s17535_s0 + %s14578_s7]]   ;;  %s14582_s7 = smov 58  }
  0x6e   :  { %s14928_s3 = sld [smem:[%s17535_s0 + %s14579_s15]]   ;;  %s14583_s15 = smov 59  }
  0x6f   :  { %17691 = sst [smem:[#allocation118_spill]] %s14933_s8 }
  0x70   :  { %s14938_s25 = sld [smem:[%s17535_s0 + %s14581_s28]]   ;;  %s14585_s28 = smov 61  }
  0x71   :  { %s14943_s21 = sld [smem:[%s17535_s0 + %s14582_s7]]   ;;  %s14586_s7 = smov 62  }
  0x72   :  { %17688 = sst [smem:[#allocation115_spill]] %s14918_s9 }
  0x73   :  { %17689 = sst [smem:[#allocation116_spill]] %s14923_s5 }
  0x74   :  { %17690 = sst [smem:[#allocation117_spill]] %s14928_s3 }
  0x75   :  { %s14948_s3 = sld [smem:[%s17535_s0 + %s14583_s15]]   ;;  %s14587_s15 = smov 63  }
  0x76   :  { %17692 = sst [smem:[#allocation119_spill]] %s14938_s25 }
  0x77   :  { %s14953_s8 = sld [smem:[%s17535_s0 + %s14584_s22]]   ;;  %s14588_s22 = smov 64  }
  0x78   :  { %s14958_s25 = sld [smem:[%s17535_s0 + %s14585_s28]]   ;;  %s14589_s28 = smov 65  }
  0x79   :  { %s14963_s13 = sld [smem:[%s17535_s0 + %s14586_s7]]   ;;  %s14590_s7 = smov 66  }
  0x7a   :  { %s14983_s5 = sld [smem:[%s17535_s0 + %s14590_s7]]   ;;  %s14594_s7 = smov 70  }
  0x7b   :  { %17693 = sst [smem:[#allocation120_spill]] %s14948_s3 }
  0x7c   :  { %s14968_s3 = sld [smem:[%s17535_s0 + %s14587_s15]]   ;;  %s14591_s15 = smov 67  }
  0x7d   :  { %17694 = sst [smem:[#allocation121_spill]] %s14953_s8 }
  0x7e   :  { %17695 = sst [smem:[#allocation122_spill]] %s14958_s25 }
  0x7f   :  { %s14973_s8 = sld [smem:[%s17535_s0 + %s14588_s22]]   ;;  %s14592_s22 = smov 68  }
  0x80   :  { %s14978_s25 = sld [smem:[%s17535_s0 + %s14589_s28]]   ;;  %s14593_s28 = smov 69  }
  0x81   :  { %17699 = sst [smem:[#allocation126_spill]] %s14983_s5 }
  0x82   :  { %17696 = sst [smem:[#allocation123_spill]] %s14968_s3 }
  0x83   :  { %s14988_s3 = sld [smem:[%s17535_s0 + %s14591_s15]]   ;;  %s14595_s15 = smov 71  }
  0x84   :  { %s14993_s17 = sld [smem:[%s17535_s0 + %s14592_s22]]   ;;  %s14596_s22 = smov 72  }
  0x85   :  { %17697 = sst [smem:[#allocation124_spill]] %s14973_s8 }
  0x86   :  { %17698 = sst [smem:[#allocation125_spill]] %s14978_s25 }
  0x87   :  { %s14998_s25 = sld [smem:[%s17535_s0 + %s14593_s28]]   ;;  %s14597_s28 = smov 73  }
  0x88   :  { %s15003_s24 = sld [smem:[%s17535_s0 + %s14594_s7]]   ;;  %s14598_s7 = smov 74  }
  0x89   :  { %17700 = sst [smem:[#allocation127_spill]] %s14988_s3 }
  0x8a   :  { %s15008_s3 = sld [smem:[%s17535_s0 + %s14595_s15]]   ;;  %s14599_s15 = smov 75  }
  0x8b   :  { %s15013_s12 = sld [smem:[%s17535_s0 + %s14596_s22]]   ;;  %s14600_s22 = smov 76  }
  0x8c   :  { %s15023_s27 = sld [smem:[%s17535_s0 + %s14598_s7]]   ;;  %s14602_s7 = smov 78  }
  0x8d   :  { %17701 = sst [smem:[#allocation128_spill]] %s14998_s25 }
  0x8e   :  { %s15018_s25 = sld [smem:[%s17535_s0 + %s14597_s28]]   ;;  %s14601_s28 = smov 77  }
  0x8f   :  { %s15033_s14 = sld [smem:[%s17535_s0 + %s14600_s22]]   ;;  %s14604_s22 = smov 80  }
  0x90   :  { %17702 = sst [smem:[#allocation129_spill]] %s15008_s3 }
  0x91   :  { %s15028_s3 = sld [smem:[%s17535_s0 + %s14599_s15]]   ;;  %s14603_s15 = smov 79  }
  0x92   :  { %17704 = sst [smem:[#allocation131_spill]] %s15023_s27 }
  0x93   :  { %s15043_s27 = sld [smem:[%s17535_s0 + %s14602_s7]]   ;;  %s14606_s7 = smov 82  }
  0x94   :  { %17703 = sst [smem:[#allocation130_spill]] %s15018_s25 }
  0x95   :  { %17706 = sst [smem:[#allocation133_spill]] %s15033_s14 }
  0x96   :  { %s15038_s25 = sld [smem:[%s17535_s0 + %s14601_s28]]   ;;  %s14605_s28 = smov 81  }
  0x97   :  { %17705 = sst [smem:[#allocation132_spill]] %s15028_s3 }
  0x98   :  { %s15048_s3 = sld [smem:[%s17535_s0 + %s14603_s15]]  }
  0x99   :  { %17708 = sst [smem:[#allocation135_spill]] %s15043_s27 }
  0x9a   :  { %s15053_s14 = sld [smem:[%s17535_s0 + %s14604_s22]]  }
  0x9b   :  { %s15063_s27 = sld [smem:[%s17535_s0 + %s14606_s7]]  }
  0x9c   :  { %17707 = sst [smem:[#allocation134_spill]] %s15038_s25 }
  0x9d   :  { %s15058_s25 = sld [smem:[%s17535_s0 + %s14605_s28]]  }
  0x9e   :  { %17709 = sst [smem:[#allocation136_spill]] %s15048_s3 }
  0x9f   :  { %171 = vsyncpa [#allocation3], 0 }
  0xa0   :  { %172 = vsyncpa [#allocation6], 0 }
  0xa1   :  { %173 = vsyncpa [#allocation9], 0 }
  0xa2   :  { %174 = vsyncpa [#allocation12], 0 }
  0xa3   :  { %175 = vsyncpa [#allocation15], 0 }
  0xa4   :  { %176 = vsyncpa [#allocation18], 0 }
  0xa5   :  { %177 = vsyncpa [#allocation21], 0 }
  0xa6   :  { %178 = vsyncpa [#allocation24], 0 }
  0xa7   :  { %179 = vsyncpa [#allocation27], 0 }
  0xa8   :  { %180 = vsyncpa [#allocation30], 0 }
  0xa9   :  { %181 = vsyncpa [#allocation33], 0 }
  0xaa   :  { %182 = vsyncpa [#allocation36], 0 }
  0xab   :  { %183 = vsyncpa [#allocation39], 0 }
  0xac   :  { %184 = vsyncpa [#allocation42], 0 }
  0xad   :  { %185 = vsyncpa [#allocation45], 0 }
  0xae   :  { %186 = vsyncpa [#allocation4], 0 }
  0xaf   :  { %188 = vsyncpa [#allocation4 + $0x1], 0  ;;  %s15065_s15 = smov 0   ;;  %s15067_s0 = smov 0  }
  0xb0   :  { %s15069_s16 = smov 0   ;;  %s15071_s18 = smov 0  }
  0xb1 LB: > { %s17710_s9 = sld [smem:[#allocation115_spill]]  ;;  %s17711_s8 = sld [smem:[#allocation124_spill]]  ;;  %s14523_s18 = sphi %s15071_s18, %s17863_s18   ;;  %s14519_s16 = sphi %s15069_s16, %s17865_s16   ;;  %s14515_s0 = sphi %s15067_s0, %s17867_s0   ;;  %s14511_s15 = sphi %s15065_s15, %s17866_s15  }
  0xb2   : > { %s17712_s6 = sld [smem:[#allocation103_spill]]  ;;  %s17713_s5 = sld [smem:[#allocation126_spill]] }
  0xb3   : > { %s17714_s4 = sld [smem:[#allocation98_spill]]  ;;  %s17715_s3 = sld [smem:[#allocation136_spill]] }
  0xb4   : > { %s17716_s20 = sld [smem:[#allocation99_spill]]  ;;  %s17717_s19 = sld [smem:[#allocation101_spill]] }
  0xb5   : > { %17718 = sst [smem:[#allocation137_spill]] %s14511_s15  ;;  %s15086_s22 = sadd.s32 4294967295, %s14523_s18  }
  0xb6   : > { %17719 = sst [smem:[#allocation138_spill]] %s14519_s16  ;;  %s11827_s23 = sadd.s32 4294967294, %s14523_s18  }
  0xb7   : > { %s15090_s26 = sadd.s32 1, %s14523_s18   ;;  %s1917_s28 = sadd.s32 1, %s14519_s16 }
  0xb8   : > { %17720 = sst [smem:[#allocation139_spill]] %s15090_s26  ;;  %s1914_s1 = ssub.s32 %s14523_s18, %s15090_s26 }
  0xb9   : > { %p1927_p0 = scmp.ne.s32.totalorder %s14519_s16, %s14515_s0  ;;  %p1915_p1 = scmp.eq.s32.totalorder %s1914_s1, 0 }
  0xba   : > { %p1928_p2 = scmp.eq.s32.totalorder %s15086_s22, 1  ;;  %p1933_p3 = scmp.ne.s32.totalorder %s14515_s0, %s14511_s15 }
  0xbb   : > { %p1934_p4 = scmp.eq.s32.totalorder %s11827_s23, 1  ;;  %p11828_p7 = scmp.ge.s32.totalorder %s14523_s18, 1 }
  0xbc   : > { %s15101_s2 = scalar_select %p1915_p1, %s14519_s16, %s1917_s28  }
  0xbd   : > { %p15103_p5 = por %p1928_p2, %p1927_p0  ;;  %p15107_p6 = por %p1934_p4, %p1933_p3 }
  0xbe   : > { %17721 = sst [smem:[#allocation140_spill]] %s15101_s2  ;;  %p1967_p8 = scmp.lt.s32.totalorder %s14523_s18, 3 }
  0xbf   : > { %s17722_s7 = scalar_select %p15103_p5, 1, 0 }
  0xc0   : > { %s17723_s10 = scalar_select %p15107_p6, 1, 0 }
  0xc1   : > { %p17579_p9 = scmp.eq.s32.totalorder %s15086_s22, 0  ;;  %p15114_p10 = pnand %p11828_p7, %p1967_p8 }
  0xc2   : > { %17724 = sst [smem:[#allocation141_spill]] %s17723_s10  ;;  %s14607_s23 = smov [#allocation5]  }
  0xc3   : > { %s17725_s11 = scalar_select %p15114_p10, 1, 0 }
  0xc4   : > { %s2084_s28 = sshll.u32 %s14607_s23, 4  ;;  %p12963_p11 = pneg %p15114_p10  ;;  %s2085_s28 = int_to_ptr.vmem [resolvable:$true] %s2084_s28 }
  0xc5   : > { %s14608_s1 = smov [#allocation8]   ;;  %s14609_s26 = smov [#allocation11]  }
  0xc6   : > { %s2106_s2 = sshll.u32 %s14608_s1, 4  ;;  %p15122_p12 = pnand %p17579_p9, %p12963_p11  ;;  %s15126_s2 = int_to_ptr.vmem [resolvable:$true] %s2106_s2 }
  0xc7   : > { %s2128_s10 = sshll.u32 %s14609_s26, 4  ;;  %s13589_s15 = scalar_lea.hbm %s17716_s20, 16  ;;  %s15128_s10 = int_to_ptr.vmem [resolvable:$true] %s2128_s10 }
  0xc8   : > { %p13590_p13 = scmp.ne.s32.totalorder %s17716_s20, %s13589_s15  ;;  %p15134_p0 = pneg %p15122_p12 }
  0xc9   : > { %p13596_p3 = scmp.lt.u32.totalorder %s13589_s15, %s17716_s20 }
  0xca   : > { %p13592_p1 = pnand %p15134_p0, %p13590_p13 }
  0xcc   : > { %p13593_p2 = pneg %p13592_p1 }
  0xce   : > { %p13598_p4 = pnand %p13596_p3, %p13593_p2 }
  0xd0   : > { %13601 = shalt.err (!%p13598_p4)
}
  0xd1   : > { %s13602_s1 = scalar_lea.vmem %s2085_s28, 16  ;;  %s13609_s26 = scalar_lea.vmem %s2085_s28, 32 }
  0xd2   : > { %p13603_p7 = scmp.ne.s32.totalorder %s2085_s28, %s13602_s1  ;;  %p13610_p9 = scmp.lt.s32.totalorder %s2085_s28, %s2085_s28 }
  0xd3   : > { %p13611_p6 = scmp.lt.s32.totalorder %s13609_s26, %s13602_s1 }
  0xd4   : > { %p13605_p8 = pnand %p13603_p7, %p15134_p0 }
  0xd5   : > { %p13612_p5 = por %p13611_p6, %p13610_p9 }
  0xd6   : > { %p13606_p11 = pneg %p13605_p8 }
  0xd8   : > { %p13613_p10 = pnand %p13612_p5, %p13606_p11 }
  0xda   : > { %13616 = shalt.err (!%p13613_p10)
}
  0xdb   : > { %12969 = dma.hbm_to_vmem [thread:$0]  (!%p15122_p12), %s17716_s20, 16, %s2085_s28, [#allocation6]  }
  0xdc   : > { %s13617_s15 = scalar_lea.hbm %s17717_s19, 16 }
  0xdd   : > { %p13618_p13 = scmp.ne.s32.totalorder %s17717_s19, %s13617_s15  ;;  %p13624_p3 = scmp.lt.u32.totalorder %s13617_s15, %s17717_s19 }
  0xdf   : > { %p13620_p1 = pnand %p13618_p13, %p15134_p0 }
  0xe1   : > { %p13621_p2 = pneg %p13620_p1 }
  0xe3   : > { %p13626_p4 = pnand %p13624_p3, %p13621_p2 }
  0xe5   : > { %13629 = shalt.err (!%p13626_p4)
}
  0xe6   : > { %s13630_s1 = scalar_lea.vmem %s15126_s2, 16  ;;  %s13637_s26 = scalar_lea.vmem %s15126_s2, 32 }
  0xe7   : > { %p13631_p5 = scmp.ne.s32.totalorder %s15126_s2, %s13630_s1  ;;  %p13638_p10 = scmp.lt.s32.totalorder %s15126_s2, %s15126_s2 }
  0xe8   : > { %p13639_p7 = scmp.lt.s32.totalorder %s13637_s26, %s13630_s1 }
  0xe9   : > { %p13633_p6 = pnand %p13631_p5, %p15134_p0 }
  0xea   : > { %p13640_p8 = por %p13639_p7, %p13638_p10 }
  0xeb   : > { %p13634_p9 = pneg %p13633_p6 }
  0xed   : > { %p13641_p11 = pnand %p13640_p8, %p13634_p9 }
  0xef   : > { %13644 = shalt.err (!%p13641_p11)
}
  0xf0   : > { %12975 = dma.hbm_to_vmem [thread:$0]  (!%p15122_p12), %s17717_s19, 16, %s15126_s2, [#allocation9]  }
  0xf1   : > { %s13645_s28 = scalar_lea.hbm %s17712_s6, 16 }
  0xf2   : > { %p13646_p13 = scmp.ne.s32.totalorder %s17712_s6, %s13645_s28  ;;  %p13652_p3 = scmp.lt.u32.totalorder %s13645_s28, %s17712_s6 }
  0xf4   : > { %p13648_p1 = pnand %p13646_p13, %p15134_p0 }
  0xf6   : > { %p13649_p2 = pneg %p13648_p1 }
  0xf8   : > { %p13654_p4 = pnand %p13652_p3, %p13649_p2 }
  0xfa   : > { %13657 = shalt.err (!%p13654_p4)
}
  0xfb   : > { %s13658_s15 = scalar_lea.vmem %s15128_s10, 16  ;;  %s13665_s1 = scalar_lea.vmem %s15128_s10, 32 }
  0xfc   : > { %p13659_p5 = scmp.ne.s32.totalorder %s15128_s10, %s13658_s15  ;;  %p13666_p10 = scmp.lt.s32.totalorder %s15128_s10, %s15128_s10 }
  0xfd   : > { %p13667_p7 = scmp.lt.s32.totalorder %s13665_s1, %s13658_s15 }
  0xfe   : > { %p13661_p6 = pnand %p13659_p5, %p15134_p0 }
  0xff   : > { %p13668_p8 = por %p13667_p7, %p13666_p10 }
 0x100   : > { %p13662_p9 = pneg %p13661_p6 }
 0x102   : > { %p13669_p11 = pnand %p13668_p8, %p13662_p9 }
 0x104   : > { %13672 = shalt.err (!%p13669_p11)
}
 0x105   : > { %12981 = dma.hbm_to_vmem [thread:$0]  (!%p15122_p12), %s17712_s6, 16, %s15128_s10, [#allocation12]  }
 0x106   : > { %s14610_s2 = smov [#allocation14]   ;;  %s14611_s28 = smov [#allocation17]  }
 0x107   : > { %s2165_s26 = sshll.u32 %s14610_s2, 4  ;;  %s2187_s19 = sshll.u32 %s14611_s28, 4  ;;  %s2166_s26 = int_to_ptr.vmem [resolvable:$true] %s2165_s26  ;;  %s2188_s19 = int_to_ptr.vmem [resolvable:$true] %s2187_s19 }
 0x108   : > { %s13673_s20 = scalar_lea.hbm %s14883_s30, 16 }
 0x109   : > { %p13674_p13 = scmp.ne.s32.totalorder %s14883_s30, %s13673_s20  ;;  %p13680_p3 = scmp.lt.u32.totalorder %s13673_s20, %s14883_s30 }
 0x10b   : > { %p13676_p1 = pnand %p13674_p13, %p15134_p0 }
 0x10d   : > { %p13677_p2 = pneg %p13676_p1 }
 0x10f   : > { %p13682_p4 = pnand %p13680_p3, %p13677_p2 }
 0x111   : > { %13685 = shalt.err (!%p13682_p4)
}
 0x112   : > { %s13686_s15 = scalar_lea.vmem %s2166_s26, 16  ;;  %s13693_s10 = scalar_lea.vmem %s2166_s26, 32 }
 0x113   : > { %p13687_p5 = scmp.ne.s32.totalorder %s2166_s26, %s13686_s15  ;;  %p13694_p10 = scmp.lt.s32.totalorder %s2166_s26, %s2166_s26 }
 0x114   : > { %p13695_p7 = scmp.lt.s32.totalorder %s13693_s10, %s13686_s15 }
 0x115   : > { %p13689_p6 = pnand %p13687_p5, %p15134_p0 }
 0x116   : > { %p13696_p8 = por %p13695_p7, %p13694_p10 }
 0x117   : > { %p13690_p9 = pneg %p13689_p6 }
 0x119   : > { %p13697_p11 = pnand %p13696_p8, %p13690_p9 }
 0x11b   : > { %13700 = shalt.err (!%p13697_p11)
}
 0x11c   : > { %12987 = dma.hbm_to_vmem [thread:$0]  (!%p15122_p12), %s14883_s30, 16, %s2166_s26, [#allocation15]  }
 0x11d   : > { %s13701_s20 = scalar_lea.hbm %s14893_s29, 16 }
 0x11e   : > { %p13702_p13 = scmp.ne.s32.totalorder %s14893_s29, %s13701_s20  ;;  %p13708_p3 = scmp.lt.u32.totalorder %s13701_s20, %s14893_s29 }
 0x120   : > { %p13704_p1 = pnand %p13702_p13, %p15134_p0 }
 0x122   : > { %p13705_p2 = pneg %p13704_p1 }
 0x124   : > { %p13710_p4 = pnand %p13708_p3, %p13705_p2 }
 0x126   : > { %13713 = shalt.err (!%p13710_p4)
}
 0x127   : > { %s13714_s1 = scalar_lea.vmem %s2188_s19, 16  ;;  %s13721_s2 = scalar_lea.vmem %s2188_s19, 32 }
 0x128   : > { %p13715_p5 = scmp.ne.s32.totalorder %s2188_s19, %s13714_s1  ;;  %p13722_p10 = scmp.lt.s32.totalorder %s2188_s19, %s2188_s19 }
 0x129   : > { %p13723_p7 = scmp.lt.s32.totalorder %s13721_s2, %s13714_s1 }
 0x12a   : > { %p13717_p6 = pnand %p13715_p5, %p15134_p0 }
 0x12b   : > { %p13724_p8 = por %p13723_p7, %p13722_p10 }
 0x12c   : > { %p13718_p9 = pneg %p13717_p6 }
 0x12e   : > { %p13725_p11 = pnand %p13724_p8, %p13718_p9 }
 0x130   : > { %13728 = shalt.err (!%p13725_p11)
}
 0x131   : > { %12993 = dma.hbm_to_vmem [thread:$0]  (!%p15122_p12), %s14893_s29, 16, %s2188_s19, [#allocation18]  }
 0x132   : > { %s14612_s26 = smov [#allocation20]   ;;  %s14613_s15 = smov [#allocation23]  }
 0x133   : > { %s2218_s28 = sshll.u32 %s14612_s26, 4  ;;  %s2249_s10 = sshll.u32 %s14613_s15, 4  ;;  %s2219_s28 = int_to_ptr.vmem [resolvable:$true] %s2218_s28  ;;  %s2250_s10 = int_to_ptr.vmem [resolvable:$true] %s2249_s10 }
 0x134   : > { %s13729_s20 = scalar_lea.hbm %s17710_s9, 16 }
 0x135   : > { %p13730_p13 = scmp.ne.s32.totalorder %s17710_s9, %s13729_s20  ;;  %p13736_p3 = scmp.lt.u32.totalorder %s13729_s20, %s17710_s9 }
 0x137   : > { %p13732_p1 = pnand %p13730_p13, %p15134_p0 }
 0x139   : > { %p13733_p2 = pneg %p13732_p1 }
 0x13b   : > { %p13738_p4 = pnand %p13736_p3, %p13733_p2 }
 0x13d   : > { %13741 = shalt.err (!%p13738_p4)
}
 0x13e   : > { %s13742_s1 = scalar_lea.vmem %s2219_s28, 16  ;;  %s13749_s19 = scalar_lea.vmem %s2219_s28, 32 }
 0x13f   : > { %p13743_p5 = scmp.ne.s32.totalorder %s2219_s28, %s13742_s1  ;;  %p13750_p10 = scmp.lt.s32.totalorder %s2219_s28, %s2219_s28 }
 0x140   : > { %p13751_p7 = scmp.lt.s32.totalorder %s13749_s19, %s13742_s1 }
 0x141   : > { %p13745_p6 = pnand %p13743_p5, %p15134_p0 }
 0x142   : > { %p13752_p8 = por %p13751_p7, %p13750_p10 }
 0x143   : > { %p13746_p9 = pneg %p13745_p6 }
 0x145   : > { %p13753_p11 = pnand %p13752_p8, %p13746_p9 }
 0x147   : > { %13756 = shalt.err (!%p13753_p11)
}
 0x148   : > { %12999 = dma.hbm_to_vmem [thread:$0]  (!%p15122_p12), %s17710_s9, 16, %s2219_s28, [#allocation21]  }
 0x149   : > { %s13757_s2 = scalar_lea.hbm %s14943_s21, 16 }
 0x14a   : > { %p13758_p13 = scmp.ne.s32.totalorder %s14943_s21, %s13757_s2  ;;  %p13764_p3 = scmp.lt.u32.totalorder %s13757_s2, %s14943_s21 }
 0x14c   : > { %p13760_p1 = pnand %p13758_p13, %p15134_p0 }
 0x14e   : > { %p13761_p2 = pneg %p13760_p1 }
 0x150   : > { %p13766_p4 = pnand %p13764_p3, %p13761_p2 }
 0x152   : > { %13769 = shalt.err (!%p13766_p4)
}
 0x153   : > { %s13770_s26 = scalar_lea.vmem %s2250_s10, 16  ;;  %s13777_s15 = scalar_lea.vmem %s2250_s10, 32 }
 0x154   : > { %p13771_p5 = scmp.ne.s32.totalorder %s2250_s10, %s13770_s26  ;;  %p13778_p10 = scmp.lt.s32.totalorder %s2250_s10, %s2250_s10 }
 0x155   : > { %p13779_p7 = scmp.lt.s32.totalorder %s13777_s15, %s13770_s26 }
 0x156   : > { %p13773_p6 = pnand %p13771_p5, %p15134_p0 }
 0x157   : > { %p13780_p8 = por %p13779_p7, %p13778_p10 }
 0x158   : > { %p13774_p9 = pneg %p13773_p6 }
 0x15a   : > { %p13781_p11 = pnand %p13780_p8, %p13774_p9 }
 0x15c   : > { %13784 = shalt.err (!%p13781_p11)
}
 0x15d   : > { %13005 = dma.hbm_to_vmem [thread:$0]  (!%p15122_p12), %s14943_s21, 16, %s2250_s10, [#allocation24]  }
 0x15e   : > { %s14614_s28 = smov [#allocation26]   ;;  %s14615_s1 = smov [#allocation29]  }
 0x15f   : > { %s2277_s20 = sshll.u32 %s14614_s28, 4  ;;  %s2299_s19 = sshll.u32 %s14615_s1, 4  ;;  %s2278_s20 = int_to_ptr.vmem [resolvable:$true] %s2277_s20  ;;  %s2300_s19 = int_to_ptr.vmem [resolvable:$true] %s2299_s19 }
 0x160   : > { %s13785_s2 = scalar_lea.hbm %s14963_s13, 16 }
 0x161   : > { %p13786_p13 = scmp.ne.s32.totalorder %s14963_s13, %s13785_s2  ;;  %p13792_p3 = scmp.lt.u32.totalorder %s13785_s2, %s14963_s13 }
 0x163   : > { %p13788_p1 = pnand %p13786_p13, %p15134_p0 }
 0x165   : > { %p13789_p2 = pneg %p13788_p1 }
 0x167   : > { %p13794_p4 = pnand %p13792_p3, %p13789_p2 }
 0x169   : > { %13797 = shalt.err (!%p13794_p4)
}
 0x16a   : > { %s13798_s26 = scalar_lea.vmem %s2278_s20, 16  ;;  %s13805_s10 = scalar_lea.vmem %s2278_s20, 32 }
 0x16b   : > { %p13799_p5 = scmp.ne.s32.totalorder %s2278_s20, %s13798_s26  ;;  %p13806_p10 = scmp.lt.s32.totalorder %s2278_s20, %s2278_s20 }
 0x16c   : > { %p13807_p7 = scmp.lt.s32.totalorder %s13805_s10, %s13798_s26 }
 0x16d   : > { %p13801_p6 = pnand %p13799_p5, %p15134_p0 }
 0x16e   : > { %p13808_p8 = por %p13807_p7, %p13806_p10 }
 0x16f   : > { %p13802_p9 = pneg %p13801_p6 }
 0x171   : > { %p13809_p11 = pnand %p13808_p8, %p13802_p9 }
 0x173   : > { %13812 = shalt.err (!%p13809_p11)
}
 0x174   : > { %13011 = dma.hbm_to_vmem [thread:$0]  (!%p15122_p12), %s14963_s13, 16, %s2278_s20, [#allocation27]  }
 0x175   : > { %s13813_s15 = scalar_lea.hbm %s17711_s8, 16 }
 0x176   : > { %p13814_p13 = scmp.ne.s32.totalorder %s17711_s8, %s13813_s15  ;;  %p13820_p3 = scmp.lt.u32.totalorder %s13813_s15, %s17711_s8 }
 0x178   : > { %p13816_p1 = pnand %p13814_p13, %p15134_p0 }
 0x17a   : > { %p13817_p2 = pneg %p13816_p1 }
 0x17c   : > { %p13822_p4 = pnand %p13820_p3, %p13817_p2 }
 0x17e   : > { %13825 = shalt.err (!%p13822_p4)
}
 0x17f   : > { %s13826_s28 = scalar_lea.vmem %s2300_s19, 16  ;;  %s13833_s1 = scalar_lea.vmem %s2300_s19, 32 }
 0x180   : > { %p13827_p5 = scmp.ne.s32.totalorder %s2300_s19, %s13826_s28  ;;  %p13834_p10 = scmp.lt.s32.totalorder %s2300_s19, %s2300_s19 }
 0x181   : > { %p13835_p7 = scmp.lt.s32.totalorder %s13833_s1, %s13826_s28 }
 0x182   : > { %p13829_p6 = pnand %p13827_p5, %p15134_p0 }
 0x183   : > { %p13836_p8 = por %p13835_p7, %p13834_p10 }
 0x184   : > { %p13830_p9 = pneg %p13829_p6 }
 0x186   : > { %p13837_p11 = pnand %p13836_p8, %p13830_p9 }
 0x188   : > { %13840 = shalt.err (!%p13837_p11)
}
 0x189   : > { %13017 = dma.hbm_to_vmem [thread:$0]  (!%p15122_p12), %s17711_s8, 16, %s2300_s19, [#allocation30]  }
 0x18a   : > { %s14616_s20 = smov [#allocation32]   ;;  %s14617_s26 = smov [#allocation35]  }
 0x18b   : > { %s2321_s2 = sshll.u32 %s14616_s20, 4  ;;  %s2343_s10 = sshll.u32 %s14617_s26, 4  ;;  %s2322_s2 = int_to_ptr.vmem [resolvable:$true] %s2321_s2  ;;  %s2344_s10 = int_to_ptr.vmem [resolvable:$true] %s2343_s10 }
 0x18c   : > { %s13841_s15 = scalar_lea.hbm %s17713_s5, 16 }
 0x18d   : > { %p13842_p13 = scmp.ne.s32.totalorder %s17713_s5, %s13841_s15  ;;  %p13848_p3 = scmp.lt.u32.totalorder %s13841_s15, %s17713_s5 }
 0x18f   : > { %p13844_p1 = pnand %p13842_p13, %p15134_p0 }
 0x191   : > { %p13845_p2 = pneg %p13844_p1 }
 0x193   : > { %p13850_p4 = pnand %p13848_p3, %p13845_p2 }
 0x195   : > { %13853 = shalt.err (!%p13850_p4)
}
 0x196   : > { %s13854_s28 = scalar_lea.vmem %s2322_s2, 16  ;;  %s13861_s19 = scalar_lea.vmem %s2322_s2, 32 }
 0x197   : > { %p13855_p5 = scmp.ne.s32.totalorder %s2322_s2, %s13854_s28  ;;  %p13862_p10 = scmp.lt.s32.totalorder %s2322_s2, %s2322_s2 }
 0x198   : > { %p13863_p7 = scmp.lt.s32.totalorder %s13861_s19, %s13854_s28 }
 0x199   : > { %p13857_p6 = pnand %p13855_p5, %p15134_p0 }
 0x19a   : > { %p13864_p8 = por %p13863_p7, %p13862_p10 }
 0x19b   : > { %p13858_p9 = pneg %p13857_p6 }
 0x19d   : > { %p13865_p11 = pnand %p13864_p8, %p13858_p9 }
 0x19f   : > { %13868 = shalt.err (!%p13865_p11)
}
 0x1a0   : > { %13023 = dma.hbm_to_vmem [thread:$0]  (!%p15122_p12), %s17713_s5, 16, %s2322_s2, [#allocation33]  }
 0x1a1   : > { %s13869_s1 = scalar_lea.hbm %s14993_s17, 16 }
 0x1a2   : > { %p13870_p13 = scmp.ne.s32.totalorder %s14993_s17, %s13869_s1  ;;  %p13876_p3 = scmp.lt.u32.totalorder %s13869_s1, %s14993_s17 }
 0x1a4   : > { %p13872_p1 = pnand %p13870_p13, %p15134_p0 }
 0x1a6   : > { %p13873_p2 = pneg %p13872_p1 }
 0x1a8   : > { %p13878_p4 = pnand %p13876_p3, %p13873_p2 }
 0x1aa   : > { %13881 = shalt.err (!%p13878_p4)
}
 0x1ab   : > { %s13882_s20 = scalar_lea.vmem %s2344_s10, 16  ;;  %s13889_s26 = scalar_lea.vmem %s2344_s10, 32 }
 0x1ac   : > { %p13883_p5 = scmp.ne.s32.totalorder %s2344_s10, %s13882_s20  ;;  %p13890_p10 = scmp.lt.s32.totalorder %s2344_s10, %s2344_s10 }
 0x1ad   : > { %p13891_p7 = scmp.lt.s32.totalorder %s13889_s26, %s13882_s20 }
 0x1ae   : > { %p13885_p6 = pnand %p13883_p5, %p15134_p0 }
 0x1af   : > { %p13892_p8 = por %p13891_p7, %p13890_p10 }
 0x1b0   : > { %p13886_p9 = pneg %p13885_p6 }
 0x1b2   : > { %p13893_p11 = pnand %p13892_p8, %p13886_p9 }
 0x1b4   : > { %13896 = shalt.err (!%p13893_p11)
}
 0x1b5   : > { %13029 = dma.hbm_to_vmem [thread:$0]  (!%p15122_p12), %s14993_s17, 16, %s2344_s10, [#allocation36]  }
 0x1b6   : > { %s14618_s2 = smov [#allocation38]   ;;  %s14619_s28 = smov [#allocation41]  }
 0x1b7   : > { %s2365_s15 = sshll.u32 %s14618_s2, 4  ;;  %s2387_s19 = sshll.u32 %s14619_s28, 4  ;;  %s2366_s15 = int_to_ptr.vmem [resolvable:$true] %s2365_s15  ;;  %s2388_s19 = int_to_ptr.vmem [resolvable:$true] %s2387_s19 }
 0x1b8   : > { %s13897_s1 = scalar_lea.hbm %s15003_s24, 16 }
 0x1b9   : > { %p13898_p13 = scmp.ne.s32.totalorder %s15003_s24, %s13897_s1  ;;  %p13904_p3 = scmp.lt.u32.totalorder %s13897_s1, %s15003_s24 }
 0x1bb   : > { %p13900_p1 = pnand %p13898_p13, %p15134_p0 }
 0x1bd   : > { %p13901_p2 = pneg %p13900_p1 }
 0x1bf   : > { %p13906_p4 = pnand %p13904_p3, %p13901_p2 }
 0x1c1   : > { %13909 = shalt.err (!%p13906_p4)
}
 0x1c2   : > { %s13910_s20 = scalar_lea.vmem %s2366_s15, 16  ;;  %s13917_s10 = scalar_lea.vmem %s2366_s15, 32 }
 0x1c3   : > { %p13911_p5 = scmp.ne.s32.totalorder %s2366_s15, %s13910_s20  ;;  %p13918_p10 = scmp.lt.s32.totalorder %s2366_s15, %s2366_s15 }
 0x1c4   : > { %p13919_p7 = scmp.lt.s32.totalorder %s13917_s10, %s13910_s20 }
 0x1c5   : > { %p13913_p6 = pnand %p13911_p5, %p15134_p0 }
 0x1c6   : > { %p13920_p8 = por %p13919_p7, %p13918_p10 }
 0x1c7   : > { %p13914_p9 = pneg %p13913_p6 }
 0x1c9   : > { %p13921_p11 = pnand %p13920_p8, %p13914_p9 }
 0x1cb   : > { %13924 = shalt.err (!%p13921_p11)
}
 0x1cc   : > { %13035 = dma.hbm_to_vmem [thread:$0]  (!%p15122_p12), %s15003_s24, 16, %s2366_s15, [#allocation39]  }
 0x1cd   : > { %s13925_s26 = scalar_lea.hbm %s15013_s12, 16 }
 0x1ce   : > { %p13926_p13 = scmp.ne.s32.totalorder %s15013_s12, %s13925_s26  ;;  %p13932_p3 = scmp.lt.u32.totalorder %s13925_s26, %s15013_s12 }
 0x1d0   : > { %p13928_p1 = pnand %p13926_p13, %p15134_p0 }
 0x1d2   : > { %p13929_p2 = pneg %p13928_p1 }
 0x1d4   : > { %p13934_p4 = pnand %p13932_p3, %p13929_p2 }
 0x1d6   : > { %13937 = shalt.err (!%p13934_p4)
}
 0x1d7   : > { %s13938_s2 = scalar_lea.vmem %s2388_s19, 16  ;;  %s13945_s28 = scalar_lea.vmem %s2388_s19, 32 }
 0x1d8   : > { %p13939_p5 = scmp.ne.s32.totalorder %s2388_s19, %s13938_s2  ;;  %p13946_p10 = scmp.lt.s32.totalorder %s2388_s19, %s2388_s19 }
 0x1d9   : > { %p13947_p7 = scmp.lt.s32.totalorder %s13945_s28, %s13938_s2 }
 0x1da   : > { %p13941_p6 = pnand %p13939_p5, %p15134_p0 }
 0x1db   : > { %p13948_p8 = por %p13947_p7, %p13946_p10 }
 0x1dc   : > { %p13942_p9 = pneg %p13941_p6 }
 0x1de   : > { %p13949_p11 = pnand %p13948_p8, %p13942_p9 }
 0x1e0   : > { %13952 = shalt.err (!%p13949_p11)
}
 0x1e1   : > { %13041 = dma.hbm_to_vmem [thread:$0]  (!%p15122_p12), %s15013_s12, 16, %s2388_s19, [#allocation42]  }
 0x1e2   : > { %s14620_s15 = smov [#allocation44]   ;;  %s14621_s20 = smov [#allocation2]  }
 0x1e3   : > { %s2424_s1 = sshll.u32 %s14620_s15, 4  ;;  %s2073_s10 = sshll.u32 %s14621_s20, 4  ;;  %s2425_s1 = int_to_ptr.vmem [resolvable:$true] %s2424_s1  ;;  %s2074_s10 = int_to_ptr.vmem [resolvable:$true] %s2073_s10 }
 0x1e4   : > { %s13953_s26 = scalar_lea.hbm %s17715_s3, 16 }
 0x1e5   : > { %p13954_p13 = scmp.ne.s32.totalorder %s17715_s3, %s13953_s26  ;;  %p13960_p3 = scmp.lt.u32.totalorder %s13953_s26, %s17715_s3 }
 0x1e7   : > { %p13956_p1 = pnand %p13954_p13, %p15134_p0 }
 0x1e9   : > { %p13957_p2 = pneg %p13956_p1 }
 0x1eb   : > { %p13962_p4 = pnand %p13960_p3, %p13957_p2 }
 0x1ed   : > { %13965 = shalt.err (!%p13962_p4)
}
 0x1ee   : > { %s13966_s2 = scalar_lea.vmem %s2425_s1, 16  ;;  %s13973_s19 = scalar_lea.vmem %s2425_s1, 32 }
 0x1ef   : > { %p13967_p5 = scmp.ne.s32.totalorder %s2425_s1, %s13966_s2  ;;  %p13974_p10 = scmp.lt.s32.totalorder %s2425_s1, %s2425_s1 }
 0x1f0   : > { %p13975_p7 = scmp.lt.s32.totalorder %s13973_s19, %s13966_s2 }
 0x1f1   : > { %p13969_p6 = pnand %p13967_p5, %p15134_p0 }
 0x1f2   : > { %p13976_p8 = por %p13975_p7, %p13974_p10 }
 0x1f3   : > { %p13970_p9 = pneg %p13969_p6 }
 0x1f5   : > { %p13977_p11 = pnand %p13976_p8, %p13970_p9 }
 0x1f7   : > { %13980 = shalt.err (!%p13977_p11)
}
 0x1f8   : > { %13047 = dma.hbm_to_vmem [thread:$0]  (!%p15122_p12), %s17715_s3, 16, %s2425_s1, [#allocation45]  }
 0x1f9   : > { %s13981_s28 = scalar_lea.hbm %s17714_s4, 16 }
 0x1fa   : > { %p13982_p13 = scmp.ne.s32.totalorder %s17714_s4, %s13981_s28  ;;  %p13988_p3 = scmp.lt.u32.totalorder %s13981_s28, %s17714_s4 }
 0x1fc   : > { %p13984_p1 = pnand %p13982_p13, %p15134_p0 }
 0x1fe   : > { %p13985_p2 = pneg %p13984_p1 }
 0x200   : > { %p13990_p4 = pnand %p13988_p3, %p13985_p2 }
 0x202   : > { %13993 = shalt.err (!%p13990_p4)
}
 0x203   : > { %s13994_s15 = scalar_lea.vmem %s2074_s10, 16  ;;  %s14001_s20 = scalar_lea.vmem %s2074_s10, 32 }
 0x204   : > { %p13995_p5 = scmp.ne.s32.totalorder %s2074_s10, %s13994_s15  ;;  %p14002_p10 = scmp.lt.s32.totalorder %s2074_s10, %s2074_s10 }
 0x205   : > { %p14003_p7 = scmp.lt.s32.totalorder %s14001_s20, %s13994_s15 }
 0x206   : > { %p13997_p6 = pnand %p13995_p5, %p15134_p0 }
 0x207   : > { %p14004_p8 = por %p14003_p7, %p14002_p10 }
 0x208   : > { %p13998_p9 = pneg %p13997_p6 }
 0x20a   : > { %p14005_p11 = pnand %p14004_p8, %p13998_p9 }
 0x20c   : > { %14008 = shalt.err (!%p14005_p11)
}
 0x20d   : > { %s17728_s1 = sld [smem:[#allocation100_spill]]  ;;  %s14622_s26 = smov [#allocation7]  }
 0x20e   : > { %12966 = dma.hbm_to_vmem [thread:$0]  (!%p15122_p12), %s17714_s4, 16, %s2074_s10, [#allocation3]  }
 0x20f   : > { %s2095_s2 = sshll.u32 %s14622_s26, 4  ;;  %s14623_s19 = smov [#allocation10]   ;;  %s2096_s2 = int_to_ptr.vmem [resolvable:$true] %s2095_s2 }
 0x210   : > { %s2117_s28 = sshll.u32 %s14623_s19, 4  ;;  %s2118_s28 = int_to_ptr.vmem [resolvable:$true] %s2117_s28 }
 0x213   : > { %s14009_s3 = scalar_lea.hbm %s17728_s1, 16 }
 0x214   : > { %p14010_p13 = scmp.ne.s32.totalorder %s17728_s1, %s14009_s3  ;;  %p14016_p3 = scmp.lt.u32.totalorder %s14009_s3, %s17728_s1 }
 0x216   : > { %p14012_p1 = pnand %p14010_p13, %p15134_p0 }
 0x218   : > { %p14013_p2 = pneg %p14012_p1 }
 0x21a   : > { %p14018_p4 = pnand %p14016_p3, %p14013_p2 }
 0x21c   : > { %14021 = shalt.err (!%p14018_p4)
}
 0x21d   : > { %s14022_s15 = scalar_lea.vmem %s2096_s2, 16  ;;  %s14029_s10 = scalar_lea.vmem %s2096_s2, 32 }
 0x21e   : > { %p14023_p5 = scmp.ne.s32.totalorder %s2096_s2, %s14022_s15  ;;  %p14030_p10 = scmp.lt.s32.totalorder %s2096_s2, %s2096_s2 }
 0x21f   : > { %p14031_p7 = scmp.lt.s32.totalorder %s14029_s10, %s14022_s15 }
 0x220   : > { %p14025_p6 = pnand %p14023_p5, %p15134_p0 }
 0x221   : > { %p14032_p8 = por %p14031_p7, %p14030_p10 }
 0x222   : > { %p14026_p9 = pneg %p14025_p6 }
 0x224   : > { %p14033_p11 = pnand %p14032_p8, %p14026_p9 }
 0x226   : > { %14036 = shalt.err (!%p14033_p11)
}
 0x227   : > { %s17729_s20 = sld [smem:[#allocation102_spill]] }
 0x228   : > { %12972 = dma.hbm_to_vmem [thread:$0]  (!%p15122_p12), %s17728_s1, 16, %s2096_s2, [#allocation6]  }
 0x22d   : > { %s14037_s3 = scalar_lea.hbm %s17729_s20, 16 }
 0x22e   : > { %p14038_p13 = scmp.ne.s32.totalorder %s17729_s20, %s14037_s3  ;;  %p14044_p3 = scmp.lt.u32.totalorder %s14037_s3, %s17729_s20 }
 0x230   : > { %p14040_p1 = pnand %p14038_p13, %p15134_p0 }
 0x232   : > { %p14041_p2 = pneg %p14040_p1 }
 0x234   : > { %p14046_p4 = pnand %p14044_p3, %p14041_p2 }
 0x236   : > { %14049 = shalt.err (!%p14046_p4)
}
 0x237   : > { %s14050_s26 = scalar_lea.vmem %s2118_s28, 16  ;;  %s14057_s19 = scalar_lea.vmem %s2118_s28, 32 }
 0x238   : > { %p14051_p5 = scmp.ne.s32.totalorder %s2118_s28, %s14050_s26  ;;  %p14058_p10 = scmp.lt.s32.totalorder %s2118_s28, %s2118_s28 }
 0x239   : > { %p14059_p7 = scmp.lt.s32.totalorder %s14057_s19, %s14050_s26 }
 0x23a   : > { %p14053_p6 = pnand %p14051_p5, %p15134_p0 }
 0x23b   : > { %p14060_p8 = por %p14059_p7, %p14058_p10 }
 0x23c   : > { %p14054_p9 = pneg %p14053_p6 }
 0x23e   : > { %p14061_p11 = pnand %p14060_p8, %p14054_p9 }
 0x240   : > { %14064 = shalt.err (!%p14061_p11)
}
 0x241   : > { %s17730_s2 = sld [smem:[#allocation109_spill]]  ;;  %s14624_s15 = smov [#allocation13]  }
 0x242   : > { %12978 = dma.hbm_to_vmem [thread:$0]  (!%p15122_p12), %s17729_s20, 16, %s2118_s28, [#allocation9]  }
 0x243   : > { %s2154_s10 = sshll.u32 %s14624_s15, 4  ;;  %s14625_s3 = smov [#allocation16]   ;;  %s2155_s10 = int_to_ptr.vmem [resolvable:$true] %s2154_s10 }
 0x244   : > { %s2176_s1 = sshll.u32 %s14625_s3, 4  ;;  %s2177_s1 = int_to_ptr.vmem [resolvable:$true] %s2176_s1 }
 0x247   : > { %s14065_s4 = scalar_lea.hbm %s17730_s2, 16 }
 0x248   : > { %p14066_p13 = scmp.ne.s32.totalorder %s17730_s2, %s14065_s4  ;;  %p14072_p3 = scmp.lt.u32.totalorder %s14065_s4, %s17730_s2 }
 0x24a   : > { %p14068_p1 = pnand %p14066_p13, %p15134_p0 }
 0x24c   : > { %p14069_p2 = pneg %p14068_p1 }
 0x24e   : > { %p14074_p4 = pnand %p14072_p3, %p14069_p2 }
 0x250   : > { %14077 = shalt.err (!%p14074_p4)
}
 0x251   : > { %s14078_s26 = scalar_lea.vmem %s2155_s10, 16  ;;  %s14085_s28 = scalar_lea.vmem %s2155_s10, 32 }
 0x252   : > { %p14079_p5 = scmp.ne.s32.totalorder %s2155_s10, %s14078_s26  ;;  %p14086_p10 = scmp.lt.s32.totalorder %s2155_s10, %s2155_s10 }
 0x253   : > { %p14087_p7 = scmp.lt.s32.totalorder %s14085_s28, %s14078_s26 }
 0x254   : > { %p14081_p6 = pnand %p14079_p5, %p15134_p0 }
 0x255   : > { %p14088_p8 = por %p14087_p7, %p14086_p10 }
 0x256   : > { %p14082_p9 = pneg %p14081_p6 }
 0x258   : > { %p14089_p11 = pnand %p14088_p8, %p14082_p9 }
 0x25a   : > { %14092 = shalt.err (!%p14089_p11)
}
 0x25b   : > { %s17731_s19 = sld [smem:[#allocation110_spill]] }
 0x25c   : > { %12984 = dma.hbm_to_vmem [thread:$0]  (!%p15122_p12), %s17730_s2, 16, %s2155_s10, [#allocation12]  }
 0x261   : > { %s14093_s4 = scalar_lea.hbm %s17731_s19, 16 }
 0x262   : > { %p14094_p13 = scmp.ne.s32.totalorder %s17731_s19, %s14093_s4  ;;  %p14100_p3 = scmp.lt.u32.totalorder %s14093_s4, %s17731_s19 }
 0x264   : > { %p14096_p1 = pnand %p14094_p13, %p15134_p0 }
 0x266   : > { %p14097_p2 = pneg %p14096_p1 }
 0x268   : > { %p14102_p4 = pnand %p14100_p3, %p14097_p2 }
 0x26a   : > { %14105 = shalt.err (!%p14102_p4)
}
 0x26b   : > { %s14106_s15 = scalar_lea.vmem %s2177_s1, 16  ;;  %s14113_s3 = scalar_lea.vmem %s2177_s1, 32 }
 0x26c   : > { %p14107_p5 = scmp.ne.s32.totalorder %s2177_s1, %s14106_s15  ;;  %p14114_p10 = scmp.lt.s32.totalorder %s2177_s1, %s2177_s1 }
 0x26d   : > { %p14115_p7 = scmp.lt.s32.totalorder %s14113_s3, %s14106_s15 }
 0x26e   : > { %p14109_p6 = pnand %p14107_p5, %p15134_p0 }
 0x26f   : > { %p14116_p8 = por %p14115_p7, %p14114_p10 }
 0x270   : > { %p14110_p9 = pneg %p14109_p6 }
 0x272   : > { %p14117_p11 = pnand %p14116_p8, %p14110_p9 }
 0x274   : > { %14120 = shalt.err (!%p14117_p11)
}
 0x275   : > { %s17732_s10 = sld [smem:[#allocation114_spill]]  ;;  %s14626_s26 = smov [#allocation19]  }
 0x276   : > { %12990 = dma.hbm_to_vmem [thread:$0]  (!%p15122_p12), %s17731_s19, 16, %s2177_s1, [#allocation15]  }
 0x277   : > { %s2207_s28 = sshll.u32 %s14626_s26, 4  ;;  %s14627_s4 = smov [#allocation22]   ;;  %s2208_s28 = int_to_ptr.vmem [resolvable:$true] %s2207_s28 }
 0x278   : > { %s2229_s2 = sshll.u32 %s14627_s4, 4  ;;  %s2230_s2 = int_to_ptr.vmem [resolvable:$true] %s2229_s2 }
 0x27b   : > { %s14121_s5 = scalar_lea.hbm %s17732_s10, 16 }
 0x27c   : > { %p14122_p13 = scmp.ne.s32.totalorder %s17732_s10, %s14121_s5  ;;  %p14128_p3 = scmp.lt.u32.totalorder %s14121_s5, %s17732_s10 }
 0x27e   : > { %p14124_p1 = pnand %p14122_p13, %p15134_p0 }
 0x280   : > { %p14125_p2 = pneg %p14124_p1 }
 0x282   : > { %p14130_p4 = pnand %p14128_p3, %p14125_p2 }
 0x284   : > { %14133 = shalt.err (!%p14130_p4)
}
 0x285   : > { %s14134_s15 = scalar_lea.vmem %s2208_s28, 16  ;;  %s14141_s1 = scalar_lea.vmem %s2208_s28, 32 }
 0x286   : > { %p14135_p5 = scmp.ne.s32.totalorder %s2208_s28, %s14134_s15  ;;  %p14142_p10 = scmp.lt.s32.totalorder %s2208_s28, %s2208_s28 }
 0x287   : > { %p14143_p7 = scmp.lt.s32.totalorder %s14141_s1, %s14134_s15 }
 0x288   : > { %p14137_p6 = pnand %p14135_p5, %p15134_p0 }
 0x289   : > { %p14144_p8 = por %p14143_p7, %p14142_p10 }
 0x28a   : > { %p14138_p9 = pneg %p14137_p6 }
 0x28c   : > { %p14145_p11 = pnand %p14144_p8, %p14138_p9 }
 0x28e   : > { %14148 = shalt.err (!%p14145_p11)
}
 0x28f   : > { %s17733_s3 = sld [smem:[#allocation116_spill]] }
 0x290   : > { %12996 = dma.hbm_to_vmem [thread:$0]  (!%p15122_p12), %s17732_s10, 16, %s2208_s28, [#allocation18]  }
 0x295   : > { %s14149_s5 = scalar_lea.hbm %s17733_s3, 16 }
 0x296   : > { %p14150_p13 = scmp.ne.s32.totalorder %s17733_s3, %s14149_s5  ;;  %p14156_p3 = scmp.lt.u32.totalorder %s14149_s5, %s17733_s3 }
 0x298   : > { %p14152_p1 = pnand %p14150_p13, %p15134_p0 }
 0x29a   : > { %p14153_p2 = pneg %p14152_p1 }
 0x29c   : > { %p14158_p4 = pnand %p14156_p3, %p14153_p2 }
 0x29e   : > { %14161 = shalt.err (!%p14158_p4)
}
 0x29f   : > { %s14162_s26 = scalar_lea.vmem %s2230_s2, 16  ;;  %s14169_s4 = scalar_lea.vmem %s2230_s2, 32 }
 0x2a0   : > { %p14163_p5 = scmp.ne.s32.totalorder %s2230_s2, %s14162_s26  ;;  %p14170_p10 = scmp.lt.s32.totalorder %s2230_s2, %s2230_s2 }
 0x2a1   : > { %p14171_p7 = scmp.lt.s32.totalorder %s14169_s4, %s14162_s26 }
 0x2a2   : > { %p14165_p6 = pnand %p14163_p5, %p15134_p0 }
 0x2a3   : > { %p14172_p8 = por %p14171_p7, %p14170_p10 }
 0x2a4   : > { %p14166_p9 = pneg %p14165_p6 }
 0x2a6   : > { %p14173_p11 = pnand %p14172_p8, %p14166_p9 }
 0x2a8   : > { %14176 = shalt.err (!%p14173_p11)
}
 0x2a9   : > { %s17734_s28 = sld [smem:[#allocation120_spill]]  ;;  %s14628_s15 = smov [#allocation25]  }
 0x2aa   : > { %13002 = dma.hbm_to_vmem [thread:$0]  (!%p15122_p12), %s17733_s3, 16, %s2230_s2, [#allocation21]  }
 0x2ab   : > { %s2260_s1 = sshll.u32 %s14628_s15, 4  ;;  %s14629_s5 = smov [#allocation28]   ;;  %s2261_s1 = int_to_ptr.vmem [resolvable:$true] %s2260_s1 }
 0x2ac   : > { %s2288_s6 = sshll.u32 %s14629_s5, 4  ;;  %s2289_s6 = int_to_ptr.vmem [resolvable:$true] %s2288_s6 }
 0x2af   : > { %s14177_s8 = scalar_lea.hbm %s17734_s28, 16 }
 0x2b0   : > { %p14178_p13 = scmp.ne.s32.totalorder %s17734_s28, %s14177_s8  ;;  %p14184_p3 = scmp.lt.u32.totalorder %s14177_s8, %s17734_s28 }
 0x2b2   : > { %p14180_p1 = pnand %p14178_p13, %p15134_p0 }
 0x2b4   : > { %p14181_p2 = pneg %p14180_p1 }
 0x2b6   : > { %p14186_p4 = pnand %p14184_p3, %p14181_p2 }
 0x2b8   : > { %14189 = shalt.err (!%p14186_p4)
}
 0x2b9   : > { %s14190_s26 = scalar_lea.vmem %s2261_s1, 16  ;;  %s14197_s2 = scalar_lea.vmem %s2261_s1, 32 }
 0x2ba   : > { %p14191_p5 = scmp.ne.s32.totalorder %s2261_s1, %s14190_s26  ;;  %p14198_p10 = scmp.lt.s32.totalorder %s2261_s1, %s2261_s1 }
 0x2bb   : > { %p14199_p7 = scmp.lt.s32.totalorder %s14197_s2, %s14190_s26 }
 0x2bc   : > { %p14193_p6 = pnand %p14191_p5, %p15134_p0 }
 0x2bd   : > { %p14200_p8 = por %p14199_p7, %p14198_p10 }
 0x2be   : > { %p14194_p9 = pneg %p14193_p6 }
 0x2c0   : > { %p14201_p11 = pnand %p14200_p8, %p14194_p9 }
 0x2c2   : > { %14204 = shalt.err (!%p14201_p11)
}
 0x2c3   : > { %s17735_s4 = sld [smem:[#allocation123_spill]] }
 0x2c4   : > { %13008 = dma.hbm_to_vmem [thread:$0]  (!%p15122_p12), %s17734_s28, 16, %s2261_s1, [#allocation24]  }
 0x2c9   : > { %s14205_s8 = scalar_lea.hbm %s17735_s4, 16 }
 0x2ca   : > { %p14206_p13 = scmp.ne.s32.totalorder %s17735_s4, %s14205_s8  ;;  %p14212_p3 = scmp.lt.u32.totalorder %s14205_s8, %s17735_s4 }
 0x2cc   : > { %p14208_p1 = pnand %p14206_p13, %p15134_p0 }
 0x2ce   : > { %p14209_p2 = pneg %p14208_p1 }
 0x2d0   : > { %p14214_p4 = pnand %p14212_p3, %p14209_p2 }
 0x2d2   : > { %14217 = shalt.err (!%p14214_p4)
}
 0x2d3   : > { %s14218_s15 = scalar_lea.vmem %s2289_s6, 16  ;;  %s14225_s5 = scalar_lea.vmem %s2289_s6, 32 }
 0x2d4   : > { %p14219_p5 = scmp.ne.s32.totalorder %s2289_s6, %s14218_s15  ;;  %p14226_p10 = scmp.lt.s32.totalorder %s2289_s6, %s2289_s6 }
 0x2d5   : > { %p14227_p7 = scmp.lt.s32.totalorder %s14225_s5, %s14218_s15 }
 0x2d6   : > { %p14221_p6 = pnand %p14219_p5, %p15134_p0 }
 0x2d7   : > { %p14228_p8 = por %p14227_p7, %p14226_p10 }
 0x2d8   : > { %p14222_p9 = pneg %p14221_p6 }
 0x2da   : > { %p14229_p11 = pnand %p14228_p8, %p14222_p9 }
 0x2dc   : > { %14232 = shalt.err (!%p14229_p11)
}
 0x2dd   : > { %s17736_s1 = sld [smem:[#allocation125_spill]]  ;;  %s14630_s26 = smov [#allocation31]  }
 0x2de   : > { %13014 = dma.hbm_to_vmem [thread:$0]  (!%p15122_p12), %s17735_s4, 16, %s2289_s6, [#allocation27]  }
 0x2df   : > { %s2310_s2 = sshll.u32 %s14630_s26, 4  ;;  %s14631_s8 = smov [#allocation34]   ;;  %s2311_s2 = int_to_ptr.vmem [resolvable:$true] %s2310_s2 }
 0x2e0   : > { %s2332_s3 = sshll.u32 %s14631_s8, 4  ;;  %s2333_s3 = int_to_ptr.vmem [resolvable:$true] %s2332_s3 }
 0x2e3   : > { %s14233_s9 = scalar_lea.hbm %s17736_s1, 16 }
 0x2e4   : > { %p14234_p13 = scmp.ne.s32.totalorder %s17736_s1, %s14233_s9  ;;  %p14240_p3 = scmp.lt.u32.totalorder %s14233_s9, %s17736_s1 }
 0x2e6   : > { %p14236_p1 = pnand %p14234_p13, %p15134_p0 }
 0x2e8   : > { %p14237_p2 = pneg %p14236_p1 }
 0x2ea   : > { %p14242_p4 = pnand %p14240_p3, %p14237_p2 }
 0x2ec   : > { %14245 = shalt.err (!%p14242_p4)
}
 0x2ed   : > { %s14246_s15 = scalar_lea.vmem %s2311_s2, 16  ;;  %s14253_s6 = scalar_lea.vmem %s2311_s2, 32 }
 0x2ee   : > { %p14247_p5 = scmp.ne.s32.totalorder %s2311_s2, %s14246_s15  ;;  %p14254_p10 = scmp.lt.s32.totalorder %s2311_s2, %s2311_s2 }
 0x2ef   : > { %p14255_p7 = scmp.lt.s32.totalorder %s14253_s6, %s14246_s15 }
 0x2f0   : > { %p14249_p6 = pnand %p14247_p5, %p15134_p0 }
 0x2f1   : > { %p14256_p8 = por %p14255_p7, %p14254_p10 }
 0x2f2   : > { %p14250_p9 = pneg %p14249_p6 }
 0x2f4   : > { %p14257_p11 = pnand %p14256_p8, %p14250_p9 }
 0x2f6   : > { %14260 = shalt.err (!%p14257_p11)
}
 0x2f7   : > { %s17737_s5 = sld [smem:[#allocation127_spill]] }
 0x2f8   : > { %13020 = dma.hbm_to_vmem [thread:$0]  (!%p15122_p12), %s17736_s1, 16, %s2311_s2, [#allocation30]  }
 0x2fd   : > { %s14261_s9 = scalar_lea.hbm %s17737_s5, 16 }
 0x2fe   : > { %p14262_p13 = scmp.ne.s32.totalorder %s17737_s5, %s14261_s9  ;;  %p14268_p3 = scmp.lt.u32.totalorder %s14261_s9, %s17737_s5 }
 0x300   : > { %p14264_p1 = pnand %p14262_p13, %p15134_p0 }
 0x302   : > { %p14265_p2 = pneg %p14264_p1 }
 0x304   : > { %p14270_p4 = pnand %p14268_p3, %p14265_p2 }
 0x306   : > { %14273 = shalt.err (!%p14270_p4)
}
 0x307   : > { %s14274_s26 = scalar_lea.vmem %s2333_s3, 16  ;;  %s14281_s8 = scalar_lea.vmem %s2333_s3, 32 }
 0x308   : > { %p14275_p5 = scmp.ne.s32.totalorder %s2333_s3, %s14274_s26  ;;  %p14282_p10 = scmp.lt.s32.totalorder %s2333_s3, %s2333_s3 }
 0x309   : > { %p14283_p7 = scmp.lt.s32.totalorder %s14281_s8, %s14274_s26 }
 0x30a   : > { %p14277_p6 = pnand %p14275_p5, %p15134_p0 }
 0x30b   : > { %p14284_p8 = por %p14283_p7, %p14282_p10 }
 0x30c   : > { %p14278_p9 = pneg %p14277_p6 }
 0x30e   : > { %p14285_p11 = pnand %p14284_p8, %p14278_p9 }
 0x310   : > { %14288 = shalt.err (!%p14285_p11)
}
 0x311   : > { %s17738_s2 = sld [smem:[#allocation128_spill]]  ;;  %s14632_s15 = smov [#allocation37]  }
 0x312   : > { %13026 = dma.hbm_to_vmem [thread:$0]  (!%p15122_p12), %s17737_s5, 16, %s2333_s3, [#allocation33]  }
 0x313   : > { %s2354_s6 = sshll.u32 %s14632_s15, 4  ;;  %s14633_s9 = smov [#allocation40]   ;;  %s2355_s6 = int_to_ptr.vmem [resolvable:$true] %s2354_s6 }
 0x314   : > { %s2376_s1 = sshll.u32 %s14633_s9, 4  ;;  %s2377_s1 = int_to_ptr.vmem [resolvable:$true] %s2376_s1 }
 0x317   : > { %s14289_s4 = scalar_lea.hbm %s17738_s2, 16 }
 0x318   : > { %p14290_p13 = scmp.ne.s32.totalorder %s17738_s2, %s14289_s4  ;;  %p14296_p3 = scmp.lt.u32.totalorder %s14289_s4, %s17738_s2 }
 0x31a   : > { %p14292_p1 = pnand %p14290_p13, %p15134_p0 }
 0x31c   : > { %p14293_p2 = pneg %p14292_p1 }
 0x31e   : > { %p14298_p4 = pnand %p14296_p3, %p14293_p2 }
 0x320   : > { %14301 = shalt.err (!%p14298_p4)
}
 0x321   : > { %s14302_s26 = scalar_lea.vmem %s2355_s6, 16  ;;  %s14309_s3 = scalar_lea.vmem %s2355_s6, 32 }
 0x322   : > { %p14303_p5 = scmp.ne.s32.totalorder %s2355_s6, %s14302_s26  ;;  %p14310_p10 = scmp.lt.s32.totalorder %s2355_s6, %s2355_s6 }
 0x323   : > { %p14311_p7 = scmp.lt.s32.totalorder %s14309_s3, %s14302_s26 }
 0x324   : > { %p14305_p6 = pnand %p14303_p5, %p15134_p0 }
 0x325   : > { %p14312_p8 = por %p14311_p7, %p14310_p10 }
 0x326   : > { %p14306_p9 = pneg %p14305_p6 }
 0x328   : > { %p14313_p11 = pnand %p14312_p8, %p14306_p9 }
 0x32a   : > { %14316 = shalt.err (!%p14313_p11)
}
 0x32b   : > { %s17739_s8 = sld [smem:[#allocation129_spill]] }
 0x32c   : > { %13032 = dma.hbm_to_vmem [thread:$0]  (!%p15122_p12), %s17738_s2, 16, %s2355_s6, [#allocation36]  }
 0x331   : > { %s14317_s4 = scalar_lea.hbm %s17739_s8, 16 }
 0x332   : > { %p14318_p13 = scmp.ne.s32.totalorder %s17739_s8, %s14317_s4  ;;  %p14324_p3 = scmp.lt.u32.totalorder %s14317_s4, %s17739_s8 }
 0x334   : > { %p14320_p1 = pnand %p14318_p13, %p15134_p0 }
 0x336   : > { %p14321_p2 = pneg %p14320_p1 }
 0x338   : > { %p14326_p4 = pnand %p14324_p3, %p14321_p2 }
 0x33a   : > { %14329 = shalt.err (!%p14326_p4)
}
 0x33b   : > { %s14330_s15 = scalar_lea.vmem %s2377_s1, 16  ;;  %s14337_s9 = scalar_lea.vmem %s2377_s1, 32 }
 0x33c   : > { %p14331_p5 = scmp.ne.s32.totalorder %s2377_s1, %s14330_s15  ;;  %p14338_p10 = scmp.lt.s32.totalorder %s2377_s1, %s2377_s1 }
 0x33d   : > { %p14339_p7 = scmp.lt.s32.totalorder %s14337_s9, %s14330_s15 }
 0x33e   : > { %p14333_p6 = pnand %p14331_p5, %p15134_p0 }
 0x33f   : > { %p14340_p8 = por %p14339_p7, %p14338_p10 }
 0x340   : > { %p14334_p9 = pneg %p14333_p6 }
 0x342   : > { %p14341_p11 = pnand %p14340_p8, %p14334_p9 }
 0x344   : > { %14344 = shalt.err (!%p14341_p11)
}
 0x345   : > { %s17740_s6 = sld [smem:[#allocation130_spill]]  ;;  %s14634_s26 = smov [#allocation43]  }
 0x346   : > { %13038 = dma.hbm_to_vmem [thread:$0]  (!%p15122_p12), %s17739_s8, 16, %s2377_s1, [#allocation39]  }
 0x347   : > { %s2398_s3 = sshll.u32 %s14634_s26, 4  ;;  %s14635_s4 = smov [#allocation46]   ;;  %s2399_s3 = int_to_ptr.vmem [resolvable:$true] %s2398_s3 }
 0x348   : > { %s2435_s2 = sshll.u32 %s14635_s4, 4  ;;  %s2436_s2 = int_to_ptr.vmem [resolvable:$true] %s2435_s2 }
 0x34b   : > { %s14345_s5 = scalar_lea.hbm %s17740_s6, 16 }
 0x34c   : > { %p14346_p13 = scmp.ne.s32.totalorder %s17740_s6, %s14345_s5  ;;  %p14352_p3 = scmp.lt.u32.totalorder %s14345_s5, %s17740_s6 }
 0x34e   : > { %p14348_p1 = pnand %p14346_p13, %p15134_p0 }
 0x350   : > { %p14349_p2 = pneg %p14348_p1 }
 0x352   : > { %p14354_p4 = pnand %p14352_p3, %p14349_p2 }
 0x354   : > { %14357 = shalt.err (!%p14354_p4)
}
 0x355   : > { %s14358_s15 = scalar_lea.vmem %s2399_s3, 16  ;;  %s14365_s1 = scalar_lea.vmem %s2399_s3, 32 }
 0x356   : > { %p14359_p5 = scmp.ne.s32.totalorder %s2399_s3, %s14358_s15  ;;  %p14366_p10 = scmp.lt.s32.totalorder %s2399_s3, %s2399_s3 }
 0x357   : > { %p14367_p7 = scmp.lt.s32.totalorder %s14365_s1, %s14358_s15 }
 0x358   : > { %p14361_p6 = pnand %p14359_p5, %p15134_p0 }
 0x359   : > { %p14368_p8 = por %p14367_p7, %p14366_p10 }
 0x35a   : > { %p14362_p9 = pneg %p14361_p6 }
 0x35c   : > { %p14369_p11 = pnand %p14368_p8, %p14362_p9 }
 0x35e   : > { %14372 = shalt.err (!%p14369_p11)
}
 0x35f   : > { %13044 = dma.hbm_to_vmem [thread:$0]  (!%p15122_p12), %s17740_s6, 16, %s2399_s3, [#allocation42]  }
 0x360   : > { %s14373_s5 = scalar_lea.hbm %s15053_s14, 16 }
 0x361   : > { %p14374_p13 = scmp.ne.s32.totalorder %s15053_s14, %s14373_s5  ;;  %p14380_p3 = scmp.lt.u32.totalorder %s14373_s5, %s15053_s14 }
 0x363   : > { %p14376_p1 = pnand %p14374_p13, %p15134_p0 }
 0x365   : > { %p14377_p2 = pneg %p14376_p1 }
 0x367   : > { %p14382_p4 = pnand %p14380_p3, %p14377_p2 }
 0x369   : > { %14385 = shalt.err (!%p14382_p4)
}
 0x36a   : > { %s14386_s9 = scalar_lea.vmem %s2436_s2, 16  ;;  %s14393_s26 = scalar_lea.vmem %s2436_s2, 32 }
 0x36b   : > { %p14387_p5 = scmp.ne.s32.totalorder %s2436_s2, %s14386_s9  ;;  %p14394_p10 = scmp.lt.s32.totalorder %s2436_s2, %s2436_s2 }
 0x36c   : > { %p14395_p7 = scmp.lt.s32.totalorder %s14393_s26, %s14386_s9 }
 0x36d   : > { %p14389_p6 = pnand %p14387_p5, %p15134_p0 }
 0x36e   : > { %p14396_p8 = por %p14395_p7, %p14394_p10 }
 0x36f   : > { %p14390_p9 = pneg %p14389_p6 }
 0x371   : > { %p14397_p11 = pnand %p14396_p8, %p14390_p9 }
 0x373   : > { %14400 = shalt.err (!%p14397_p11)
}
 0x374   : > { %13050 = dma.hbm_to_vmem [thread:$0]  (!%p15122_p12), %s15053_s14, 16, %s2436_s2, [#allocation45]  }
 0x375   : > { %p17741_p13 = scmp.ne.s32.totalorder %s17725_s11, 0 }
 0x376   : > { %p17742_p1 = scmp.eq.s32.totalorder (!%p17741_p13), %s15086_s22, 0 }
 0x377   : > { %2471 = sbr.rel (%p17741_p13) target bundleno = 14440 (0x3868), region = 344 }
 0x37e   : > { %14446 = dma.done.wait (%p17742_p1), [#allocation3], 16   ;;  %p17743_p2 = pmov %p17742_p1 }
 0x37f   : > { %p17744_p0 = pmov %p17742_p1 }
 0x380   : > { %14448 = vsyncadd (%p17743_p2), [#allocation3], 4294967280 }
 0x381   : > { %14450 = dma.done.wait (%p17744_p0), [#allocation6], 32   ;;  %p17745_p3 = pmov %p17744_p0 }
 0x382   : > { %p17746_p4 = pmov %p17744_p0 }
 0x383   : > { %14452 = vsyncadd (%p17745_p3), [#allocation6], 4294967264 }
 0x384   : > { %14454 = dma.done.wait (%p17746_p4), [#allocation9], 32   ;;  %p17747_p12 = pmov %p17744_p0 }
 0x385   : > { %p17748_p5 = pmov %p17744_p0 }
 0x386   : > { %14456 = vsyncadd (%p17747_p12), [#allocation9], 4294967264 }
 0x387   : > { %14458 = dma.done.wait (%p17748_p5), [#allocation12], 32   ;;  %p17749_p6 = pmov %p17744_p0 }
 0x388   : > { %p17750_p9 = pmov %p17744_p0 }
 0x389   : > { %14460 = vsyncadd (%p17749_p6), [#allocation12], 4294967264 }
 0x38a   : > { %14462 = dma.done.wait (%p17750_p9), [#allocation15], 32   ;;  %p17751_p10 = pmov %p17744_p0 }
 0x38b   : > { %p17752_p7 = pmov %p17744_p0 }
 0x38c   : > { %14464 = vsyncadd (%p17751_p10), [#allocation15], 4294967264 }
 0x38d   : > { %14466 = dma.done.wait (%p17752_p7), [#allocation18], 32   ;;  %p17753_p8 = pmov %p17744_p0 }
 0x38e   : > { %p17754_p11 = pmov %p17744_p0 }
 0x38f   : > { %14468 = vsyncadd (%p17753_p8), [#allocation18], 4294967264 }
 0x390   : > { %14470 = dma.done.wait (%p17754_p11), [#allocation21], 32   ;;  %p17755_p13 = pmov %p17744_p0 }
 0x391   : > { %p17756_p1 = pmov %p17744_p0 }
 0x392   : > { %14472 = vsyncadd (%p17755_p13), [#allocation21], 4294967264 }
 0x393   : > { %14474 = dma.done.wait (%p17756_p1), [#allocation24], 32   ;;  %p17757_p2 = pmov %p17744_p0 }
 0x395   : > { %14476 = vsyncadd (%p17757_p2), [#allocation24], 4294967264 }
 0x396   : > { %14478 = dma.done.wait (%p17744_p0), [#allocation27], 32   ;;  %p17758_p3 = pmov %p17744_p0 }
 0x397   : > { %p17759_p4 = pmov %p17744_p0 }
 0x398   : > { %14480 = vsyncadd (%p17758_p3), [#allocation27], 4294967264 }
 0x399   : > { %14482 = dma.done.wait (%p17759_p4), [#allocation30], 32   ;;  %p17760_p12 = pmov %p17744_p0 }
 0x39a   : > { %p17761_p5 = pmov %p17744_p0 }
 0x39b   : > { %14484 = vsyncadd (%p17760_p12), [#allocation30], 4294967264 }
 0x39c   : > { %14486 = dma.done.wait (%p17761_p5), [#allocation33], 32   ;;  %p17762_p6 = pmov %p17744_p0 }
 0x39d   : > { %p17763_p9 = pmov %p17744_p0 }
 0x39e   : > { %14488 = vsyncadd (%p17762_p6), [#allocation33], 4294967264 }
 0x39f   : > { %14490 = dma.done.wait (%p17763_p9), [#allocation36], 32   ;;  %p17764_p10 = pmov %p17744_p0 }
 0x3a0   : > { %p17765_p7 = pmov %p17744_p0 }
 0x3a1   : > { %14492 = vsyncadd (%p17764_p10), [#allocation36], 4294967264 }
 0x3a2   : > { %14494 = dma.done.wait (%p17765_p7), [#allocation39], 32   ;;  %p17766_p8 = pmov %p17744_p0 }
 0x3a3   : > { %p17767_p11 = pmov %p17744_p0 }
 0x3a4   : > { %14496 = vsyncadd (%p17766_p8), [#allocation39], 4294967264 }
 0x3a5   : > { %14498 = dma.done.wait (%p17767_p11), [#allocation42], 32   ;;  %p17768_p13 = pmov %p17744_p0 }
 0x3a6   : > { %p17769_p1 = pmov %p17744_p0 }
 0x3a7   : > { %14500 = vsyncadd (%p17768_p13), [#allocation42], 4294967264 }
 0x3a8   : > { %14502 = dma.done.wait (%p17769_p1), [#allocation45], 32   ;;  %p17770_p2 = pmov %p17744_p0 }
 0x3a9   : > { %s17771_s16 = sld [smem:[#allocation66_spill]]  ;;  %s17772_s11 = sld [smem:[#allocation104_spill]]  ;;  %v17629_v0 = vmov 0.0   ;;  %vm14637_vm0 = vmmov 0   ;;  %vm2856_vm1 = vcmask 261120   ;;  %vm3072_vm2 = vcmask 130048  }
 0x3aa   : > { %14504 = vsyncadd (%p17770_p2), [#allocation45], 4294967264  ;;  %s17773_s23 = sld [smem:[#allocation106_spill]]  ;;  %p2779_p0 = scmp.lt.s32.totalorder %s15086_s22, 1  ;;  %12371 = vmatprep.subr.bf16.mxu1 %v17629_v0  ;;  %12375 = vmatprep.mubr.msk.bf16.mxu1 %vm14637_vm0, %v17629_v0  ;;  %v11901_v9 = vld [vmem:[#allocation7] ss:$0 sm:$0xff] }
 0x3ab   : > { %12363 = vmatprep.subr.bf16.mxu0 %v17629_v0  ;;  %12367 = vmatprep.mubr.msk.bf16.mxu0 %vm14637_vm0, %v17629_v0  ;;  %s17774_s15 = sld [smem:[#allocation107_spill]]  ;;  %v11897_v13 = vld [vmem:[#allocation10] ss:$0 sm:$0xff]  ;;  %s17597_s5 = smov 112   ;;  %vm3161_vm3 = vcmask 64512   ;;  %vm3975_vm4 = vcmask 1043456  }
 0x3ac   : > { %s15505_s2 = scalar_select %p2779_p0, %s15086_s22, 1  ;;  %v11905_v43 = vld [vmem:[#allocation11] ss:$0 sm:$0xff]  ;;  %vm4067_vm5 = vcmask 523264  }
 0x3ad   : > { %s17776_s9 = sld [smem:[#allocation105_spill]]  ;;  %s17777_s26 = sld [smem:[#allocation108_spill]] }
 0x3ae   : > { %s11894_s3 = sshll.u32 %s15505_s2, 3  ;;  %p17859_p4 = scmp.ne.s32.totalorder %s17722_s7, 0 }
 0x3af   : > { %s15512_s4 = scalar_lea.vmem %s17771_s16, %s11894_s3  ;;  %v13306_v1 = vld [vmem:[%s17772_s11] sm:$0xff]   ;;  %v13307_v2 = vld [vmem:[%s17772_s11 + $0x8] sm:$0xff]   ;;  %s17778_s16 = sld [smem:[#allocation64_spill]] }
 0x3b0   : > { %12372 = vmatpush3.bf16.msra.mxu1 %v13306_v1  ;;  %v15517_v3 = vld [vmem:[%s15512_s4] sm:$0xff]  ;;  %v13309_v5 = vld [vmem:[%s17773_s23 + $0x8] sm:$0xff]   ;;  %s17779_s3 = sld [smem:[#allocation65_spill]] }
 0x3b1   : > { %s17775_s1 = smov %s17774_s15  ;;  %12373 = vmatprep.subr.bf16.mxu1 %v17629_v0  ;;  %v13308_v4 = vld [vmem:[%s17773_s23] sm:$0xff]   ;;  %v2832_v6 = vpack.c.bf16 %v15517_v3, %v15517_v3 }
 0x3b2   : > { %12364 = vmatpush3.bf16.msra.mxu0 %v13308_v4  ;;  %v13310_v7 = vld [vmem:[%s17774_s15] sm:$0xff]   ;;  %v13311_v8 = vld [vmem:[%s17775_s1 + $0x8] sm:$0xff]   ;;  %s17601_s15 = smov 16  }
 0x3b3   : > { %12365 = vmatprep.subr.bf16.mxu0 %v17629_v0 }
 0x3b4   : > { %12374 = vmatpush3.bf16.msra.mxu1 %v13307_v2 }
 0x3b5   : > { %12387 = vmatprep.subr.bf16.mxu1 %v17629_v0 }
 0x3b6   : > { %12366 = vmatpush3.bf16.msra.mxu0 %v13309_v5 }
 0x3b7   : > { %12376 = vmatmul.mubr.msk.bf16.vlgmr.msra.gmra.mrb[0].mxu1 %vm2856_vm1, %v2832_v6  ;;  %12379 = vmatprep.subr.bf16.mxu0 %v17629_v0 }
 0x3b8   : > { %12389 = vmatprep.mubr.msk.bf16.mxu1 %vm14637_vm0, %v17629_v0 }
 0x3b9   : > { %12368 = vmatmul.mubr.msk.bf16.vlgmr.msra.gmra.mrb[0].mxu0 %vm2856_vm1, %v2832_v6 }
 0x3ba   : > { %12383 = vmatprep.mubr.msk.bf16.mxu0 %vm14637_vm0, %v17629_v0  ;;  %12380 = vmatpush3.bf16.msra.mxu0 %v13310_v7 }
 0x3bb   : > { %12381 = vmatprep.subr.bf16.mxu0 %v17629_v0 }
 0x3be   : > { %12382 = vmatpush3.bf16.msra.mxu0 %v13311_v8 }
 0x3bf   : > { %12393 = vmatprep.subr.bf16.mxu0 %v17629_v0 }
 0x3c1   : > { %12384 = vmatmul.mubr.msk.bf16.vlgmr.msra.gmra.mrb[4].mxu0 %vm2856_vm1, %v2832_v6 }
 0x3c2   : > { %12395 = vmatprep.mubr.msk.bf16.mxu0 %vm14637_vm0, %v17629_v0 }
 0x48a   : > { %v2957_v10 = vpop.f32.mrb[0].mxu1 }
 0x48b   : > { %v2958_v11 = vadd.f32 %v11901_v9, %v2957_v10  ;;  %v12377_v12 = vpop.f32.mrb[1].mxu1 }
 0x48c   : > { %v2960_v14 = vpop.f32.mrb[2].mxu1  ;;  %v2894_v17 = vpop.f32.mrb[0].mxu0 }
 0x48d   : > { %v3030_v15 = vpack.c.bf16 %v2958_v11, %v2958_v11  ;;  %v12378_v16 = vpop.f32.mrb[3].mxu1  ;;  %v2895_v18 = vadd.f32 %v11897_v13, %v2894_v17  ;;  %v12369_v19 = vpop.f32.mrb[1].mxu0 }
 0x48e   : > { %v2897_v20 = vpop.f32.mrb[2].mxu0  ;;  %v14639_v16 = vmov 1983009808  }
 0x48f   : > { %3040 = vxpose.xlu1.c.b16.start.end [1/1] (short) (narrow) %v3030_v15, 16  ;;  %3032 = vrot.lane.b32.xlu0 %v3030_v15, %s17597_s5  ;;  %v3026_v21 = vpack.c.bf16 %v2895_v18, %v2895_v18  ;;  %v12370_v22 = vpop.f32.mrb[3].mxu0  ;;  %v13312_v15 = vld [vmem:[%s17776_s9] sm:$0xff]   ;;  %v3378_v17 = vunpack.c.l.s4 %v14639_v16  ;;  %v3380_v18 = vlaneseq }
 0x491   : > { %v3379_v19 = vunpack.c.0.s8 %v3378_v17  ;;  %v3381_v20 = vshrl.u32 %v3380_v18, 7 }
 0x493   : > { %3028 = vrot.lane.b32.xlu0 %v3026_v21, %s17597_s5 }
 0x494   : > { %v3020_v25 = vpop.f32.mrb[4].mxu0 }
 0x495   : > { %v12385_v26 = vpop.f32.mrb[5].mxu0  ;;  %v3021_v44 = vadd.f32 %v11905_v43, %v3020_v25 }
 0x496   : > { %v3023_v27 = vpop.f32.mrb[6].mxu0 }
 0x497   : > { %v12386_v28 = vpop.f32.mrb[7].mxu0  ;;  %v3035_v45 = vpack.c.bf16 %v3021_v44, %v3021_v44 }
 0x4f5   : > { %v3048_v23 = vpop.trf.xlu1 }
 0x4f6   : > { %12388 = vmatpush3.bf16.msra.mxu1 %v3048_v23 }
 0x4f7   : > { %12399 = vmatprep.subr.bf16.mxu1 %v17629_v0 }
 0x4f9   : > { %12390 = vmatmul.mubr.msk.bf16.vlgmr.msra.gmra.mrb[4].mxu1 %vm3072_vm2, %v3026_v21  ;;  %v14640_v21 = vmov 1934713408  }
 0x4fa   : > { %12401 = vmatprep.mubr.msk.bf16.mxu1 %vm14637_vm0, %v17629_v0  ;;  %v3409_v22 = vunpack.c.l.s4 %v14640_v21 }
 0x4fc   : > { %v3410_v25 = vunpack.c.0.s8 %v3409_v22 }
 0x501   : > { %v3033_v24 = vpop.permute.xlu0 %3032 }
 0x502   : > { %3056 = vxpose.xlu1.c.b16.start.end [1/1] (short) (narrow) %v3033_v24, 16  ;;  %v15564_v24 = vsub.s32 %v3379_v19, %v3381_v20 }
 0x505   : > { %v3029_v30 = vpop.permute.xlu0 %3028 }
 0x568   : > { %v3064_v29 = vpop.trf.xlu1 }
 0x569   : > { %12394 = vmatpush3.bf16.msra.mxu0 %v3064_v29  ;;  %v15568_v29 = vsub.s32 %v3410_v25, %v3381_v20 }
 0x56a   : > { %12405 = vmatprep.subr.bf16.mxu0 %v17629_v0 }
 0x56c   : > { %12396 = vmatmul.mubr.msk.bf16.vlgmr.msra.gmra.mrb[8].mxu0 %vm3072_vm2, %v3029_v30 }
 0x56d   : > { %12407 = vmatprep.mubr.msk.bf16.mxu0 %vm14637_vm0, %v17629_v0 }
 0x5cc   : > { %v3110_v31 = vpop.f32.mrb[4].mxu1 }
 0x5cd   : > { %v3159_v32 = vmul.f32 0.25, %v3110_v31  ;;  %v12391_v33 = vpop.f32.mrb[5].mxu1 }
 0x5ce   : > { %v3113_v34 = vpop.f32.mrb[6].mxu1 }
 0x5cf   : > { %v12392_v35 = vpop.f32.mrb[7].mxu1  ;;  %v3162_v36 = vsel %vm3161_vm3, %v3159_v32, -inf }
 0x5d0   : > { %3163 = vmax.xlane.f32.xlu0 %v3162_v36  ;;  %v13313_v36 = vld [vmem:[%s17776_s9 + $0x8] sm:$0xff]  }
 0x63f   : > { %v3153_v37 = vpop.f32.mrb[8].mxu0 }
 0x640   : > { %v3160_v38 = vmul.f32 0.25, %v3153_v37  ;;  %v12397_v39 = vpop.f32.mrb[9].mxu0 }
 0x641   : > { %v3156_v40 = vpop.f32.mrb[10].mxu0 }
 0x642   : > { %v12398_v41 = vpop.f32.mrb[11].mxu0  ;;  %v3165_v42 = vsel %vm3161_vm3, %v3160_v38, -inf }
 0x643   : > { %3166 = vmax.xlane.f32.xlu1 %v3165_v42 }
 0x654   : > { %3037 = vrot.lane.b32.xlu1 %v3035_v45, %s17597_s5  ;;  %s12148_s5 = sshll.u32 %s15505_s2, 5 }
 0x655   : > { %s2783_s1 = scalar_lea.vmem %s17778_s16, %s12148_s5  ;;  %s2788_s6 = scalar_lea.vmem %s17779_s3, %s12148_s5 }
 0x656   : > { %s17602_s5 = smov 120   ;;  %s17782_s16 = sld [smem:[#allocation93_spill]] }
 0x657   : > { %s17783_s3 = sld [smem:[#allocation92_spill]] }
 0x65d   : > { %v3164_v46 = vpop.xlane.xlu0 %3163 }
 0x65e   : > { %v3168_v47 = vsub.f32 %v3159_v32, %v3164_v46 }
 0x660   : > { %v3170_v48 = vmul.f32 1.442695, %v3168_v47 }
 0x662   : > { %13373 = vpow2.f32 %v3170_v48 }
 0x66c   : > { %v13374_v49 = vpop.eup %13373 }
 0x66d   : > { %v3174_v50 = vsel %vm3161_vm3, %v13374_v49, 0.0 }
 0x678   : > { %3175 = vadd.xlane.f32.xlu1 %v3174_v50 }
 0x6d0   : > { %v3167_v51 = vpop.xlane.xlu1 %3166 }
 0x6d1   : > { %v3169_v52 = vsub.f32 %v3160_v38, %v3167_v51 }
 0x6d3   : > { %v3172_v53 = vmul.f32 1.442695, %v3169_v52 }
 0x6d4   : > { %v3038_v54 = vpop.permute.xlu1 %3037 }
 0x6d5   : > { %13375 = vpow2.f32 %v3172_v53  ;;  %3202 = vxpose.xlu1.c.b16.start.end [1/1] (short) (narrow) %v3038_v54, 16 }
 0x6df   : > { %v13376_v55 = vpop.eup %13375 }
 0x6e0   : > { %v3177_v56 = vsel %vm3161_vm3, %v13376_v55, 0.0 }
 0x6e1   : > { %3178 = vadd.xlane.f32.xlu0 %v3177_v56 }
 0x705   : > { %v3176_v57 = vpop.xlane.xlu1 %3175 }
 0x706   : > { %13377 = vrcp.f32 %v3176_v57 }
 0x70e   : > { %3186 = vxpose.xlu0.c.b16.start.end [1/1] (short) (narrow) %v3035_v45, 16 }
 0x710   : > { %v13378_v58 = vpop.eup %13377 }
 0x711   : > { %v3182_v59 = vmul.f32 %v13378_v58, %v13374_v49 }
 0x713   : > { %v3184_v60 = vpack.c.bf16 %v3182_v59, %v3182_v59 }
 0x715   : > { %v3222_v61 = vsel %vm3161_vm3, %v3184_v60, 0  ;;  %v13314_v60 = vld [vmem:[%s17777_s26] sm:$0xff]  }
 0x716   : > { %12400 = vmatpush3.bf16.xpose.msra.mxu1 %v3222_v61  ;;  %v13315_v61 = vld [vmem:[%s17777_s26 + $0x8] sm:$0xff]  }
 0x717   : > { %12411 = vmatprep.subr.bf16.mxu1 %v17629_v0 }
 0x73b   : > { %v3210_v6 = vpop.trf.xlu1 }
 0x76e   : > { %v3179_v62 = vpop.xlane.xlu0 %3178 }
 0x76f   : > { %13379 = vrcp.f32 %v3179_v62  ;;  %v15596_v62 = vld [vmem:[%s2783_s1] sm:$0xff]  }
 0x774   : > { %v3194_v63 = vpop.trf.xlu0 }
 0x775   : > { %12402 = vmatmul.mubr.msk.bf16.vlgmr.msra.gmra.mrb[8].mxu1 %vm3161_vm3, %v3194_v63  ;;  %v12152_v63 = vld [vmem:[%s2788_s6] sm:$0xff]  }
 0x776   : > { %12415 = vmatprep.mubr.msk.bf16.mxu1 %vm14637_vm0, %v17629_v0  ;;  %12412 = vmatpush3.bf16.msra.mxu1 %v13312_v15  ;;  %v12169_v15 = vld [vmem:[%s2788_s6 + $0x18] sm:$0xff]  }
 0x777   : > { %12413 = vmatprep.subr.bf16.mxu1 %v17629_v0 }
 0x779   : > { %v13380_v1 = vpop.eup %13379 }
 0x77a   : > { %v3183_v2 = vmul.f32 %v13380_v1, %v13376_v55  ;;  %12414 = vmatpush3.bf16.msra.mxu1 %v13313_v36  ;;  %v15598_v1 = vld [vmem:[%s2783_s1 + $0x8] sm:$0xff]  }
 0x77b   : > { %12431 = vmatprep.subr.bf16.mxu1 %v17629_v0 }
 0x77c   : > { %v3185_v4 = vpack.c.bf16 %v3183_v2, %v3183_v2  ;;  %v17618_v2 = vunpack.c.l.bf16 %v15596_v62 }
 0x77e   : > { %v3269_v5 = vsel %vm3161_vm3, %v3185_v4, 0  ;;  %v17617_v4 = vunpack.c.h.bf16 %v15596_v62 }
 0x77f   : > { %12406 = vmatpush3.bf16.xpose.msra.mxu0 %v3269_v5  ;;  %v15602_v5 = vunpack.c.l.bf16 %v12152_v63 }
 0x780   : > { %12419 = vmatprep.subr.bf16.mxu0 %v13314_v60 }
 0x781   : > { %v3596_v16 = vadd.f32 %v15602_v5, %v17618_v2 }
 0x786   : > { %12408 = vmatmul.mubr.msk.bf16.vlgmr.msra.gmra.mrb[12].mxu0 %vm3161_vm3, %v3210_v6  ;;  %v15604_v6 = vunpack.c.h.bf16 %v12152_v63 }
 0x787   : > { %12420 = vmatpush3.bf16.msra.mxu0 %v13314_v60 }
 0x788   : > { %12421 = vmatprep.subr.bf16.mxu0 %v13315_v61  ;;  %v3597_v17 = vadd.f32 %v15604_v6, %v17617_v4 }
 0x78a   : > { %v3604_v25 = vpack.c.bf16 %v3597_v17, %v3596_v16 }
 0x78b   : > { %12422 = vmatpush3.bf16.msra.mxu0 %v13315_v61 }
 0x78c   : > { %12451 = vmatprep.subr.bf16.mxu0 %v17629_v0  ;;  %12423 = vmatprep.mubr.msk.bf16.mxu0 %vm2856_vm1, %v3604_v25 }
 0x848   : > { %v3258_v7 = vpop.f32.mrb[8].mxu1 }
 0x849   : > { %3312 = vxpose.xlu0.b32.start [1/2] (short) (narrow) %v3258_v7, 8  ;;  %v12403_v8 = vpop.f32.mrb[9].mxu1  ;;  %v12167_v7 = vld [vmem:[%s2788_s6 + $0x8] sm:$0xff]  }
 0x84a   : > { %v3261_v9 = vpop.f32.mrb[10].mxu1  ;;  %v15606_v8 = vld [vmem:[%s2783_s1 + $0x10] sm:$0xff]  }
 0x84b   : > { %v12404_v10 = vpop.f32.mrb[11].mxu1  ;;  %v17612_v18 = vunpack.c.l.bf16 %v15606_v8  ;;  %v17614_v19 = vunpack.c.h.bf16 %v15606_v8 }
 0x84c   : > { %v17616_v10 = vunpack.c.l.bf16 %v15598_v1 }
 0x84d   : > { %3313 = vxpose.xlu0.b32.end [2/2] (short) (narrow) %v3261_v9, 8  ;;  %v12168_v9 = vld [vmem:[%s2788_s6 + $0x10] sm:$0xff]   ;;  %s17780_s6 = sld [smem:[#allocation86_spill]] }
 0x84e   : > { %v15630_v22 = vunpack.c.l.bf16 %v12168_v9 }
 0x859   : > { %v3305_v11 = vpop.f32.mrb[12].mxu0 }
 0x85a   : > { %3344 = vxpose.xlu0.b32.start [1/2] (short) (narrow) %v3305_v11, 8  ;;  %v12409_v12 = vpop.f32.mrb[13].mxu0  ;;  %v17615_v11 = vunpack.c.h.bf16 %v15598_v1 }
 0x85b   : > { %v3308_v13 = vpop.f32.mrb[14].mxu0  ;;  %v15610_v12 = vunpack.c.l.bf16 %v12167_v7 }
 0x85c   : > { %v12410_v14 = vpop.f32.mrb[15].mxu0 }
 0x85d   : > { %v15614_v14 = vld [vmem:[%s2783_s1 + $0x18] sm:$0xff]   ;;  %v3598_v20 = vadd.f32 %v15610_v12, %v17616_v10  ;;  %s17781_s1 = sld [smem:[#allocation75_spill]] }
 0x85e   : > { %3345 = vxpose.xlu0.b32.end [2/2] (short) (narrow) %v3308_v13, 8  ;;  %v15612_v13 = vunpack.c.h.bf16 %v12167_v7 }
 0x860   : > { %v3599_v21 = vadd.f32 %v15612_v13, %v17615_v11 }
 0x8c9   : > { %v3328_v23 = vpop.trf.xlu0 }
 0x8ca   : > { %v3376_v26 = vcombine.high %v3328_v23, %v17629_v0  ;;  %v3383_v28 = vrot.slane %v3328_v23, %v15564_v24  ;;  %v15632_v23 = vunpack.c.h.bf16 %v12168_v9 }
 0x8cc   : > { %v3390_v32 = vrot.slane %v3376_v26, %v15564_v24  ;;  %v17613_v26 = vunpack.c.l.bf16 %v15614_v14 }
 0x8da   : > { %v3360_v27 = vpop.trf.xlu0 }
 0x8db   : > { %v3391_v30 = vcombine.high %v3360_v27, %v17629_v0  ;;  %v3398_v31 = vrot.slane %v3360_v27, %v15564_v24  ;;  %v17611_v27 = vunpack.c.h.bf16 %v15614_v14 }
 0x8dd   : > { %v3405_v33 = vrot.slane %v3391_v30, %v15564_v24  ;;  %v3406_v34 = vcombine.low %v3383_v28, %v3398_v31  ;;  %v3407_v35 = vcombine.high %v3383_v28, %v3398_v31  ;;  %v15636_v28 = vunpack.c.l.bf16 %v12169_v15 }
 0x8de   : > { %v3605_v30 = vpack.c.bf16 %v3599_v21, %v3598_v20  ;;  %v3600_v31 = vadd.f32 %v15630_v22, %v17612_v18 }
 0x8df   : > { %v3414_v37 = vrot.slane %v3406_v34, %v15568_v29  ;;  %v3421_v38 = vrot.slane %v3407_v35, %v15568_v29  ;;  %v3422_v39 = vcombine.low %v3390_v32, %v3405_v33  ;;  %v3423_v40 = vcombine.high %v3390_v32, %v3405_v33 }
 0x8e0   : > { %v3601_v32 = vadd.f32 %v15632_v23, %v17614_v19  ;;  %v15644_v33 = vunpack.c.h.bf16 %v12169_v15  ;;  %12424 = vmatmul.mubr.msk.bf16.vlgmr.msra.gmra.mrb[16].mxu0 %vm2856_vm1, %v3605_v30  ;;  %v3602_v35 = vadd.f32 %v15636_v28, %v17613_v26 }
 0x8e1   : > { %v3430_v41 = vrot.slane %v3422_v39, %v15568_v29  ;;  %v3437_v42 = vrot.slane %v3423_v40, %v15568_v29  ;;  %v3442_v43 = vcombine.low %v3414_v37, %v3421_v38  ;;  %v11913_v44 = vcombine.high %v3414_v37, %v3421_v38  ;;  %v11915_v38 = vld [vmem:[#allocation8] ss:$0 sm:$0xff] }
 0x8e2   : > { %v3606_v34 = vpack.c.bf16 %v3601_v32, %v3600_v31  ;;  %v3603_v36 = vadd.f32 %v15644_v33, %v17611_v27 }
 0x8e3   : > { %v3458_v45 = vcombine.low %v3430_v41, %v3437_v42  ;;  %v11914_v46 = vcombine.high %v3430_v41, %v3437_v42  ;;  %v3449_v47 = vrot.slane %v3442_v43, %v15564_v24  ;;  %v3457_v48 = vrot.slane %v11913_v44, %v15564_v24 }
 0x8e4   : > { %12427 = vmatprep.mubr.msk.bf16.mxu0 %vm2856_vm1, %v3606_v34  ;;  %v3607_v37 = vpack.c.bf16 %v3603_v36, %v3602_v35 }
 0x8e5   : > { %v3465_v49 = vrot.slane %v3458_v45, %v15564_v24  ;;  %v3473_v50 = vrot.slane %v11914_v46, %v15564_v24  ;;  %v3474_v51 = vcombine.low %v3449_v47, %v3457_v48  ;;  %v13316_v47 = vld [vmem:[%s17780_s6] sm:$0xff]   ;;  %v13317_v48 = vld [vmem:[%s17780_s6 + $0x8] sm:$0xff]   ;;  %s17801_s6 = sld [smem:[#allocation81_spill]] }
 0x8e7   : > { %v3482_v52 = vcombine.low %v3465_v49, %v3473_v50  ;;  %v3481_v53 = vrot.slane %v3474_v51, %v15568_v29  ;;  %v11921_v49 = vld [vmem:[%s17781_s1] ss:$0 sm:$0xff]  ;;  %s17784_s1 = sld [smem:[#allocation87_spill]] }
 0x8e8   : > { %12428 = vmatmul.mubr.msk.bf16.gmra.mrb[20].mxu0 %vm2856_vm1, %v3607_v37 }
 0x8e9   : > { %v3489_v54 = vrot.slane %v3482_v52, %v15568_v29  ;;  %12453 = vmatprep.mubr.msk.bf16.mxu0 %vm14637_vm0, %v17629_v0 }
 0x8eb   : > { %v3491_v55 = vcombine.high %v3481_v53, %v3489_v54  ;;  %v3490_v56 = vcombine.low %v3481_v53, %v3489_v54 }
 0x8ed   : > { %3493 = vrot.lane.b32.xlu0 %v3491_v55, %s17601_s15  ;;  %s17789_s15 = sld [smem:[#allocation90_spill]] }
 0x95f   : > { %v3494_v57 = vpop.permute.xlu0 %3493 }
 0x960   : > { %v3496_v58 = vsel %vm3072_vm2, %v3490_v56, %v3494_v57 }
 0x961   : > { %v3497_v59 = vpack.c.bf16 %v3496_v58, %v3496_v58 }
 0x963   : > { %12416 = vmatmul.mubr.msk.bf16.vlgmr.msra.gmra.mrb[12].mxu1 %vm2856_vm1, %v3497_v59 }
 0x964   : > { %12435 = vmatprep.mubr.msk.bf16.mxu1 %vm14637_vm0, %v17629_v0  ;;  %12432 = vmatpush3.bf16.msra.mxu1 %v13316_v47 }
 0x965   : > { %12433 = vmatprep.subr.bf16.mxu1 %v17629_v0 }
 0x968   : > { %12434 = vmatpush3.bf16.msra.mxu1 %v13317_v48 }
 0x9b3   : > { %v12425_v50 = vpop.f32.mrb[16].mxu0 }
 0x9b4   : > { %v3686_v51 = vadd.f32 %v12425_v50, %v11921_v49  ;;  %v3677_v52 = vpop.f32.mrb[17].mxu0 }
 0x9b5   : > { %v3678_v53 = vadd.f32 %v11921_v49, %v3677_v52  ;;  %v12426_v54 = vpop.f32.mrb[18].mxu0  ;;  %v13319_v52 = vld [vmem:[%s17784_s1 + $0x8] sm:$0xff]  }
 0x9b6   : > { %v3689_v55 = vadd.f32 %v12426_v54, %v11921_v49  ;;  %v3680_v56 = vpop.f32.mrb[19].mxu0 }
 0x9b7   : > { %v3681_v57 = vadd.f32 %v11921_v49, %v3680_v56 }
 0x9b8   : > { %v15665_v58 = vpack.c.bf16 %v3689_v55, %v3686_v51  ;;  %v13318_v51 = vld [vmem:[%s17784_s1] sm:$0xff]   ;;  %s17791_s1 = sld [smem:[#allocation91_spill]] }
 0x9b9   : > { %v15667_v59 = vpack.c.bf16 %v3681_v57, %v3678_v53  ;;  %12439 = vmatprep.subr.bf16.mxu1 %v13318_v51 }
 0x9ba   : > { %3910 = vrot.lane.b32.xlu0 %v15665_v58, %s17602_s5 }
 0x9bb   : > { %v12429_v60 = vpop.f32.mrb[20].mxu0 }
 0x9bc   : > { %v3702_v61 = vadd.f32 %v12429_v60, %v11921_v49  ;;  %v3693_v63 = vpop.f32.mrb[21].mxu0 }
 0x9bd   : > { %v3694_v7 = vadd.f32 %v11921_v49, %v3693_v63  ;;  %v12430_v9 = vpop.f32.mrb[22].mxu0 }
 0x9be   : > { %v3705_v15 = vadd.f32 %v12430_v9, %v11921_v49  ;;  %v3696_v16 = vpop.f32.mrb[23].mxu0 }
 0x9bf   : > { %v3697_v17 = vadd.f32 %v11921_v49, %v3696_v16 }
 0x9c0   : > { %v15673_v20 = vpack.c.bf16 %v3705_v15, %v3702_v61 }
 0x9c1   : > { %v15675_v21 = vpack.c.bf16 %v3697_v17, %v3694_v7 }
 0x9c3   : > { %3912 = vrot.lane.b32.xlu0 %v15675_v21, %s17602_s5 }
 0x9c7   : > { %3914 = vrot.lane.b32.xlu0 %v15673_v20, %s17602_s5 }
 0x9e5   : > { %3940 = vxpose.xlu0.c.b16.start [1/4] (short) (narrow) %v15667_v59, 16 }
 0x9e9   : > { %3941 = vxpose.xlu0.c.b16.cont [2/4] (short) (narrow) %v15665_v58, 16 }
 0x9ed   : > { %3942 = vxpose.xlu0.c.b16.cont [3/4] (short) (narrow) %v15675_v21, 16 }
 0x9f1   : > { %3943 = vxpose.xlu0.c.b16.end [4/4] (short) (narrow) %v15673_v20, 16 }
 0xa2c   : > { %v15692_v47 = vpop.permute.xlu0 %3910 }
 0xa35   : > { %v15694_v48 = vpop.permute.xlu0 %3912 }
 0xa36   : > { %v3558_v39 = vpop.f32.mrb[12].mxu1 }
 0xa37   : > { %v3559_v40 = vadd.f32 %v11915_v38, %v3558_v39  ;;  %v12417_v41 = vpop.f32.mrb[13].mxu1  ;;  %v11919_v39 = vld [vmem:[%s17782_s16] ss:$0 sm:$0xff]  ;;  %s17785_s16 = sld [smem:[#allocation83_spill]] }
 0xa38   : > { %v3561_v42 = vpop.f32.mrb[14].mxu1 }
 0xa39   : > { %v12418_v43 = vpop.f32.mrb[15].mxu1  ;;  %v3564_v44 = vsel %vm2856_vm1, %v3559_v40, 0.0  ;;  %v3569_v45 = vmul.f32 %v3559_v40, %v3559_v40  ;;  %v11920_v42 = vld [vmem:[%s17783_s3] ss:$0 sm:$0xff]  ;;  %s17786_s3 = sld [smem:[#allocation84_spill]] }
 0xa3a   : > { %3565 = vadd.xlane.f32.xlu1 %v3564_v44 }
 0xa3b   : > { %v3570_v46 = vsel %vm2856_vm1, %v3569_v45, 0.0 }
 0xa3e   : > { %3571 = vadd.xlane.f32.xlu1 %v3570_v46 }
 0xa3f   : > { %v11932_v15 = vld [vmem:[%s17786_s3] ss:$0 sm:$0xff]  ;;  %s17788_s3 = sld [smem:[#allocation82_spill]] }
 0xa4f   : > { %3908 = vrot.lane.b32.xlu1 %v15667_v59, %s17602_s5 }
 0xac7   : > { %v3566_v25 = vpop.xlane.xlu1 %3565 }
 0xac8   : > { %v3568_v30 = vmul.f32 0.03125, %v3566_v25 }
 0xaca   : > { %v3574_v32 = vmul.f32 %v3568_v30, %v3568_v30  ;;  %v3578_v37 = vsub.f32 %v3559_v40, %v3568_v30  ;;  %v15696_v40 = vpop.permute.xlu0 %3914 }
 0xacb   : > { %v3572_v31 = vpop.xlane.xlu1 %3571 }
 0xacc   : > { %v3573_v34 = vmul.f32 0.03125, %v3572_v31 }
 0xace   : > { %v3575_v35 = vsub.f32 %v3573_v34, %v3574_v32  ;;  %v3948_v49 = vpop.trf.xlu0 }
 0xacf   : > { %v3977_v50 = vsel %vm3975_vm4, %v3948_v49, 0  ;;  %v15718_v61 = vpop.permute.xlu1 %3908 }
 0xad0   : > { %v3576_v36 = vadd.f32 1e-05, %v3575_v35  ;;  %12452 = vmatpush3.bf16.msra.mxu0 %v3977_v50 }
 0xad1   : > { %12457 = vmatprep.subr.bf16.mxu0 %v17629_v0 }
 0xad2   : > { %13381 = vrsqrt.f32 %v3576_v36 }
 0xadc   : > { %v13382_v38 = vpop.eup %13381 }
 0xadd   : > { %v3579_v41 = vmul.f32 %v13382_v38, %v3578_v37 }
 0xadf   : > { %v3587_v43 = vmul.f32 %v11919_v39, %v3579_v41 }
 0xae1   : > { %v15687_v44 = vadd.f32 %v11920_v42, %v3587_v43 }
 0xae3   : > { %v3708_v45 = vadd.f32 %v15687_v44, %v15517_v3  ;;  %v11928_v3 = vld [vmem:[%s17785_s16] ss:$0 sm:$0xff]  ;;  %s17787_s16 = sld [smem:[#allocation85_spill]] }
 0xae5   : > { %v3709_v46 = vpack.c.bf16 %v3708_v45, %v3708_v45 }
 0xae7   : > { %12436 = vmatmul.mubr.msk.bf16.vlgmr.msra.gmra.mrb[16].mxu1 %vm2856_vm1, %v3709_v46 }
 0xae8   : > { %12443 = vmatprep.mubr.msk.bf16.mxu1 %vm2856_vm1, %v15596_v62  ;;  %12440 = vmatpush3.bf16.msra.mxu1 %v13318_v51 }
 0xae9   : > { %12441 = vmatprep.subr.bf16.mxu1 %v13319_v52 }
 0xaec   : > { %12442 = vmatpush3.bf16.msra.mxu1 %v13319_v52 }
 0xaed   : > { %12463 = vmatprep.subr.bf16.mxu1 %v17629_v0 }
 0xaef   : > { %12444 = vmatmul.mubr.msk.bf16.vlgmr.msra.gmra.mrb[20].mxu1 %vm2856_vm1, %v15598_v1 }
 0xaf0   : > { %12447 = vmatprep.mubr.msk.bf16.mxu1 %vm2856_vm1, %v15606_v8 }
 0xaf7   : > { %12448 = vmatmul.mubr.msk.bf16.gmra.mrb[24].mxu1 %vm2856_vm1, %v15614_v14 }
 0xaf8   : > { %12465 = vmatprep.mubr.msk.bf16.mxu1 %vm14637_vm0, %v17629_v0 }
 0xbba   : > { %v3770_v53 = vpop.f32.mrb[16].mxu1 }
 0xbbb   : > { %v3771_v54 = vadd.f32 %v11928_v3, %v3770_v53  ;;  %v12437_v55 = vpop.f32.mrb[17].mxu1 }
 0xbbc   : > { %v3773_v56 = vpop.f32.mrb[18].mxu1 }
 0xbbd   : > { %v3896_v57 = vpack.c.bf16 %v3771_v54, %v3771_v54  ;;  %v12438_v60 = vpop.f32.mrb[19].mxu1 }
 0xbbf   : > { %12454 = vmatmul.mubr.msk.bf16.vlgmr.msra.gmra.mrb[24].mxu0 %vm3161_vm3, %v3896_v57  ;;  %3898 = vrot.lane.b32.xlu1 %v3896_v57, %s17602_s5 }
 0xbc0   : > { %12459 = vmatprep.mubr.msk.bf16.mxu0 %vm14637_vm0, %v17629_v0 }
 0xbc2   : > { %v12445_v16 = vpop.f32.mrb[20].mxu1 }
 0xbc3   : > { %v3874_v17 = vadd.f32 %v12445_v16, %v11932_v15  ;;  %v3865_v25 = vpop.f32.mrb[21].mxu1 }
 0xbc4   : > { %v3866_v30 = vadd.f32 %v11932_v15, %v3865_v25  ;;  %v12446_v31 = vpop.f32.mrb[22].mxu1 }
 0xbc5   : > { %v3877_v32 = vadd.f32 %v12446_v31, %v11932_v15  ;;  %v3868_v34 = vpop.f32.mrb[23].mxu1 }
 0xbc6   : > { %v3869_v35 = vadd.f32 %v11932_v15, %v3868_v34 }
 0xbc7   : > { %v3921_v36 = vpack.c.bf16 %v3877_v32, %v3874_v17 }
 0xbc8   : > { %v3920_v37 = vpack.c.bf16 %v3869_v35, %v3866_v30 }
 0xbca   : > { %v12449_v38 = vpop.f32.mrb[24].mxu1 }
 0xbcb   : > { %v3890_v39 = vadd.f32 %v12449_v38, %v11932_v15  ;;  %v3881_v41 = vpop.f32.mrb[25].mxu1 }
 0xbcc   : > { %v3882_v42 = vadd.f32 %v11932_v15, %v3881_v41  ;;  %v12450_v43 = vpop.f32.mrb[26].mxu1 }
 0xbcd   : > { %v3893_v45 = vadd.f32 %v12450_v43, %v11932_v15  ;;  %v3884_v46 = vpop.f32.mrb[27].mxu1 }
 0xbce   : > { %v3885_v49 = vadd.f32 %v11932_v15, %v3884_v46 }
 0xbcf   : > { %v3923_v51 = vpack.c.bf16 %v3893_v45, %v3890_v39 }
 0xbd0   : > { %v3922_v53 = vpack.c.bf16 %v3885_v49, %v3882_v42 }
 0xbe2   : > { %3956 = vxpose.xlu1.c.b16.start [1/4] (short) (narrow) %v15718_v61, 16 }
 0xbe6   : > { %3957 = vxpose.xlu1.c.b16.cont [2/4] (short) (narrow) %v15692_v47, 16 }
 0xbea   : > { %3958 = vxpose.xlu1.c.b16.cont [3/4] (short) (narrow) %v15694_v48, 16 }
 0xbee   : > { %3959 = vxpose.xlu1.c.b16.end [4/4] (short) (narrow) %v15696_v40, 16 }
 0xc31   : > { %v3899_v63 = vpop.permute.xlu1 %3898 }
 0xc48   : > { %v3964_v7 = vpop.trf.xlu1 }
 0xc49   : > { %v4023_v9 = vsel %vm3975_vm4, %v3964_v7, 0 }
 0xc4a   : > { %12458 = vmatpush3.bf16.msra.mxu0 %v4023_v9 }
 0xc4b   : > { %12469 = vmatprep.subr.bf16.mxu0 %v17629_v0 }
 0xc4d   : > { %12460 = vmatmul.mubr.msk.bf16.vlgmr.msra.gmra.mrb[28].mxu0 %vm3161_vm3, %v3899_v63 }
 0xc4e   : > { %12471 = vmatprep.mubr.msk.bf16.mxu0 %vm14637_vm0, %v17629_v0 }
 0xc92   : > { %v4013_v50 = vpop.f32.mrb[24].mxu0 }
 0xc93   : > { %v4065_v52 = vmul.f32 0.35355338, %v4013_v50  ;;  %v12455_v3 = vpop.f32.mrb[25].mxu0 }
 0xc94   : > { %v4016_v54 = vpop.f32.mrb[26].mxu0 }
 0xc95   : > { %v12456_v55 = vpop.f32.mrb[27].mxu0  ;;  %v4068_v56 = vsel %vm4067_vm5, %v4065_v52, -inf }
 0xc96   : > { %4069 = vmax.xlane.f32.xlu0 %v4068_v56 }
 0xcac   : > { %3928 = vrot.lane.b32.xlu0 %v3920_v37, %s17602_s5 }
 0xcb0   : > { %3932 = vrot.lane.b32.xlu0 %v3922_v53, %s17602_s5 }
 0xd20   : > { %v4059_v57 = vpop.f32.mrb[28].mxu0 }
 0xd21   : > { %v4066_v60 = vmul.f32 0.35355338, %v4059_v57  ;;  %v12461_v63 = vpop.f32.mrb[29].mxu0 }
 0xd22   : > { %v4062_v7 = vpop.f32.mrb[30].mxu0 }
 0xd23   : > { %v4070_v9 = vpop.xlane.xlu0 %4069  ;;  %v12462_v15 = vpop.f32.mrb[31].mxu0  ;;  %v4071_v16 = vsel %vm4067_vm5, %v4066_v60, -inf }
 0xd24   : > { %v4074_v17 = vsub.f32 %v4065_v52, %v4070_v9  ;;  %4072 = vmax.xlane.f32.xlu1 %v4071_v16 }
 0xd26   : > { %v4076_v25 = vmul.f32 1.442695, %v4074_v17 }
 0xd27   : > { %v3929_v38 = vpop.permute.xlu0 %3928 }
 0xd28   : > { %13383 = vpow2.f32 %v4076_v25 }
 0xd2b   : > { %v3933_v39 = vpop.permute.xlu0 %3932 }
 0xd32   : > { %v13384_v30 = vpop.eup %13383 }
 0xd33   : > { %v4080_v31 = vsel %vm4067_vm5, %v13384_v30, 0.0 }
 0xd34   : > { %4081 = vadd.xlane.f32.xlu0 %v4080_v31 }
 0xd35   : > { %3930 = vrot.lane.b32.xlu1 %v3921_v36, %s17602_s5 }
 0xd39   : > { %3934 = vrot.lane.b32.xlu1 %v3923_v51, %s17602_s5  ;;  %s17790_s5 = smov %s17789_s15 }
 0xd61   : > { %4092 = vxpose.xlu0.c.b16.start [1/4] (short) (narrow) %v3920_v37, 16 }
 0xd65   : > { %4093 = vxpose.xlu0.c.b16.cont [2/4] (short) (narrow) %v3921_v36, 16 }
 0xd69   : > { %4094 = vxpose.xlu0.c.b16.cont [3/4] (short) (narrow) %v3922_v53, 16 }
 0xd6d   : > { %4095 = vxpose.xlu0.c.b16.end [4/4] (short) (narrow) %v3923_v51, 16 }
 0xdb1   : > { %v4073_v32 = vpop.xlane.xlu1 %4072 }
 0xdb2   : > { %v4075_v34 = vsub.f32 %v4066_v60, %v4073_v32 }
 0xdb4   : > { %v4078_v35 = vmul.f32 1.442695, %v4075_v34 }
 0xdb5   : > { %v3931_v50 = vpop.permute.xlu1 %3930 }
 0xdb6   : > { %13385 = vpow2.f32 %v4078_v35 }
 0xdb9   : > { %v3935_v51 = vpop.permute.xlu1 %3934 }
 0xdc0   : > { %v13386_v41 = vpop.eup %13385 }
 0xdc1   : > { %v4082_v42 = vpop.xlane.xlu0 %4081  ;;  %v4083_v43 = vsel %vm4067_vm5, %v13386_v41, 0.0 }
 0xdc2   : > { %13387 = vrcp.f32 %v4082_v42  ;;  %4084 = vadd.xlane.f32.xlu1 %v4083_v43  ;;  %v13324_v43 = vld [vmem:[%s17787_s16] sm:$0xff]   ;;  %s17605_s16 = smov 8  }
 0xdc7   : > { %v4100_v36 = vpop.trf.xlu0 }
 0xdcc   : > { %v13388_v45 = vpop.eup %13387 }
 0xdcd   : > { %v4088_v46 = vmul.f32 %v13388_v45, %v13384_v30 }
 0xdcf   : > { %v4090_v49 = vpack.c.bf16 %v4088_v46, %v4088_v46 }
 0xdd1   : > { %v4128_v37 = vsel %vm4067_vm5, %v4090_v49, 0 }
 0xdd2   : > { %12464 = vmatpush3.bf16.xpose.msra.mxu1 %v4128_v37 }
 0xdd3   : > { %12475 = vmatprep.subr.bf16.mxu1 %v17629_v0 }
 0xdd9   : > { %12466 = vmatmul.mubr.msk.bf16.vlgmr.msra.gmra.mrb[28].mxu1 %vm4067_vm5, %v4100_v36 }
 0xdda   : > { %12477 = vmatprep.mubr.msk.bf16.mxu1 %vm14637_vm0, %v17629_v0  ;;  %12476 = vmatpush3.bf16.msra.mxu1 %v13324_v43 }
 0xddb   : > { %12489 = vmatprep.subr.bf16.mxu1 %v17629_v0 }
 0xdef   : > { %4108 = vxpose.xlu1.c.b16.start [1/4] (short) (narrow) %v3929_v38, 16 }
 0xdf3   : > { %4109 = vxpose.xlu1.c.b16.cont [2/4] (short) (narrow) %v3931_v50, 16 }
 0xdf7   : > { %4110 = vxpose.xlu1.c.b16.cont [3/4] (short) (narrow) %v3933_v39, 16 }
 0xdfb   : > { %4111 = vxpose.xlu1.c.b16.end [4/4] (short) (narrow) %v3935_v51, 16 }
 0xe4f   : > { %v4085_v52 = vpop.xlane.xlu1 %4084 }
 0xe50   : > { %13389 = vrcp.f32 %v4085_v52 }
 0xe55   : > { %v4116_v56 = vpop.trf.xlu1 }
 0xe5a   : > { %v13390_v3 = vpop.eup %13389 }
 0xe5b   : > { %v4089_v53 = vmul.f32 %v13390_v3, %v13386_v41 }
 0xe5d   : > { %v4091_v54 = vpack.c.bf16 %v4089_v53, %v4089_v53 }
 0xe5f   : > { %v4174_v55 = vsel %vm4067_vm5, %v4091_v54, 0 }
 0xe60   : > { %12470 = vmatpush3.bf16.xpose.msra.mxu0 %v4174_v55 }
 0xe61   : > { %12481 = vmatprep.subr.bf16.mxu0 %v17629_v0 }
 0xe67   : > { %12472 = vmatmul.mubr.msk.bf16.vlgmr.msra.gmra.mrb[32].mxu0 %vm4067_vm5, %v4116_v56 }
 0xe68   : > { %12485 = vmatprep.mubr.msk.bf16.mxu0 %vm14637_vm0, %v17629_v0 }
 0xeac   : > { %v4164_v57 = vpop.f32.mrb[28].mxu1 }
 0xead   : > { %v12467_v60 = vpop.f32.mrb[29].mxu1  ;;  %4216 = vxpose.xlu0.b32.start.end [1/1] (short) (narrow) %v4164_v57, 8 }
 0xeae   : > { %v4167_v63 = vpop.f32.mrb[30].mxu1 }
 0xeaf   : > { %v12468_v7 = vpop.f32.mrb[31].mxu1 }
 0xf2d   : > { %v4232_v25 = vpop.trf.xlu0 }
 0xf2e   : > { %v4280_v30 = vcombine.high %v4232_v25, %v17629_v0  ;;  %v4287_v32 = vrot.slane %v4232_v25, %v15564_v24 }
 0xf30   : > { %v4294_v38 = vrot.slane %v4280_v30, %v15564_v24 }
 0xf3a   : > { %v4210_v9 = vpop.f32.mrb[32].mxu0 }
 0xf3b   : > { %4248 = vxpose.xlu0.b32.start.end [1/1] (short) (narrow) %v4210_v9, 8  ;;  %v12473_v15 = vpop.f32.mrb[33].mxu0 }
 0xf3c   : > { %v4213_v16 = vpop.f32.mrb[34].mxu0 }
 0xf3d   : > { %v12474_v17 = vpop.f32.mrb[35].mxu0 }
 0xfbb   : > { %v4264_v31 = vpop.trf.xlu0 }
 0xfbc   : > { %v4295_v34 = vcombine.high %v4264_v31, %v17629_v0  ;;  %v4302_v35 = vrot.slane %v4264_v31, %v15564_v24  ;;  %v11949_v31 = vld [vmem:[%s17788_s3] ss:$0 sm:$0xff]  ;;  %s17792_s3 = sld [smem:[#allocation95_spill]] }
 0xfbe   : > { %v4309_v39 = vrot.slane %v4295_v34, %v15564_v24  ;;  %v4310_v41 = vcombine.low %v4287_v32, %v4302_v35  ;;  %v4311_v42 = vcombine.high %v4287_v32, %v4302_v35 }
 0xfc0   : > { %v4318_v45 = vrot.slane %v4310_v41, %v15568_v29  ;;  %v4325_v46 = vrot.slane %v4311_v42, %v15568_v29  ;;  %v4326_v49 = vcombine.low %v4294_v38, %v4309_v39  ;;  %v4327_v37 = vcombine.high %v4294_v38, %v4309_v39 }
 0xfc2   : > { %v4334_v36 = vrot.slane %v4326_v49, %v15568_v29  ;;  %v4341_v50 = vrot.slane %v4327_v37, %v15568_v29  ;;  %v4346_v51 = vcombine.low %v4318_v45, %v4325_v46  ;;  %v11947_v52 = vcombine.high %v4318_v45, %v4325_v46  ;;  %v13325_v46 = vld [vmem:[%s17789_s15] sm:$0xff]   ;;  %v13326_v49 = vld [vmem:[%s17790_s5 + $0x8] sm:$0xff]   ;;  %s17794_s15 = sld [smem:[#allocation88_spill]]  ;;  %s17795_s5 = sld [smem:[#allocation89_spill]] }
 0xfc3   : > { %12482 = vmatpush3.bf16.msra.mxu0 %v13325_v46  ;;  %v13327_v37 = vld [vmem:[%s17791_s1] sm:$0xff]  }
 0xfc4   : > { %v4362_v3 = vcombine.low %v4334_v36, %v4341_v50  ;;  %v11948_v53 = vcombine.high %v4334_v36, %v4341_v50  ;;  %v4353_v54 = vrot.slane %v4346_v51, %v15564_v24  ;;  %v4361_v55 = vrot.slane %v11947_v52, %v15564_v24  ;;  %12483 = vmatprep.subr.bf16.mxu0 %v17629_v0 }
 0xfc6   : > { %v4369_v56 = vrot.slane %v4362_v3, %v15564_v24  ;;  %v4377_v57 = vrot.slane %v11948_v53, %v15564_v24  ;;  %v4378_v60 = vcombine.low %v4353_v54, %v4361_v55 }
 0xfc7   : > { %12484 = vmatpush3.bf16.msra.mxu0 %v13326_v49 }
 0xfc8   : > { %v4386_v63 = vcombine.low %v4369_v56, %v4377_v57  ;;  %v4385_v7 = vrot.slane %v4378_v60, %v15568_v29  ;;  %12501 = vmatprep.subr.bf16.mxu0 %v17629_v0  ;;  %v11952_v57 = vld [vmem:[%s17792_s3] ss:$0 sm:$0xff] }
 0xfca   : > { %v4393_v9 = vrot.slane %v4386_v63, %v15568_v29 }
 0xfcc   : > { %v4395_v15 = vcombine.high %v4385_v7, %v4393_v9  ;;  %v4394_v16 = vcombine.low %v4385_v7, %v4393_v9 }
 0xfce   : > { %4397 = vrot.lane.b32.xlu1 %v4395_v15, %s17605_s16  ;;  %s17793_s16 = sld [smem:[#allocation94_spill]] }
 0xfd4   : > { %v11953_v63 = vld [vmem:[%s17793_s16] ss:$0 sm:$0xff]  ;;  %s17796_s16 = sld [smem:[#allocation79_spill]] }
 0xfda   : > { %s17797_s3 = smov %s17796_s16 }
0x1040   : > { %v4398_v17 = vpop.permute.xlu1 %4397 }
0x1041   : > { %v4400_v25 = vsel %vm3161_vm3, %v4394_v16, %v4398_v17  ;;  %v13329_v16 = vld [vmem:[%s17791_s1 + $0x10] sm:$0xff]   ;;  %v13330_v17 = vld [vmem:[%s17791_s1 + $0x18] sm:$0xff]  }
0x1042   : > { %v4401_v30 = vpack.c.bf16 %v4400_v25, %v4400_v25  ;;  %v11954_v25 = vld [vmem:[%s17794_s15] ss:$0 sm:$0xff]  ;;  %s17798_s15 = smov 112  }
0x1044   : > { %12478 = vmatmul.mubr.msk.bf16.vlgmr.msra.gmra.mrb[32].mxu1 %vm3072_vm2, %v4401_v30 }
0x1045   : > { %12497 = vmatprep.mubr.msk.bf16.mxu1 %vm14637_vm0, %v17629_v0  ;;  %12490 = vmatpush3.bf16.msra.mxu1 %v13327_v37 }
0x1046   : > { %12491 = vmatprep.subr.bf16.mxu1 %v17629_v0 }
0x1117   : > { %v4454_v32 = vpop.f32.mrb[32].mxu1 }
0x1118   : > { %v4455_v34 = vadd.f32 %v11949_v31, %v4454_v32  ;;  %v12479_v35 = vpop.f32.mrb[33].mxu1 }
0x1119   : > { %v4457_v38 = vpop.f32.mrb[34].mxu1 }
0x111a   : > { %v4460_v39 = vadd.f32 %v4455_v34, %v15687_v44  ;;  %v12480_v41 = vpop.f32.mrb[35].mxu1  ;;  %v13328_v44 = vld [vmem:[%s17791_s1 + $0x8] sm:$0xff]   ;;  %s17800_s1 = sld [smem:[#allocation96_spill]] }
0x111b   : > { %12492 = vmatpush3.bf16.msra.mxu1 %v13328_v44  ;;  %v11958_v41 = vld [vmem:[%s17795_s5] ss:$0 sm:$0xff]  ;;  %s17799_s5 = sld [smem:[#allocation97_spill]] }
0x111c   : > { %v4461_v42 = vsel %vm2856_vm1, %v4460_v39, 0.0  ;;  %v4465_v43 = vmul.f32 %v4460_v39, %v4460_v39  ;;  %12493 = vmatprep.subr.bf16.mxu1 %v17629_v0 }
0x111d   : > { %4462 = vadd.xlane.f32.xlu0 %v4461_v42 }
0x111e   : > { %v4466_v45 = vsel %vm2856_vm1, %v4465_v43, 0.0 }
0x111f   : > { %4467 = vadd.xlane.f32.xlu1 %v4466_v45  ;;  %12494 = vmatpush3.bf16.msra.mxu1 %v13329_v16  ;;  %v13587_v16 = vld [vmem:[%s15512_s4] sm:$0xff] }
0x1120   : > { %12495 = vmatprep.subr.bf16.mxu1 %v17629_v0 }
0x1123   : > { %12496 = vmatpush3.bf16.msra.mxu1 %v13330_v17 }
0x11aa   : > { %v4463_v36 = vpop.xlane.xlu0 %4462 }
0x11ab   : > { %v4464_v50 = vmul.f32 0.03125, %v4463_v36 }
0x11ac   : > { %v4468_v51 = vpop.xlane.xlu1 %4467 }
0x11ad   : > { %v4470_v52 = vmul.f32 %v4464_v50, %v4464_v50  ;;  %v4469_v3 = vmul.f32 0.03125, %v4468_v51  ;;  %v4474_v55 = vsub.f32 %v4460_v39, %v4464_v50  ;;  %v13331_v51 = vld [vmem:[%s17796_s16] sm:$0xff]   ;;  %s17802_s16 = sld [smem:[#allocation76_spill]] }
0x11af   : > { %v4471_v53 = vsub.f32 %v4469_v3, %v4470_v52  ;;  %v13332_v52 = vld [vmem:[%s17797_s3 + $0x8] sm:$0xff]   ;;  %s17807_s3 = sld [smem:[#allocation131_spill]] }
0x11b1   : > { %v4472_v54 = vadd.f32 1e-05, %v4471_v53 }
0x11b3   : > { %13391 = vrsqrt.f32 %v4472_v54 }
0x11bd   : > { %v13392_v56 = vpop.eup %13391 }
0x11be   : > { %v4475_v60 = vmul.f32 %v13392_v56, %v4474_v55 }
0x11c0   : > { %v4483_v7 = vmul.f32 %v11952_v57, %v4475_v60  ;;  %v11964_v60 = vld [vmem:[%s17799_s5] ss:$0 sm:$0xff]  ;;  %s17804_s5 = sld [smem:[#allocation78_spill]] }
0x11c2   : > { %v4491_v9 = vadd.f32 %v11953_v63, %v4483_v7  ;;  %v11965_v7 = vld [vmem:[%s17800_s1] ss:$0 sm:$0xff]  ;;  %s17803_s1 = smov 120  }
0x11c4   : > { %v4492_v15 = vpack.c.bf16 %v4491_v9, %v4491_v9 }
0x11c6   : > { %12486 = vmatmul.mubr.msk.bf16.vlgmr.msra.gmra.mrb[36].mxu0 %vm2856_vm1, %v4492_v15 }
0x11c7   : > { %12505 = vmatprep.mubr.msk.bf16.mxu0 %vm14637_vm0, %v17629_v0  ;;  %12502 = vmatpush3.bf16.msra.mxu0 %v13331_v51 }
0x11c8   : > { %12503 = vmatprep.subr.bf16.mxu0 %v17629_v0 }
0x11cb   : > { %12504 = vmatpush3.bf16.msra.mxu0 %v13332_v52 }
0x11cc   : > { %12509 = vmatprep.subr.bf16.mxu0 %v17629_v0 }
0x1299   : > { %v4553_v30 = vpop.f32.mrb[36].mxu0 }
0x129a   : > { %v4554_v31 = vadd.f32 %v11954_v25, %v4553_v30  ;;  %v12487_v32 = vpop.f32.mrb[37].mxu0  ;;  %v13333_v25 = vld [vmem:[%s17801_s6] sm:$0xff]  }
0x129b   : > { %v4556_v34 = vpop.f32.mrb[38].mxu0 }
0x129c   : > { %v4559_v35 = vmax.f32 %v4554_v31, 0.0  ;;  %v12488_v38 = vpop.f32.mrb[39].mxu0  ;;  %v13334_v31 = vld [vmem:[%s17801_s6 + $0x8] sm:$0xff]   ;;  %s17834_s6 = sld [smem:[#allocation119_spill]] }
0x129e   : > { %v4560_v39 = vpack.c.bf16 %v4559_v35, %v4559_v35  ;;  %v11966_v35 = vld [vmem:[%s17802_s16] ss:$0 sm:$0xff]  ;;  %s17805_s16 = sld [smem:[#allocation133_spill]] }
0x12a0   : > { %12498 = vmatmul.mubr.msk.bf16.vlgmr.msra.gmra.mrb[36].mxu1 %vm4067_vm5, %v4560_v39 }
0x1373   : > { %v4637_v42 = vpop.f32.mrb[36].mxu1 }
0x1374   : > { %v4638_v43 = vadd.f32 %v11958_v41, %v4637_v42  ;;  %v12499_v45 = vpop.f32.mrb[37].mxu1 }
0x1375   : > { %v4640_v46 = vpop.f32.mrb[38].mxu1 }
0x1376   : > { %v4643_v49 = vadd.f32 %v4638_v43, %v4491_v9  ;;  %v12500_v37 = vpop.f32.mrb[39].mxu1 }
0x1378   : > { %v4644_v44 = vsel %vm2856_vm1, %v4643_v49, 0.0  ;;  %v4648_v36 = vmul.f32 %v4643_v49, %v4643_v49 }
0x1379   : > { %4645 = vadd.xlane.f32.xlu1 %v4644_v44 }
0x137a   : > { %v4649_v50 = vsel %vm2856_vm1, %v4648_v36, 0.0 }
0x137d   : > { %4650 = vadd.xlane.f32.xlu1 %v4649_v50 }
0x138e   : > { %4852 = vrot.lane.b32.xlu1 %v15667_v59, %s17798_s15 }
0x1392   : > { %4940 = vrot.lane.b32.xlu1 %v15718_v61, %s17798_s15 }
0x1396   : > { %4854 = vrot.lane.b32.xlu1 %v15665_v58, %s17798_s15 }
0x139a   : > { %4856 = vrot.lane.b32.xlu1 %v15675_v21, %s17798_s15 }
0x1406   : > { %v4646_v59 = vpop.xlane.xlu1 %4645 }
0x1407   : > { %v4647_v3 = vmul.f32 0.03125, %v4646_v59 }
0x1409   : > { %v4653_v53 = vmul.f32 %v4647_v3, %v4647_v3  ;;  %v4657_v56 = vsub.f32 %v4643_v49, %v4647_v3 }
0x140a   : > { %v4651_v61 = vpop.xlane.xlu1 %4650 }
0x140b   : > { %v4652_v58 = vmul.f32 0.03125, %v4651_v61 }
0x140d   : > { %v4654_v54 = vsub.f32 %v4652_v58, %v4653_v53 }
0x140e   : > { %v4853_v55 = vpop.permute.xlu1 %4852 }
0x140f   : > { %v4655_v21 = vadd.f32 1e-05, %v4654_v54  ;;  %12519 = vmatprep.mubr.msk.bf16.mxu1 %vm3161_vm3, %v4853_v55 }
0x1411   : > { %13393 = vrsqrt.f32 %v4655_v21 }
0x1412   : > { %v4941_v34 = vpop.permute.xlu1 %4940 }
0x1416   : > { %v4855_v36 = vpop.permute.xlu1 %4854 }
0x141a   : > { %v4857_v50 = vpop.permute.xlu1 %4856 }
0x141b   : > { %v13394_v57 = vpop.eup %13393 }
0x141c   : > { %v4658_v63 = vmul.f32 %v13394_v57, %v4657_v56 }
0x141e   : > { %v4666_v9 = vmul.f32 %v11964_v60, %v4658_v63 }
0x1420   : > { %v15811_v15 = vadd.f32 %v11965_v7, %v4666_v9 }
0x1422   : > { %v4675_v17 = vadd.f32 %v13587_v16, %v15811_v15  ;;  %v15826_v32 = vpack.c.bf16 %v15811_v15, %v15811_v15 }
0x1424   : > { %v15816_v30 = vpack.c.bf16 %v4675_v17, %v4675_v17 }
0x1426   : > { %12506 = vmatmul.mubr.msk.bf16.vlgmr.msra.gmra.mrb[40].mxu0 %vm2856_vm1, %v15816_v30 }
0x1427   : > { %12510 = vmatpush3.bf16.msra.mxu0 %v13333_v25  ;;  %12513 = vmatprep.mubr.msk.bf16.mxu0 %vm14637_vm0, %v17629_v0 }
0x1428   : > { %12511 = vmatprep.subr.bf16.mxu0 %v17629_v0 }
0x142b   : > { %12512 = vmatpush3.bf16.msra.mxu0 %v13334_v31 }
0x142e   : > { %12514 = vmatmul.mubr.msk.bf16.vlgmr.msra.gmra.mrb[44].mxu0 %vm2856_vm1, %v15826_v32 }
0x142f   : > { %12529 = vmatprep.mubr.msk.bf16.mxu0 %vm3161_vm3, %v4941_v34 }
0x14f9   : > { %v4737_v38 = vpop.f32.mrb[40].mxu0 }
0x14fa   : > { %v4738_v39 = vadd.f32 %v11966_v35, %v4737_v38  ;;  %v12507_v41 = vpop.f32.mrb[41].mxu0 }
0x14fb   : > { %v4740_v42 = vpop.f32.mrb[42].mxu0 }
0x14fc   : > { %v4810_v43 = vpack.c.bf16 %v4738_v39, %v4738_v39  ;;  %v12508_v45 = vpop.f32.mrb[43].mxu0 }
0x14fe   : > { %4820 = vxpose.xlu1.c.b16.start.end [1/1] (short) (narrow) %v4810_v43, 16  ;;  %4812 = vrot.lane.b32.xlu0 %v4810_v43, %s17803_s1 }
0x1501   : > { %v15833_v46 = vpop.f32.mrb[44].mxu0 }
0x1502   : > { %4946 = vrot.lane.b32.xlu1 %v15696_v40, %s17798_s15  ;;  %4942 = vrot.lane.b32.xlu0 %v15692_v47, %s17798_s15  ;;  %v12515_v49 = vpop.f32.mrb[45].mxu0 }
0x1503   : > { %v4807_v37 = vpop.f32.mrb[46].mxu0 }
0x1504   : > { %v12516_v44 = vpop.f32.mrb[47].mxu0 }
0x1506   : > { %4944 = vrot.lane.b32.xlu0 %v15694_v48, %s17798_s15 }
0x1564   : > { %v4828_v51 = vpop.trf.xlu1 }
0x1565   : > { %12841 = vmatprep.subr.msk.bf16.mxu1 %vm3975_vm4, %v4828_v51  ;;  %v4873_v52 = vsel %vm3975_vm4, %v4828_v51, 0 }
0x1566   : > { %12518 = vmatpush3.bf16.msra.mxu1 %v4873_v52 }
0x1567   : > { %12537 = vmatprep.subr.bf16.mxu1 %v17629_v0 }
0x1569   : > { %12520 = vmatmul.mubr.msk.bf16.vlgmr.msra.gmra.mrb[40].mxu1 %vm3161_vm3, %v4855_v36 }
0x156a   : > { %12523 = vmatprep.mubr.msk.bf16.mxu1 %vm3161_vm3, %v4857_v50 }
0x1570   : > { %v4813_v47 = vpop.permute.xlu0 %4812 }
0x1571   : > { %4836 = vxpose.xlu0.c.b16.start.end [1/1] (short) (narrow) %v4813_v47, 16 }
0x1574   : > { %v4943_v48 = vpop.permute.xlu0 %4942  ;;  %v4947_v61 = vpop.permute.xlu1 %4946 }
0x1578   : > { %v4945_v40 = vpop.permute.xlu0 %4944 }
0x157a   : > { %4858 = vrot.lane.b32.xlu0 %v15673_v20, %s17798_s15 }
0x15d7   : > { %v4844_v59 = vpop.trf.xlu0 }
0x15d8   : > { %12842 = vmatprep.subr.msk.bf16.mxu0 %vm3975_vm4, %v4844_v59  ;;  %v4961_v3 = vsel %vm3975_vm4, %v4844_v59, 0 }
0x15d9   : > { %12528 = vmatpush3.bf16.msra.mxu0 %v4961_v3 }
0x15da   : > { %12549 = vmatprep.subr.bf16.mxu0 %v17629_v0 }
0x15dc   : > { %12530 = vmatmul.mubr.msk.bf16.vlgmr.msra.gmra.mrb[48].mxu0 %vm3161_vm3, %v4943_v48 }
0x15dd   : > { %12533 = vmatprep.mubr.msk.bf16.mxu0 %vm3161_vm3, %v4945_v40 }
0x15e4   : > { %12534 = vmatmul.mubr.msk.bf16.gmra.mrb[52].mxu0 %vm3161_vm3, %v4947_v61 }
0x15e5   : > { %12557 = vmatprep.mubr.msk.bf16.mxu0 %vm14637_vm0, %v17629_v0 }
0x15ec   : > { %v4859_v20 = vpop.permute.xlu0 %4858 }
0x15ed   : > { %12524 = vmatmul.mubr.msk.bf16.gmra.mrb[44].mxu1 %vm3161_vm3, %v4859_v20 }
0x15ee   : > { %12545 = vmatprep.mubr.msk.bf16.mxu1 %vm14637_vm0, %v17629_v0 }
0x163c   : > { %v12521_v53 = vpop.f32.mrb[40].mxu1 }
0x163d   : > { %v4909_v58 = vpop.f32.mrb[41].mxu1  ;;  %v15861_v56 = vmul.f32 0.35355338, %v12521_v53 }
0x163e   : > { %v15859_v54 = vmul.f32 0.35355338, %v4909_v58  ;;  %v12522_v55 = vpop.f32.mrb[42].mxu1 }
0x163f   : > { %v4912_v21 = vpop.f32.mrb[43].mxu1  ;;  %v5050_v7 = vsel %vm3161_vm3, %v15861_v56, -inf  ;;  %v5031_v41 = vmul.f32 0.35355338, %v12522_v55 }
0x1640   : > { %v15863_v57 = vmul.f32 0.35355338, %v4912_v21  ;;  %v5044_v60 = vsel %vm3161_vm3, %v15859_v54, -inf }
0x1641   : > { %5045 = vmax.xlane.f32.xlu1 %v5044_v60  ;;  %v5053_v36 = vsel %vm3161_vm3, %v5031_v41, -inf }
0x1642   : > { %v5047_v63 = vsel %vm3161_vm3, %v15863_v57, -inf }
0x1643   : > { %5048 = vmax.xlane.f32.xlu0 %v5047_v63 }
0x1645   : > { %5051 = vmax.xlane.f32.xlu1 %v5050_v7 }
0x16af   : > { %v12531_v9 = vpop.f32.mrb[48].mxu0 }
0x16b0   : > { %v15871_v16 = vmul.f32 0.35355338, %v12531_v9  ;;  %v4997_v17 = vpop.f32.mrb[49].mxu0 }
0x16b1   : > { %v15873_v25 = vmul.f32 0.35355338, %v4997_v17  ;;  %v12532_v31 = vpop.f32.mrb[50].mxu0 }
0x16b2   : > { %v5000_v34 = vpop.f32.mrb[51].mxu0  ;;  %v5074_v35 = vsel %vm3161_vm3, %v15871_v16, -inf  ;;  %v5039_v44 = vmul.f32 0.35355338, %v12532_v31 }
0x16b3   : > { %v15877_v38 = vmul.f32 0.35355338, %v5000_v34  ;;  %5075 = vmax.xlane.f32.xlu1 %v5074_v35  ;;  %v5068_v39 = vsel %vm3161_vm3, %v15873_v25, -inf }
0x16b4   : > { %5069 = vmax.xlane.f32.xlu0 %v5068_v39  ;;  %v5077_v50 = vsel %vm3161_vm3, %v5039_v44, -inf }
0x16b5   : > { %v5071_v43 = vsel %vm3161_vm3, %v15877_v38, -inf }
0x16b7   : > { %v12535_v42 = vpop.f32.mrb[52].mxu0 }
0x16b8   : > { %5072 = vmax.xlane.f32.xlu0 %v5071_v43  ;;  %v5013_v45 = vpop.f32.mrb[53].mxu0  ;;  %v15905_v63 = vmul.f32 0.35355338, %v12535_v42 }
0x16b9   : > { %v12536_v49 = vpop.f32.mrb[54].mxu0  ;;  %v15887_v59 = vmul.f32 0.35355338, %v5013_v45 }
0x16ba   : > { %v5016_v37 = vpop.f32.mrb[55].mxu0  ;;  %v15909_v9 = vmul.f32 0.35355338, %v12536_v49  ;;  %v5086_v34 = vsel %vm3161_vm3, %v15905_v63, -inf }
0x16bb   : > { %v15893_v20 = vmul.f32 0.35355338, %v5016_v37  ;;  %v5080_v55 = vsel %vm3161_vm3, %v15887_v59, -inf }
0x16bc   : > { %5054 = vmax.xlane.f32.xlu0 %v5053_v36  ;;  %v5089_v42 = vsel %vm3161_vm3, %v15909_v9, -inf }
0x16bd   : > { %v5083_v60 = vsel %vm3161_vm3, %v15893_v20, -inf }
0x16c0   : > { %v12525_v51 = vpop.f32.mrb[44].mxu1  ;;  %5078 = vmax.xlane.f32.xlu0 %v5077_v50 }
0x16c1   : > { %v4925_v52 = vpop.f32.mrb[45].mxu1  ;;  %v15897_v58 = vmul.f32 0.35355338, %v12525_v51 }
0x16c2   : > { %v15885_v47 = vmul.f32 0.35355338, %v4925_v52  ;;  %v12526_v48 = vpop.f32.mrb[46].mxu1 }
0x16c3   : > { %v4928_v40 = vpop.f32.mrb[47].mxu1  ;;  %v15901_v21 = vmul.f32 0.35355338, %v12526_v48  ;;  %v5062_v7 = vsel %vm3161_vm3, %v15897_v58, -inf }
0x16c4   : > { %v15889_v3 = vmul.f32 0.35355338, %v4928_v40  ;;  %v5056_v61 = vsel %vm3161_vm3, %v15885_v47, -inf }
0x16c5   : > { %5057 = vmax.xlane.f32.xlu1 %v5056_v61  ;;  %v5065_v31 = vsel %vm3161_vm3, %v15901_v21, -inf }
0x16c6   : > { %v5059_v53 = vsel %vm3161_vm3, %v15889_v3, -inf }
0x16c7   : > { %5060 = vmax.xlane.f32.xlu0 %v5059_v53 }
0x16c9   : > { %5081 = vmax.xlane.f32.xlu1 %v5080_v55 }
0x16cb   : > { %5084 = vmax.xlane.f32.xlu0 %v5083_v60 }
0x16cd   : > { %5063 = vmax.xlane.f32.xlu1 %v5062_v7 }
0x16ce   : > { %v5046_v17 = vpop.xlane.xlu1 %5045 }
0x16cf   : > { %5066 = vmax.xlane.f32.xlu0 %v5065_v31  ;;  %v5092_v35 = vsub.f32 %v15859_v54, %v5046_v17 }
0x16d0   : > { %v5049_v51 = vpop.xlane.xlu0 %5048 }
0x16d1   : > { %5087 = vmax.xlane.f32.xlu1 %v5086_v34  ;;  %v5108_v45 = vmul.f32 1.442695, %v5092_v35  ;;  %v5093_v48 = vsub.f32 %v15863_v57, %v5049_v51 }
0x16d2   : > { %v5052_v39 = vpop.xlane.xlu1 %5051 }
0x16d3   : > { %v5094_v43 = vsub.f32 %v15861_v56, %v5052_v39  ;;  %5090 = vmax.xlane.f32.xlu0 %v5089_v42  ;;  %v5110_v53 = vmul.f32 1.442695, %v5093_v48 }
0x16d5   : > { %v5112_v49 = vmul.f32 1.442695, %v5094_v43 }
0x16d7   : > { %13395 = vpow2.f32 %v5112_v49 }
0x16d8   : > { %13397 = vpow2.f32 %v5108_v45 }
0x16e1   : > { %v15919_v37 = vpop.eup %13395 }
0x16e2   : > { %v5146_v36 = vsel %vm3161_vm3, %v15919_v37, 0.0  ;;  %v15923_v50 = vpop.eup %13397 }
0x16e3   : > { %5147 = vadd.xlane.f32.xlu1 %v5146_v36  ;;  %v5140_v54 = vsel %vm3161_vm3, %v15923_v50, 0.0 }
0x16e7   : > { %5141 = vadd.xlane.f32.xlu1 %v5140_v54 }
0x1740   : > { %v5076_v7 = vpop.xlane.xlu1 %5075 }
0x1741   : > { %v5070_v52 = vpop.xlane.xlu0 %5069  ;;  %v5102_v35 = vsub.f32 %v15871_v16, %v5076_v7 }
0x1743   : > { %v5128_v45 = vmul.f32 1.442695, %v5102_v35 }
0x1745   : > { %v5073_v56 = vpop.xlane.xlu0 %5072 }
0x1746   : > { %v5101_v31 = vsub.f32 %v15877_v38, %v5073_v56 }
0x1748   : > { %v5126_v43 = vmul.f32 1.442695, %v5101_v31 }
0x1749   : > { %v5055_v40 = vpop.xlane.xlu0 %5054 }
0x174a   : > { %v5095_v61 = vsub.f32 %v5031_v41, %v5055_v40  ;;  %v5100_v41 = vsub.f32 %v15873_v25, %v5070_v52 }
0x174c   : > { %v5114_v55 = vmul.f32 1.442695, %v5095_v61 }
0x174d   : > { %v5079_v60 = vpop.xlane.xlu0 %5078 }
0x174e   : > { %13399 = vpow2.f32 %v5114_v55  ;;  %v5103_v17 = vsub.f32 %v5039_v44, %v5079_v60 }
0x174f   : > { %13401 = vpow2.f32 %v5110_v53 }
0x1750   : > { %v5130_v34 = vmul.f32 1.442695, %v5103_v17 }
0x1752   : > { %v5058_v39 = vpop.xlane.xlu1 %5057  ;;  %13403 = vpow2.f32 %v5130_v34 }
0x1753   : > { %v5096_v42 = vsub.f32 %v15885_v47, %v5058_v39  ;;  %v5124_v47 = vmul.f32 1.442695, %v5100_v41 }
0x1754   : > { %v5061_v57 = vpop.xlane.xlu0 %5060 }
0x1755   : > { %v5116_v49 = vmul.f32 1.442695, %v5096_v42  ;;  %v5097_v36 = vsub.f32 %v15889_v3, %v5061_v57 }
0x1756   : > { %v5082_v54 = vpop.xlane.xlu1 %5081 }
0x1757   : > { %13405 = vpow2.f32 %v5116_v49  ;;  %v5118_v38 = vmul.f32 1.442695, %v5097_v36  ;;  %v5104_v56 = vsub.f32 %v15887_v59, %v5082_v54 }
0x1758   : > { %v15933_v44 = vpop.eup %13399  ;;  %13407 = vpow2.f32 %v5126_v43  ;;  %v5085_v51 = vpop.xlane.xlu0 %5084 }
0x1759   : > { %v15935_v16 = vpop.eup %13401  ;;  %13409 = vpow2.f32 %v5128_v45  ;;  %v5149_v48 = vsel %vm3161_vm3, %v15933_v44, 0.0  ;;  %v5132_v61 = vmul.f32 1.442695, %v5104_v56  ;;  %v5105_v59 = vsub.f32 %v15893_v20, %v5085_v51 }
0x175a   : > { %v5064_v25 = vpop.xlane.xlu1 %5063  ;;  %5150 = vadd.xlane.f32.xlu0 %v5149_v48  ;;  %13411 = vpow2.f32 %v5118_v38  ;;  %v5143_v40 = vsel %vm3161_vm3, %v15935_v16, 0.0 }
0x175b   : > { %v5098_v3 = vsub.f32 %v15897_v58, %v5064_v25  ;;  %13413 = vpow2.f32 %v5124_v47  ;;  %v5134_v39 = vmul.f32 1.442695, %v5105_v59 }
0x175c   : > { %v5067_v52 = vpop.xlane.xlu0 %5066  ;;  %v15944_v60 = vpop.eup %13403 }
0x175d   : > { %v5120_v53 = vmul.f32 1.442695, %v5098_v3  ;;  %v5099_v55 = vsub.f32 %v15901_v21, %v5067_v52  ;;  %v5173_v31 = vsel %vm3161_vm3, %v15944_v60, 0.0 }
0x175e   : > { %5144 = vadd.xlane.f32.xlu0 %v5143_v40  ;;  %v5088_v58 = vpop.xlane.xlu1 %5087 }
0x175f   : > { %13415 = vpow2.f32 %v5120_v53  ;;  %v5122_v7 = vmul.f32 1.442695, %v5099_v55  ;;  %v5106_v20 = vsub.f32 %v15905_v63, %v5088_v58 }
0x1760   : > { %13417 = vpow2.f32 %v5132_v61  ;;  %v5091_v42 = vpop.xlane.xlu0 %5090  ;;  %v11970_v61 = vld [vmem:[%s17804_s5] ss:$0 sm:$0xff]  ;;  %s17806_s5 = smov %s17805_s16 }
0x1761   : > { %v15947_v17 = vpop.eup %13405  ;;  %13419 = vpow2.f32 %v5122_v7  ;;  %v5136_v49 = vmul.f32 1.442695, %v5106_v20  ;;  %v5107_v36 = vsub.f32 %v15909_v9, %v5091_v42  ;;  %v4805_v59 = vadd.f32 %v11970_v61, %v15833_v46 }
0x1762   : > { %v15951_v34 = vpop.eup %13407  ;;  %5174 = vadd.xlane.f32.xlu0 %v5173_v31  ;;  %v5152_v21 = vsel %vm3161_vm3, %v15947_v17, 0.0  ;;  %13421 = vpow2.f32 %v5134_v39 }
0x1763   : > { %v15955_v35 = vpop.eup %13409  ;;  %5153 = vadd.xlane.f32.xlu1 %v5152_v21  ;;  %v5167_v43 = vsel %vm3161_vm3, %v15951_v34, 0.0  ;;  %13423 = vpow2.f32 %v5136_v49  ;;  %v5138_v47 = vmul.f32 1.442695, %v5107_v36  ;;  %v4815_v58 = vpack.c.bf16 %v4805_v59, %v4805_v59 }
0x1764   : > { %v15960_v57 = vpop.eup %13411  ;;  %v5170_v45 = vsel %vm3161_vm3, %v15955_v35, 0.0 }
0x1765   : > { %v15964_v41 = vpop.eup %13413  ;;  %v5155_v63 = vsel %vm3161_vm3, %v15960_v57, 0.0  ;;  %13425 = vpow2.f32 %v5138_v47 }
0x1766   : > { %5168 = vadd.xlane.f32.xlu0 %v5167_v43  ;;  %v5164_v38 = vsel %vm3161_vm3, %v15964_v41, 0.0 }
0x1767   : > { %5171 = vadd.xlane.f32.xlu1 %v5170_v45 }
0x1769   : > { %v15969_v54 = vpop.eup %13415 }
0x176a   : > { %5156 = vadd.xlane.f32.xlu0 %v5155_v63  ;;  %v15973_v51 = vpop.eup %13417  ;;  %v5158_v56 = vsel %vm3161_vm3, %v15969_v54, 0.0 }
0x176b   : > { %5165 = vadd.xlane.f32.xlu1 %v5164_v38  ;;  %v15977_v48 = vpop.eup %13419  ;;  %v5176_v9 = vsel %vm3161_vm3, %v15973_v51, 0.0 }
0x176c   : > { %v5161_v25 = vsel %vm3161_vm3, %v15977_v48, 0.0  ;;  %v15983_v3 = vpop.eup %13421 }
0x176d   : > { %v5179_v52 = vsel %vm3161_vm3, %v15983_v3, 0.0  ;;  %v15987_v40 = vpop.eup %13423 }
0x176e   : > { %5159 = vadd.xlane.f32.xlu0 %v5158_v56  ;;  %v5182_v53 = vsel %vm3161_vm3, %v15987_v40, 0.0 }
0x176f   : > { %5177 = vadd.xlane.f32.xlu1 %v5176_v9  ;;  %v15992_v55 = vpop.eup %13425 }
0x1770   : > { %v5185_v7 = vsel %vm3161_vm3, %v15992_v55, 0.0  ;;  %v5148_v31 = vpop.xlane.xlu1 %5147 }
0x1772   : > { %5162 = vadd.xlane.f32.xlu0 %v5161_v25 }
0x1774   : > { %v5142_v21 = vpop.xlane.xlu1 %5141 }
0x1775   : > { %13427 = vrcp.f32 %v5142_v21 }
0x1776   : > { %5180 = vadd.xlane.f32.xlu0 %v5179_v52 }
0x177a   : > { %5183 = vadd.xlane.f32.xlu0 %v5182_v53 }
0x177e   : > { %5186 = vadd.xlane.f32.xlu0 %v5185_v7 }
0x177f   : > { %v13428_v45 = vpop.eup %13427 }
0x1780   : > { %4817 = vrot.lane.b32.xlu1 %v4815_v58, %s17803_s1  ;;  %v5204_v38 = vmul.f32 %v13428_v45, %v15923_v50 }
0x17a3   : > { %5228 = vxpose.xlu1.c.b16.start.end [1/1] (short) (narrow) %v4815_v58, 16 }
0x17e7   : > { %v5151_v39 = vpop.xlane.xlu0 %5150 }
0x17eb   : > { %v5145_v20 = vpop.xlane.xlu0 %5144 }
0x17ec   : > { %13429 = vrcp.f32 %v5145_v20 }
0x17ed   : > { %13431 = vrcp.f32 %v5151_v39 }
0x17ee   : > { %13433 = vrcp.f32 %v5148_v31 }
0x17ef   : > { %v5175_v42 = vpop.xlane.xlu0 %5174 }
0x17f0   : > { %v5154_v43 = vpop.xlane.xlu1 %5153 }
0x17f1   : > { %13435 = vrcp.f32 %v5154_v43 }
0x17f3   : > { %v5169_v46 = vpop.xlane.xlu0 %5168 }
0x17f4   : > { %v5172_v49 = vpop.xlane.xlu1 %5171  ;;  %13437 = vrcp.f32 %v5169_v46 }
0x17f6   : > { %v13430_v36 = vpop.eup %13429 }
0x17f7   : > { %v5157_v63 = vpop.xlane.xlu0 %5156  ;;  %v5205_v47 = vmul.f32 %v13430_v36, %v15935_v16  ;;  %v13432_v56 = vpop.eup %13431 }
0x17f8   : > { %13439 = vrcp.f32 %v5157_v63  ;;  %v5166_v9 = vpop.xlane.xlu1 %5165  ;;  %v13434_v52 = vpop.eup %13433  ;;  %v5207_v59 = vmul.f32 %v13432_v56, %v15933_v44 }
0x17f9   : > { %13441 = vrcp.f32 %v5166_v9  ;;  %v5220_v25 = vpack.c.bf16 %v5205_v47, %v5204_v38  ;;  %v5206_v50 = vmul.f32 %v13434_v52, %v15919_v37 }
0x17fa   : > { %13443 = vrcp.f32 %v5172_v49 }
0x17fb   : > { %v5160_v61 = vpop.xlane.xlu0 %5159  ;;  %v5264_v53 = vsel %vm3161_vm3, %v5220_v25, 0  ;;  %13445 = vrcp.f32 %v5175_v42  ;;  %v5221_v58 = vpack.c.bf16 %v5207_v59, %v5206_v50  ;;  %v13436_v31 = vpop.eup %13435 }
0x17fc   : > { %v5178_v7 = vpop.xlane.xlu1 %5177  ;;  %12538 = vmatpush3.bf16.xpose.msra.mxu1 %v5264_v53  ;;  %13447 = vrcp.f32 %v5160_v61  ;;  %v5208_v36 = vmul.f32 %v13436_v31, %v15947_v17 }
0x17fd   : > { %12539 = vmatprep.subr.bf16.mxu1 %v17629_v0  ;;  %v5267_v44 = vsel %vm3161_vm3, %v5221_v58, 0 }
0x17fe   : > { %v13438_v39 = vpop.eup %13437 }
0x17ff   : > { %v5163_v16 = vpop.xlane.xlu0 %5162  ;;  %v5213_v37 = vmul.f32 %v13438_v39, %v15951_v34 }
0x1800   : > { %13449 = vrcp.f32 %v5163_v16  ;;  %v4818_v21 = vpop.permute.xlu1 %4817 }
0x1801   : > { %5244 = vxpose.xlu0.c.b16.start.end [1/1] (short) (narrow) %v4818_v21, 16 }
0x1802   : > { %v13440_v20 = vpop.eup %13439 }
0x1803   : > { %v13442_v43 = vpop.eup %13441  ;;  %v5181_v46 = vpop.xlane.xlu0 %5180  ;;  %v5209_v45 = vmul.f32 %v13440_v20, %v15960_v57 }
0x1804   : > { %13451 = vrcp.f32 %v5181_v46  ;;  %12540 = vmatpush3.bf16.xpose.msra.mxu1 %v5267_v44  ;;  %v5212_v42 = vmul.f32 %v13442_v43, %v15964_v41  ;;  %v13444_v49 = vpop.eup %13443  ;;  %v13335_v44 = vld [vmem:[%s17805_s16] sm:$0xff]   ;;  %s17808_s16 = sld [smem:[#allocation80_spill]] }
0x1805   : > { %13453 = vrcp.f32 %v5178_v7  ;;  %12541 = vmatprep.subr.bf16.mxu1 %v17629_v0  ;;  %v13446_v38 = vpop.eup %13445  ;;  %v5222_v56 = vpack.c.bf16 %v5209_v45, %v5208_v36  ;;  %v5214_v57 = vmul.f32 %v13444_v49, %v15955_v35 }
0x1806   : > { %v5224_v63 = vpack.c.bf16 %v5213_v37, %v5212_v42  ;;  %v13448_v25 = vpop.eup %13447  ;;  %v5215_v34 = vmul.f32 %v13446_v38, %v15944_v60  ;;  %v13338_v42 = vld [vmem:[%s17807_s3 + $0x8] sm:$0xff]  }
0x1807   : > { %v5184_v47 = vpop.xlane.xlu0 %5183  ;;  %v5270_v61 = vsel %vm3161_vm3, %v5222_v56, 0  ;;  %v5210_v35 = vmul.f32 %v13448_v25, %v15969_v54 }
0x1808   : > { %v5319_v9 = vsel %vm3161_vm3, %v5224_v63, 0  ;;  %v5225_v53 = vpack.c.bf16 %v5215_v34, %v5214_v57 }
0x1809   : > { %12550 = vmatpush3.bf16.xpose.msra.mxu0 %v5319_v9  ;;  %v5236_v43 = vpop.trf.xlu1 }
0x180a   : > { %v13450_v52 = vpop.eup %13449  ;;  %12551 = vmatprep.subr.bf16.mxu0 %v17629_v0  ;;  %v5322_v16 = vsel %vm3161_vm3, %v5225_v53, 0 }
0x180b   : > { %v5187_v41 = vpop.xlane.xlu0 %5186  ;;  %v5211_v17 = vmul.f32 %v13450_v52, %v15977_v48 }
0x180c   : > { %13455 = vrcp.f32 %v5187_v41  ;;  %12542 = vmatpush3.bf16.xpose.msra.mxu1 %v5270_v61  ;;  %v12012_v41 = vld [vmem:[#allocation38] ss:$0 sm:$0xff] }
0x180d   : > { %13457 = vrcp.f32 %v5184_v47  ;;  %12543 = vmatprep.subr.bf16.mxu1 %v17629_v0  ;;  %v5223_v50 = vpack.c.bf16 %v5211_v17, %v5210_v35 }
0x180e   : > { %v13452_v59 = vpop.eup %13451 }
0x180f   : > { %v13454_v7 = vpop.eup %13453  ;;  %v5217_v60 = vmul.f32 %v13452_v59, %v15983_v3  ;;  %v5273_v58 = vsel %vm3161_vm3, %v5223_v50, 0 }
0x1810   : > { %v5216_v48 = vmul.f32 %v13454_v7, %v15973_v51 }
0x1811   : > { %12552 = vmatpush3.bf16.xpose.msra.mxu0 %v5322_v16 }
0x1812   : > { %12553 = vmatprep.subr.bf16.mxu0 %v17629_v0  ;;  %v5226_v31 = vpack.c.bf16 %v5217_v60, %v5216_v48 }
0x1814   : > { %12544 = vmatpush3.bf16.xpose.msra.mxu1 %v5273_v58  ;;  %v5325_v54 = vsel %vm3161_vm3, %v5226_v31, 0 }
0x1816   : > { %v13456_v21 = vpop.eup %13455 }
0x1817   : > { %v13458_v39 = vpop.eup %13457  ;;  %v5219_v20 = vmul.f32 %v13456_v21, %v15992_v55  ;;  %v13336_v55 = vld [vmem:[%s17806_s5 + $0x8] sm:$0xff]   ;;  %v12008_v21 = vld [vmem:[#allocation41] ss:$0 sm:$0xff] }
0x1818   : > { %v5218_v3 = vmul.f32 %v13458_v39, %v15987_v40  ;;  %v13337_v40 = vld [vmem:[%s17807_s3] sm:$0xff]   ;;  %s17809_s3 = smov 8  }
0x1819   : > { %12554 = vmatpush3.bf16.xpose.msra.mxu0 %v5325_v54 }
0x181a   : > { %12555 = vmatprep.subr.bf16.mxu0 %v17629_v0  ;;  %v5227_v51 = vpack.c.bf16 %v5219_v20, %v5218_v3 }
0x181b   : > { %12546 = vmatmul.mubr.msk.bf16.vlgmr.msra.gmra.mrb[48].mxu1 %vm3161_vm3, %v5236_v43 }
0x181c   : > { %v5328_v46 = vsel %vm3161_vm3, %v5227_v51, 0 }
0x1821   : > { %12556 = vmatpush3.bf16.xpose.msra.mxu0 %v5328_v46 }
0x1822   : > { %12571 = vmatprep.subr.bf16.mxu0 %v17629_v0 }
0x1867   : > { %v5252_v45 = vpop.trf.xlu0 }
0x1868   : > { %12558 = vmatmul.mubr.msk.bf16.vlgmr.msra.gmra.mrb[56].mxu0 %vm3161_vm3, %v5252_v45 }
0x1869   : > { %12572 = vmatpush3.bf16.msra.mxu0 %v13335_v44  ;;  %12575 = vmatprep.mubr.msk.bf16.mxu0 %vm14637_vm0, %v17629_v0 }
0x186a   : > { %12573 = vmatprep.subr.bf16.mxu0 %v17629_v0 }
0x186d   : > { %12574 = vmatpush3.bf16.msra.mxu0 %v13336_v55 }
0x186e   : > { %12579 = vmatprep.subr.bf16.mxu0 %v17629_v0 }
0x1870   : > { %12576 = vmatmul.mubr.msk.bf16.vlgmr.msra.gmra.mrb[60].mxu0 %vm2856_vm1, %v15816_v30 }
0x1871   : > { %12580 = vmatpush3.bf16.msra.mxu0 %v13337_v40  ;;  %12583 = vmatprep.mubr.msk.bf16.mxu0 %vm14637_vm0, %v17629_v0 }
0x1872   : > { %12581 = vmatprep.subr.bf16.mxu0 %v17629_v0 }
0x1875   : > { %12582 = vmatpush3.bf16.msra.mxu0 %v13338_v42 }
0x1876   : > { %12595 = vmatprep.subr.bf16.mxu0 %v17629_v0 }
0x1878   : > { %12584 = vmatmul.mubr.msk.bf16.vlgmr.msra.gmra.mrb[64].mxu0 %vm2856_vm1, %v15816_v30 }
0x1879   : > { %12597 = vmatprep.mubr.msk.bf16.mxu0 %vm14637_vm0, %v17629_v0 }
0x18ee   : > { %v5309_v37 = vpop.f32.mrb[48].mxu1 }
0x18ef   : > { %v12547_v49 = vpop.f32.mrb[49].mxu1  ;;  %5370 = vxpose.xlu1.b32.start.end [1/1] (short) (narrow) %v5309_v37, 64 }
0x18f0   : > { %v5312_v36 = vpop.f32.mrb[50].mxu1 }
0x18f1   : > { %v12548_v63 = vpop.f32.mrb[51].mxu1 }
0x193b   : > { %v5364_v38 = vpop.f32.mrb[56].mxu0 }
0x193c   : > { %5402 = vxpose.xlu1.b32.start.end [1/1] (short) (narrow) %v5364_v38, 64  ;;  %v12559_v47 = vpop.f32.mrb[57].mxu0 }
0x193d   : > { %v5367_v56 = vpop.f32.mrb[58].mxu0 }
0x193e   : > { %v12560_v9 = vpop.f32.mrb[59].mxu0 }
0x1943   : > { %v6713_v57 = vpop.f32.mrb[60].mxu0 }
0x1944   : > { %v12577_v25 = vpop.f32.mrb[61].mxu0  ;;  %v6714_v54 = vadd.f32 %v12008_v21, %v6713_v57 }
0x1945   : > { %v6716_v52 = vpop.f32.mrb[62].mxu0 }
0x1946   : > { %v12578_v34 = vpop.f32.mrb[63].mxu0  ;;  %v16054_v46 = vpack.c.bf16 %v6714_v54, %v6714_v54 }
0x194b   : > { %v6776_v61 = vpop.f32.mrb[64].mxu0 }
0x194c   : > { %v6777_v30 = vadd.f32 %v12012_v41, %v6776_v61  ;;  %v12585_v17 = vpop.f32.mrb[65].mxu0 }
0x194d   : > { %v6779_v53 = vpop.f32.mrb[66].mxu0 }
0x194e   : > { %v6849_v35 = vpack.c.bf16 %v6777_v30, %v6777_v30  ;;  %v12586_v59 = vpop.f32.mrb[67].mxu0 }
0x1950   : > { %6851 = vrot.lane.b32.xlu0 %v6849_v35, %s17798_s15 }
0x196f   : > { %v5386_v7 = vpop.trf.xlu1 }
0x1970   : > { %v5434_v20 = vcombine.high %v5386_v7, %v17629_v0  ;;  %v5441_v44 = vrot.slane %v5386_v7, %v15564_v24 }
0x1972   : > { %v5448_v55 = vrot.slane %v5434_v20, %v15564_v24 }
0x1973   : > { %v5387_v50 = vpop.trf.xlu1 }
0x1974   : > { %v5500_v43 = vcombine.high %v5387_v50, %v17629_v0  ;;  %v5507_v40 = vrot.slane %v5387_v50, %v15564_v24 }
0x1976   : > { %6859 = vxpose.xlu1.c.b16.start.end [1/1] (short) (narrow) %v6849_v35, 16  ;;  %v5514_v42 = vrot.slane %v5500_v43, %v15564_v24 }
0x1977   : > { %v5388_v16 = vpop.trf.xlu1 }
0x1978   : > { %v5566_v3 = vcombine.high %v5388_v16, %v17629_v0  ;;  %v5573_v36 = vrot.slane %v5388_v16, %v15564_v24 }
0x197a   : > { %v16064_v63 = vrot.slane %v5566_v3, %v15564_v24 }
0x197b   : > { %v5389_v60 = vpop.trf.xlu1 }
0x197c   : > { %v5632_v51 = vcombine.high %v5389_v60, %v17629_v0  ;;  %v16069_v56 = vrot.slane %v5389_v60, %v15564_v24 }
0x197e   : > { %v16072_v9 = vrot.slane %v5632_v51, %v15564_v24 }
0x197f   : > { %v5390_v48 = vpop.trf.xlu1 }
0x1980   : > { %v5698_v45 = vcombine.high %v5390_v48, %v17629_v0  ;;  %v16075_v57 = vrot.slane %v5390_v48, %v15564_v24 }
0x1982   : > { %v16079_v52 = vrot.slane %v5698_v45, %v15564_v24 }
0x1983   : > { %v5391_v58 = vpop.trf.xlu1 }
0x1984   : > { %v5764_v37 = vcombine.high %v5391_v58, %v17629_v0  ;;  %v16083_v30 = vrot.slane %v5391_v58, %v15564_v24 }
0x1986   : > { %v16086_v17 = vrot.slane %v5764_v37, %v15564_v24 }
0x1987   : > { %v5392_v31 = vpop.trf.xlu1 }
0x1988   : > { %v5830_v25 = vcombine.high %v5392_v31, %v17629_v0  ;;  %v16089_v53 = vrot.slane %v5392_v31, %v15564_v24 }
0x198a   : > { %v16095_v48 = vrot.slane %v5830_v25, %v15564_v24 }
0x198b   : > { %v5393_v39 = vpop.trf.xlu1 }
0x198c   : > { %v5896_v35 = vcombine.high %v5393_v39, %v17629_v0  ;;  %v16098_v58 = vrot.slane %v5393_v39, %v15564_v24 }
0x198e   : > { %v16105_v51 = vrot.slane %v5896_v35, %v15564_v24 }
0x19bc   : > { %v5418_v49 = vpop.trf.xlu1 }
0x19bd   : > { %v5449_v38 = vcombine.high %v5418_v49, %v17629_v0  ;;  %v5456_v47 = vrot.slane %v5418_v49, %v15564_v24 }
0x19bf   : > { %v5463_v34 = vrot.slane %v5449_v38, %v15564_v24  ;;  %v5464_v41 = vcombine.low %v5441_v44, %v5456_v47  ;;  %v5465_v61 = vcombine.high %v5441_v44, %v5456_v47 }
0x19c0   : > { %v5419_v59 = vpop.trf.xlu1 }
0x19c1   : > { %v5472_v7 = vrot.slane %v5464_v41, %v15568_v29  ;;  %v5479_v50 = vrot.slane %v5465_v61, %v15568_v29  ;;  %v5480_v16 = vcombine.low %v5448_v55, %v5463_v34  ;;  %v5481_v60 = vcombine.high %v5448_v55, %v5463_v34 }
0x19c2   : > { %v5515_v21 = vcombine.high %v5419_v59, %v17629_v0  ;;  %v5522_v31 = vrot.slane %v5419_v59, %v15564_v24 }
0x19c3   : > { %v5488_v54 = vrot.slane %v5480_v16, %v15568_v29  ;;  %v5495_v20 = vrot.slane %v5481_v60, %v15568_v29  ;;  %v5962_v43 = vcombine.low %v5472_v7, %v5479_v50  ;;  %v11984_v3 = vcombine.high %v5472_v7, %v5479_v50 }
0x19c4   : > { %v5529_v44 = vrot.slane %v5515_v21, %v15564_v24  ;;  %v5530_v45 = vcombine.low %v5507_v40, %v5522_v31  ;;  %v5531_v55 = vcombine.high %v5507_v40, %v5522_v31  ;;  %v5420_v37 = vpop.trf.xlu1 }
0x19c5   : > { %v16109_v39 = vrot.slane %v5962_v43, %v15564_v24  ;;  %v16112_v49 = vrot.slane %v11984_v3, %v15564_v24  ;;  %v5978_v38 = vcombine.low %v5488_v54, %v5495_v20  ;;  %v11985_v47 = vcombine.high %v5488_v54, %v5495_v20 }
0x19c6   : > { %v5538_v25 = vrot.slane %v5530_v45, %v15568_v29  ;;  %v5545_v34 = vrot.slane %v5531_v55, %v15568_v29  ;;  %v5546_v41 = vcombine.low %v5514_v42, %v5529_v44  ;;  %v5547_v61 = vcombine.high %v5514_v42, %v5529_v44 }
0x19c7   : > { %v5581_v35 = vcombine.high %v5420_v37, %v17629_v0  ;;  %v5588_v59 = vrot.slane %v5420_v37, %v15564_v24  ;;  %v16119_v40 = vrot.slane %v5978_v38, %v15564_v24  ;;  %v16122_v7 = vrot.slane %v11985_v47, %v15564_v24 }
0x19c8   : > { %v16125_v50 = vrot.slane %v5546_v41, %v15568_v29  ;;  %v16128_v16 = vrot.slane %v5547_v61, %v15568_v29  ;;  %v6012_v60 = vcombine.low %v5538_v25, %v5545_v34  ;;  %v11986_v21 = vcombine.high %v5538_v25, %v5545_v34  ;;  %v5421_v31 = vpop.trf.xlu1 }
0x19c9   : > { %v5595_v42 = vrot.slane %v5581_v35, %v15564_v24  ;;  %v5596_v54 = vcombine.low %v5573_v36, %v5588_v59  ;;  %v5597_v20 = vcombine.high %v5573_v36, %v5588_v59  ;;  %v5647_v43 = vcombine.high %v5421_v31, %v17629_v0 }
0x19ca   : > { %v16133_v3 = vrot.slane %v6012_v60, %v15564_v24  ;;  %v16136_v44 = vrot.slane %v11986_v21, %v15564_v24  ;;  %v6028_v45 = vcombine.low %v16125_v50, %v16128_v16  ;;  %v11987_v55 = vcombine.high %v16125_v50, %v16128_v16 }
0x19cb   : > { %v5604_v37 = vrot.slane %v5596_v54, %v15568_v29  ;;  %v5611_v38 = vrot.slane %v5597_v20, %v15568_v29  ;;  %v5612_v36 = vcombine.low %v16064_v63, %v5595_v42  ;;  %v5613_v47 = vcombine.high %v16064_v63, %v5595_v42 }
0x19cc   : > { %v5654_v25 = vrot.slane %v5421_v31, %v15564_v24  ;;  %v5661_v34 = vrot.slane %v5647_v43, %v15564_v24  ;;  %v5422_v41 = vpop.trf.xlu1  ;;  %v5994_v61 = vcombine.low %v16109_v39, %v16112_v49  ;;  %v6002_v35 = vcombine.low %v16119_v40, %v16122_v7 }
0x19cd   : > { %v16153_v59 = vrot.slane %v5612_v36, %v15568_v29  ;;  %v16156_v60 = vrot.slane %v5613_v47, %v15568_v29  ;;  %v6062_v21 = vcombine.low %v5604_v37, %v5611_v38  ;;  %v11988_v54 = vcombine.high %v5604_v37, %v5611_v38 }
0x19ce   : > { %v5662_v63 = vcombine.low %v16069_v56, %v5654_v25  ;;  %v5663_v31 = vcombine.high %v16069_v56, %v5654_v25  ;;  %v5678_v42 = vcombine.low %v16072_v9, %v5661_v34  ;;  %v5679_v20 = vcombine.high %v16072_v9, %v5661_v34 }
0x19cf   : > { %v16163_v43 = vrot.slane %v6062_v21, %v15564_v24  ;;  %v16166_v27 = vrot.slane %v11988_v54, %v15564_v24  ;;  %v6078_v36 = vcombine.low %v16153_v59, %v16156_v60  ;;  %v5713_v34 = vcombine.high %v5422_v41, %v17629_v0 }
0x19d0   : > { %v5670_v38 = vrot.slane %v5662_v63, %v15568_v29  ;;  %v5677_v56 = vrot.slane %v5663_v31, %v15568_v29  ;;  %v16175_v47 = vrot.slane %v5678_v42, %v15568_v29  ;;  %v16178_v9 = vrot.slane %v5679_v20, %v15568_v29  ;;  %v5423_v25 = vpop.trf.xlu1 }
0x19d1   : > { %v5720_v21 = vrot.slane %v5422_v41, %v15564_v24  ;;  %v5779_v54 = vcombine.high %v5423_v25, %v17629_v0  ;;  %v5786_v18 = vrot.slane %v5423_v25, %v15564_v24  ;;  %v5727_v42 = vrot.slane %v5713_v34, %v15564_v24 }
0x19d2   : > { %v6112_v26 = vcombine.low %v5670_v38, %v5677_v56  ;;  %v11990_v19 = vcombine.high %v5670_v38, %v5677_v56  ;;  %v6044_v39 = vcombine.low %v16133_v3, %v16136_v44 }
0x19d3   : > { %v5728_v20 = vcombine.low %v16075_v57, %v5720_v21  ;;  %v5729_v11 = vcombine.high %v16075_v57, %v5720_v21  ;;  %v5793_v41 = vrot.slane %v5779_v54, %v15564_v24  ;;  %v5794_v38 = vcombine.low %v16083_v30, %v5786_v18 }
0x19d4   : > { %v16193_v10 = vrot.slane %v6112_v26, %v15564_v24  ;;  %v16196_v25 = vrot.slane %v11990_v19, %v15564_v24  ;;  %v5795_v56 = vcombine.high %v16083_v30, %v5786_v18  ;;  %v5424_v4 = vpop.trf.xlu1  ;;  %v5744_v31 = vcombine.low %v16079_v52, %v5727_v42 }
0x19d5   : > { %v5736_v2 = vrot.slane %v5728_v20, %v15568_v29  ;;  %v5743_v34 = vrot.slane %v5729_v11, %v15568_v29  ;;  %v5745_v57 = vcombine.high %v16079_v52, %v5727_v42  ;;  %v5802_v21 = vrot.slane %v5794_v38, %v15568_v29 }
0x19d6   : > { %v5809_v26 = vrot.slane %v5795_v56, %v15568_v29  ;;  %v5810_v19 = vcombine.low %v16086_v17, %v5793_v41  ;;  %v5811_v54 = vcombine.high %v16086_v17, %v5793_v41  ;;  %v16209_v63 = vrot.slane %v5744_v31, %v15568_v29 }
0x19d7   : > { %v16212_v18 = vrot.slane %v5745_v57, %v15568_v29  ;;  %v6162_v30 = vcombine.low %v5736_v2, %v5743_v34  ;;  %v11992_v11 = vcombine.high %v5736_v2, %v5743_v34  ;;  %v16273_v16 = vrot.slane %v6044_v39, %v15568_v29 }
0x19d8   : > { %v16215_v20 = vrot.slane %v5810_v19, %v15568_v29  ;;  %v16218_v52 = vrot.slane %v5811_v54, %v15568_v29  ;;  %v6212_v42 = vcombine.low %v5802_v21, %v5809_v26  ;;  %v11994_v38 = vcombine.high %v5802_v21, %v5809_v26  ;;  %v5425_v56 = vpop.trf.xlu1 }
0x19d9   : > { %v16221_v37 = vrot.slane %v6162_v30, %v15564_v24  ;;  %v16224_v17 = vrot.slane %v11992_v11, %v15564_v24  ;;  %v6178_v31 = vcombine.low %v16209_v63, %v16212_v18  ;;  %v11993_v2 = vcombine.high %v16209_v63, %v16212_v18 }
0x19da   : > { %v16231_v41 = vrot.slane %v6212_v42, %v15564_v24  ;;  %v16234_v34 = vrot.slane %v11994_v38, %v15564_v24  ;;  %v6228_v57 = vcombine.low %v16215_v20, %v16218_v52  ;;  %v5845_v26 = vcombine.high %v5424_v4, %v17629_v0 }
0x19db   : > { %v5852_v19 = vrot.slane %v5424_v4, %v15564_v24  ;;  %v16246_v54 = vrot.slane %v5994_v61, %v15568_v29  ;;  %v16252_v30 = vrot.slane %v6002_v35, %v15568_v29  ;;  %v6035_v11 = vrot.slane %v6028_v45, %v15564_v24 }
0x19dc   : > { %v6043_v4 = vrot.slane %v11987_v55, %v15564_v24  ;;  %v5911_v49 = vcombine.high %v5425_v56, %v17629_v0  ;;  %v6867_v61 = vpop.trf.xlu1  ;;  %v5859_v40 = vrot.slane %v5845_v26, %v15564_v24  ;;  %v5918_v44 = vrot.slane %v5425_v56, %v15564_v24 }
0x19dd   : > { %v5860_v7 = vcombine.low %v16089_v53, %v5852_v19  ;;  %v5861_v35 = vcombine.high %v16089_v53, %v5852_v19  ;;  %12596 = vmatpush3.bf16.msra.mxu0 %v6867_v61  ;;  %v6011_v50 = vcombine.high %v16246_v54, %v16252_v30  ;;  %v6235_v63 = vrot.slane %v6228_v57, %v15564_v24 }
0x19de   : > { %v6052_v3 = vcombine.low %v6035_v11, %v6043_v4  ;;  %12607 = vmatprep.subr.bf16.mxu0 %v17629_v0  ;;  %v5876_v53 = vcombine.low %v16095_v48, %v5859_v40  ;;  %v5877_v38 = vcombine.high %v16095_v48, %v5859_v40  ;;  %v5925_v19 = vrot.slane %v5911_v49, %v15564_v24 }
0x19df   : > { %v5868_v55 = vrot.slane %v5860_v7, %v15568_v29  ;;  %v5875_v42 = vrot.slane %v5861_v35, %v15568_v29  ;;  %v5926_v39 = vcombine.low %v16098_v58, %v5918_v44  ;;  %v5927_v11 = vcombine.high %v16098_v58, %v5918_v44 }
0x19e0   : > { %v16282_v26 = vrot.slane %v6052_v3, %v15568_v29  ;;  %12598 = vmatmul.mubr.msk.bf16.vlgmr.msra.gmra.mrb[68].mxu0 %vm3072_vm2, %v16054_v46  ;;  %v5884_v56 = vrot.slane %v5876_v53, %v15568_v29  ;;  %v5891_v4 = vrot.slane %v5877_v38, %v15568_v29  ;;  %v5943_v38 = vcombine.high %v16105_v51, %v5925_v19 }
0x19e1   : > { %v6262_v61 = vcombine.low %v5868_v55, %v5875_v42  ;;  %v11996_v7 = vcombine.high %v5868_v55, %v5875_v42  ;;  %12609 = vmatprep.mubr.msk.bf16.mxu0 %vm14637_vm0, %v17629_v0  ;;  %v5934_v58 = vrot.slane %v5926_v39, %v15568_v29  ;;  %v5941_v40 = vrot.slane %v5927_v11, %v15568_v29 }
0x19e2   : > { %v6061_v48 = vcombine.high %v16273_v16, %v16282_v26  ;;  %v6278_v44 = vcombine.low %v5884_v56, %v5891_v4  ;;  %v11997_v53 = vcombine.high %v5884_v56, %v5891_v4  ;;  %v5942_v42 = vcombine.low %v16105_v51, %v5925_v19 }
0x19e3   : > { %v6269_v35 = vrot.slane %v6262_v61, %v15564_v24  ;;  %v6277_v3 = vrot.slane %v11996_v7, %v15564_v24  ;;  %v6312_v45 = vcombine.low %v5934_v58, %v5941_v40  ;;  %v11998_v39 = vcombine.high %v5934_v58, %v5941_v40  ;;  %v13339_v40 = vld [vmem:[%s17808_s16] sm:$0xff]   ;;  %s17814_s16 = sld [smem:[#allocation134_spill]] }
0x19e4   : > { %v13266_v55 = vpack.i.bf16 %v6061_v48, %v6011_v50  ;;  %v6285_v21 = vrot.slane %v6278_v44, %v15564_v24  ;;  %v6293_v49 = vrot.slane %v11997_v53, %v15564_v24  ;;  %v6085_v11 = vrot.slane %v6078_v36, %v15564_v24  ;;  %12561 = vmatprep.subr.bf16.mxu1 %v13339_v40 }
0x19e5   : > { %v5950_v50 = vrot.slane %v5942_v42, %v15568_v29  ;;  %v5957_v56 = vrot.slane %v5943_v38, %v15568_v29  ;;  %v6319_v4 = vrot.slane %v6312_v45, %v15564_v24  ;;  %v17810_v51 = vcombine.high %v16153_v59, %v16156_v60  ;;  %12562 = vmatpush3.bf16.msra.mxu1 %v13339_v40 }
0x19e6   : > { %13267 = vrot.lane.b32.xlu0 %v13266_v55, %s17809_s3  ;;  %v6327_v61 = vrot.slane %v11998_v39, %v15564_v24  ;;  %v6094_v7 = vcombine.low %v16163_v43, %v16166_v27  ;;  %v17811_v36 = vcombine.low %v16175_v47, %v16178_v9  ;;  %v17812_v58 = vcombine.high %v16175_v47, %v16178_v9 }
0x19e7   : > { %v6093_v19 = vrot.slane %v17810_v51, %v15564_v24  ;;  %v6328_v44 = vcombine.low %v5950_v50, %v5957_v56  ;;  %v11999_v53 = vcombine.high %v5950_v50, %v5957_v56  ;;  %v6144_v60 = vcombine.low %v16193_v10, %v16196_v25  ;;  %12587 = vmatprep.subr.bf16.mxu1 %v17629_v0 }
0x19e8   : > { %v6135_v48 = vrot.slane %v17811_v36, %v15564_v24  ;;  %v6143_v45 = vrot.slane %v17812_v58, %v15564_v24  ;;  %v16332_v55 = vrot.slane %v6094_v7, %v15568_v29  ;;  %v6185_v43 = vrot.slane %v6178_v31, %v15564_v24 }
0x19e9   : > { %v6102_v59 = vcombine.low %v6085_v11, %v6093_v19  ;;  %v6193_v47 = vrot.slane %v11993_v2, %v15564_v24  ;;  %v6335_v9 = vrot.slane %v6328_v44, %v15564_v24  ;;  %v6343_v42 = vrot.slane %v11999_v53, %v15564_v24  ;;  %s17815_s5 = smov %s17814_s16 }
0x19ea   : > { %v6152_v27 = vcombine.low %v6135_v48, %v6143_v45  ;;  %v6151_v25 = vrot.slane %v6144_v60, %v15568_v29  ;;  %v6194_v31 = vcombine.low %v16221_v37, %v16224_v17  ;;  %v17813_v11 = vcombine.high %v16215_v20, %v16218_v52 }
0x19eb   : > { %v6109_v10 = vrot.slane %v6102_v59, %v15568_v29  ;;  %v6202_v39 = vcombine.low %v6185_v43, %v6193_v47  ;;  %v6244_v37 = vcombine.low %v16231_v41, %v16234_v34  ;;  %v6294_v7 = vcombine.low %v6269_v35, %v6277_v3 }
0x19ec   : > { %v6159_v38 = vrot.slane %v6152_v27, %v15568_v29  ;;  %v6243_v50 = vrot.slane %v17813_v11, %v15564_v24  ;;  %v6201_v51 = vrot.slane %v6194_v31, %v15568_v29  ;;  %v6302_v36 = vcombine.low %v6285_v21, %v6293_v49  ;;  %v6852_v27 = vpop.permute.xlu0 %6851 }
0x19ed   : > { %v6110_v18 = vcombine.low %v16332_v55, %v6109_v10  ;;  %v6111_v2 = vcombine.high %v16332_v55, %v6109_v10  ;;  %v6209_v57 = vrot.slane %v6202_v39, %v15568_v29  ;;  %v6344_v45 = vcombine.low %v6319_v4, %v6327_v61 }
0x19ee   : > { %v6161_v17 = vcombine.high %v6151_v25, %v6159_v38  ;;  %v6160_v56 = vcombine.low %v6151_v25, %v6159_v38  ;;  %v6252_v19 = vcombine.low %v6235_v63, %v6243_v50  ;;  %v6251_v40 = vrot.slane %v6244_v37, %v15568_v29  ;;  %v13340_v50 = vld [vmem:[%s17814_s16] sm:$0xff]   ;;  %s17818_s16 = sld [smem:[#allocation77_spill]] }
0x19ef   : > { %v6210_v58 = vcombine.low %v6201_v51, %v6209_v57  ;;  %v6309_v52 = vrot.slane %v6302_v36, %v15568_v29  ;;  %v6352_v44 = vcombine.low %v6335_v9, %v6343_v42  ;;  %v6211_v41 = vcombine.high %v6201_v51, %v6209_v57 }
0x19f0   : > { %v13271_v48 = vpack.i.bf16 %v6161_v17, %v6111_v2  ;;  %v6259_v20 = vrot.slane %v6252_v19, %v15568_v29  ;;  %v6301_v34 = vrot.slane %v6294_v7, %v15568_v29  ;;  %v6351_v35 = vrot.slane %v6344_v45, %v15568_v29 }
0x19f1   : > { %v6359_v21 = vrot.slane %v6352_v44, %v15568_v29  ;;  %v17816_v42 = vcombine.low %v16273_v16, %v16282_v26  ;;  %v17817_v25 = vcombine.low %v16246_v54, %v16252_v30  ;;  %v13341_v30 = vld [vmem:[%s17815_s5 + $0x8] sm:$0xff]  }
0x19f2   : > { %13272 = vrot.lane.b32.xlu0 %v13271_v48, %s17809_s3  ;;  %v6261_v53 = vcombine.high %v6251_v40, %v6259_v20  ;;  %v6260_v59 = vcombine.low %v6251_v40, %v6259_v20  ;;  %v6310_v49 = vcombine.low %v6301_v34, %v6309_v52  ;;  %v6311_v4 = vcombine.high %v6301_v34, %v6309_v52 }
0x19f3   : > { %v6361_v61 = vcombine.high %v6351_v35, %v6359_v21  ;;  %v6360_v60 = vcombine.low %v6351_v35, %v6359_v21 }
0x19f4   : > { %v13276_v3 = vpack.i.bf16 %v6261_v53, %v6211_v41 }
0x19f5   : > { %v13281_v55 = vpack.i.bf16 %v6361_v61, %v6311_v4 }
0x19f6   : > { %13277 = vrot.lane.b32.xlu0 %v13276_v3, %s17809_s3 }
0x19fa   : > { %13282 = vrot.lane.b32.xlu0 %v13281_v55, %s17809_s3 }
0x19fe   : > { %6847 = vrot.lane.b32.xlu0 %v16054_v46, %s17798_s15 }
0x1a1c   : > { %6875 = vxpose.xlu0.c.b16.start.end [1/1] (short) (narrow) %v6852_v27, 16 }
0x1a58   : > { %v13268_v43 = vpop.permute.xlu0 %13267 }
0x1a59   : > { %v13270_v47 = vunpack.i.h.bf16 %v13268_v43  ;;  %v13269_v9 = vunpack.i.l.bf16 %v13268_v43 }
0x1a5b   : > { %v6395_v10 = vsel %vm3161_vm3, %v17816_v42, %v13270_v47  ;;  %v6394_v38 = vsel %vm3161_vm3, %v17817_v25, %v13269_v9 }
0x1a5c   : > { %v6402_v31 = vpack.c.bf16 %v6395_v10, %v6394_v38 }
0x1a5e   : > { %12563 = vmatprep.mubr.msk.bf16.mxu1 %vm3072_vm2, %v6402_v31 }
0x1a64   : > { %v13273_v46 = vpop.permute.xlu0 %13272 }
0x1a65   : > { %v13275_v39 = vunpack.i.h.bf16 %v13273_v46  ;;  %v13274_v63 = vunpack.i.l.bf16 %v13273_v46 }
0x1a67   : > { %v6397_v2 = vsel %vm3161_vm3, %v6160_v56, %v13275_v39  ;;  %v6396_v11 = vsel %vm3161_vm3, %v6110_v18, %v13274_v63 }
0x1a68   : > { %v6403_v16 = vpack.c.bf16 %v6397_v2, %v6396_v11  ;;  %v13278_v26 = vpop.permute.xlu0 %13277  ;;  %v12016_v2 = vld [vmem:[#allocation43] ss:$0 sm:$0xff] }
0x1a69   : > { %v13280_v37 = vunpack.i.h.bf16 %v13278_v26  ;;  %v13279_v54 = vunpack.i.l.bf16 %v13278_v26 }
0x1a6a   : > { %12564 = vmatmul.mubr.msk.bf16.vlgmr.msra.gmra.mrb[52].mxu1 %vm3072_vm2, %v6403_v16 }
0x1a6b   : > { %12588 = vmatpush3.bf16.msra.mxu1 %v13340_v50  ;;  %v6399_v17 = vsel %vm3161_vm3, %v6260_v59, %v13280_v37  ;;  %v6398_v51 = vsel %vm3161_vm3, %v6210_v58, %v13279_v54 }
0x1a6c   : > { %12589 = vmatprep.subr.bf16.mxu1 %v17629_v0  ;;  %v6404_v57 = vpack.c.bf16 %v6399_v17, %v6398_v51  ;;  %v13283_v19 = vpop.permute.xlu0 %13282 }
0x1a6d   : > { %v13285_v56 = vunpack.i.h.bf16 %v13283_v19  ;;  %v13284_v7 = vunpack.i.l.bf16 %v13283_v19 }
0x1a6e   : > { %12567 = vmatprep.mubr.msk.bf16.mxu1 %vm3072_vm2, %v6404_v57 }
0x1a6f   : > { %12590 = vmatpush3.bf16.msra.mxu1 %v13341_v30  ;;  %v6401_v18 = vsel %vm3161_vm3, %v6360_v60, %v13285_v56  ;;  %v6400_v36 = vsel %vm3161_vm3, %v6310_v49, %v13284_v7 }
0x1a70   : > { %12601 = vmatprep.subr.bf16.mxu1 %v17629_v0  ;;  %v6405_v48 = vpack.c.bf16 %v6401_v18, %v6400_v36  ;;  %v6848_v58 = vpop.permute.xlu0 %6847  ;;  %v12000_v36 = vld [vmem:[%s17818_s16] ss:$0 sm:$0xff]  ;;  %s17827_s16 = sld [smem:[#allocation135_spill]] }
0x1a72   : > { %12568 = vmatmul.mubr.msk.bf16.gmra.mrb[56].mxu1 %vm3072_vm2, %v6405_v48 }
0x1a73   : > { %12591 = vmatprep.mubr.msk.bf16.mxu1 %vm14637_vm0, %v17629_v0 }
0x1a76   : > { %s17828_s5 = smov %s17827_s16 }
0x1a7a   : > { %12592 = vmatmul.mubr.msk.bf16.vlgmr.msra.gmra.mrb[60].mxu1 %vm2856_vm1, %v15826_v32 }
0x1a7b   : > { %12603 = vmatprep.mubr.msk.bf16.mxu1 %vm14637_vm0, %v17629_v0 }
0x1a82   : > { %v6883_v45 = vpop.trf.xlu0 }
0x1a83   : > { %12602 = vmatpush3.bf16.msra.mxu1 %v6883_v45 }
0x1a84   : > { %12613 = vmatprep.subr.bf16.mxu1 %v17629_v0 }
0x1a86   : > { %12604 = vmatmul.mubr.msk.bf16.vlgmr.msra.gmra.mrb[64].mxu1 %vm3072_vm2, %v6848_v58  ;;  %v17819_v58 = vunpack.c.l.bf16 %v15596_v62 }
0x1a87   : > { %12615 = vmatprep.mubr.msk.bf16.mxu1 %vm14637_vm0, %v17629_v0 }
0x1ab3   : > { %v6928_v40 = vpop.f32.mrb[68].mxu0 }
0x1ab4   : > { %v6977_v20 = vmul.f32 0.25, %v6928_v40  ;;  %v12599_v52 = vpop.f32.mrb[69].mxu0 }
0x1ab5   : > { %v6931_v44 = vpop.f32.mrb[70].mxu0  ;;  %v17820_v52 = vunpack.c.h.bf16 %v15596_v62 }
0x1ab6   : > { %v12600_v41 = vpop.f32.mrb[71].mxu0  ;;  %v6979_v32 = vsel %vm3161_vm3, %v6977_v20, -inf }
0x1ab7   : > { %6980 = vmax.xlane.f32.xlu0 %v6979_v32  ;;  %v17821_v32 = vunpack.c.l.bf16 %v15598_v1 }
0x1b3d   : > { %v12565_v34 = vpop.f32.mrb[52].mxu1 }
0x1b3e   : > { %v6467_v53 = vpop.f32.mrb[53].mxu1 }
0x1b3f   : > { %v12566_v59 = vpop.f32.mrb[54].mxu1  ;;  %v6468_v48 = vadd.f32 %v12000_v36, %v6467_v53 }
0x1b40   : > { %v6470_v35 = vpop.f32.mrb[55].mxu1 }
0x1b41   : > { %v16431_v45 = vadd.f32 %v6468_v48, %v17819_v58  ;;  %v6471_v40 = vadd.f32 %v12000_v36, %v6470_v35  ;;  %v17822_v35 = vunpack.c.h.bf16 %v15598_v1  ;;  %v13342_v48 = vld [vmem:[%s17827_s16] sm:$0xff]   ;;  %s17829_s16 = sld [smem:[#allocation132_spill]] }
0x1b43   : > { %v16435_v44 = vadd.f32 %v6471_v40, %v17820_v52  ;;  %v6506_v41 = vsel %vm2856_vm1, %v16431_v45, 0.0 }
0x1b44   : > { %v6981_v21 = vpop.xlane.xlu0 %6980 }
0x1b45   : > { %v16408_v49 = vpop.f32.mrb[56].mxu1  ;;  %v6985_v3 = vsub.f32 %v6977_v20, %v6981_v21  ;;  %v6476_v20 = vadd.f32 %v12565_v34, %v12000_v36  ;;  %v6509_v53 = vsel %vm2856_vm1, %v16435_v44, 0.0 }
0x1b46   : > { %v16410_v4 = vpop.f32.mrb[57].mxu1 }
0x1b47   : > { %v16412_v61 = vpop.f32.mrb[58].mxu1  ;;  %v6987_v60 = vmul.f32 1.442695, %v6985_v3  ;;  %v16441_v21 = vadd.f32 %v6476_v20, %v17821_v32  ;;  %v6479_v3 = vadd.f32 %v12566_v59, %v12000_v36  ;;  %v13343_v20 = vld [vmem:[%s17828_s5 + $0x8] sm:$0xff]   ;;  %s17830_s5 = smov %s17829_s16 }
0x1b48   : > { %v16414_v55 = vpop.f32.mrb[59].mxu1 }
0x1b49   : > { %13459 = vpow2.f32 %v6987_v60  ;;  %v16447_v34 = vadd.f32 %v6479_v3, %v17822_v35  ;;  %v6512_v62 = vsel %vm2856_vm1, %v16441_v21, 0.0 }
0x1b4b   : > { %v6515_v60 = vsel %vm2856_vm1, %v16447_v34, 0.0 }
0x1b4d   : > { %v6839_v27 = vpop.f32.mrb[60].mxu1 }
0x1b4e   : > { %v12593_v43 = vpop.f32.mrb[61].mxu1  ;;  %v6840_v11 = vadd.f32 %v12016_v2, %v6839_v27  ;;  %v6538_v27 = vmul.f32 %v16431_v45, %v16431_v45  ;;  %v6495_v2 = vadd.f32 %v16412_v61, %v12000_v36 }
0x1b4f   : > { %v6842_v47 = vpop.f32.mrb[62].mxu1  ;;  %v6539_v43 = vmul.f32 %v16435_v44, %v16435_v44 }
0x1b50   : > { %v12594_v9 = vpop.f32.mrb[63].mxu1  ;;  %v6854_v50 = vpack.c.bf16 %v6840_v11, %v6840_v11  ;;  %v6546_v59 = vsel %vm2856_vm1, %v6538_v27, 0.0  ;;  %v6540_v47 = vmul.f32 %v16441_v21, %v16441_v21 }
0x1b51   : > { %v6549_v1 = vsel %vm2856_vm1, %v6539_v43, 0.0  ;;  %v6487_v9 = vadd.f32 %v12000_v36, %v16414_v55  ;;  %v6484_v55 = vadd.f32 %v12000_v36, %v16410_v4 }
0x1b53   : > { %v13460_v42 = vpop.eup %13459 }
0x1b54   : > { %v6991_v10 = vsel %vm3161_vm3, %v13460_v42, 0.0 }
0x1b55   : > { %6992 = vadd.xlane.f32.xlu1 %v6991_v10  ;;  %v6541_v10 = vmul.f32 %v16447_v34, %v16447_v34 }
0x1b59   : > { %v6971_v25 = vpop.f32.mrb[64].mxu1 }
0x1b5a   : > { %v6978_v38 = vmul.f32 0.25, %v6971_v25  ;;  %v12605_v31 = vpop.f32.mrb[65].mxu1  ;;  %v6492_v25 = vadd.f32 %v16408_v49, %v12000_v36  ;;  %v17825_v49 = vunpack.c.l.bf16 %v15606_v8 }
0x1b5b   : > { %v6974_v46 = vpop.f32.mrb[66].mxu1 }
0x1b5c   : > { %v12606_v39 = vpop.f32.mrb[67].mxu1  ;;  %v6982_v63 = vsel %vm3161_vm3, %v6978_v38, -inf  ;;  %v6555_v46 = vsel %vm2856_vm1, %v6541_v10, 0.0 }
0x1b5d   : > { %6983 = vmax.xlane.f32.xlu0 %v6982_v63  ;;  %v17824_v39 = vunpack.c.l.bf16 %v15614_v14 }
0x1b5f   : > { %v16473_v63 = vadd.f32 %v6492_v25, %v17824_v39 }
0x1b73   : > { %6856 = vrot.lane.b32.xlu0 %v6854_v50, %s17798_s15 }
0x1b91   : > { %7003 = vxpose.xlu0.c.b16.start.end [1/1] (short) (narrow) %v6854_v50, 16  ;;  %v16481_v50 = vadd.f32 %v6484_v55, %v17825_v49 }
0x1b93   : > { %v6542_v61 = vmul.f32 %v16481_v50, %v16481_v50 }
0x1be2   : > { %v6993_v16 = vpop.xlane.xlu1 %6992 }
0x1be3   : > { %13461 = vrcp.f32 %v6993_v16  ;;  %v17826_v16 = vunpack.c.h.bf16 %v15614_v14 }
0x1bea   : > { %v6984_v26 = vpop.xlane.xlu0 %6983 }
0x1beb   : > { %v6986_v37 = vsub.f32 %v6978_v38, %v6984_v26  ;;  %v17823_v38 = vunpack.c.h.bf16 %v15606_v8  ;;  %v16485_v26 = vadd.f32 %v6495_v2, %v17826_v16 }
0x1bed   : > { %v13462_v54 = vpop.eup %13461  ;;  %v6989_v30 = vmul.f32 1.442695, %v6986_v37  ;;  %v16468_v31 = vadd.f32 %v6487_v9, %v17823_v38  ;;  %v6524_v37 = vsel %vm2856_vm1, %v16473_v63, 0.0  ;;  %v6527_v4 = vsel %vm2856_vm1, %v16485_v26, 0.0 }
0x1bee   : > { %v6999_v17 = vmul.f32 %v13462_v54, %v13460_v42  ;;  %v6857_v7 = vpop.permute.xlu0 %6856  ;;  %v6552_v42 = vsel %vm2856_vm1, %v6540_v47, 0.0  ;;  %v6558_v54 = vsel %vm2856_vm1, %v6542_v61, 0.0 }
0x1bef   : > { %13463 = vpow2.f32 %v6989_v30  ;;  %v6521_v11 = vsel %vm2856_vm1, %v16468_v31, 0.0  ;;  %v6543_v8 = vmul.f32 %v16468_v31, %v16468_v31  ;;  %v6544_v30 = vmul.f32 %v16473_v63, %v16473_v63 }
0x1bf0   : > { %v7001_v51 = vpack.c.bf16 %v6999_v17, %v6999_v17 }
0x1bf1   : > { %v6561_v14 = vsel %vm2856_vm1, %v6543_v8, 0.0  ;;  %v6564_v17 = vsel %vm2856_vm1, %v6544_v30, 0.0 }
0x1bf2   : > { %v7039_v57 = vsel %vm3161_vm3, %v7001_v51, 0  ;;  %v6545_v51 = vmul.f32 %v16485_v26, %v16485_v26 }
0x1bf3   : > { %12608 = vmatpush3.bf16.xpose.msra.mxu0 %v7039_v57 }
0x1bf4   : > { %12619 = vmatprep.subr.bf16.mxu0 %v17629_v0  ;;  %v6567_v57 = vsel %vm2856_vm1, %v6545_v51, 0.0 }
0x1bf7   : > { %v7011_v18 = vpop.trf.xlu0 }
0x1bf9   : > { %v16421_v19 = vpop.eup %13463 }
0x1bfa   : > { %v6994_v56 = vsel %vm3161_vm3, %v16421_v19, 0.0  ;;  %12610 = vmatmul.mubr.msk.bf16.vlgmr.msra.gmra.mrb[72].mxu0 %vm3161_vm3, %v7011_v18 }
0x1bfb   : > { %6995 = vadd.xlane.f32.xlu1 %v6994_v56  ;;  %12623 = vmatprep.mubr.msk.bf16.mxu0 %vm14637_vm0, %v17629_v0 }
0x1c28   : > { %7019 = vxpose.xlu1.c.b16.start.end [1/1] (short) (narrow) %v6857_v7, 16 }
0x1c35   : > { %6507 = vadd.xlane.f32.xlu1 %v6506_v41 }
0x1c39   : > { %6510 = vadd.xlane.f32.xlu1 %v6509_v53 }
0x1c3d   : > { %6513 = vadd.xlane.f32.xlu1 %v6512_v62 }
0x1c41   : > { %6516 = vadd.xlane.f32.xlu1 %v6515_v60 }
0x1c45   : > { %6547 = vadd.xlane.f32.xlu1 %v6546_v59 }
0x1c49   : > { %6550 = vadd.xlane.f32.xlu1 %v6549_v1 }
0x1c4d   : > { %6553 = vadd.xlane.f32.xlu1 %v6552_v42 }
0x1c51   : > { %6556 = vadd.xlane.f32.xlu1 %v6555_v46 }
0x1c55   : > { %6522 = vadd.xlane.f32.xlu1 %v6521_v11 }
0x1c59   : > { %6525 = vadd.xlane.f32.xlu1 %v6524_v37 }
0x1c5d   : > { %6528 = vadd.xlane.f32.xlu1 %v6527_v4 }
0x1c61   : > { %6559 = vadd.xlane.f32.xlu1 %v6558_v54 }
0x1c65   : > { %6562 = vadd.xlane.f32.xlu1 %v6561_v14 }
0x1c69   : > { %6565 = vadd.xlane.f32.xlu1 %v6564_v17  ;;  %v16510_v17 = vld [vmem:[#allocation5] ss:$0 sm:$0xff] }
0x1c6d   : > { %6568 = vadd.xlane.f32.xlu1 %v6567_v57 }
0x1c88   : > { %v6996_v56 = vpop.xlane.xlu1 %6995 }
0x1c89   : > { %13465 = vrcp.f32 %v6996_v56 }
0x1c8e   : > { %v7027_v40 = vpop.trf.xlu1 }
0x1c93   : > { %v13466_v7 = vpop.eup %13465 }
0x1c94   : > { %v7000_v18 = vmul.f32 %v13466_v7, %v16421_v19 }
0x1c96   : > { %v7002_v36 = vpack.c.bf16 %v7000_v18, %v7000_v18 }
0x1c98   : > { %v7086_v58 = vsel %vm3161_vm3, %v7002_v36, 0  ;;  %v16514_v36 = vld [vmem:[#allocation2] ss:$0 sm:$0xff] }
0x1c99   : > { %12614 = vmatpush3.bf16.xpose.msra.mxu1 %v7086_v58 }
0x1c9a   : > { %12627 = vmatprep.subr.bf16.mxu1 %v13342_v48 }
0x1ca0   : > { %12616 = vmatmul.mubr.msk.bf16.vlgmr.msra.gmra.mrb[68].mxu1 %vm3161_vm3, %v7027_v40 }
0x1ca1   : > { %12628 = vmatpush3.bf16.msra.mxu1 %v13342_v48 }
0x1ca2   : > { %12629 = vmatprep.subr.bf16.mxu1 %v13343_v20 }
0x1ca5   : > { %12630 = vmatpush3.bf16.msra.mxu1 %v13343_v20 }
0x1ca6   : > { %12659 = vmatprep.subr.bf16.mxu1 %v17629_v0 }
0x1cc2   : > { %v6508_v52 = vpop.xlane.xlu1 %6507 }
0x1cc3   : > { %v6530_v19 = vmul.f32 0.03125, %v6508_v52 }
0x1cc5   : > { %v6578_v35 = vmul.f32 %v6530_v19, %v6530_v19  ;;  %v6610_v14 = vsub.f32 %v16431_v45, %v6530_v19 }
0x1cc6   : > { %v6511_v41 = vpop.xlane.xlu1 %6510 }
0x1cc7   : > { %v6531_v62 = vmul.f32 0.03125, %v6511_v41 }
0x1cc9   : > { %v6579_v43 = vmul.f32 %v6531_v62, %v6531_v62  ;;  %v6611_v56 = vsub.f32 %v16435_v44, %v6531_v62 }
0x1cca   : > { %v6514_v32 = vpop.xlane.xlu1 %6513 }
0x1ccb   : > { %v6532_v1 = vmul.f32 0.03125, %v6514_v32 }
0x1ccd   : > { %v6580_v25 = vmul.f32 %v6532_v1, %v6532_v1  ;;  %v7075_v2 = vpop.f32.mrb[72].mxu0  ;;  %v6612_v58 = vsub.f32 %v16441_v21, %v6532_v1 }
0x1cce   : > { %v6517_v3 = vpop.xlane.xlu1 %6516  ;;  %7129 = vxpose.xlu0.b32.start [1/2] (short) (narrow) %v7075_v2, 8  ;;  %v12611_v49 = vpop.f32.mrb[73].mxu0 }
0x1ccf   : > { %v6533_v38 = vmul.f32 0.03125, %v6517_v3  ;;  %v7078_v61 = vpop.f32.mrb[74].mxu0 }
0x1cd0   : > { %v12612_v54 = vpop.f32.mrb[75].mxu0 }
0x1cd1   : > { %v6581_v16 = vmul.f32 %v6533_v38, %v6533_v38  ;;  %v6613_v44 = vsub.f32 %v16447_v34, %v6533_v38  ;;  %v16545_v38 = vld [vmem:[#allocation13] ss:$0 sm:$0xff] }
0x1cd2   : > { %v6548_v53 = vpop.xlane.xlu1 %6547  ;;  %7130 = vxpose.xlu0.b32.end [2/2] (short) (narrow) %v7078_v61, 8 }
0x1cd3   : > { %v6570_v60 = vmul.f32 0.03125, %v6548_v53 }
0x1cd5   : > { %v6586_v27 = vsub.f32 %v6570_v60, %v6578_v35 }
0x1cd6   : > { %v6551_v59 = vpop.xlane.xlu1 %6550 }
0x1cd7   : > { %v6594_v47 = vadd.f32 1e-05, %v6586_v27  ;;  %v6571_v9 = vmul.f32 0.03125, %v6551_v59 }
0x1cd9   : > { %13467 = vrsqrt.f32 %v6594_v47  ;;  %v6587_v42 = vsub.f32 %v6571_v9, %v6579_v43 }
0x1cda   : > { %v6554_v10 = vpop.xlane.xlu1 %6553 }
0x1cdb   : > { %v6595_v46 = vadd.f32 1e-05, %v6587_v42  ;;  %v6572_v39 = vmul.f32 0.03125, %v6554_v10  ;;  %v13344_v10 = vld [vmem:[%s17829_s16] sm:$0xff]   ;;  %s17831_s16 = smov 16  }
0x1cdc   : > { %12620 = vmatpush3.bf16.msra.mxu0 %v13344_v10 }
0x1cdd   : > { %13469 = vrsqrt.f32 %v6595_v46  ;;  %v6588_v55 = vsub.f32 %v6572_v39, %v6580_v25  ;;  %12621 = vmatprep.subr.bf16.mxu0 %v17629_v0 }
0x1cde   : > { %v6557_v11 = vpop.xlane.xlu1 %6556 }
0x1cdf   : > { %v6596_v37 = vadd.f32 1e-05, %v6588_v55  ;;  %v6573_v4 = vmul.f32 0.03125, %v6557_v11 }
0x1ce1   : > { %13471 = vrsqrt.f32 %v6596_v37  ;;  %v6589_v8 = vsub.f32 %v6573_v4, %v6581_v16 }
0x1ce3   : > { %v13468_v30 = vpop.eup %13467  ;;  %v6597_v51 = vadd.f32 1e-05, %v6589_v8 }
0x1ce4   : > { %v6618_v57 = vmul.f32 %v13468_v30, %v6610_v14 }
0x1ce5   : > { %13473 = vrsqrt.f32 %v6597_v51 }
0x1ce6   : > { %v6633_v7 = vmul.f32 %v16510_v17, %v6618_v57 }
0x1ce7   : > { %v13470_v18 = vpop.eup %13469 }
0x1ce8   : > { %v6619_v48 = vmul.f32 %v13470_v18, %v6611_v56  ;;  %v16519_v45 = vadd.f32 %v16514_v36, %v6633_v7 }
0x1cea   : > { %v6634_v40 = vmul.f32 %v16510_v17, %v6619_v48  ;;  %v7413_v3 = vadd.f32 %v15602_v5, %v16519_v45 }
0x1ceb   : > { %v13472_v20 = vpop.eup %13471 }
0x1cec   : > { %v6620_v52 = vmul.f32 %v13472_v20, %v6612_v58  ;;  %v16522_v41 = vadd.f32 %v16514_v36, %v6634_v40 }
0x1cee   : > { %v6635_v32 = vmul.f32 %v16510_v17, %v6620_v52  ;;  %v7414_v21 = vadd.f32 %v15604_v6, %v16522_v41 }
0x1cef   : > { %v13474_v19 = vpop.eup %13473 }
0x1cf0   : > { %v6621_v53 = vmul.f32 %v13474_v19, %v6613_v44  ;;  %v7421_v35 = vpack.c.bf16 %v7414_v21, %v7413_v3  ;;  %v16533_v60 = vadd.f32 %v16514_v36, %v6635_v32  ;;  %v13345_v21 = vld [vmem:[%s17830_s5 + $0x8] sm:$0xff]  }
0x1cf1   : > { %12622 = vmatpush3.bf16.msra.mxu0 %v13345_v21 }
0x1cf2   : > { %v6636_v62 = vmul.f32 %v16510_v17, %v6621_v53  ;;  %12631 = vmatprep.mubr.msk.bf16.mxu1 %vm2856_vm1, %v7421_v35  ;;  %v7415_v27 = vadd.f32 %v15610_v12, %v16533_v60  ;;  %12639 = vmatprep.subr.bf16.mxu0 %v17629_v0 }
0x1cf4   : > { %v16536_v34 = vadd.f32 %v16514_v36, %v6636_v62 }
0x1cf6   : > { %v7416_v59 = vadd.f32 %v15612_v13, %v16536_v34 }
0x1cf8   : > { %v7422_v43 = vpack.c.bf16 %v7416_v59, %v7415_v27 }
0x1cfa   : > { %12632 = vmatmul.mubr.msk.bf16.vlgmr.msra.gmra.mrb[72].mxu1 %vm2856_vm1, %v7422_v43 }
0x1d4e   : > { %v7145_v61 = vpop.trf.xlu0 }
0x1d4f   : > { %v7193_v54 = vcombine.high %v7145_v61, %v17629_v0  ;;  %v7200_v14 = vrot.slane %v7145_v61, %v15564_v24 }
0x1d51   : > { %v7207_v57 = vrot.slane %v7193_v54, %v15564_v24 }
0x1d73   : > { %v7122_v1 = vpop.f32.mrb[68].mxu1 }
0x1d74   : > { %v12617_v47 = vpop.f32.mrb[69].mxu1  ;;  %7161 = vxpose.xlu0.b32.start [1/2] (short) (narrow) %v7122_v1, 8 }
0x1d75   : > { %v7125_v9 = vpop.f32.mrb[70].mxu1 }
0x1d76   : > { %v12618_v42 = vpop.f32.mrb[71].mxu1 }
0x1d78   : > { %7162 = vxpose.xlu0.b32.end [2/2] (short) (narrow) %v7125_v9, 8 }
0x1dcd   : > { %v12633_v25 = vpop.f32.mrb[72].mxu1 }
0x1dce   : > { %v7494_v46 = vpop.f32.mrb[73].mxu1  ;;  %v7503_v55 = vadd.f32 %v12633_v25, %v16545_v38  ;;  %v6518_v25 = vsel %vm2856_vm1, %v16481_v50, 0.0 }
0x1dcf   : > { %v12634_v39 = vpop.f32.mrb[74].mxu1  ;;  %v7495_v49 = vadd.f32 %v16545_v38, %v7494_v46 }
0x1dd0   : > { %v7506_v2 = vadd.f32 %v12634_v39, %v16545_v38  ;;  %v7497_v11 = vpop.f32.mrb[75].mxu1 }
0x1dd1   : > { %v7498_v16 = vadd.f32 %v16545_v38, %v7497_v11 }
0x1dd2   : > { %v16551_v37 = vpack.c.bf16 %v7506_v2, %v7503_v55  ;;  %v6523_v2 = vpop.xlane.xlu1 %6522 }
0x1dd3   : > { %v16553_v4 = vpack.c.bf16 %v7498_v16, %v7495_v49 }
0x1dd6   : > { %v6526_v11 = vpop.xlane.xlu1 %6525 }
0x1dda   : > { %v6529_v49 = vpop.xlane.xlu1 %6528 }
0x1dde   : > { %v6560_v16 = vpop.xlane.xlu1 %6559 }
0x1de2   : > { %v6563_v61 = vpop.xlane.xlu1 %6562 }
0x1de6   : > { %v6566_v54 = vpop.xlane.xlu1 %6565 }
0x1df4   : > { %v7177_v8 = vpop.trf.xlu0 }
0x1df5   : > { %v7208_v30 = vcombine.high %v7177_v8, %v17629_v0  ;;  %v7215_v51 = vrot.slane %v7177_v8, %v15564_v24  ;;  %v6569_v8 = vpop.xlane.xlu1 %6568 }
0x1df7   : > { %v7222_v56 = vrot.slane %v7208_v30, %v15564_v24  ;;  %v7223_v7 = vcombine.low %v7200_v14, %v7215_v51  ;;  %v7224_v18 = vcombine.high %v7200_v14, %v7215_v51  ;;  %v6537_v14 = vmul.f32 0.03125, %v6529_v49 }
0x1df8   : > { %v6535_v30 = vmul.f32 0.03125, %v6523_v2  ;;  %v6536_v51 = vmul.f32 0.03125, %v6526_v11 }
0x1df9   : > { %v7231_v48 = vrot.slane %v7223_v7, %v15568_v29  ;;  %v7238_v58 = vrot.slane %v7224_v18, %v15568_v29  ;;  %v7239_v40 = vcombine.low %v7207_v57, %v7222_v56  ;;  %v7240_v20 = vcombine.high %v7207_v57, %v7222_v56 }
0x1dfa   : > { %v6577_v57 = vmul.f32 0.03125, %v6569_v8  ;;  %v6575_v56 = vmul.f32 0.03125, %v6563_v61  ;;  %v6585_v7 = vmul.f32 %v6537_v14, %v6537_v14  ;;  %v6576_v18 = vmul.f32 0.03125, %v6566_v54 }
0x1dfb   : > { %v7247_v52 = vrot.slane %v7239_v40, %v15568_v29  ;;  %v7254_v44 = vrot.slane %v7240_v20, %v15568_v29  ;;  %v7259_v32 = vcombine.low %v7231_v48, %v7238_v58  ;;  %v12024_v3 = vcombine.high %v7231_v48, %v7238_v58 }
0x1dfc   : > { %v6583_v48 = vmul.f32 %v6535_v30, %v6535_v30  ;;  %v6584_v58 = vmul.f32 %v6536_v51, %v6536_v51  ;;  %v6593_v40 = vsub.f32 %v6577_v57, %v6585_v7 }
0x1dfd   : > { %v7266_v19 = vrot.slane %v7259_v32, %v15564_v24  ;;  %v7274_v53 = vrot.slane %v12024_v3, %v15564_v24  ;;  %v7275_v35 = vcombine.low %v7247_v52, %v7254_v44  ;;  %v12025_v62 = vcombine.high %v7247_v52, %v7254_v44 }
0x1dfe   : > { %v6591_v20 = vsub.f32 %v6575_v56, %v6583_v48  ;;  %v6592_v52 = vsub.f32 %v6576_v18, %v6584_v58  ;;  %v6601_v44 = vadd.f32 1e-05, %v6593_v40 }
0x1dff   : > { %v7282_v27 = vrot.slane %v7275_v35, %v15564_v24  ;;  %v7290_v59 = vrot.slane %v12025_v62, %v15564_v24  ;;  %v7291_v43 = vcombine.low %v7266_v19, %v7274_v53  ;;  %v6574_v53 = vmul.f32 0.03125, %v6560_v16 }
0x1e00   : > { %v6599_v32 = vadd.f32 1e-05, %v6591_v20  ;;  %v6600_v3 = vadd.f32 1e-05, %v6592_v52  ;;  %13475 = vrsqrt.f32 %v6601_v44 }
0x1e01   : > { %v7299_v1 = vcombine.low %v7282_v27, %v7290_v59  ;;  %v7298_v47 = vrot.slane %v7291_v43, %v15568_v29 }
0x1e02   : > { %13477 = vrsqrt.f32 %v6599_v32 }
0x1e03   : > { %v7306_v9 = vrot.slane %v7299_v1, %v15568_v29  ;;  %13479 = vrsqrt.f32 %v6600_v3  ;;  %v6617_v1 = vsub.f32 %v16485_v26, %v6537_v14 }
0x1e05   : > { %v7308_v42 = vcombine.high %v7298_v47, %v7306_v9  ;;  %v7307_v10 = vcombine.low %v7298_v47, %v7306_v9  ;;  %v6615_v9 = vsub.f32 %v16468_v31, %v6535_v30 }
0x1e07   : > { %7310 = vrot.lane.b32.xlu0 %v7308_v42, %s17831_s16  ;;  %v6616_v42 = vsub.f32 %v16473_v63, %v6536_v51  ;;  %s17832_s16 = sld [smem:[#allocation118_spill]] }
0x1e0a   : > { %v13476_v59 = vpop.eup %13475 }
0x1e0c   : > { %v13478_v43 = vpop.eup %13477 }
0x1e0d   : > { %v13480_v47 = vpop.eup %13479  ;;  %s17833_s5 = smov %s17832_s16  ;;  %v13346_v44 = vld [vmem:[%s17832_s16] sm:$0xff]   ;;  %s17836_s16 = sld [smem:[#allocation121_spill]] }
0x1e0e   : > { %v13347_v32 = vld [vmem:[%s17833_s5 + $0x8] sm:$0xff]   ;;  %s17838_s5 = sld [smem:[#allocation122_spill]] }
0x1e26   : > { %6519 = vadd.xlane.f32.xlu0 %v6518_v25  ;;  %v6623_v25 = vmul.f32 %v13478_v43, %v6615_v9 }
0x1e28   : > { %v6638_v2 = vmul.f32 %v16510_v17, %v6623_v25 }
0x1e2a   : > { %v16592_v63 = vadd.f32 %v16514_v36, %v6638_v2  ;;  %v12030_v2 = vld [vmem:[#allocation28] ss:$0 sm:$0xff] }
0x1e2c   : > { %v7418_v14 = vadd.f32 %v15632_v23, %v16592_v63 }
0x1e79   : > { %v7311_v46 = vpop.permute.xlu0 %7310 }
0x1e7a   : > { %v7313_v39 = vsel %vm3072_vm2, %v7307_v10, %v7311_v46  ;;  %v6625_v10 = vmul.f32 %v13476_v59, %v6617_v1  ;;  %v6624_v46 = vmul.f32 %v13480_v47, %v6616_v42 }
0x1e7b   : > { %v7314_v55 = vpack.c.bf16 %v7313_v39, %v7313_v39 }
0x1e7c   : > { %v6640_v39 = vmul.f32 %v16510_v17, %v6625_v10  ;;  %v6639_v49 = vmul.f32 %v16510_v17, %v6624_v46 }
0x1e7d   : > { %12624 = vmatmul.mubr.msk.bf16.vlgmr.msra.gmra.mrb[76].mxu0 %vm2856_vm1, %v7314_v55 }
0x1e7e   : > { %12643 = vmatprep.mubr.msk.bf16.mxu0 %vm14637_vm0, %v17629_v0  ;;  %v16588_v26 = vadd.f32 %v16514_v36, %v6640_v39  ;;  %v16595_v61 = vadd.f32 %v16514_v36, %v6639_v49  ;;  %12640 = vmatpush3.bf16.msra.mxu0 %v13346_v44  ;;  %v12031_v49 = vld [vmem:[#allocation26] ss:$0 sm:$0xff] }
0x1e7f   : > { %12641 = vmatprep.subr.bf16.mxu0 %v17629_v0 }
0x1e82   : > { %12642 = vmatpush3.bf16.msra.mxu0 %v13347_v32 }
0x1eb3   : > { %v6520_v21 = vpop.xlane.xlu0 %6519 }
0x1eb4   : > { %v6534_v19 = vmul.f32 0.03125, %v6520_v21 }
0x1eb6   : > { %v6582_v35 = vmul.f32 %v6534_v19, %v6534_v19  ;;  %v6614_v55 = vsub.f32 %v16481_v50, %v6534_v19  ;;  %v7420_v50 = vadd.f32 %v15644_v33, %v16588_v26 }
0x1eb8   : > { %v6590_v62 = vsub.f32 %v6574_v53, %v6582_v35 }
0x1eba   : > { %v6598_v27 = vadd.f32 1e-05, %v6590_v62 }
0x1ebc   : > { %13481 = vrsqrt.f32 %v6598_v27 }
0x1ec6   : > { %v13482_v11 = vpop.eup %13481 }
0x1ec7   : > { %v6622_v16 = vmul.f32 %v13482_v11, %v6614_v55 }
0x1ec9   : > { %v6637_v31 = vmul.f32 %v16510_v17, %v6622_v16  ;;  %v7419_v17 = vadd.f32 %v15636_v28, %v16595_v61 }
0x1ecb   : > { %v16598_v54 = vadd.f32 %v16514_v36, %v6637_v31  ;;  %v7424_v51 = vpack.c.bf16 %v7420_v50, %v7419_v17  ;;  %v12026_v36 = vld [vmem:[#allocation40] ss:$0 sm:$0xff]  ;;  %v16642_v50 = vld [vmem:[%s15512_s4] sm:$0xff]  ;;  %v13349_v17 = vld [vmem:[%s17834_s6 + $0x8] sm:$0xff]   ;;  %s17835_s4 = sld [smem:[#allocation117_spill]] }
0x1ecd   : > { %v7417_v8 = vadd.f32 %v15630_v22, %v16598_v54 }
0x1ecf   : > { %v7423_v30 = vpack.c.bf16 %v7418_v14, %v7417_v8 }
0x1ed1   : > { %12635 = vmatprep.mubr.msk.bf16.mxu1 %vm2856_vm1, %v7423_v30  ;;  %v7593_v30 = vpack.c.bf16 %v16522_v41, %v16519_v45 }
0x1ed2   : > { %12636 = vmatmul.mubr.msk.bf16.gmra.mrb[76].mxu1 %vm2856_vm1, %v7424_v51  ;;  %v7594_v51 = vpack.c.bf16 %v16536_v34, %v16533_v60 }
0x1ed3   : > { %12661 = vmatprep.mubr.msk.bf16.mxu1 %vm14637_vm0, %v17629_v0 }
0x1f50   : > { %v7375_v57 = vpop.f32.mrb[76].mxu0 }
0x1f51   : > { %v7376_v56 = vadd.f32 %v12026_v36, %v7375_v57  ;;  %v12625_v7 = vpop.f32.mrb[77].mxu0  ;;  %v7595_v36 = vpack.c.bf16 %v16592_v63, %v16598_v54  ;;  %v7596_v57 = vpack.c.bf16 %v16588_v26, %v16595_v61 }
0x1f52   : > { %v7378_v18 = vpop.f32.mrb[78].mxu0 }
0x1f53   : > { %v7381_v48 = vadd.f32 %v7376_v56, %v15811_v15  ;;  %v12626_v58 = vpop.f32.mrb[79].mxu0  ;;  %v13348_v15 = vld [vmem:[%s17834_s6] sm:$0xff]  }
0x1f54   : > { %12647 = vmatprep.subr.bf16.mxu0 %v13348_v15 }
0x1f55   : > { %v7382_v40 = vsel %vm2856_vm1, %v7381_v48, 0.0  ;;  %v7386_v20 = vmul.f32 %v7381_v48, %v7381_v48 }
0x1f56   : > { %7383 = vadd.xlane.f32.xlu1 %v7382_v40  ;;  %v12039_v40 = vld [vmem:[#allocation20] ss:$0 sm:$0xff] }
0x1f57   : > { %v7387_v52 = vsel %vm2856_vm1, %v7386_v20, 0.0 }
0x1f58   : > { %7388 = vadd.xlane.f32.xlu0 %v7387_v52 }
0x1f67   : > { %7709 = vrot.lane.b32.xlu1 %v16553_v4, %s17803_s1 }
0x1f6e   : > { %7711 = vrot.lane.b32.xlu0 %v16551_v37, %s17803_s1 }
0x1fa5   : > { %v12637_v3 = vpop.f32.mrb[76].mxu1 }
0x1fa6   : > { %v7510_v21 = vpop.f32.mrb[77].mxu1  ;;  %v7519_v53 = vadd.f32 %v12637_v3, %v16545_v38 }
0x1fa7   : > { %v12638_v19 = vpop.f32.mrb[78].mxu1  ;;  %v7511_v27 = vadd.f32 %v16545_v38, %v7510_v21  ;;  %v12043_v21 = vld [vmem:[#allocation22] ss:$0 sm:$0xff] }
0x1fa8   : > { %v7522_v35 = vadd.f32 %v12638_v19, %v16545_v38  ;;  %v7513_v62 = vpop.f32.mrb[79].mxu1 }
0x1fa9   : > { %v7514_v59 = vadd.f32 %v16545_v38, %v7513_v62 }
0x1faa   : > { %v16627_v43 = vpack.c.bf16 %v7522_v35, %v7519_v53 }
0x1fab   : > { %v16629_v1 = vpack.c.bf16 %v7514_v59, %v7511_v27 }
0x1fad   : > { %7713 = vrot.lane.b32.xlu1 %v16629_v1, %s17803_s1 }
0x1fb1   : > { %7715 = vrot.lane.b32.xlu1 %v16627_v43, %s17803_s1 }
0x1fd4   : > { %7741 = vxpose.xlu1.c.b16.start [1/4] (short) (narrow) %v16553_v4, 16 }
0x1fd8   : > { %7742 = vxpose.xlu1.c.b16.cont [2/4] (short) (narrow) %v16551_v37, 16 }
0x1fdc   : > { %7743 = vxpose.xlu1.c.b16.cont [3/4] (short) (narrow) %v16629_v1, 16 }
0x1fe0   : > { %7744 = vxpose.xlu1.c.b16.end [4/4] (short) (narrow) %v16627_v43, 16 }
0x1fe3   : > { %v7384_v38 = vpop.xlane.xlu1 %7383 }
0x1fe4   : > { %v7385_v47 = vmul.f32 0.03125, %v7384_v38 }
0x1fe5   : > { %v7389_v9 = vpop.xlane.xlu0 %7388 }
0x1fe6   : > { %v7391_v42 = vmul.f32 %v7385_v47, %v7385_v47  ;;  %v7390_v10 = vmul.f32 0.03125, %v7389_v9  ;;  %v7395_v39 = vsub.f32 %v7381_v48, %v7385_v47 }
0x1fe7   : > { %v16663_v56 = vpop.permute.xlu1 %7709 }
0x1fe8   : > { %v7392_v25 = vsub.f32 %v7390_v10, %v7391_v42 }
0x1fea   : > { %v7393_v46 = vadd.f32 1e-05, %v7392_v25 }
0x1fec   : > { %13483 = vrsqrt.f32 %v7393_v46 }
0x1ff6   : > { %v13484_v55 = vpop.eup %13483 }
0x1ff7   : > { %v7396_v11 = vmul.f32 %v13484_v55, %v7395_v39 }
0x1ff9   : > { %v7404_v16 = vmul.f32 %v12030_v2, %v7396_v11 }
0x1ffb   : > { %v16639_v31 = vadd.f32 %v12031_v49, %v7404_v16 }
0x1ffd   : > { %v7525_v8 = vadd.f32 %v16642_v50, %v16639_v31 }
0x1fff   : > { %v7526_v14 = vpack.c.bf16 %v7525_v8, %v7525_v8 }
0x2001   : > { %12644 = vmatmul.mubr.msk.bf16.vlgmr.msra.gmra.mrb[80].mxu0 %vm2856_vm1, %v7526_v14  ;;  %v16682_v14 = vpop.permute.xlu0 %7711 }
0x2002   : > { %12648 = vmatpush3.bf16.msra.mxu0 %v13348_v15  ;;  %12651 = vmatprep.mubr.msk.bf16.mxu0 %vm2856_vm1, %v7593_v30 }
0x2003   : > { %12649 = vmatprep.subr.bf16.mxu0 %v13349_v17 }
0x2006   : > { %12650 = vmatpush3.bf16.msra.mxu0 %v13349_v17 }
0x2007   : > { %12671 = vmatprep.subr.bf16.mxu0 %v17629_v0 }
0x2009   : > { %12652 = vmatmul.mubr.msk.bf16.vlgmr.msra.gmra.mrb[84].mxu0 %vm2856_vm1, %v7594_v51 }
0x200a   : > { %12655 = vmatprep.mubr.msk.bf16.mxu0 %vm2856_vm1, %v7595_v36 }
0x2011   : > { %12656 = vmatmul.mubr.msk.bf16.gmra.mrb[88].mxu0 %vm2856_vm1, %v7596_v57 }
0x2012   : > { %12673 = vmatprep.mubr.msk.bf16.mxu0 %vm14637_vm0, %v17629_v0 }
0x201f   : > { %v16665_v7 = vpop.permute.xlu1 %7713 }
0x2023   : > { %v16667_v18 = vpop.permute.xlu1 %7715 }
0x203a   : > { %v7749_v48 = vpop.trf.xlu1 }
0x203b   : > { %v7777_v58 = vsel %vm3975_vm4, %v7749_v48, 0 }
0x203c   : > { %12660 = vmatpush3.bf16.msra.mxu1 %v7777_v58 }
0x203d   : > { %12665 = vmatprep.subr.bf16.mxu1 %v17629_v0 }
0x20d4   : > { %v7587_v20 = vpop.f32.mrb[80].mxu0 }
0x20d5   : > { %v7588_v52 = vadd.f32 %v12039_v40, %v7587_v20  ;;  %v12645_v44 = vpop.f32.mrb[81].mxu0 }
0x20d6   : > { %v7590_v32 = vpop.f32.mrb[82].mxu0 }
0x20d7   : > { %v7697_v15 = vpack.c.bf16 %v7588_v52, %v7588_v52  ;;  %v12646_v3 = vpop.f32.mrb[83].mxu0 }
0x20d9   : > { %7699 = vrot.lane.b32.xlu0 %v7697_v15, %s17803_s1  ;;  %12662 = vmatmul.mubr.msk.bf16.vlgmr.msra.gmra.mrb[80].mxu1 %vm3161_vm3, %v7697_v15 }
0x20da   : > { %12667 = vmatprep.mubr.msk.bf16.mxu1 %vm14637_vm0, %v17629_v0 }
0x20dc   : > { %v12653_v19 = vpop.f32.mrb[84].mxu0 }
0x20dd   : > { %v7675_v53 = vadd.f32 %v12653_v19, %v12043_v21  ;;  %v7666_v35 = vpop.f32.mrb[85].mxu0 }
0x20de   : > { %v12654_v62 = vpop.f32.mrb[86].mxu0  ;;  %v7667_v38 = vadd.f32 %v12043_v21, %v7666_v35 }
0x20df   : > { %v7678_v27 = vadd.f32 %v12654_v62, %v12043_v21  ;;  %v7669_v59 = vpop.f32.mrb[87].mxu0 }
0x20e0   : > { %v7670_v47 = vadd.f32 %v12043_v21, %v7669_v59 }
0x20e1   : > { %v16675_v9 = vpack.c.bf16 %v7678_v27, %v7675_v53 }
0x20e2   : > { %v16677_v42 = vpack.c.bf16 %v7670_v47, %v7667_v38 }
0x20e4   : > { %v12657_v10 = vpop.f32.mrb[88].mxu0 }
0x20e5   : > { %v7682_v25 = vpop.f32.mrb[89].mxu0  ;;  %v7691_v55 = vadd.f32 %v12657_v10, %v12043_v21 }
0x20e6   : > { %v7683_v46 = vadd.f32 %v12043_v21, %v7682_v25  ;;  %v12658_v39 = vpop.f32.mrb[90].mxu0 }
0x20e7   : > { %v7694_v2 = vadd.f32 %v12658_v39, %v12043_v21  ;;  %v7685_v11 = vpop.f32.mrb[91].mxu0 }
0x20e8   : > { %v7686_v49 = vadd.f32 %v12043_v21, %v7685_v11 }
0x20e9   : > { %v16679_v16 = vpack.c.bf16 %v7694_v2, %v7691_v55 }
0x20ea   : > { %v7723_v8 = vpack.c.bf16 %v7686_v49, %v7683_v46 }
0x20f7   : > { %7757 = vxpose.xlu0.c.b16.start [1/4] (short) (narrow) %v16663_v56, 16 }
0x20fb   : > { %7758 = vxpose.xlu0.c.b16.cont [2/4] (short) (narrow) %v16682_v14, 16 }
0x20ff   : > { %7759 = vxpose.xlu0.c.b16.cont [3/4] (short) (narrow) %v16665_v7, 16 }
0x2103   : > { %7760 = vxpose.xlu0.c.b16.end [4/4] (short) (narrow) %v16667_v18, 16 }
0x214b   : > { %v7700_v17 = vpop.permute.xlu0 %7699 }
0x215d   : > { %v7765_v30 = vpop.trf.xlu0 }
0x215e   : > { %v7823_v51 = vsel %vm3975_vm4, %v7765_v30, 0 }
0x215f   : > { %12666 = vmatpush3.bf16.msra.mxu1 %v7823_v51 }
0x2160   : > { %12677 = vmatprep.subr.bf16.mxu1 %v17629_v0 }
0x2162   : > { %12668 = vmatmul.mubr.msk.bf16.vlgmr.msra.gmra.mrb[84].mxu1 %vm3161_vm3, %v7700_v17 }
0x2163   : > { %12679 = vmatprep.mubr.msk.bf16.mxu1 %vm14637_vm0, %v17629_v0 }
0x21ac   : > { %v7813_v36 = vpop.f32.mrb[80].mxu1 }
0x21ad   : > { %v7865_v57 = vmul.f32 0.35355338, %v7813_v36  ;;  %v12663_v48 = vpop.f32.mrb[81].mxu1 }
0x21ae   : > { %v7816_v58 = vpop.f32.mrb[82].mxu1 }
0x21af   : > { %v12664_v40 = vpop.f32.mrb[83].mxu1  ;;  %v7867_v20 = vsel %vm4067_vm5, %v7865_v57, -inf }
0x21b0   : > { %7868 = vmax.xlane.f32.xlu0 %v7867_v20 }
0x21c6   : > { %7729 = vrot.lane.b32.xlu0 %v16677_v42, %s17803_s1 }
0x21ca   : > { %7735 = vrot.lane.b32.xlu0 %v16679_v16, %s17803_s1 }
0x2235   : > { %v7859_v52 = vpop.f32.mrb[84].mxu1 }
0x2236   : > { %v7866_v44 = vmul.f32 0.35355338, %v7859_v52  ;;  %v12669_v32 = vpop.f32.mrb[85].mxu1 }
0x2237   : > { %v7862_v15 = vpop.f32.mrb[86].mxu1 }
0x2238   : > { %v12670_v3 = vpop.f32.mrb[87].mxu1  ;;  %v7870_v21 = vsel %vm4067_vm5, %v7866_v44, -inf }
0x2239   : > { %7871 = vmax.xlane.f32.xlu1 %v7870_v21 }
0x223d   : > { %v7869_v19 = vpop.xlane.xlu0 %7868 }
0x223e   : > { %v7873_v53 = vsub.f32 %v7865_v57, %v7869_v19 }
0x2240   : > { %v7875_v35 = vmul.f32 1.442695, %v7873_v53 }
0x2241   : > { %v7730_v59 = vpop.permute.xlu0 %7729 }
0x2242   : > { %13485 = vpow2.f32 %v7875_v35 }
0x2245   : > { %v7736_v39 = vpop.permute.xlu0 %7735 }
0x224a   : > { %7731 = vrot.lane.b32.xlu1 %v16675_v9, %s17803_s1 }
0x224c   : > { %v13486_v62 = vpop.eup %13485 }
0x224d   : > { %v7879_v27 = vsel %vm4067_vm5, %v13486_v62, 0.0 }
0x224e   : > { %7733 = vrot.lane.b32.xlu1 %v7723_v8, %s17803_s1 }
0x2272   : > { %7880 = vadd.xlane.f32.xlu1 %v7879_v27 }
0x229f   : > { %7907 = vxpose.xlu1.c.b16.start [1/4] (short) (narrow) %v7730_v59, 16 }
0x22c6   : > { %v7872_v38 = vpop.xlane.xlu1 %7871 }
0x22c7   : > { %v7874_v47 = vsub.f32 %v7866_v44, %v7872_v38 }
0x22c9   : > { %v7877_v10 = vmul.f32 1.442695, %v7874_v47 }
0x22ca   : > { %v7732_v25 = vpop.permute.xlu1 %7731 }
0x22cb   : > { %13487 = vpow2.f32 %v7877_v10  ;;  %7908 = vxpose.xlu1.c.b16.cont [2/4] (short) (narrow) %v7732_v25, 16 }
0x22ce   : > { %v7734_v46 = vpop.permute.xlu1 %7733 }
0x22cf   : > { %7909 = vxpose.xlu1.c.b16.cont [3/4] (short) (narrow) %v7734_v46, 16 }
0x22d3   : > { %7910 = vxpose.xlu1.c.b16.end [4/4] (short) (narrow) %v7736_v39, 16 }
0x22d5   : > { %v13488_v55 = vpop.eup %13487 }
0x22d6   : > { %v7882_v2 = vsel %vm4067_vm5, %v13488_v55, 0.0 }
0x22d7   : > { %7883 = vadd.xlane.f32.xlu0 %v7882_v2 }
0x22ff   : > { %v7881_v11 = vpop.xlane.xlu1 %7880 }
0x2300   : > { %13489 = vrcp.f32 %v7881_v11 }
0x2304   : > { %7891 = vxpose.xlu0.c.b16.start [1/4] (short) (narrow) %v16677_v42, 16 }
0x2308   : > { %7892 = vxpose.xlu0.c.b16.cont [2/4] (short) (narrow) %v16675_v9, 16 }
0x230a   : > { %v13490_v49 = vpop.eup %13489 }
0x230b   : > { %v7887_v17 = vmul.f32 %v13490_v49, %v13486_v62 }
0x230c   : > { %7893 = vxpose.xlu0.c.b16.cont [3/4] (short) (narrow) %v7723_v8, 16 }
0x230d   : > { %v7889_v30 = vpack.c.bf16 %v7887_v17, %v7887_v17 }
0x230f   : > { %v7927_v51 = vsel %vm4067_vm5, %v7889_v30, 0  ;;  %v13350_v30 = vld [vmem:[%s17835_s4] sm:$0xff]   ;;  %s17837_s4 = smov %s17836_s16 }
0x2310   : > { %12672 = vmatpush3.bf16.xpose.msra.mxu0 %v7927_v51  ;;  %7894 = vxpose.xlu0.c.b16.end [4/4] (short) (narrow) %v16679_v16, 16 }
0x2311   : > { %12683 = vmatprep.subr.bf16.mxu0 %v17629_v0 }
0x232d   : > { %v7915_v58 = vpop.trf.xlu1 }
0x2364   : > { %v7884_v36 = vpop.xlane.xlu0 %7883 }
0x2365   : > { %13491 = vrcp.f32 %v7884_v36 }
0x236a   : > { %v7899_v57 = vpop.trf.xlu0 }
0x236b   : > { %12674 = vmatmul.mubr.msk.bf16.vlgmr.msra.gmra.mrb[92].mxu0 %vm4067_vm5, %v7899_v57 }
0x236c   : > { %12685 = vmatprep.mubr.msk.bf16.mxu0 %vm14637_vm0, %v17629_v0  ;;  %12684 = vmatpush3.bf16.msra.mxu0 %v13350_v30 }
0x236d   : > { %12697 = vmatprep.subr.bf16.mxu0 %v17629_v0 }
0x236f   : > { %v13492_v9 = vpop.eup %13491 }
0x2370   : > { %v7888_v42 = vmul.f32 %v13492_v9, %v13488_v55 }
0x2372   : > { %v7890_v48 = vpack.c.bf16 %v7888_v42, %v7888_v42 }
0x2374   : > { %v7973_v8 = vsel %vm4067_vm5, %v7890_v48, 0 }
0x2375   : > { %12678 = vmatpush3.bf16.xpose.msra.mxu1 %v7973_v8 }
0x2376   : > { %12689 = vmatprep.subr.bf16.mxu1 %v17629_v0 }
0x237c   : > { %12680 = vmatmul.mubr.msk.bf16.vlgmr.msra.gmra.mrb[88].mxu1 %vm4067_vm5, %v7915_v58 }
0x237d   : > { %12693 = vmatprep.mubr.msk.bf16.mxu1 %vm14637_vm0, %v17629_v0 }
0x243e   : > { %v7963_v16 = vpop.f32.mrb[92].mxu0 }
0x243f   : > { %v12675_v40 = vpop.f32.mrb[93].mxu0  ;;  %8015 = vxpose.xlu0.b32.start.end [1/1] (short) (narrow) %v7963_v16, 8 }
0x2440   : > { %v7966_v20 = vpop.f32.mrb[94].mxu0 }
0x2441   : > { %v12676_v52 = vpop.f32.mrb[95].mxu0 }
0x244f   : > { %v8009_v44 = vpop.f32.mrb[88].mxu1 }
0x2450   : > { %8047 = vxpose.xlu1.b32.start.end [1/1] (short) (narrow) %v8009_v44, 8  ;;  %v12681_v32 = vpop.f32.mrb[89].mxu1 }
0x2451   : > { %v8012_v15 = vpop.f32.mrb[90].mxu1 }
0x2452   : > { %v12682_v3 = vpop.f32.mrb[91].mxu1 }
0x2453   : > { %v12056_v3 = vld [vmem:[#allocation19] ss:$0 sm:$0xff] }
0x24bf   : > { %v8031_v21 = vpop.trf.xlu0 }
0x24c0   : > { %v8079_v19 = vcombine.high %v8031_v21, %v17629_v0  ;;  %v8086_v53 = vrot.slane %v8031_v21, %v15564_v24 }
0x24c2   : > { %v8093_v59 = vrot.slane %v8079_v19, %v15564_v24 }
0x24d0   : > { %v8063_v35 = vpop.trf.xlu1 }
0x24d1   : > { %v8094_v62 = vcombine.high %v8063_v35, %v17629_v0  ;;  %v8101_v27 = vrot.slane %v8063_v35, %v15564_v24 }
0x24d3   : > { %v8108_v38 = vrot.slane %v8094_v62, %v15564_v24  ;;  %v8109_v47 = vcombine.low %v8086_v53, %v8101_v27  ;;  %v8110_v10 = vcombine.high %v8086_v53, %v8101_v27 }
0x24d5   : > { %v8117_v25 = vrot.slane %v8109_v47, %v15568_v29  ;;  %v8124_v46 = vrot.slane %v8110_v10, %v15568_v29  ;;  %v8125_v39 = vcombine.low %v8093_v59, %v8108_v38  ;;  %v8126_v55 = vcombine.high %v8093_v59, %v8108_v38  ;;  %v13351_v10 = vld [vmem:[%s17836_s16] sm:$0xff]   ;;  %s17839_s16 = sld [smem:[#allocation111_spill]] }
0x24d6   : > { %12690 = vmatpush3.bf16.msra.mxu1 %v13351_v10 }
0x24d7   : > { %v8133_v2 = vrot.slane %v8125_v39, %v15568_v29  ;;  %v8140_v11 = vrot.slane %v8126_v55, %v15568_v29  ;;  %v8145_v49 = vcombine.low %v8117_v25, %v8124_v46  ;;  %v12054_v17 = vcombine.high %v8117_v25, %v8124_v46  ;;  %v13352_v25 = vld [vmem:[%s17837_s4 + $0x8] sm:$0xff]   ;;  %12691 = vmatprep.subr.bf16.mxu1 %v17629_v0 }
0x24d8   : > { %v13354_v46 = vld [vmem:[%s17838_s5 + $0x8] sm:$0xff]  }
0x24d9   : > { %v8152_v51 = vrot.slane %v8145_v49, %v15564_v24  ;;  %v8160_v36 = vrot.slane %v12054_v17, %v15564_v24  ;;  %v8161_v57 = vcombine.low %v8133_v2, %v8140_v11  ;;  %v12055_v9 = vcombine.high %v8133_v2, %v8140_v11 }
0x24da   : > { %12692 = vmatpush3.bf16.msra.mxu1 %v13352_v25 }
0x24db   : > { %v8168_v42 = vrot.slane %v8161_v57, %v15564_v24  ;;  %v8176_v48 = vrot.slane %v12055_v9, %v15564_v24  ;;  %v8177_v8 = vcombine.low %v8152_v51, %v8160_v36  ;;  %12709 = vmatprep.subr.bf16.mxu1 %v17629_v0  ;;  %v12059_v36 = vld [vmem:[#allocation31] ss:$0 sm:$0xff]  ;;  %v12060_v9 = vld [vmem:[#allocation29] ss:$0 sm:$0xff]  ;;  %s17840_s4 = smov %s17839_s16 }
0x24dd   : > { %v8185_v58 = vcombine.low %v8168_v42, %v8176_v48  ;;  %v8184_v16 = vrot.slane %v8177_v8, %v15568_v29 }
0x24df   : > { %v8192_v40 = vrot.slane %v8185_v58, %v15568_v29  ;;  %v13355_v58 = vld [vmem:[%s17838_s5 + $0x10] sm:$0xff]  }
0x24e1   : > { %v8194_v20 = vcombine.high %v8184_v16, %v8192_v40  ;;  %v8193_v52 = vcombine.low %v8184_v16, %v8192_v40  ;;  %v13356_v16 = vld [vmem:[%s17838_s5 + $0x18] sm:$0xff]  }
0x24e2   : > { %v12061_v40 = vld [vmem:[#allocation23] ss:$0 sm:$0xff] }
0x24e3   : > { %8196 = vrot.lane.b32.xlu0 %v8194_v20, %s17809_s3 }
0x2555   : > { %v8197_v44 = vpop.permute.xlu0 %8196 }
0x2556   : > { %v8199_v32 = vsel %vm3161_vm3, %v8193_v52, %v8197_v44 }
0x2557   : > { %v8200_v15 = vpack.c.bf16 %v8199_v32, %v8199_v32 }
0x2559   : > { %12686 = vmatmul.mubr.msk.bf16.vlgmr.msra.gmra.mrb[96].mxu0 %vm3072_vm2, %v8200_v15 }
0x255a   : > { %12705 = vmatprep.mubr.msk.bf16.mxu0 %vm14637_vm0, %v17629_v0 }
0x262c   : > { %v8253_v21 = vpop.f32.mrb[96].mxu0 }
0x262d   : > { %v8254_v19 = vadd.f32 %v12056_v3, %v8253_v21  ;;  %v12687_v53 = vpop.f32.mrb[97].mxu0 }
0x262e   : > { %v8256_v35 = vpop.f32.mrb[98].mxu0  ;;  %v12065_v53 = vld [vmem:[#allocation25] ss:$0 sm:$0xff] }
0x262f   : > { %v8259_v62 = vadd.f32 %v8254_v19, %v16639_v31  ;;  %v12688_v27 = vpop.f32.mrb[99].mxu0  ;;  %v13353_v31 = vld [vmem:[%s17838_s5] sm:$0xff]   ;;  %s17841_s5 = sld [smem:[#allocation113_spill]] }
0x2630   : > { %12698 = vmatpush3.bf16.msra.mxu0 %v13353_v31 }
0x2631   : > { %v8260_v59 = vsel %vm2856_vm1, %v8259_v62, 0.0  ;;  %v8264_v38 = vmul.f32 %v8259_v62, %v8259_v62  ;;  %12699 = vmatprep.subr.bf16.mxu0 %v17629_v0 }
0x2632   : > { %8261 = vadd.xlane.f32.xlu1 %v8260_v59 }
0x2633   : > { %v8265_v47 = vsel %vm2856_vm1, %v8264_v38, 0.0 }
0x2634   : > { %8266 = vadd.xlane.f32.xlu0 %v8265_v47  ;;  %12700 = vmatpush3.bf16.msra.mxu0 %v13354_v46  ;;  %v13357_v46 = vld [vmem:[%s17839_s16] sm:$0xff]   ;;  %s17847_s16 = sld [smem:[#allocation112_spill]] }
0x2635   : > { %12701 = vmatprep.subr.bf16.mxu0 %v17629_v0 }
0x2638   : > { %12702 = vmatpush3.bf16.msra.mxu0 %v13355_v58 }
0x2639   : > { %12703 = vmatprep.subr.bf16.mxu0 %v17629_v0 }
0x263c   : > { %12704 = vmatpush3.bf16.msra.mxu0 %v13356_v16  ;;  %v13359_v16 = vld [vmem:[%s17841_s5] sm:$0xff]  }
0x264a   : > { %8651 = vrot.lane.b32.xlu0 %v16553_v4, %s17798_s15 }
0x26bf   : > { %v8262_v39 = vpop.xlane.xlu1 %8261 }
0x26c0   : > { %v8263_v55 = vmul.f32 0.03125, %v8262_v39  ;;  %v13358_v39 = vld [vmem:[%s17840_s4 + $0x8] sm:$0xff]  }
0x26c1   : > { %v8267_v2 = vpop.xlane.xlu0 %8266 }
0x26c2   : > { %v8269_v4 = vmul.f32 %v8263_v55, %v8263_v55  ;;  %v8268_v11 = vmul.f32 0.03125, %v8267_v2  ;;  %v8273_v30 = vsub.f32 %v8259_v62, %v8263_v55 }
0x26c4   : > { %v8270_v49 = vsub.f32 %v8268_v11, %v8269_v4 }
0x26c5   : > { %v8652_v19 = vpop.permute.xlu0 %8651 }
0x26c6   : > { %v8271_v17 = vadd.f32 1e-05, %v8270_v49 }
0x26c8   : > { %13493 = vrsqrt.f32 %v8271_v17 }
0x26d2   : > { %v13494_v51 = vpop.eup %13493 }
0x26d3   : > { %v8274_v57 = vmul.f32 %v13494_v51, %v8273_v30 }
0x26d5   : > { %v8282_v42 = vmul.f32 %v12059_v36, %v8274_v57  ;;  %v12071_v57 = vld [vmem:[#allocation34] ss:$0 sm:$0xff] }
0x26d7   : > { %v8290_v48 = vadd.f32 %v12060_v9, %v8282_v42  ;;  %v12072_v42 = vld [vmem:[#allocation32] ss:$0 sm:$0xff] }
0x26d9   : > { %v8291_v8 = vpack.c.bf16 %v8290_v48, %v8290_v48 }
0x26db   : > { %12694 = vmatmul.mubr.msk.bf16.vlgmr.msra.gmra.mrb[92].mxu1 %vm2856_vm1, %v8291_v8 }
0x26dc   : > { %12713 = vmatprep.mubr.msk.bf16.mxu1 %vm14637_vm0, %v17629_v0  ;;  %12710 = vmatpush3.bf16.msra.mxu1 %v13357_v46 }
0x26dd   : > { %12711 = vmatprep.subr.bf16.mxu1 %v17629_v0 }
0x26e0   : > { %12712 = vmatpush3.bf16.msra.mxu1 %v13358_v39 }
0x26e1   : > { %12717 = vmatprep.subr.bf16.mxu1 %v17629_v0 }
0x27ae   : > { %v8352_v20 = vpop.f32.mrb[92].mxu1 }
0x27af   : > { %v8353_v52 = vadd.f32 %v12061_v40, %v8352_v20  ;;  %v12695_v44 = vpop.f32.mrb[93].mxu1  ;;  %v13360_v20 = vld [vmem:[%s17841_s5 + $0x8] sm:$0xff]  }
0x27b0   : > { %v8355_v32 = vpop.f32.mrb[94].mxu1 }
0x27b1   : > { %v8358_v15 = vmax.f32 %v8353_v52, 0.0  ;;  %v12696_v3 = vpop.f32.mrb[95].mxu1 }
0x27b3   : > { %v8359_v21 = vpack.c.bf16 %v8358_v15, %v8358_v15 }
0x27b5   : > { %12706 = vmatmul.mubr.msk.bf16.vlgmr.msra.gmra.mrb[100].mxu0 %vm4067_vm5, %v8359_v21 }
0x27b6   : > { %12727 = vmatprep.mubr.msk.bf16.mxu0 %vm3161_vm3, %v8652_v19 }
0x2888   : > { %v8436_v35 = vpop.f32.mrb[100].mxu0 }
0x2889   : > { %v8437_v62 = vadd.f32 %v12065_v53, %v8436_v35  ;;  %v12707_v27 = vpop.f32.mrb[101].mxu0 }
0x288a   : > { %v8439_v59 = vpop.f32.mrb[102].mxu0 }
0x288b   : > { %v8442_v38 = vadd.f32 %v8437_v62, %v8290_v48  ;;  %v12708_v47 = vpop.f32.mrb[103].mxu0 }
0x288d   : > { %v8443_v10 = vsel %vm2856_vm1, %v8442_v38, 0.0  ;;  %v8447_v25 = vmul.f32 %v8442_v38, %v8442_v38 }
0x288e   : > { %8444 = vadd.xlane.f32.xlu1 %v8443_v10 }
0x288f   : > { %v8448_v31 = vsel %vm2856_vm1, %v8447_v25, 0.0 }
0x2892   : > { %8449 = vadd.xlane.f32.xlu1 %v8448_v31 }
0x291b   : > { %v8445_v55 = vpop.xlane.xlu1 %8444 }
0x291c   : > { %v8446_v2 = vmul.f32 0.03125, %v8445_v55 }
0x291e   : > { %v8452_v11 = vmul.f32 %v8446_v2, %v8446_v2  ;;  %v8456_v51 = vsub.f32 %v8442_v38, %v8446_v2 }
0x291f   : > { %v8450_v4 = vpop.xlane.xlu1 %8449 }
0x2920   : > { %v8451_v49 = vmul.f32 0.03125, %v8450_v4 }
0x2922   : > { %v8453_v17 = vsub.f32 %v8451_v49, %v8452_v11 }
0x2924   : > { %v8454_v30 = vadd.f32 1e-05, %v8453_v17 }
0x2926   : > { %13495 = vrsqrt.f32 %v8454_v30 }
0x2930   : > { %v13496_v36 = vpop.eup %13495 }
0x2931   : > { %v8457_v9 = vmul.f32 %v13496_v36, %v8456_v51 }
0x2933   : > { %v8465_v48 = vmul.f32 %v12071_v57, %v8457_v9 }
0x2935   : > { %v16766_v8 = vadd.f32 %v12072_v42, %v8465_v48 }
0x2937   : > { %v8474_v58 = vadd.f32 %v16642_v50, %v16766_v8  ;;  %v8542_v52 = vpack.c.bf16 %v16766_v8, %v16766_v8  ;;  %v12073_v50 = vld [vmem:[#allocation14] ss:$0 sm:$0xff] }
0x2939   : > { %v16771_v40 = vpack.c.bf16 %v8474_v58, %v8474_v58 }
0x293b   : > { %12714 = vmatmul.mubr.msk.bf16.vlgmr.msra.gmra.mrb[96].mxu1 %vm2856_vm1, %v16771_v40 }
0x293c   : > { %12718 = vmatpush3.bf16.msra.mxu1 %v13359_v16  ;;  %12721 = vmatprep.mubr.msk.bf16.mxu1 %vm14637_vm0, %v17629_v0 }
0x293d   : > { %12719 = vmatprep.subr.bf16.mxu1 %v17629_v0 }
0x2940   : > { %12720 = vmatpush3.bf16.msra.mxu1 %v13360_v20 }
0x2943   : > { %12722 = vmatmul.mubr.msk.bf16.vlgmr.msra.gmra.mrb[100].mxu1 %vm2856_vm1, %v8542_v52 }
0x2a0e   : > { %v8536_v44 = vpop.f32.mrb[96].mxu1 }
0x2a0f   : > { %v8537_v32 = vadd.f32 %v12073_v50, %v8536_v44  ;;  %v12715_v15 = vpop.f32.mrb[97].mxu1 }
0x2a10   : > { %v8539_v3 = vpop.f32.mrb[98].mxu1 }
0x2a11   : > { %v8609_v21 = vpack.c.bf16 %v8537_v32, %v8537_v32  ;;  %v12716_v19 = vpop.f32.mrb[99].mxu1 }
0x2a13   : > { %8611 = vrot.lane.b32.xlu1 %v8609_v21, %s17803_s1 }
0x2a16   : > { %v16783_v53 = vpop.f32.mrb[100].mxu1 }
0x2a17   : > { %8739 = vrot.lane.b32.xlu1 %v16663_v56, %s17798_s15  ;;  %v12723_v35 = vpop.f32.mrb[101].mxu1 }
0x2a18   : > { %v8606_v62 = vpop.f32.mrb[102].mxu1 }
0x2a19   : > { %v12724_v27 = vpop.f32.mrb[103].mxu1 }
0x2a1b   : > { %8653 = vrot.lane.b32.xlu1 %v16551_v37, %s17798_s15 }
0x2a1f   : > { %8741 = vrot.lane.b32.xlu1 %v16682_v14, %s17798_s15 }
0x2a23   : > { %8655 = vrot.lane.b32.xlu1 %v16629_v1, %s17798_s15 }
0x2a27   : > { %8743 = vrot.lane.b32.xlu1 %v16665_v7, %s17798_s15 }
0x2a4a   : > { %8619 = vxpose.xlu1.c.b16.start.end [1/1] (short) (narrow) %v8609_v21, 16 }
0x2a4e   : > { %8745 = vrot.lane.b32.xlu1 %v16667_v18, %s17798_s15 }
0x2a85   : > { %v8612_v56 = vpop.permute.xlu1 %8611 }
0x2a86   : > { %8635 = vxpose.xlu0.c.b16.start.end [1/1] (short) (narrow) %v8612_v56, 16 }
0x2a89   : > { %v8740_v59 = vpop.permute.xlu1 %8739 }
0x2a8a   : > { %12737 = vmatprep.mubr.msk.bf16.mxu1 %vm3161_vm3, %v8740_v59 }
0x2a8d   : > { %v8654_v37 = vpop.permute.xlu1 %8653 }
0x2a8f   : > { %8657 = vrot.lane.b32.xlu0 %v16627_v43, %s17798_s15  ;;  %s17842_s15 = sld [smem:[#allocation73_spill]] }
0x2a91   : > { %v8742_v14 = vpop.permute.xlu1 %8741 }
0x2a95   : > { %v8656_v38 = vpop.permute.xlu1 %8655  ;;  %s17843_s4 = smov %s17842_s15 }
0x2a99   : > { %v8744_v47 = vpop.permute.xlu1 %8743 }
0x2ab0   : > { %v8627_v1 = vpop.trf.xlu1 }
0x2ab1   : > { %v8672_v10 = vsel %vm3975_vm4, %v8627_v1, 0  ;;  %12843 = vmatprep.subr.msk.bf16.mxu0 %vm3975_vm4, %v8627_v1 }
0x2ab2   : > { %12726 = vmatpush3.bf16.msra.mxu0 %v8672_v10 }
0x2ab3   : > { %12745 = vmatprep.subr.bf16.mxu0 %v17629_v0 }
0x2ab5   : > { %12728 = vmatmul.mubr.msk.bf16.vlgmr.msra.gmra.mrb[104].mxu0 %vm3161_vm3, %v8654_v37 }
0x2ab6   : > { %12731 = vmatprep.mubr.msk.bf16.mxu0 %vm3161_vm3, %v8656_v38 }
0x2ac0   : > { %v8746_v18 = vpop.permute.xlu1 %8745 }
0x2aec   : > { %v8643_v7 = vpop.trf.xlu0 }
0x2aed   : > { %12844 = vmatprep.subr.msk.bf16.mxu1 %vm3975_vm4, %v8643_v7  ;;  %v8760_v43 = vsel %vm3975_vm4, %v8643_v7, 0 }
0x2aee   : > { %12736 = vmatpush3.bf16.msra.mxu1 %v8760_v43 }
0x2aef   : > { %12757 = vmatprep.subr.bf16.mxu1 %v17629_v0 }
0x2af1   : > { %12738 = vmatmul.mubr.msk.bf16.vlgmr.msra.gmra.mrb[104].mxu1 %vm3161_vm3, %v8742_v14 }
0x2af2   : > { %12741 = vmatprep.mubr.msk.bf16.mxu1 %vm3161_vm3, %v8744_v47 }
0x2af9   : > { %12742 = vmatmul.mubr.msk.bf16.gmra.mrb[108].mxu1 %vm3161_vm3, %v8746_v18 }
0x2afa   : > { %12765 = vmatprep.mubr.msk.bf16.mxu1 %vm14637_vm0, %v17629_v0 }
0x2b01   : > { %v8658_v25 = vpop.permute.xlu0 %8657 }
0x2b02   : > { %12732 = vmatmul.mubr.msk.bf16.gmra.mrb[108].mxu0 %vm3161_vm3, %v8658_v25 }
0x2b03   : > { %12753 = vmatprep.mubr.msk.bf16.mxu0 %vm14637_vm0, %v17629_v0 }
0x2b88   : > { %v12729_v31 = vpop.f32.mrb[104].mxu0 }
0x2b89   : > { %v8708_v46 = vpop.f32.mrb[105].mxu0  ;;  %v16818_v4 = vmul.f32 0.35355338, %v12729_v31 }
0x2b8a   : > { %v16816_v39 = vmul.f32 0.35355338, %v8708_v46  ;;  %v12730_v55 = vpop.f32.mrb[106].mxu0 }
0x2b8b   : > { %v8711_v2 = vpop.f32.mrb[107].mxu0  ;;  %v8849_v30 = vsel %vm3161_vm3, %v16818_v4, -inf  ;;  %v8830_v52 = vmul.f32 0.35355338, %v12730_v55 }
0x2b8c   : > { %v16820_v11 = vmul.f32 0.35355338, %v8711_v2  ;;  %v8843_v49 = vsel %vm3161_vm3, %v16816_v39, -inf }
0x2b8d   : > { %8844 = vmax.xlane.f32.xlu1 %v8843_v49  ;;  %v8852_v19 = vsel %vm3161_vm3, %v8830_v52, -inf }
0x2b8e   : > { %v8846_v17 = vsel %vm3161_vm3, %v16820_v11, -inf }
0x2b8f   : > { %8847 = vmax.xlane.f32.xlu0 %v8846_v17 }
0x2b91   : > { %8850 = vmax.xlane.f32.xlu1 %v8849_v30 }
0x2bc4   : > { %v12739_v51 = vpop.f32.mrb[104].mxu1 }
0x2bc5   : > { %v16828_v36 = vmul.f32 0.35355338, %v12739_v51  ;;  %v8796_v57 = vpop.f32.mrb[105].mxu1 }
0x2bc6   : > { %v16830_v9 = vmul.f32 0.35355338, %v8796_v57  ;;  %v12740_v42 = vpop.f32.mrb[106].mxu1 }
0x2bc7   : > { %v8799_v48 = vpop.f32.mrb[107].mxu1  ;;  %v8873_v58 = vsel %vm3161_vm3, %v16828_v36, -inf  ;;  %v8838_v21 = vmul.f32 0.35355338, %v12740_v42 }
0x2bc8   : > { %v16834_v16 = vmul.f32 0.35355338, %v8799_v48  ;;  %8874 = vmax.xlane.f32.xlu1 %v8873_v58  ;;  %v8867_v20 = vsel %vm3161_vm3, %v16830_v9, -inf }
0x2bc9   : > { %8868 = vmax.xlane.f32.xlu0 %v8867_v20  ;;  %v8876_v35 = vsel %vm3161_vm3, %v8838_v21, -inf }
0x2bca   : > { %v8870_v44 = vsel %vm3161_vm3, %v16834_v16, -inf }
0x2bcc   : > { %v12743_v50 = vpop.f32.mrb[108].mxu1 }
0x2bcd   : > { %v8812_v32 = vpop.f32.mrb[109].mxu1  ;;  %8871 = vmax.xlane.f32.xlu0 %v8870_v44  ;;  %v16862_v31 = vmul.f32 0.35355338, %v12743_v50 }
0x2bce   : > { %v12744_v15 = vpop.f32.mrb[110].mxu1  ;;  %v16844_v14 = vmul.f32 0.35355338, %v8812_v32 }
0x2bcf   : > { %v8815_v3 = vpop.f32.mrb[111].mxu1  ;;  %v16866_v55 = vmul.f32 0.35355338, %v12744_v15  ;;  %v8885_v49 = vsel %vm3161_vm3, %v16862_v31, -inf }
0x2bd0   : > { %v16850_v1 = vmul.f32 0.35355338, %v8815_v3  ;;  %v8879_v43 = vsel %vm3161_vm3, %v16844_v14, -inf }
0x2bd1   : > { %8853 = vmax.xlane.f32.xlu0 %v8852_v19  ;;  %v8888_v17 = vsel %vm3161_vm3, %v16866_v55, -inf }
0x2bd2   : > { %v8882_v25 = vsel %vm3161_vm3, %v16850_v1, -inf }
0x2bd5   : > { %8877 = vmax.xlane.f32.xlu0 %v8876_v35  ;;  %v12733_v62 = vpop.f32.mrb[108].mxu0 }
0x2bd6   : > { %v8724_v27 = vpop.f32.mrb[109].mxu0  ;;  %v16854_v7 = vmul.f32 0.35355338, %v12733_v62 }
0x2bd7   : > { %v16842_v56 = vmul.f32 0.35355338, %v8724_v27  ;;  %v12734_v59 = vpop.f32.mrb[110].mxu0 }
0x2bd8   : > { %v8727_v37 = vpop.f32.mrb[111].mxu0  ;;  %v16858_v18 = vmul.f32 0.35355338, %v12734_v59  ;;  %v8861_v46 = vsel %vm3161_vm3, %v16854_v7, -inf }
0x2bd9   : > { %v16846_v38 = vmul.f32 0.35355338, %v8727_v37  ;;  %v8855_v47 = vsel %vm3161_vm3, %v16842_v56, -inf }
0x2bda   : > { %8856 = vmax.xlane.f32.xlu1 %v8855_v47  ;;  %v8864_v2 = vsel %vm3161_vm3, %v16858_v18, -inf }
0x2bdb   : > { %v8858_v10 = vsel %vm3161_vm3, %v16846_v38, -inf }
0x2bdc   : > { %8859 = vmax.xlane.f32.xlu0 %v8858_v10 }
0x2bde   : > { %8880 = vmax.xlane.f32.xlu1 %v8879_v43 }
0x2be0   : > { %8883 = vmax.xlane.f32.xlu0 %v8882_v25 }
0x2be2   : > { %8862 = vmax.xlane.f32.xlu1 %v8861_v46 }
0x2be4   : > { %8865 = vmax.xlane.f32.xlu0 %v8864_v2 }
0x2be6   : > { %8886 = vmax.xlane.f32.xlu1 %v8885_v49 }
0x2be8   : > { %8889 = vmax.xlane.f32.xlu0 %v8888_v17 }
0x2c1a   : > { %v8845_v30 = vpop.xlane.xlu1 %8844 }
0x2c1b   : > { %v8891_v51 = vsub.f32 %v16816_v39, %v8845_v30 }
0x2c1c   : > { %v8848_v39 = vpop.xlane.xlu0 %8847 }
0x2c1d   : > { %v8907_v48 = vmul.f32 1.442695, %v8891_v51 }
0x2c1e   : > { %v8851_v57 = vpop.xlane.xlu1 %8850 }
0x2c1f   : > { %v8893_v42 = vsub.f32 %v16818_v4, %v8851_v57  ;;  %v8892_v4 = vsub.f32 %v16820_v11, %v8848_v39 }
0x2c21   : > { %v8911_v58 = vmul.f32 1.442695, %v8893_v42  ;;  %v8909_v62 = vmul.f32 1.442695, %v8892_v4 }
0x2c23   : > { %13497 = vpow2.f32 %v8911_v58 }
0x2c24   : > { %13499 = vpow2.f32 %v8907_v48 }
0x2c2d   : > { %v16876_v20 = vpop.eup %13497 }
0x2c2e   : > { %v8945_v50 = vsel %vm3161_vm3, %v16876_v20, 0.0  ;;  %v16880_v44 = vpop.eup %13499 }
0x2c2f   : > { %8946 = vadd.xlane.f32.xlu1 %v8945_v50  ;;  %v8939_v32 = vsel %vm3161_vm3, %v16880_v44, 0.0 }
0x2c33   : > { %8940 = vadd.xlane.f32.xlu1 %v8939_v32 }
0x2c55   : > { %v8875_v37 = vpop.xlane.xlu1 %8874 }
0x2c56   : > { %v8869_v15 = vpop.xlane.xlu0 %8868  ;;  %v8901_v25 = vsub.f32 %v16828_v36, %v8875_v37 }
0x2c58   : > { %v8927_v17 = vmul.f32 1.442695, %v8901_v25 }
0x2c5a   : > { %v8872_v3 = vpop.xlane.xlu0 %8871 }
0x2c5b   : > { %v8900_v10 = vsub.f32 %v16834_v16, %v8872_v3 }
0x2c5d   : > { %v8925_v49 = vmul.f32 1.442695, %v8900_v10 }
0x2c5e   : > { %v8854_v19 = vpop.xlane.xlu0 %8853 }
0x2c5f   : > { %v8894_v35 = vsub.f32 %v8830_v52, %v8854_v19  ;;  %v8899_v52 = vsub.f32 %v16830_v9, %v8869_v15 }
0x2c61   : > { %v8913_v27 = vmul.f32 1.442695, %v8894_v35 }
0x2c62   : > { %v8878_v59 = vpop.xlane.xlu0 %8877 }
0x2c63   : > { %13501 = vpow2.f32 %v8913_v27  ;;  %v8902_v47 = vsub.f32 %v8838_v21, %v8878_v59 }
0x2c64   : > { %13503 = vpow2.f32 %v8909_v62 }
0x2c65   : > { %v8929_v43 = vmul.f32 1.442695, %v8902_v47 }
0x2c67   : > { %v8857_v46 = vpop.xlane.xlu1 %8856  ;;  %13505 = vpow2.f32 %v8929_v43 }
0x2c68   : > { %v8895_v2 = vsub.f32 %v16842_v56, %v8857_v46  ;;  %v8923_v56 = vmul.f32 1.442695, %v8899_v52 }
0x2c69   : > { %v8860_v11 = vpop.xlane.xlu0 %8859 }
0x2c6a   : > { %v8915_v30 = vmul.f32 1.442695, %v8895_v2  ;;  %v8896_v51 = vsub.f32 %v16846_v38, %v8860_v11 }
0x2c6b   : > { %v8881_v57 = vpop.xlane.xlu1 %8880 }
0x2c6c   : > { %13507 = vpow2.f32 %v8915_v30  ;;  %v8917_v16 = vmul.f32 1.442695, %v8896_v51  ;;  %v8903_v48 = vsub.f32 %v16844_v14, %v8881_v57 }
0x2c6d   : > { %v16890_v21 = vpop.eup %13501  ;;  %13509 = vpow2.f32 %v8925_v49  ;;  %v8884_v42 = vpop.xlane.xlu0 %8883 }
0x2c6e   : > { %v16892_v36 = vpop.eup %13503  ;;  %13511 = vpow2.f32 %v8927_v17  ;;  %v8948_v58 = vsel %vm3161_vm3, %v16890_v21, 0.0  ;;  %v8931_v39 = vmul.f32 1.442695, %v8903_v48  ;;  %v8904_v14 = vsub.f32 %v16850_v1, %v8884_v42 }
0x2c6f   : > { %v8863_v9 = vpop.xlane.xlu1 %8862  ;;  %8949 = vadd.xlane.f32.xlu0 %v8948_v58  ;;  %13513 = vpow2.f32 %v8917_v16  ;;  %v8942_v32 = vsel %vm3161_vm3, %v16892_v36, 0.0  ;;  %v12077_v58 = vld [vmem:[#allocation17] ss:$0 sm:$0xff] }
0x2c70   : > { %v8897_v38 = vsub.f32 %v16854_v7, %v8863_v9  ;;  %13515 = vpow2.f32 %v8923_v56  ;;  %v8933_v37 = vmul.f32 1.442695, %v8904_v14 }
0x2c71   : > { %v8866_v50 = vpop.xlane.xlu0 %8865  ;;  %v16901_v4 = vpop.eup %13505 }
0x2c72   : > { %v8919_v15 = vmul.f32 1.442695, %v8897_v38  ;;  %v8898_v3 = vsub.f32 %v16858_v18, %v8866_v50  ;;  %v8972_v62 = vsel %vm3161_vm3, %v16901_v4, 0.0  ;;  %v8604_v50 = vadd.f32 %v12077_v58, %v16783_v53 }
0x2c73   : > { %8943 = vadd.xlane.f32.xlu0 %v8942_v32  ;;  %v8887_v7 = vpop.xlane.xlu1 %8886 }
0x2c74   : > { %13517 = vpow2.f32 %v8919_v15  ;;  %v8921_v19 = vmul.f32 1.442695, %v8898_v3  ;;  %v8905_v1 = vsub.f32 %v16862_v31, %v8887_v7 }
0x2c75   : > { %13519 = vpow2.f32 %v8931_v39  ;;  %v8890_v47 = vpop.xlane.xlu0 %8889  ;;  %v8614_v39 = vpack.c.bf16 %v8604_v50, %v8604_v50 }
0x2c76   : > { %v16904_v35 = vpop.eup %13507  ;;  %13521 = vpow2.f32 %v8921_v19  ;;  %v8935_v2 = vmul.f32 1.442695, %v8905_v1  ;;  %v8906_v49 = vsub.f32 %v16866_v55, %v8890_v47 }
0x2c77   : > { %v16908_v27 = vpop.eup %13509  ;;  %8973 = vadd.xlane.f32.xlu0 %v8972_v62  ;;  %v8951_v18 = vsel %vm3161_vm3, %v16904_v35, 0.0  ;;  %13523 = vpow2.f32 %v8933_v37 }
0x2c78   : > { %v16912_v59 = vpop.eup %13511  ;;  %8952 = vadd.xlane.f32.xlu1 %v8951_v18  ;;  %v8966_v10 = vsel %vm3161_vm3, %v16908_v27, 0.0  ;;  %13525 = vpow2.f32 %v8935_v2  ;;  %v8937_v30 = vmul.f32 1.442695, %v8906_v49 }
0x2c79   : > { %v16917_v43 = vpop.eup %13513  ;;  %v8969_v25 = vsel %vm3161_vm3, %v16912_v59, 0.0 }
0x2c7a   : > { %v16921_v46 = vpop.eup %13515  ;;  %v8954_v31 = vsel %vm3161_vm3, %v16917_v43, 0.0  ;;  %13527 = vpow2.f32 %v8937_v30 }
0x2c7b   : > { %8967 = vadd.xlane.f32.xlu0 %v8966_v10  ;;  %v8963_v17 = vsel %vm3161_vm3, %v16921_v46, 0.0 }
0x2c7c   : > { %8970 = vadd.xlane.f32.xlu1 %v8969_v25 }
0x2c7e   : > { %v16926_v11 = vpop.eup %13517 }
0x2c7f   : > { %8955 = vadd.xlane.f32.xlu0 %v8954_v31  ;;  %v16930_v52 = vpop.eup %13519  ;;  %v8957_v51 = vsel %vm3161_vm3, %v16926_v11, 0.0 }
0x2c80   : > { %8964 = vadd.xlane.f32.xlu1 %v8963_v17  ;;  %v16934_v57 = vpop.eup %13521  ;;  %v8975_v55 = vsel %vm3161_vm3, %v16930_v52, 0.0 }
0x2c81   : > { %v8960_v16 = vsel %vm3161_vm3, %v16934_v57, 0.0  ;;  %v16940_v42 = vpop.eup %13523 }
0x2c82   : > { %v8978_v56 = vsel %vm3161_vm3, %v16940_v42, 0.0  ;;  %v16944_v48 = vpop.eup %13525 }
0x2c83   : > { %8958 = vadd.xlane.f32.xlu0 %v8957_v51  ;;  %v8981_v9 = vsel %vm3161_vm3, %v16944_v48, 0.0 }
0x2c84   : > { %8976 = vadd.xlane.f32.xlu1 %v8975_v55  ;;  %v16948_v38 = vpop.eup %13527 }
0x2c85   : > { %v8984_v32 = vsel %vm3161_vm3, %v16948_v38, 0.0 }
0x2c87   : > { %8961 = vadd.xlane.f32.xlu0 %v8960_v16 }
0x2c8b   : > { %8979 = vadd.xlane.f32.xlu0 %v8978_v56 }
0x2c8f   : > { %8982 = vadd.xlane.f32.xlu0 %v8981_v9 }
0x2c93   : > { %8985 = vadd.xlane.f32.xlu0 %v8984_v32 }
0x2c95   : > { %8616 = vrot.lane.b32.xlu1 %v8614_v39, %s17803_s1 }
0x2cb8   : > { %9027 = vxpose.xlu1.c.b16.start.end [1/1] (short) (narrow) %v8614_v39, 16 }
0x2cbc   : > { %v8947_v15 = vpop.xlane.xlu1 %8946 }
0x2cc0   : > { %v8941_v3 = vpop.xlane.xlu1 %8940 }
0x2cc1   : > { %13529 = vrcp.f32 %v8941_v3 }
0x2ccb   : > { %v13530_v18 = vpop.eup %13529 }
0x2ccc   : > { %v9003_v10 = vmul.f32 %v13530_v18, %v16880_v44 }
0x2cfc   : > { %v8950_v14 = vpop.xlane.xlu0 %8949 }
0x2d00   : > { %v8944_v19 = vpop.xlane.xlu0 %8943 }
0x2d01   : > { %13531 = vrcp.f32 %v8944_v19 }
0x2d02   : > { %13533 = vrcp.f32 %v8950_v14 }
0x2d03   : > { %13535 = vrcp.f32 %v8947_v15 }
0x2d04   : > { %v8974_v7 = vpop.xlane.xlu0 %8973 }
0x2d05   : > { %v8953_v62 = vpop.xlane.xlu1 %8952 }
0x2d06   : > { %13537 = vrcp.f32 %v8953_v62 }
0x2d08   : > { %v8968_v53 = vpop.xlane.xlu0 %8967 }
0x2d09   : > { %v8971_v37 = vpop.xlane.xlu1 %8970  ;;  %13539 = vrcp.f32 %v8968_v53 }
0x2d0b   : > { %v13532_v1 = vpop.eup %13531 }
0x2d0c   : > { %v8956_v47 = vpop.xlane.xlu0 %8955  ;;  %v9004_v25 = vmul.f32 %v13532_v1, %v16892_v36  ;;  %v13534_v2 = vpop.eup %13533 }
0x2d0d   : > { %13541 = vrcp.f32 %v8956_v47  ;;  %v8965_v49 = vpop.xlane.xlu1 %8964  ;;  %v13536_v17 = vpop.eup %13535  ;;  %v9006_v55 = vmul.f32 %v13534_v2, %v16890_v21 }
0x2d0e   : > { %13543 = vrcp.f32 %v8965_v49  ;;  %v9019_v31 = vpack.c.bf16 %v9004_v25, %v9003_v10  ;;  %v9005_v44 = vmul.f32 %v13536_v17, %v16876_v20 }
0x2d0f   : > { %13545 = vrcp.f32 %v8971_v37 }
0x2d10   : > { %v8959_v30 = vpop.xlane.xlu0 %8958  ;;  %v9063_v51 = vsel %vm3161_vm3, %v9019_v31, 0  ;;  %13547 = vrcp.f32 %v8974_v7  ;;  %v9020_v56 = vpack.c.bf16 %v9006_v55, %v9005_v44  ;;  %v13538_v58 = vpop.eup %13537 }
0x2d11   : > { %v8977_v16 = vpop.xlane.xlu1 %8976  ;;  %12746 = vmatpush3.bf16.xpose.msra.mxu0 %v9063_v51  ;;  %13549 = vrcp.f32 %v8959_v30  ;;  %v9007_v7 = vmul.f32 %v13538_v58, %v16904_v35 }
0x2d12   : > { %12747 = vmatprep.subr.bf16.mxu0 %v17629_v0  ;;  %v9066_v21 = vsel %vm3161_vm3, %v9020_v56, 0 }
0x2d13   : > { %v13540_v50 = vpop.eup %13539 }
0x2d14   : > { %v8962_v36 = vpop.xlane.xlu0 %8961  ;;  %v9012_v20 = vmul.f32 %v13540_v50, %v16908_v27 }
0x2d15   : > { %13551 = vrcp.f32 %v8962_v36  ;;  %v8617_v9 = vpop.permute.xlu1 %8616 }
0x2d16   : > { %9043 = vxpose.xlu0.c.b16.start.end [1/1] (short) (narrow) %v8617_v9, 16  ;;  %v13361_v9 = vld [vmem:[%s17842_s15] sm:$0xff]   ;;  %s17850_s15 = sld [smem:[#allocation74_spill]] }
0x2d17   : > { %v13542_v32 = vpop.eup %13541 }
0x2d18   : > { %v13544_v39 = vpop.eup %13543  ;;  %v8980_v15 = vpop.xlane.xlu0 %8979  ;;  %v9008_v3 = vmul.f32 %v13542_v32, %v16917_v43 }
0x2d19   : > { %13553 = vrcp.f32 %v8980_v15  ;;  %12748 = vmatpush3.bf16.xpose.msra.mxu0 %v9066_v21  ;;  %v9011_v14 = vmul.f32 %v13544_v39, %v16921_v46  ;;  %v13546_v19 = vpop.eup %13545 }
0x2d1a   : > { %13555 = vrcp.f32 %v8977_v16  ;;  %12749 = vmatprep.subr.bf16.mxu0 %v17629_v0  ;;  %v13548_v53 = vpop.eup %13547  ;;  %v9021_v37 = vpack.c.bf16 %v9008_v3, %v9007_v7  ;;  %v9013_v43 = vmul.f32 %v13546_v19, %v16912_v59 }
0x2d1b   : > { %v9023_v62 = vpack.c.bf16 %v9012_v20, %v9011_v14  ;;  %v13550_v47 = vpop.eup %13549  ;;  %v9014_v27 = vmul.f32 %v13548_v53, %v16901_v4 }
0x2d1c   : > { %v8983_v18 = vpop.xlane.xlu0 %8982  ;;  %v9069_v25 = vsel %vm3161_vm3, %v9021_v37, 0  ;;  %v9009_v59 = vmul.f32 %v13550_v47, %v16926_v11 }
0x2d1d   : > { %v9118_v1 = vsel %vm3161_vm3, %v9023_v62, 0  ;;  %v9024_v2 = vpack.c.bf16 %v9014_v27, %v9013_v43 }
0x2d1e   : > { %12758 = vmatpush3.bf16.xpose.msra.mxu1 %v9118_v1  ;;  %v9035_v56 = vpop.trf.xlu1 }
0x2d1f   : > { %v13552_v10 = vpop.eup %13551  ;;  %12759 = vmatprep.subr.bf16.mxu1 %v17629_v0  ;;  %v9121_v30 = vsel %vm3161_vm3, %v9024_v2, 0 }
0x2d20   : > { %v8986_v46 = vpop.xlane.xlu0 %8985  ;;  %v9010_v35 = vmul.f32 %v13552_v10, %v16934_v57 }
0x2d21   : > { %13557 = vrcp.f32 %v8986_v46  ;;  %12750 = vmatpush3.bf16.xpose.msra.mxu0 %v9069_v25 }
0x2d22   : > { %13559 = vrcp.f32 %v8983_v18  ;;  %12751 = vmatprep.subr.bf16.mxu0 %v17629_v0  ;;  %v9022_v17 = vpack.c.bf16 %v9010_v35, %v9009_v59 }
0x2d23   : > { %v13554_v49 = vpop.eup %13553 }
0x2d24   : > { %v13556_v31 = vpop.eup %13555  ;;  %v9016_v4 = vmul.f32 %v13554_v49, %v16940_v42  ;;  %v9072_v51 = vsel %vm3161_vm3, %v9022_v17, 0 }
0x2d25   : > { %v9015_v57 = vmul.f32 %v13556_v31, %v16930_v52 }
0x2d26   : > { %12760 = vmatpush3.bf16.xpose.msra.mxu1 %v9121_v30 }
0x2d27   : > { %12761 = vmatprep.subr.bf16.mxu1 %v17629_v0  ;;  %v9025_v55 = vpack.c.bf16 %v9016_v4, %v9015_v57 }
0x2d29   : > { %12752 = vmatpush3.bf16.xpose.msra.mxu0 %v9072_v51  ;;  %v9124_v11 = vsel %vm3161_vm3, %v9025_v55, 0 }
0x2d2b   : > { %v13558_v16 = vpop.eup %13557 }
0x2d2c   : > { %v13560_v44 = vpop.eup %13559  ;;  %v9018_v36 = vmul.f32 %v13558_v16, %v16948_v38  ;;  %v13362_v38 = vld [vmem:[%s17843_s4 + $0x8] sm:$0xff]   ;;  %s17851_s4 = smov %s17850_s15 }
0x2d2d   : > { %v9017_v42 = vmul.f32 %v13560_v44, %v16944_v48 }
0x2d2e   : > { %12762 = vmatpush3.bf16.xpose.msra.mxu1 %v9124_v11 }
0x2d2f   : > { %12763 = vmatprep.subr.bf16.mxu1 %v17629_v0  ;;  %v9026_v52 = vpack.c.bf16 %v9018_v36, %v9017_v42 }
0x2d30   : > { %12754 = vmatmul.mubr.msk.bf16.vlgmr.msra.gmra.mrb[112].mxu0 %vm3161_vm3, %v9035_v56 }
0x2d31   : > { %v9127_v58 = vsel %vm3161_vm3, %v9026_v52, 0 }
0x2d36   : > { %12764 = vmatpush3.bf16.xpose.msra.mxu1 %v9127_v58 }
0x2d37   : > { %12779 = vmatprep.subr.bf16.mxu1 %v17629_v0 }
0x2d7c   : > { %v9051_v50 = vpop.trf.xlu0 }
0x2d7d   : > { %12766 = vmatmul.mubr.msk.bf16.vlgmr.msra.gmra.mrb[112].mxu1 %vm3161_vm3, %v9051_v50 }
0x2d7e   : > { %12780 = vmatpush3.bf16.msra.mxu1 %v13361_v9  ;;  %12783 = vmatprep.mubr.msk.bf16.mxu1 %vm14637_vm0, %v17629_v0 }
0x2d7f   : > { %12781 = vmatprep.subr.bf16.mxu1 %v17629_v0 }
0x2d82   : > { %12782 = vmatpush3.bf16.msra.mxu1 %v13362_v38 }
0x2d85   : > { %12784 = vmatmul.mubr.msk.bf16.vlgmr.msra.gmra.mrb[116].mxu1 %vm2856_vm1, %v16771_v40 }
0x2e03   : > { %v9108_v48 = vpop.f32.mrb[112].mxu0 }
0x2e04   : > { %v12755_v32 = vpop.f32.mrb[113].mxu0  ;;  %9169 = vxpose.xlu1.b32.start.end [1/1] (short) (narrow) %v9108_v48, 64 }
0x2e05   : > { %v9111_v39 = vpop.f32.mrb[114].mxu0 }
0x2e06   : > { %v12756_v15 = vpop.f32.mrb[115].mxu0 }
0x2e50   : > { %v9163_v21 = vpop.f32.mrb[112].mxu1 }
0x2e51   : > { %9201 = vxpose.xlu1.b32.start.end [1/1] (short) (narrow) %v9163_v21, 64  ;;  %v12767_v3 = vpop.f32.mrb[113].mxu1 }
0x2e52   : > { %v9166_v14 = vpop.f32.mrb[114].mxu1 }
0x2e53   : > { %v12768_v20 = vpop.f32.mrb[115].mxu1 }
0x2e58   : > { %v16994_v19 = vpop.f32.mrb[116].mxu1 }
0x2e59   : > { %v12785_v7 = vpop.f32.mrb[117].mxu1 }
0x2e5a   : > { %v10523_v62 = vpop.f32.mrb[118].mxu1 }
0x2e5b   : > { %v12786_v53 = vpop.f32.mrb[119].mxu1 }
0x2e84   : > { %v9185_v18 = vpop.trf.xlu1 }
0x2e85   : > { %v9233_v46 = vcombine.high %v9185_v18, %v17629_v0  ;;  %v9240_v59 = vrot.slane %v9185_v18, %v15564_v24 }
0x2e87   : > { %v9247_v31 = vrot.slane %v9233_v46, %v15564_v24 }
0x2e88   : > { %v9186_v37 = vpop.trf.xlu1 }
0x2e89   : > { %v9299_v25 = vcombine.high %v9186_v37, %v17629_v0  ;;  %v9306_v17 = vrot.slane %v9186_v37, %v15564_v24 }
0x2e8b   : > { %v9313_v30 = vrot.slane %v9299_v25, %v15564_v24 }
0x2e8c   : > { %v9187_v1 = vpop.trf.xlu1 }
0x2e8d   : > { %v9365_v35 = vcombine.high %v9187_v1, %v17629_v0  ;;  %v17007_v51 = vrot.slane %v9187_v1, %v15564_v24 }
0x2e8f   : > { %v17010_v55 = vrot.slane %v9365_v35, %v15564_v24 }
0x2e90   : > { %v9188_v43 = vpop.trf.xlu1 }
0x2e91   : > { %v9431_v2 = vcombine.high %v9188_v43, %v17629_v0  ;;  %v17015_v11 = vrot.slane %v9188_v43, %v15564_v24 }
0x2e93   : > { %v17018_v36 = vrot.slane %v9431_v2, %v15564_v24 }
0x2e94   : > { %v9189_v40 = vpop.trf.xlu1 }
0x2e95   : > { %v9497_v49 = vcombine.high %v9189_v40, %v17629_v0  ;;  %v17021_v56 = vrot.slane %v9189_v40, %v15564_v24 }
0x2e97   : > { %v17025_v52 = vrot.slane %v9497_v49, %v15564_v24 }
0x2e98   : > { %v9190_v47 = vpop.trf.xlu1 }
0x2e99   : > { %v9563_v4 = vcombine.high %v9190_v47, %v17629_v0  ;;  %v17029_v38 = vrot.slane %v9190_v47, %v15564_v24 }
0x2e9b   : > { %v17032_v48 = vrot.slane %v9563_v4, %v15564_v24 }
0x2e9c   : > { %v9191_v10 = vpop.trf.xlu1 }
0x2e9d   : > { %v9629_v42 = vcombine.high %v9191_v10, %v17629_v0  ;;  %v17035_v32 = vrot.slane %v9191_v10, %v15564_v24 }
0x2e9f   : > { %v17041_v7 = vrot.slane %v9629_v42, %v15564_v24 }
0x2ea0   : > { %v9192_v27 = vpop.trf.xlu1 }
0x2ea1   : > { %v9695_v39 = vcombine.high %v9192_v27, %v17629_v0  ;;  %v17044_v62 = vrot.slane %v9192_v27, %v15564_v24 }
0x2ea3   : > { %v17051_v47 = vrot.slane %v9695_v39, %v15564_v24 }
0x2ed1   : > { %v9217_v57 = vpop.trf.xlu1 }
0x2ed2   : > { %v9248_v16 = vcombine.high %v9217_v57, %v17629_v0  ;;  %v9255_v44 = vrot.slane %v9217_v57, %v15564_v24 }
0x2ed4   : > { %v9262_v58 = vrot.slane %v9248_v16, %v15564_v24  ;;  %v9263_v9 = vcombine.low %v9240_v59, %v9255_v44  ;;  %v9264_v50 = vcombine.high %v9240_v59, %v9255_v44 }
0x2ed5   : > { %v9218_v15 = vpop.trf.xlu1 }
0x2ed6   : > { %v9271_v21 = vrot.slane %v9263_v9, %v15568_v29  ;;  %v9278_v3 = vrot.slane %v9264_v50, %v15568_v29  ;;  %v9279_v14 = vcombine.low %v9247_v31, %v9262_v58  ;;  %v9280_v20 = vcombine.high %v9247_v31, %v9262_v58 }
0x2ed7   : > { %v9314_v53 = vcombine.high %v9218_v15, %v17629_v0  ;;  %v9321_v18 = vrot.slane %v9218_v15, %v15564_v24 }
0x2ed8   : > { %v9287_v37 = vrot.slane %v9279_v14, %v15568_v29  ;;  %v9294_v1 = vrot.slane %v9280_v20, %v15568_v29  ;;  %v9761_v43 = vcombine.low %v9271_v21, %v9278_v3  ;;  %v12091_v40 = vcombine.high %v9271_v21, %v9278_v3 }
0x2ed9   : > { %v9328_v10 = vrot.slane %v9314_v53, %v15564_v24  ;;  %v9329_v46 = vcombine.low %v9306_v17, %v9321_v18  ;;  %v9330_v25 = vcombine.high %v9306_v17, %v9321_v18  ;;  %v9219_v35 = vpop.trf.xlu1 }
0x2eda   : > { %v17055_v27 = vrot.slane %v9761_v43, %v15564_v24  ;;  %v17058_v2 = vrot.slane %v12091_v40, %v15564_v24  ;;  %v9777_v59 = vcombine.low %v9287_v37, %v9294_v1  ;;  %v12092_v49 = vcombine.high %v9287_v37, %v9294_v1 }
0x2edb   : > { %v9337_v31 = vrot.slane %v9329_v46, %v15568_v29  ;;  %v9344_v4 = vrot.slane %v9330_v25, %v15568_v29  ;;  %v9345_v57 = vcombine.low %v9313_v30, %v9328_v10  ;;  %v9346_v16 = vcombine.high %v9313_v30, %v9328_v10 }
0x2edc   : > { %v17063_v44 = vrot.slane %v9777_v59, %v15564_v24  ;;  %v17066_v17 = vrot.slane %v12092_v49, %v15564_v24  ;;  %v9380_v58 = vcombine.high %v9219_v35, %v17629_v0  ;;  %v9387_v30 = vrot.slane %v9219_v35, %v15564_v24 }
0x2edd   : > { %v9353_v9 = vrot.slane %v9345_v57, %v15568_v29  ;;  %v9360_v50 = vrot.slane %v9346_v16, %v15568_v29  ;;  %v9811_v39 = vcombine.low %v9337_v31, %v9344_v4  ;;  %v12093_v15 = vcombine.high %v9337_v31, %v9344_v4  ;;  %v9220_v21 = vpop.trf.xlu1 }
0x2ede   : > { %v9394_v3 = vrot.slane %v9380_v58, %v15564_v24  ;;  %v9446_v14 = vcombine.high %v9220_v21, %v17629_v0  ;;  %v9453_v20 = vrot.slane %v9220_v21, %v15564_v24  ;;  %v9395_v43 = vcombine.low %v17007_v51, %v9387_v30 }
0x2edf   : > { %v17078_v53 = vrot.slane %v9811_v39, %v15564_v24  ;;  %v17081_v18 = vrot.slane %v12093_v15, %v15564_v24  ;;  %v9827_v37 = vcombine.low %v9353_v9, %v9360_v50  ;;  %v12094_v1 = vcombine.high %v9353_v9, %v9360_v50 }
0x2ee0   : > { %v9396_v40 = vcombine.high %v17007_v51, %v9387_v30  ;;  %v9411_v10 = vcombine.low %v17010_v55, %v9394_v3  ;;  %v9412_v46 = vcombine.high %v17010_v55, %v9394_v3  ;;  %v9460_v49 = vrot.slane %v9446_v14, %v15564_v24 }
0x2ee1   : > { %v17088_v25 = vrot.slane %v9827_v37, %v15564_v24  ;;  %v17091_v35 = vrot.slane %v12094_v1, %v15564_v24  ;;  %v9221_v31 = vpop.trf.xlu1  ;;  %v9403_v4 = vrot.slane %v9395_v43, %v15568_v29  ;;  %v9461_v16 = vcombine.low %v17015_v11, %v9453_v20 }
0x2ee2   : > { %v9410_v51 = vrot.slane %v9396_v40, %v15568_v29  ;;  %v9419_v57 = vrot.slane %v9411_v10, %v15568_v29  ;;  %v9426_v55 = vrot.slane %v9412_v46, %v15568_v29  ;;  %v9462_v58 = vcombine.high %v17015_v11, %v9453_v20 }
0x2ee3   : > { %v9477_v9 = vcombine.low %v17018_v36, %v9460_v49  ;;  %v9478_v50 = vcombine.high %v17018_v36, %v9460_v49  ;;  %v9469_v3 = vrot.slane %v9461_v16, %v15568_v29 }
0x2ee4   : > { %v9861_v39 = vcombine.low %v9403_v4, %v9410_v51  ;;  %v12095_v15 = vcombine.high %v9403_v4, %v9410_v51  ;;  %v9877_v21 = vcombine.low %v9419_v57, %v9426_v55  ;;  %v12096_v30 = vcombine.high %v9419_v57, %v9426_v55 }
0x2ee5   : > { %v9476_v14 = vrot.slane %v9462_v58, %v15568_v29  ;;  %v9485_v37 = vrot.slane %v9477_v9, %v15568_v29  ;;  %v9492_v1 = vrot.slane %v9478_v50, %v15568_v29  ;;  %v9222_v43 = vpop.trf.xlu1  ;;  %v9512_v57 = vcombine.high %v9221_v31, %v17629_v0 }
0x2ee6   : > { %v17109_v40 = vrot.slane %v9861_v39, %v15564_v24  ;;  %v17112_v11 = vrot.slane %v12095_v15, %v15564_v24  ;;  %v17115_v36 = vrot.slane %v9877_v21, %v15564_v24  ;;  %v17118_v20 = vrot.slane %v12096_v30, %v15564_v24 }
0x2ee7   : > { %v9911_v10 = vcombine.low %v9469_v3, %v9476_v14  ;;  %v12097_v46 = vcombine.high %v9469_v3, %v9476_v14  ;;  %v9927_v49 = vcombine.low %v9485_v37, %v9492_v1  ;;  %v12098_v4 = vcombine.high %v9485_v37, %v9492_v1 }
0x2ee8   : > { %v9519_v55 = vrot.slane %v9221_v31, %v15564_v24  ;;  %v9578_v16 = vcombine.high %v9222_v43, %v17629_v0  ;;  %v9526_v21 = vrot.slane %v9512_v57, %v15564_v24  ;;  %v9585_v3 = vrot.slane %v9222_v43, %v15564_v24 }
0x2ee9   : > { %v17126_v58 = vrot.slane %v9911_v10, %v15564_v24  ;;  %v17129_v9 = vrot.slane %v12097_v46, %v15564_v24  ;;  %v17132_v50 = vrot.slane %v9927_v49, %v15564_v24  ;;  %v17135_v39 = vrot.slane %v12098_v4, %v15564_v24  ;;  %v9223_v15 = vpop.trf.xlu1 }
0x2eea   : > { %v9527_v30 = vcombine.low %v17021_v56, %v9519_v55  ;;  %v9528_v31 = vcombine.high %v17021_v56, %v9519_v55  ;;  %v9592_v37 = vrot.slane %v9578_v16, %v15564_v24  ;;  %v9644_v1 = vcombine.high %v9223_v15, %v17629_v0 }
0x2eeb   : > { %v9651_v10 = vrot.slane %v9223_v15, %v15564_v24  ;;  %v9543_v4 = vcombine.low %v17025_v52, %v9526_v21  ;;  %v9544_v57 = vcombine.high %v17025_v52, %v9526_v21  ;;  %v9593_v56 = vcombine.low %v17029_v38, %v9585_v3 }
0x2eec   : > { %v9535_v46 = vrot.slane %v9527_v30, %v15568_v29  ;;  %v9542_v49 = vrot.slane %v9528_v31, %v15568_v29  ;;  %v9594_v43 = vcombine.high %v17029_v38, %v9585_v3  ;;  %v9609_v55 = vcombine.low %v17032_v48, %v9592_v37 }
0x2eed   : > { %v9610_v16 = vcombine.high %v17032_v48, %v9592_v37  ;;  %v9551_v14 = vrot.slane %v9543_v4, %v15568_v29  ;;  %v9558_v15 = vrot.slane %v9544_v57, %v15568_v29  ;;  %v9601_v31 = vrot.slane %v9593_v56, %v15568_v29 }
0x2eee   : > { %v9961_v51 = vcombine.low %v9535_v46, %v9542_v49  ;;  %v12099_v30 = vcombine.high %v9535_v46, %v9542_v49  ;;  %v9608_v0 = vrot.slane %v9594_v43, %v15568_v29  ;;  %v9617_v52 = vrot.slane %v9609_v55, %v15568_v29 }
0x2eef   : > { %v9624_v21 = vrot.slane %v9610_v16, %v15568_v29  ;;  %v9977_v59 = vcombine.low %v9551_v14, %v9558_v15  ;;  %v12100_v48 = vcombine.high %v9551_v14, %v9558_v15  ;;  %v9658_v43 = vrot.slane %v9644_v1, %v15564_v24 }
0x2ef0   : > { %v9968_v38 = vrot.slane %v9961_v51, %v15564_v24  ;;  %v9976_v3 = vrot.slane %v12099_v30, %v15564_v24  ;;  %v10011_v37 = vcombine.low %v9601_v31, %v9608_v0  ;;  %v12101_v4 = vcombine.high %v9601_v31, %v9608_v0  ;;  %v9224_v31 = vpop.trf.xlu1 }
0x2ef1   : > { %v10027_v42 = vcombine.low %v9617_v52, %v9624_v21  ;;  %v12102_v57 = vcombine.high %v9617_v52, %v9624_v21  ;;  %v17163_v46 = vrot.slane %v9977_v59, %v15564_v24  ;;  %v17166_v49 = vrot.slane %v12100_v48, %v15564_v24 }
0x2ef2   : > { %v9993_v56 = vcombine.low %v9968_v38, %v9976_v3  ;;  %v10018_v55 = vrot.slane %v10011_v37, %v15564_v24  ;;  %v10026_v51 = vrot.slane %v12101_v4, %v15564_v24  ;;  %v9659_v14 = vcombine.low %v17035_v32, %v9651_v10 }
0x2ef3   : > { %v17172_v16 = vrot.slane %v10027_v42, %v15564_v24  ;;  %v17175_v0 = vrot.slane %v12102_v57, %v15564_v24  ;;  %v9660_v59 = vcombine.high %v17035_v32, %v9651_v10  ;;  %v9675_v15 = vcombine.low %v17041_v7, %v9658_v43 }
0x2ef4   : > { %v9676_v30 = vcombine.high %v17041_v7, %v9658_v43  ;;  %v10043_v1 = vcombine.low %v10018_v55, %v10026_v51  ;;  %v17844_v52 = vcombine.low %v17055_v27, %v17058_v2  ;;  %v9801_v42 = vcombine.low %v17063_v44, %v17066_v17 }
0x2ef5   : > { %v17845_v38 = vcombine.low %v17078_v53, %v17081_v18  ;;  %v9667_v10 = vrot.slane %v9659_v14, %v15568_v29  ;;  %v9674_v7 = vrot.slane %v9660_v59, %v15568_v29  ;;  %v9683_v3 = vrot.slane %v9675_v15, %v15568_v29 }
0x2ef6   : > { %v17185_v21 = vrot.slane %v17844_v52, %v15568_v29  ;;  %v9690_v48 = vrot.slane %v9676_v30, %v15568_v29  ;;  %v17200_v27 = vrot.slane %v9801_v42, %v15568_v29  ;;  %v9851_v2 = vcombine.low %v17088_v25, %v17091_v35 }
0x2ef7   : > { %v17193_v32 = vrot.slane %v17845_v38, %v15568_v29  ;;  %v17846_v44 = vmov 0.0   ;;  %v9717_v53 = vrot.slane %v9224_v31, %v15564_v24  ;;  %v10061_v18 = vcombine.low %v9667_v10, %v9674_v7 }
0x2ef8   : > { %v9710_v17 = vcombine.high %v9224_v31, %v17846_v44  ;;  %v12103_v37 = vcombine.high %v9667_v10, %v9674_v7  ;;  %v10077_v4 = vcombine.low %v9683_v3, %v9690_v48  ;;  %v12104_v57 = vcombine.high %v9683_v3, %v9690_v48 }
0x2ef9   : > { %v9810_v43 = vcombine.high %v17185_v21, %v17200_v27  ;;  %v17209_v55 = vrot.slane %v9851_v2, %v15568_v29  ;;  %v9725_v14 = vcombine.low %v17044_v62, %v9717_v53  ;;  %v10068_v25 = vrot.slane %v10061_v18, %v15564_v24  ;;  %v13363_v2 = vld [vmem:[%s17847_s16] sm:$0xff]   ;;  %s17852_s16 = sld [smem:[#allocation71_spill]] }
0x2efa   : > { %v9724_v51 = vrot.slane %v9710_v17, %v15564_v24  ;;  %v10076_v35 = vrot.slane %v12103_v37, %v15564_v24  ;;  %v10084_v59 = vrot.slane %v10077_v4, %v15564_v24  ;;  %v10092_v15 = vrot.slane %v12104_v57, %v15564_v24  ;;  %12769 = vmatprep.subr.bf16.mxu0 %v13363_v2 }
0x2efb   : > { %v9860_v30 = vcombine.high %v17193_v32, %v17209_v55  ;;  %v9726_v31 = vcombine.high %v17044_v62, %v9717_v53  ;;  %v9733_v52 = vrot.slane %v9725_v14, %v15568_v29  ;;  %v17848_v7 = vcombine.low %v17109_v40, %v17112_v11  ;;  %12770 = vmatpush3.bf16.msra.mxu0 %v13363_v2 }
0x2efc   : > { %v9741_v42 = vcombine.low %v17051_v47, %v9724_v51  ;;  %v10093_v38 = vcombine.low %v10068_v25, %v10076_v35  ;;  %v9742_v10 = vcombine.high %v17051_v47, %v9724_v51  ;;  %v9901_v48 = vcombine.low %v17115_v36, %v17118_v20 }
0x2efd   : > { %v17227_v3 = vrot.slane %v17848_v7, %v15568_v29  ;;  %v13286_v17 = vpack.i.bf16 %v9860_v30, %v9810_v43  ;;  %v9740_v62 = vrot.slane %v9726_v31, %v15568_v29  ;;  %v17849_v18 = vcombine.low %v17126_v58, %v17129_v9 }
0x2efe   : > { %v9749_v53 = vrot.slane %v9741_v42, %v15568_v29  ;;  %v9756_v37 = vrot.slane %v9742_v10, %v15568_v29  ;;  %v9908_v40 = vrot.slane %v9901_v48, %v15568_v29  ;;  %v9951_v11 = vcombine.low %v17132_v50, %v17135_v39 }
0x2eff   : > { %v9950_v47 = vrot.slane %v17849_v18, %v15568_v29  ;;  %v17243_v36 = vrot.slane %v9993_v56, %v15568_v29  ;;  %13287 = vrot.lane.b32.xlu0 %v13286_v17, %s17809_s3  ;;  %v10111_v20 = vcombine.low %v9733_v52, %v9740_v62  ;;  %v12105_v4 = vcombine.high %v9733_v52, %v9740_v62  ;;  %s17853_s5 = smov %s17852_s16 }
0x2f00   : > { %v10001_v57 = vcombine.low %v17163_v46, %v17166_v49  ;;  %v10050_v58 = vrot.slane %v10043_v1, %v15568_v29  ;;  %v10127_v9 = vcombine.low %v9749_v53, %v9756_v37  ;;  %v12106_v43 = vcombine.high %v9749_v53, %v9756_v37 }
0x2f01   : > { %v9910_v51 = vcombine.high %v17227_v3, %v9908_v40  ;;  %v9958_v14 = vrot.slane %v9951_v11, %v15568_v29  ;;  %v10118_v50 = vrot.slane %v10111_v20, %v15564_v24  ;;  %v10126_v39 = vrot.slane %v12105_v4, %v15564_v24 }
0x2f02   : > { %v10008_v56 = vrot.slane %v10001_v57, %v15568_v29  ;;  %v10051_v25 = vcombine.low %v17172_v16, %v17175_v0  ;;  %v10134_v46 = vrot.slane %v10127_v9, %v15564_v24  ;;  %v10142_v49 = vrot.slane %v12106_v43, %v15564_v24 }
0x2f03   : > { %v9960_v1 = vcombine.high %v9950_v47, %v9958_v14  ;;  %v10100_v35 = vrot.slane %v10093_v38, %v15568_v29  ;;  %v10143_v30 = vcombine.low %v10118_v50, %v10126_v39  ;;  %v10101_v42 = vcombine.low %v10084_v59, %v10092_v15 }
0x2f04   : > { %v10010_v31 = vcombine.high %v17243_v36, %v10008_v56  ;;  %v10058_v52 = vrot.slane %v10051_v25, %v15568_v29  ;;  %v10151_v7 = vcombine.low %v10134_v46, %v10142_v49  ;;  %v9809_v48 = vcombine.low %v17185_v21, %v17200_v27 }
0x2f05   : > { %v13291_v10 = vpack.i.bf16 %v9960_v1, %v9910_v51  ;;  %v9859_v16 = vcombine.low %v17193_v32, %v17209_v55  ;;  %v10108_v2 = vrot.slane %v10101_v42, %v15568_v29  ;;  %v10150_v17 = vrot.slane %v10143_v30, %v15568_v29  ;;  %v12107_v42 = vld [vmem:[#allocation16] ss:$0 sm:$0xff] }
0x2f06   : > { %v10060_v0 = vcombine.high %v10050_v58, %v10058_v52  ;;  %v9909_v38 = vcombine.low %v17227_v3, %v9908_v40  ;;  %v10158_v62 = vrot.slane %v10151_v7, %v15568_v29  ;;  %v9959_v59 = vcombine.low %v9950_v47, %v9958_v14 }
0x2f07   : > { %13292 = vrot.lane.b32.xlu0 %v13291_v10, %s17809_s3  ;;  %v10009_v15 = vcombine.low %v17243_v36, %v10008_v56  ;;  %v10059_v53 = vcombine.low %v10050_v58, %v10058_v52  ;;  %v10109_v21 = vcombine.low %v10100_v35, %v10108_v2  ;;  %v10110_v27 = vcombine.high %v10100_v35, %v10108_v2 }
0x2f08   : > { %v13296_v18 = vpack.i.bf16 %v10060_v0, %v10010_v31  ;;  %v10160_v37 = vcombine.high %v10150_v17, %v10158_v62  ;;  %v10159_v32 = vcombine.low %v10150_v17, %v10158_v62 }
0x2f0a   : > { %v13301_v55 = vpack.i.bf16 %v10160_v37, %v10110_v27 }
0x2f0b   : > { %13297 = vrot.lane.b32.xlu0 %v13296_v18, %s17809_s3 }
0x2f0f   : > { %13302 = vrot.lane.b32.xlu0 %v13301_v55, %s17809_s3 }
0x2f71   : > { %v13288_v11 = vpop.permute.xlu0 %13287 }
0x2f72   : > { %v13290_v3 = vunpack.i.h.bf16 %v13288_v11  ;;  %v13289_v40 = vunpack.i.l.bf16 %v13288_v11 }
0x2f74   : > { %v10193_v20 = vsel %vm3161_vm3, %v9809_v48, %v13289_v40  ;;  %v10194_v47 = vsel %vm3161_vm3, %v9859_v16, %v13290_v3 }
0x2f75   : > { %v10201_v4 = vpack.c.bf16 %v10194_v47, %v10193_v20 }
0x2f77   : > { %12771 = vmatprep.mubr.msk.bf16.mxu0 %vm3072_vm2, %v10201_v4 }
0x2f79   : > { %v13293_v36 = vpop.permute.xlu0 %13292 }
0x2f7a   : > { %v13295_v57 = vunpack.i.h.bf16 %v13293_v36  ;;  %v13294_v58 = vunpack.i.l.bf16 %v13293_v36 }
0x2f7c   : > { %v10195_v9 = vsel %vm3161_vm3, %v9909_v38, %v13294_v58  ;;  %v10196_v43 = vsel %vm3161_vm3, %v9959_v59, %v13295_v57 }
0x2f7d   : > { %v10202_v51 = vpack.c.bf16 %v10196_v43, %v10195_v9  ;;  %v13298_v14 = vpop.permute.xlu0 %13297 }
0x2f7e   : > { %v13300_v50 = vunpack.i.h.bf16 %v13298_v14  ;;  %v13299_v39 = vunpack.i.l.bf16 %v13298_v14 }
0x2f7f   : > { %12772 = vmatmul.mubr.msk.bf16.vlgmr.msra.gmra.mrb[116].mxu0 %vm3072_vm2, %v10202_v51 }
0x2f80   : > { %v10197_v56 = vsel %vm3161_vm3, %v10009_v15, %v13299_v39  ;;  %v10198_v25 = vsel %vm3161_vm3, %v10059_v53, %v13300_v50 }
0x2f81   : > { %v10203_v46 = vpack.c.bf16 %v10198_v25, %v10197_v56  ;;  %v13303_v49 = vpop.permute.xlu0 %13302 }
0x2f82   : > { %v13305_v1 = vunpack.i.h.bf16 %v13303_v49  ;;  %v13304_v35 = vunpack.i.l.bf16 %v13303_v49 }
0x2f83   : > { %12775 = vmatprep.mubr.msk.bf16.mxu0 %vm3072_vm2, %v10203_v46 }
0x2f84   : > { %v10199_v30 = vsel %vm3161_vm3, %v10109_v21, %v13304_v35  ;;  %v10200_v31 = vsel %vm3161_vm3, %v10159_v32, %v13305_v1 }
0x2f85   : > { %v10204_v52 = vpack.c.bf16 %v10200_v31, %v10199_v30  ;;  %v13364_v31 = vld [vmem:[%s17850_s15] sm:$0xff]   ;;  %s12150_s15 = sshll.u32 %s15505_s2, 6  ;;  %s17854_s2 = sld [smem:[#allocation70_spill]] }
0x2f86   : > { %12799 = vmatprep.subr.bf16.mxu0 %v13364_v31 }
0x2f87   : > { %12776 = vmatmul.mubr.msk.bf16.gmra.mrb[120].mxu0 %vm3072_vm2, %v10204_v52  ;;  %v13365_v52 = vld [vmem:[%s17852_s16] sm:$0xff]   ;;  %s17364_s16 = scalar_lea.vmem %s15063_s27, %s12150_s15  ;;  %s17855_s15 = sld [smem:[#allocation67_spill]] }
0x2f88   : > { %12800 = vmatpush3.bf16.msra.mxu0 %v13364_v31  ;;  %12787 = vmatprep.subr.bf16.mxu1 %v13365_v52 }
0x2f89   : > { %12788 = vmatpush3.bf16.msra.mxu1 %v13365_v52 }
0x3052   : > { %v12773_v10 = vpop.f32.mrb[116].mxu0 }
0x3053   : > { %v10266_v7 = vpop.f32.mrb[117].mxu0  ;;  %v10275_v48 = vadd.f32 %v12773_v10, %v12107_v42  ;;  %v13367_v10 = vld [vmem:[%s17853_s5 + $0x8] sm:$0xff]  }
0x3054   : > { %v10267_v16 = vadd.f32 %v12107_v42, %v10266_v7  ;;  %v12774_v0 = vpop.f32.mrb[118].mxu0  ;;  %12789 = vmatprep.subr.bf16.mxu1 %v13367_v10 }
0x3055   : > { %v10269_v2 = vpop.f32.mrb[119].mxu0  ;;  %v17289_v62 = vadd.f32 %v10275_v48, %v16533_v60  ;;  %v10278_v59 = vadd.f32 %v12774_v0, %v12107_v42  ;;  %12790 = vmatpush3.bf16.msra.mxu1 %v13367_v10 }
0x3056   : > { %v17286_v17 = vadd.f32 %v10267_v16, %v16519_v45  ;;  %v10270_v38 = vadd.f32 %v12107_v42, %v10269_v2  ;;  %12811 = vmatprep.subr.bf16.mxu1 %v17846_v44 }
0x3057   : > { %v17299_v45 = vadd.f32 %v10278_v59, %v16536_v34  ;;  %v10311_v60 = vsel %vm2856_vm1, %v17289_v62, 0.0  ;;  %v10339_v40 = vmul.f32 %v17289_v62, %v17289_v62 }
0x3058   : > { %v17292_v15 = vadd.f32 %v10270_v38, %v16522_v41  ;;  %v10305_v53 = vsel %vm2856_vm1, %v17286_v17, 0.0  ;;  %v10337_v4 = vmul.f32 %v17286_v17, %v17286_v17 }
0x3059   : > { %10306 = vadd.xlane.f32.xlu0 %v10305_v53  ;;  %v10314_v11 = vsel %vm2856_vm1, %v17299_v45, 0.0  ;;  %v10351_v47 = vsel %vm2856_vm1, %v10339_v40, 0.0 }
0x305a   : > { %v10308_v18 = vsel %vm2856_vm1, %v17292_v15, 0.0  ;;  %v12777_v21 = vpop.f32.mrb[120].mxu0  ;;  %v10345_v57 = vsel %vm2856_vm1, %v10337_v4, 0.0  ;;  %v10338_v51 = vmul.f32 %v17292_v15, %v17292_v15 }
0x305b   : > { %10309 = vadd.xlane.f32.xlu1 %v10308_v18  ;;  %v10282_v27 = vpop.f32.mrb[121].mxu0  ;;  %v10291_v9 = vadd.f32 %v12777_v21, %v12107_v42 }
0x305c   : > { %v12778_v37 = vpop.f32.mrb[122].mxu0  ;;  %v10283_v50 = vadd.f32 %v12107_v42, %v10282_v27  ;;  %v10348_v39 = vsel %vm2856_vm1, %v10338_v51, 0.0 }
0x305d   : > { %10312 = vadd.xlane.f32.xlu0 %v10311_v60  ;;  %v10294_v41 = vadd.f32 %v12778_v37, %v12107_v42  ;;  %v10285_v32 = vpop.f32.mrb[123].mxu0  ;;  %v17329_v14 = vadd.f32 %v10291_v9, %v16595_v61 }
0x305e   : > { %v10286_v55 = vadd.f32 %v12107_v42, %v10285_v32  ;;  %v17333_v56 = vadd.f32 %v10283_v50, %v16598_v54  ;;  %v13366_v42 = vld [vmem:[%s17851_s4 + $0x8] sm:$0xff]  }
0x305f   : > { %v17306_v3 = vadd.f32 %v10294_v41, %v16588_v26  ;;  %v10323_v25 = vsel %vm2856_vm1, %v17329_v14, 0.0  ;;  %v10343_v35 = vmul.f32 %v17329_v14, %v17329_v14  ;;  %12801 = vmatprep.subr.bf16.mxu0 %v13366_v42 }
0x3060   : > { %v17311_v34 = vadd.f32 %v10286_v55, %v16592_v63  ;;  %v10340_v63 = vmul.f32 %v17299_v45, %v17299_v45  ;;  %v10317_v46 = vsel %vm2856_vm1, %v17333_v56, 0.0  ;;  %v10341_v54 = vmul.f32 %v17333_v56, %v17333_v56  ;;  %12802 = vmatpush3.bf16.msra.mxu0 %v13366_v42 }
0x3061   : > { %10315 = vadd.xlane.f32.xlu0 %v10314_v11  ;;  %v10344_v26 = vmul.f32 %v17306_v3, %v17306_v3  ;;  %v10326_v61 = vsel %vm2856_vm1, %v17306_v3, 0.0  ;;  %v10363_v30 = vsel %vm2856_vm1, %v10343_v35, 0.0  ;;  %12817 = vmatprep.subr.bf16.mxu0 %v17846_v44 }
0x3062   : > { %v10342_v20 = vmul.f32 %v17311_v34, %v17311_v34  ;;  %v10354_v43 = vsel %vm2856_vm1, %v10340_v63, 0.0  ;;  %v10320_v49 = vsel %vm2856_vm1, %v17311_v34, 0.0  ;;  %v10357_v1 = vsel %vm2856_vm1, %v10341_v54, 0.0 }
0x3063   : > { %v10366_v58 = vsel %vm2856_vm1, %v10344_v26, 0.0 }
0x3064   : > { %v10360_v36 = vsel %vm2856_vm1, %v10342_v20, 0.0 }
0x3065   : > { %10352 = vadd.xlane.f32.xlu0 %v10351_v47  ;;  %10361 = vadd.xlane.f32.xlu1 %v10360_v36 }
0x3069   : > { %10346 = vadd.xlane.f32.xlu0 %v10345_v57  ;;  %10367 = vadd.xlane.f32.xlu1 %v10366_v58 }
0x306d   : > { %10355 = vadd.xlane.f32.xlu0 %v10354_v43 }
0x3071   : > { %10349 = vadd.xlane.f32.xlu0 %v10348_v39  ;;  %v17356_v39 = vld [vmem:[#allocation37] ss:$0 sm:$0xff] }
0x3075   : > { %10324 = vadd.xlane.f32.xlu0 %v10323_v25 }
0x3079   : > { %10318 = vadd.xlane.f32.xlu0 %v10317_v46 }
0x307d   : > { %10327 = vadd.xlane.f32.xlu0 %v10326_v61 }
0x3081   : > { %10321 = vadd.xlane.f32.xlu0 %v10320_v49  ;;  %v17359_v49 = vld [vmem:[#allocation35] ss:$0 sm:$0xff] }
0x3085   : > { %10358 = vadd.xlane.f32.xlu0 %v10357_v1 }
0x3089   : > { %10364 = vadd.xlane.f32.xlu0 %v10363_v30 }
0x30e6   : > { %v10307_v7 = vpop.xlane.xlu0 %10306 }
0x30e7   : > { %v10329_v38 = vmul.f32 0.03125, %v10307_v7 }
0x30e8   : > { %v10310_v32 = vpop.xlane.xlu1 %10309 }
0x30e9   : > { %v10377_v27 = vmul.f32 %v10329_v38, %v10329_v38  ;;  %v10330_v40 = vmul.f32 0.03125, %v10310_v32  ;;  %v10409_v54 = vsub.f32 %v17286_v17, %v10329_v38 }
0x30ea   : > { %v10313_v48 = vpop.xlane.xlu0 %10312 }
0x30eb   : > { %v10331_v0 = vmul.f32 0.03125, %v10313_v48  ;;  %v10378_v57 = vmul.f32 %v10330_v40, %v10330_v40 }
0x30ed   : > { %v10379_v59 = vmul.f32 %v10331_v0, %v10331_v0  ;;  %v10411_v43 = vsub.f32 %v17289_v62, %v10331_v0 }
0x30ee   : > { %v10316_v16 = vpop.xlane.xlu0 %10315 }
0x30ef   : > { %v10332_v60 = vmul.f32 0.03125, %v10316_v16 }
0x30f1   : > { %v10380_v20 = vmul.f32 %v10332_v60, %v10332_v60  ;;  %v10412_v52 = vsub.f32 %v17299_v45, %v10332_v60 }
0x30f2   : > { %v10353_v2 = vpop.xlane.xlu0 %10352  ;;  %v10362_v61 = vpop.xlane.xlu1 %10361 }
0x30f3   : > { %v10371_v53 = vmul.f32 0.03125, %v10353_v2  ;;  %v10374_v32 = vmul.f32 0.03125, %v10362_v61 }
0x30f5   : > { %v10387_v18 = vsub.f32 %v10371_v53, %v10379_v59  ;;  %v10410_v59 = vsub.f32 %v17292_v15, %v10330_v40 }
0x30f6   : > { %v10347_v21 = vpop.xlane.xlu0 %10346  ;;  %v10368_v42 = vpop.xlane.xlu1 %10367 }
0x30f7   : > { %v10395_v37 = vadd.f32 1e-05, %v10387_v18  ;;  %v10369_v41 = vmul.f32 0.03125, %v10347_v21  ;;  %v10376_v2 = vmul.f32 0.03125, %v10368_v42 }
0x30f9   : > { %13561 = vrsqrt.f32 %v10395_v37  ;;  %v10385_v55 = vsub.f32 %v10369_v41, %v10377_v27 }
0x30fa   : > { %v10356_v11 = vpop.xlane.xlu0 %10355 }
0x30fb   : > { %v10393_v47 = vadd.f32 1e-05, %v10385_v55  ;;  %v10372_v4 = vmul.f32 0.03125, %v10356_v11 }
0x30fd   : > { %13563 = vrsqrt.f32 %v10393_v47  ;;  %v10388_v36 = vsub.f32 %v10372_v4, %v10380_v20 }
0x30fe   : > { %v10350_v26 = vpop.xlane.xlu0 %10349 }
0x30ff   : > { %v10396_v63 = vadd.f32 1e-05, %v10388_v36  ;;  %v10370_v58 = vmul.f32 0.03125, %v10350_v26 }
0x3101   : > { %13565 = vrsqrt.f32 %v10396_v63  ;;  %v10386_v9 = vsub.f32 %v10370_v58, %v10378_v57 }
0x3102   : > { %v10325_v51 = vpop.xlane.xlu0 %10324 }
0x3103   : > { %v13562_v50 = vpop.eup %13561  ;;  %v10394_v25 = vadd.f32 1e-05, %v10386_v9  ;;  %v10335_v55 = vmul.f32 0.03125, %v10325_v51 }
0x3104   : > { %v10419_v46 = vmul.f32 %v13562_v50, %v10411_v43 }
0x3105   : > { %13567 = vrsqrt.f32 %v10394_v25  ;;  %v10383_v57 = vmul.f32 %v10335_v55, %v10335_v55 }
0x3106   : > { %v10434_v1 = vmul.f32 %v17356_v39, %v10419_v46  ;;  %v10319_v35 = vpop.xlane.xlu0 %10318 }
0x3107   : > { %v13564_v30 = vpop.eup %13563  ;;  %v10333_v21 = vmul.f32 0.03125, %v10319_v35 }
0x3108   : > { %v10449_v62 = vadd.f32 %v17359_v49, %v10434_v1  ;;  %v10417_v31 = vmul.f32 %v13564_v30, %v10409_v54 }
0x3109   : > { %v10381_v47 = vmul.f32 %v10333_v21, %v10333_v21 }
0x310a   : > { %11331 = vst.msk [vmem:[%s17364_s16 + $0x10] sm:$0xff] %vm2856_vm1, %v10449_v62  ;;  %v10328_v10 = vpop.xlane.xlu0 %10327  ;;  %v10432_v7 = vmul.f32 %v17356_v39, %v10417_v31  ;;  %v10457_v46 = vadd.f32 %v15610_v12, %v10449_v62 }
0x310b   : > { %v13566_v17 = vpop.eup %13565  ;;  %v10336_v48 = vmul.f32 0.03125, %v10328_v10  ;;  %v10413_v10 = vsub.f32 %v17333_v56, %v10333_v21 }
0x310c   : > { %v10420_v16 = vmul.f32 %v13566_v17, %v10412_v52  ;;  %v10447_v0 = vadd.f32 %v17359_v49, %v10432_v7 }
0x310d   : > { %v10384_v38 = vmul.f32 %v10336_v48, %v10336_v48 }
0x310e   : > { %v10435_v53 = vmul.f32 %v17356_v39, %v10420_v16  ;;  %v10322_v18 = vpop.xlane.xlu0 %10321  ;;  %11329 = vst.msk [vmem:[%s17364_s16] sm:$0xff] %vm2856_vm1, %v10447_v0  ;;  %v10455_v50 = vadd.f32 %v15602_v5, %v10447_v0 }
0x310f   : > { %v13568_v45 = vpop.eup %13567  ;;  %v10392_v27 = vsub.f32 %v10376_v2, %v10384_v38  ;;  %v10334_v60 = vmul.f32 0.03125, %v10322_v18 }
0x3110   : > { %v10450_v37 = vadd.f32 %v17359_v49, %v10435_v53  ;;  %v10418_v41 = vmul.f32 %v13568_v45, %v10410_v59 }
0x3111   : > { %v10400_v11 = vadd.f32 1e-05, %v10392_v27  ;;  %v10382_v20 = vmul.f32 %v10334_v60, %v10334_v60  ;;  %v10414_v52 = vsub.f32 %v17311_v34, %v10334_v60 }
0x3112   : > { %11332 = vst.msk [vmem:[%s17364_s16 + $0x18] sm:$0xff] %vm2856_vm1, %v10450_v37  ;;  %v10359_v15 = vpop.xlane.xlu0 %10358  ;;  %v10433_v40 = vmul.f32 %v17356_v39, %v10418_v41  ;;  %v10458_v9 = vadd.f32 %v15612_v13, %v10450_v37  ;;  %v10631_v1 = vpack.c.bf16 %v10450_v37, %v10449_v62 }
0x3113   : > { %13569 = vrsqrt.f32 %v10400_v11  ;;  %v10390_v4 = vsub.f32 %v10374_v32, %v10382_v20  ;;  %v10373_v36 = vmul.f32 0.03125, %v10359_v15  ;;  %v12119_v11 = vld [vmem:[%s17855_s15] ss:$0 sm:$0xff] }
0x3114   : > { %v10448_v26 = vadd.f32 %v17359_v49, %v10433_v40  ;;  %v10527_v13 = vpack.c.bf16 %v10458_v9, %v10457_v46 }
0x3115   : > { %v10398_v63 = vadd.f32 1e-05, %v10390_v4  ;;  %v10389_v58 = vsub.f32 %v10373_v36, %v10381_v47 }
0x3116   : > { %v10365_v43 = vpop.xlane.xlu0 %10364  ;;  %v10630_v51 = vpack.c.bf16 %v10448_v26, %v10447_v0  ;;  %11330 = vst.msk [vmem:[%s17364_s16 + $0x8] sm:$0xff] %vm2856_vm1, %v10448_v26  ;;  %v10456_v25 = vadd.f32 %v15604_v6, %v10448_v26  ;;  %v10416_v6 = vsub.f32 %v17306_v3, %v10336_v48  ;;  %v10415_v0 = vsub.f32 %v17329_v14, %v10335_v55 }
0x3117   : > { %13571 = vrsqrt.f32 %v10398_v63  ;;  %v10397_v61 = vadd.f32 1e-05, %v10389_v58  ;;  %v10375_v54 = vmul.f32 0.03125, %v10365_v43 }
0x3118   : > { %12803 = vmatprep.mubr.msk.bf16.mxu0 %vm2856_vm1, %v10630_v51  ;;  %v10526_v35 = vpack.c.bf16 %v10456_v25, %v10455_v50 }
0x3119   : > { %13573 = vrsqrt.f32 %v10397_v61  ;;  %v10391_v30 = vsub.f32 %v10375_v54, %v10383_v57  ;;  %12804 = vmatmul.mubr.msk.bf16.vlgmr.msra.gmra.mrb[124].mxu0 %vm2856_vm1, %v10631_v1 }
0x311a   : > { %12791 = vmatprep.mubr.msk.bf16.mxu1 %vm2856_vm1, %v10526_v35 }
0x311b   : > { %v10399_v5 = vadd.f32 1e-05, %v10391_v30  ;;  %12792 = vmatmul.mubr.msk.bf16.vlgmr.msra.gmra.mrb[120].mxu1 %vm2856_vm1, %v10527_v13 }
0x311d   : > { %v13570_v12 = vpop.eup %13569  ;;  %13575 = vrsqrt.f32 %v10399_v5 }
0x311e   : > { %v10424_v62 = vmul.f32 %v13570_v12, %v10416_v6 }
0x3120   : > { %v10439_v31 = vmul.f32 %v17356_v39, %v10424_v62 }
0x3121   : > { %v13572_v42 = vpop.eup %13571 }
0x3122   : > { %v10454_v7 = vadd.f32 %v17359_v49, %v10439_v31  ;;  %v10422_v17 = vmul.f32 %v13572_v42, %v10414_v52 }
0x3123   : > { %v13574_v16 = vpop.eup %13573 }
0x3124   : > { %11336 = vst.msk [vmem:[%s17364_s16 + $0x38] sm:$0xff] %vm2856_vm1, %v10454_v7  ;;  %v10437_v3 = vmul.f32 %v17356_v39, %v10422_v17  ;;  %v10421_v48 = vmul.f32 %v13574_v16, %v10413_v10 }
0x3126   : > { %v10452_v2 = vadd.f32 %v17359_v49, %v10437_v3  ;;  %v10436_v34 = vmul.f32 %v17356_v39, %v10421_v48 }
0x3127   : > { %v13576_v38 = vpop.eup %13575 }
0x3128   : > { %11334 = vst.msk [vmem:[%s17364_s16 + $0x28] sm:$0xff] %vm2856_vm1, %v10452_v2  ;;  %v10423_v56 = vmul.f32 %v13576_v38, %v10415_v0  ;;  %v10451_v59 = vadd.f32 %v17359_v49, %v10436_v34  ;;  %v10460_v45 = vadd.f32 %v15632_v23, %v10452_v2 }
0x312a   : > { %v10632_v53 = vpack.c.bf16 %v10452_v2, %v10451_v59  ;;  %11333 = vst.msk [vmem:[%s17364_s16 + $0x20] sm:$0xff] %vm2856_vm1, %v10451_v59  ;;  %v10459_v18 = vadd.f32 %v15630_v22, %v10451_v59  ;;  %v10438_v14 = vmul.f32 %v17356_v39, %v10423_v56  ;;  %v10462_v22 = vadd.f32 %v15644_v33, %v10454_v7  ;;  %v12126_v39 = vld [vmem:[%s17854_s2] ss:$0 sm:$0xff]  ;;  %s17858_s2 = sld [smem:[#allocation68_spill]] }
0x312c   : > { %12807 = vmatprep.mubr.msk.bf16.mxu0 %vm2856_vm1, %v10632_v53  ;;  %v10528_v21 = vpack.c.bf16 %v10460_v45, %v10459_v18  ;;  %v10453_v27 = vadd.f32 %v17359_v49, %v10438_v14 }
0x312e   : > { %12795 = vmatprep.mubr.msk.bf16.mxu1 %vm2856_vm1, %v10528_v21  ;;  %v10633_v60 = vpack.c.bf16 %v10454_v7, %v10453_v27  ;;  %11335 = vst.msk [vmem:[%s17364_s16 + $0x30] sm:$0xff] %vm2856_vm1, %v10453_v27  ;;  %v10461_v37 = vadd.f32 %v15636_v28, %v10453_v27  ;;  %s17856_s16 = sld [smem:[#allocation69_spill]] }
0x3130   : > { %12808 = vmatmul.mubr.msk.bf16.gmra.mrb[128].mxu0 %vm2856_vm1, %v10633_v60  ;;  %v10529_v23 = vpack.c.bf16 %v10462_v22, %v10461_v37 }
0x3131   : > { %12819 = vmatprep.mubr.msk.bf16.mxu0 %vm14637_vm0, %v17846_v44 }
0x3132   : > { %12796 = vmatmul.mubr.msk.bf16.gmra.mrb[124].mxu1 %vm2856_vm1, %v10529_v23 }
0x3133   : > { %12813 = vmatprep.mubr.msk.bf16.mxu1 %vm14637_vm0, %v17846_v44 }
0x3134   : > { %v12115_v62 = vld [vmem:[%s17856_s16] ss:$0 sm:$0xff]  ;;  %s12145_s16 = sshll.u32 %s15086_s22, 7  ;;  %s14644_s22 = smov [#allocation47]  }
0x3135   : > { %v10521_v48 = vadd.f32 %v12115_v62, %v16994_v19  ;;  %s17496_s4 = scalar_lea.hbm %s15058_s25, %s12145_s16 }
0x3137   : > { %v10734_v2 = vpack.c.bf16 %v10521_v48, %v10521_v48 }
0x31ec   : > { %v12805_v49 = vpop.f32.mrb[124].mxu0 }
0x31ed   : > { %v10712_v41 = vadd.f32 %v12805_v49, %v12126_v39  ;;  %v10703_v32 = vpop.f32.mrb[125].mxu0 }
0x31ee   : > { %v12793_v55 = vpop.f32.mrb[120].mxu1  ;;  %v12806_v28 = vpop.f32.mrb[126].mxu0  ;;  %v10704_v40 = vadd.f32 %v12126_v39, %v10703_v32 }
0x31ef   : > { %v10715_v20 = vadd.f32 %v12806_v28, %v12126_v39  ;;  %v10599_v33 = vpop.f32.mrb[121].mxu1  ;;  %v10706_v15 = vpop.f32.mrb[127].mxu0  ;;  %v10608_v36 = vadd.f32 %v12793_v55, %v12119_v11 }
0x31f0   : > { %v10707_v47 = vadd.f32 %v12126_v39, %v10706_v15  ;;  %v12794_v4 = vpop.f32.mrb[122].mxu1  ;;  %v10600_v58 = vadd.f32 %v12119_v11, %v10599_v33 }
0x31f1   : > { %v17425_v26 = vpack.c.bf16 %v10715_v20, %v10712_v41  ;;  %v10611_v57 = vadd.f32 %v12794_v4, %v12119_v11  ;;  %v10602_v63 = vpop.f32.mrb[123].mxu1 }
0x31f2   : > { %v17427_v9 = vpack.c.bf16 %v10707_v47, %v10704_v40  ;;  %v10603_v43 = vadd.f32 %v12119_v11, %v10602_v63 }
0x31f3   : > { %v10739_v51 = vpack.c.bf16 %v10611_v57, %v10608_v36 }
0x31f4   : > { %v10738_v50 = vpack.c.bf16 %v10603_v43, %v10600_v58 }
0x31f5   : > { %10748 = vrot.lane.b32.xlu1 %v10739_v51, %s17803_s1 }
0x31f6   : > { %10746 = vrot.lane.b32.xlu0 %v10738_v50, %s17803_s1 }
0x3203   : > { %v12809_v25 = vpop.f32.mrb[128].mxu0 }
0x3204   : > { %v10728_v46 = vadd.f32 %v12809_v25, %v12126_v39  ;;  %v10719_v61 = vpop.f32.mrb[129].mxu0 }
0x3205   : > { %v12797_v54 = vpop.f32.mrb[124].mxu1  ;;  %v12810_v1 = vpop.f32.mrb[130].mxu0  ;;  %v10720_v5 = vadd.f32 %v12126_v39, %v10719_v61 }
0x3206   : > { %v10731_v35 = vadd.f32 %v12810_v1, %v12126_v39  ;;  %v10615_v30 = vpop.f32.mrb[125].mxu1  ;;  %v10722_v13 = vpop.f32.mrb[131].mxu0  ;;  %v10624_v31 = vadd.f32 %v12797_v54, %v12119_v11 }
0x3207   : > { %v10723_v6 = vadd.f32 %v12126_v39, %v10722_v13  ;;  %v12798_v12 = vpop.f32.mrb[126].mxu1  ;;  %v10616_v7 = vadd.f32 %v12119_v11, %v10615_v30 }
0x3208   : > { %v17432_v52 = vpack.c.bf16 %v10731_v35, %v10728_v46  ;;  %v10627_v42 = vadd.f32 %v12798_v12, %v12119_v11  ;;  %v10618_v10 = vpop.f32.mrb[127].mxu1 }
0x3209   : > { %v10760_v17 = vpack.c.bf16 %v10723_v6, %v10720_v5  ;;  %v10619_v16 = vadd.f32 %v12119_v11, %v10618_v10 }
0x320a   : > { %v10741_v3 = vpack.c.bf16 %v10627_v42, %v10624_v31 }
0x320b   : > { %v10740_v0 = vpack.c.bf16 %v10619_v16, %v10616_v7 }
0x320c   : > { %10752 = vrot.lane.b32.xlu0 %v10741_v3, %s17803_s1 }
0x320d   : > { %10750 = vrot.lane.b32.xlu1 %v10740_v0, %s17803_s1 }
0x3211   : > { %10736 = vrot.lane.b32.xlu1 %v10734_v2, %s17803_s1 }
0x322a   : > { %10778 = vxpose.xlu0.c.b16.start [1/4] (short) (narrow) %v10738_v50, 16 }
0x322e   : > { %10779 = vxpose.xlu0.c.b16.cont [2/4] (short) (narrow) %v10739_v51, 16 }
0x3232   : > { %10780 = vxpose.xlu0.c.b16.cont [3/4] (short) (narrow) %v10740_v0, 16 }
0x3236   : > { %10781 = vxpose.xlu0.c.b16.end [4/4] (short) (narrow) %v10741_v3, 16 }
0x3267   : > { %v10749_v38 = vpop.permute.xlu1 %10748 }
0x3268   : > { %v10747_v34 = vpop.permute.xlu0 %10746 }
0x3269   : > { %10794 = vxpose.xlu1.c.b16.start [1/4] (short) (narrow) %v10747_v34, 16 }
0x326d   : > { %10795 = vxpose.xlu1.c.b16.cont [2/4] (short) (narrow) %v10749_v38, 16 }
0x327e   : > { %v10753_v59 = vpop.permute.xlu0 %10752 }
0x327f   : > { %v10751_v56 = vpop.permute.xlu1 %10750 }
0x3280   : > { %10796 = vxpose.xlu1.c.b16.cont [3/4] (short) (narrow) %v10751_v56, 16 }
0x3283   : > { %v10737_v18 = vpop.permute.xlu1 %10736 }
0x3284   : > { %10797 = vxpose.xlu1.c.b16.end [4/4] (short) (narrow) %v10753_v59, 16 }
0x3290   : > { %v10786_v19 = vpop.trf.xlu0 }
0x3291   : > { %v10814_v53 = vsel %vm3975_vm4, %v10786_v19, 0 }
0x3292   : > { %12812 = vmatpush3.bf16.msra.mxu1 %v10814_v53 }
0x3293   : > { %12823 = vmatprep.subr.bf16.mxu1 %v17846_v44 }
0x3295   : > { %12814 = vmatmul.mubr.msk.bf16.vlgmr.msra.gmra.mrb[128].mxu1 %vm3161_vm3, %v10734_v2 }
0x3296   : > { %12825 = vmatprep.mubr.msk.bf16.mxu1 %vm14637_vm0, %v17846_v44 }
0x32de   : > { %v10802_v45 = vpop.trf.xlu1 }
0x32df   : > { %v10860_v14 = vsel %vm3975_vm4, %v10802_v45, 0 }
0x32e0   : > { %12818 = vmatpush3.bf16.msra.mxu0 %v10860_v14 }
0x32e1   : > { %12829 = vmatprep.subr.bf16.mxu0 %v17846_v44 }
0x32e3   : > { %12820 = vmatmul.mubr.msk.bf16.vlgmr.msra.gmra.mrb[132].mxu0 %vm3161_vm3, %v10737_v18 }
0x32e4   : > { %12831 = vmatprep.mubr.msk.bf16.mxu0 %vm14637_vm0, %v17846_v44 }
0x3368   : > { %v10850_v21 = vpop.f32.mrb[128].mxu1 }
0x3369   : > { %v10902_v27 = vmul.f32 0.35355338, %v10850_v21  ;;  %v12815_v60 = vpop.f32.mrb[129].mxu1 }
0x336a   : > { %v10853_v37 = vpop.f32.mrb[130].mxu1 }
0x336b   : > { %v12816_v22 = vpop.f32.mrb[131].mxu1  ;;  %v10904_v23 = vsel %vm4067_vm5, %v10902_v27, -inf }
0x336c   : > { %10905 = vmax.xlane.f32.xlu0 %v10904_v23 }
0x3382   : > { %10766 = vrot.lane.b32.xlu0 %v17427_v9, %s17803_s1 }
0x3386   : > { %10770 = vrot.lane.b32.xlu0 %v10760_v17, %s17803_s1 }
0x33b6   : > { %v10896_v39 = vpop.f32.mrb[132].mxu0 }
0x33b7   : > { %v10903_v49 = vmul.f32 0.35355338, %v10896_v39  ;;  %v12821_v41 = vpop.f32.mrb[133].mxu0 }
0x33b8   : > { %v10899_v32 = vpop.f32.mrb[134].mxu0 }
0x33b9   : > { %v12822_v55 = vpop.f32.mrb[135].mxu0  ;;  %v10907_v11 = vsel %vm4067_vm5, %v10903_v49, -inf }
0x33ba   : > { %10908 = vmax.xlane.f32.xlu1 %v10907_v11 }
0x33cb   : > { %10768 = vrot.lane.b32.xlu1 %v17425_v26, %s17803_s1 }
0x33cf   : > { %10772 = vrot.lane.b32.xlu1 %v17432_v52, %s17803_s1  ;;  %s17857_s1 = sld [smem:[#allocation72_spill]] }
0x33d5   : > { %v13368_v37 = vld [vmem:[%s17857_s1] sm:$0xff]  }
0x33f9   : > { %v10906_v28 = vpop.xlane.xlu0 %10905 }
0x33fa   : > { %v10910_v20 = vsub.f32 %v10902_v27, %v10906_v28 }
0x33fc   : > { %v10912_v33 = vmul.f32 1.442695, %v10910_v20 }
0x33fd   : > { %v10767_v58 = vpop.permute.xlu0 %10766 }
0x33fe   : > { %13577 = vpow2.f32 %v10912_v33 }
0x3401   : > { %v10771_v51 = vpop.permute.xlu0 %10770 }
0x3408   : > { %v13578_v15 = vpop.eup %13577 }
0x3409   : > { %v10916_v40 = vsel %vm4067_vm5, %v13578_v15, 0.0 }
0x340a   : > { %10917 = vadd.xlane.f32.xlu0 %v10916_v40 }
0x3437   : > { %10928 = vxpose.xlu0.c.b16.start [1/4] (short) (narrow) %v17427_v9, 16 }
0x343b   : > { %10929 = vxpose.xlu0.c.b16.cont [2/4] (short) (narrow) %v17425_v26, 16 }
0x343f   : > { %10930 = vxpose.xlu0.c.b16.cont [3/4] (short) (narrow) %v10760_v17, 16 }
0x3443   : > { %10931 = vxpose.xlu0.c.b16.end [4/4] (short) (narrow) %v17432_v52, 16 }
0x3447   : > { %v10909_v47 = vpop.xlane.xlu1 %10908 }
0x3448   : > { %v10911_v4 = vsub.f32 %v10903_v49, %v10909_v47 }
0x344a   : > { %v10914_v36 = vmul.f32 1.442695, %v10911_v4 }
0x344b   : > { %v10769_v43 = vpop.permute.xlu1 %10768 }
0x344c   : > { %13579 = vpow2.f32 %v10914_v36  ;;  %v12139_v36 = vld [vmem:[%s17858_s2] ss:$0 sm:$0xff] }
0x344f   : > { %v10773_v9 = vpop.permute.xlu1 %10772 }
0x3456   : > { %v13580_v57 = vpop.eup %13579 }
0x3457   : > { %v10919_v63 = vsel %vm4067_vm5, %v13580_v57, 0.0 }
0x3458   : > { %10920 = vadd.xlane.f32.xlu1 %v10919_v63 }
0x3485   : > { %10944 = vxpose.xlu1.c.b16.start [1/4] (short) (narrow) %v10767_v58, 16 }
0x3489   : > { %10945 = vxpose.xlu1.c.b16.cont [2/4] (short) (narrow) %v10769_v43, 16 }
0x348d   : > { %10946 = vxpose.xlu1.c.b16.cont [3/4] (short) (narrow) %v10771_v51, 16 }
0x3491   : > { %10947 = vxpose.xlu1.c.b16.end [4/4] (short) (narrow) %v10773_v9, 16 }
0x3497   : > { %v10918_v26 = vpop.xlane.xlu0 %10917 }
0x3498   : > { %13581 = vrcp.f32 %v10918_v26 }
0x349d   : > { %v10936_v54 = vpop.trf.xlu0 }
0x34a2   : > { %v13582_v50 = vpop.eup %13581 }
0x34a3   : > { %v10924_v25 = vmul.f32 %v13582_v50, %v13578_v15 }
0x34a5   : > { %v10926_v46 = vpack.c.bf16 %v10924_v25, %v10924_v25 }
0x34a7   : > { %v10964_v61 = vsel %vm4067_vm5, %v10926_v46, 0 }
0x34a8   : > { %12824 = vmatpush3.bf16.xpose.msra.mxu1 %v10964_v61 }
0x34a9   : > { %12835 = vmatprep.subr.bf16.mxu1 %v17846_v44 }
0x34af   : > { %12826 = vmatmul.mubr.msk.bf16.vlgmr.msra.gmra.mrb[132].mxu1 %vm4067_vm5, %v10936_v54 }
0x34b0   : > { %12837 = vmatprep.mubr.msk.bf16.mxu1 %vm14637_vm0, %v17846_v44  ;;  %12836 = vmatpush3.bf16.msra.mxu1 %v13368_v37 }
0x34e5   : > { %v10921_v1 = vpop.xlane.xlu1 %10920 }
0x34e6   : > { %13583 = vrcp.f32 %v10921_v1 }
0x34eb   : > { %v10952_v6 = vpop.trf.xlu1 }
0x34f0   : > { %v13584_v35 = vpop.eup %13583 }
0x34f1   : > { %v10925_v30 = vmul.f32 %v13584_v35, %v13580_v57 }
0x34f3   : > { %v10927_v13 = vpack.c.bf16 %v10925_v30, %v10925_v30 }
0x34f5   : > { %v11010_v5 = vsel %vm4067_vm5, %v10927_v13, 0  ;;  %v12142_v13 = vld [vmem:[#allocation46] ss:$0 sm:$0xff] }
0x34f6   : > { %12830 = vmatpush3.bf16.xpose.msra.mxu0 %v11010_v5 }
0x34fd   : > { %12832 = vmatmul.mubr.msk.bf16.vlgmr.msra.gmra.mrb[136].mxu0 %vm4067_vm5, %v10952_v6  ;;  %v12143_v6 = vld [vmem:[#allocation44] ss:$0 sm:$0xff] }
0x3582   : > { %v11000_v12 = vpop.f32.mrb[132].mxu1 }
0x3583   : > { %11052 = vxpose.xlu0.b32.start.end [1/1] (short) (narrow) %v11000_v12, 8  ;;  %v12827_v62 = vpop.f32.mrb[133].mxu1 }
0x3584   : > { %v11003_v31 = vpop.f32.mrb[134].mxu1 }
0x3585   : > { %v12828_v52 = vpop.f32.mrb[135].mxu1 }
0x35d0   : > { %v11046_v42 = vpop.f32.mrb[136].mxu0 }
0x35d1   : > { %11084 = vxpose.xlu0.b32.start.end [1/1] (short) (narrow) %v11046_v42, 8  ;;  %v12833_v10 = vpop.f32.mrb[137].mxu0 }
0x35d2   : > { %v11049_v7 = vpop.f32.mrb[138].mxu0 }
0x35d3   : > { %v12834_v17 = vpop.f32.mrb[139].mxu0 }
0x3603   : > { %v11068_v16 = vpop.trf.xlu0 }
0x3604   : > { %v11116_v3 = vcombine.high %v11068_v16, %v17846_v44  ;;  %v11123_v0 = vrot.slane %v11068_v16, %v15564_v24 }
0x3606   : > { %v11130_v38 = vrot.slane %v11116_v3, %v15564_v24 }
0x3651   : > { %v11100_v48 = vpop.trf.xlu0 }
0x3652   : > { %v11131_v2 = vcombine.high %v11100_v48, %v17846_v44  ;;  %v11138_v34 = vrot.slane %v11100_v48, %v15564_v24 }
0x3654   : > { %v11145_v56 = vrot.slane %v11131_v2, %v15564_v24  ;;  %v11146_v59 = vcombine.low %v11123_v0, %v11138_v34  ;;  %v11147_v19 = vcombine.high %v11123_v0, %v11138_v34 }
0x3656   : > { %v11154_v53 = vrot.slane %v11146_v59, %v15568_v29  ;;  %v11161_v18 = vrot.slane %v11147_v19, %v15568_v29  ;;  %v11162_v45 = vcombine.low %v11130_v38, %v11145_v56  ;;  %v11163_v14 = vcombine.high %v11130_v38, %v11145_v56 }
0x3658   : > { %v11170_v21 = vrot.slane %v11162_v45, %v15568_v29  ;;  %v11177_v27 = vrot.slane %v11163_v14, %v15568_v29  ;;  %v11182_v60 = vcombine.low %v11154_v53, %v11161_v18  ;;  %v12137_v44 = vcombine.high %v11154_v53, %v11161_v18 }
0x365a   : > { %v11189_v22 = vrot.slane %v11182_v60, %v15564_v24  ;;  %v11197_v23 = vrot.slane %v12137_v44, %v15564_v24  ;;  %v11198_v39 = vcombine.low %v11170_v21, %v11177_v27  ;;  %v12138_v49 = vcombine.high %v11170_v21, %v11177_v27 }
0x365c   : > { %v11205_v41 = vrot.slane %v11198_v39, %v15564_v24  ;;  %v11213_v32 = vrot.slane %v12138_v49, %v15564_v24  ;;  %v11214_v55 = vcombine.low %v11189_v22, %v11197_v23 }
0x365e   : > { %v11222_v11 = vcombine.low %v11205_v41, %v11213_v32  ;;  %v11221_v28 = vrot.slane %v11214_v55, %v15568_v29 }
0x3660   : > { %v11229_v20 = vrot.slane %v11222_v11, %v15568_v29 }
0x3662   : > { %v11231_v33 = vcombine.high %v11221_v28, %v11229_v20  ;;  %v11230_v15 = vcombine.low %v11221_v28, %v11229_v20 }
0x3664   : > { %11233 = vrot.lane.b32.xlu1 %v11231_v33, %s17809_s3  ;;  %s2769_s3 = sand.u32 1, %s14515_s0  }
0x3665   : > { %s11889_s15 = sshll.u32 %s2769_s3, 3  ;;  %s11338_s5 = scalar_lea.sflag [#allocation4], %s2769_s3 }
0x3666   : > { %s2771_s1 = scalar_lea.vmem [#allocation47], %s11889_s15  ;;  %s14405_s15 = sshll.u32 %s14644_s22, 4  ;;  %s14406_s15 = int_to_ptr.vmem [resolvable:$false] %s14405_s15 }
0x3667   : > { %s11356_s2 = sshll.u32 %s2771_s1, 4  ;;  %s14407_s8 = scalar_lea.vmem %s14406_s15, 256  ;;  %s17498_s2 = int_to_ptr.vmem [resolvable:$true] %s11356_s2 }
0x3668   : > { %s14401_s6 = scalar_lea.vmem %s17498_s2, 128  ;;  %p14408_p6 = scmp.lt.s32.totalorder %s17498_s2, %s14406_s15 }
0x3669   : > { %p14402_p3 = scmp.ne.s32.totalorder %s17498_s2, %s14401_s6  ;;  %p14409_p9 = scmp.lt.s32.totalorder %s14407_s8, %s14401_s6 }
0x366b   : > { %p14403_p12 = pnand %p14402_p3, %p17859_p4  ;;  %p14410_p10 = por %p14409_p9, %p14408_p6 }
0x366d   : > { %p14404_p5 = pneg %p14403_p12 }
0x366f   : > { %p14411_p7 = pnand %p14410_p10, %p14404_p5 }
0x36d6   : > { %v11234_v40 = vpop.permute.xlu1 %11233 }
0x36d7   : > { %v11236_v47 = vsel %vm3161_vm3, %v11230_v15, %v11234_v40 }
0x36d8   : > { %v11237_v4 = vpack.c.bf16 %v11236_v47, %v11236_v47 }
0x36da   : > { %12838 = vmatmul.mubr.msk.bf16.vlgmr.msra.gmra.mrb[136].mxu1 %vm3072_vm2, %v11237_v4 }
0x37ad   : > { %v11290_v57 = vpop.f32.mrb[136].mxu1 }
0x37ae   : > { %v11291_v63 = vadd.f32 %v12139_v36, %v11290_v57  ;;  %v12839_v24 = vpop.f32.mrb[137].mxu1 }
0x37af   : > { %v11293_v58 = vpop.f32.mrb[138].mxu1 }
0x37b0   : > { %v11296_v43 = vadd.f32 %v11291_v63, %v16766_v8  ;;  %v12840_v51 = vpop.f32.mrb[139].mxu1 }
0x37b2   : > { %v11297_v29 = vsel %vm2856_vm1, %v11296_v43, 0.0  ;;  %v11301_v9 = vmul.f32 %v11296_v43, %v11296_v43 }
0x37b3   : > { %11298 = vadd.xlane.f32.xlu0 %v11297_v29 }
0x37b4   : > { %v11302_v26 = vsel %vm2856_vm1, %v11301_v9, 0.0 }
0x37b5   : > { %11303 = vadd.xlane.f32.xlu1 %v11302_v26 }
0x3840   : > { %v11299_v50 = vpop.xlane.xlu0 %11298 }
0x3841   : > { %v11300_v25 = vmul.f32 0.03125, %v11299_v50 }
0x3842   : > { %v11304_v46 = vpop.xlane.xlu1 %11303 }
0x3843   : > { %v11306_v61 = vmul.f32 %v11300_v25, %v11300_v25  ;;  %v11305_v54 = vmul.f32 0.03125, %v11304_v46  ;;  %v11310_v8 = vsub.f32 %v11296_v43, %v11300_v25 }
0x3845   : > { %v11307_v1 = vsub.f32 %v11305_v54, %v11306_v61 }
0x3847   : > { %v11308_v35 = vadd.f32 1e-05, %v11307_v1 }
0x3849   : > { %13585 = vrsqrt.f32 %v11308_v35 }
0x3853   : > { %v13586_v30 = vpop.eup %13585 }
0x3854   : > { %v11311_v5 = vmul.f32 %v13586_v30, %v11310_v8 }
0x3856   : > { %v11319_v12 = vmul.f32 %v12142_v13, %v11311_v5 }
0x3858   : > { %v11327_v62 = vadd.f32 %v12143_v6, %v11319_v12 }
0x385a   : > { %11328 = vst.msk [vmem:[%s2771_s1] sm:$0xff] %vm2856_vm1, %v11327_v62 }
0x385b   : > { %14414 = shalt.err (!%p14411_p7)
}
0x385c   : > { %s14415_s3 = scalar_lea.hbm %s17496_s4, 128  ;;  %s14419_s16 = scalar_lea.hbm %s15058_s25, 256 }
0x385d   : > { %p14416_p8 = scmp.ne.s32.totalorder %s17496_s4, %s14415_s3  ;;  %p14420_p1 = scmp.lt.u32.totalorder %s17496_s4, %s15058_s25 }
0x385e   : > { %p14421_p2 = scmp.lt.u32.totalorder %s14419_s16, %s14415_s3  ;;  %p14423_p3 = scmp.lt.u32.totalorder %s14415_s3, %s17496_s4 }
0x385f   : > { %p14417_p11 = pnand %p14416_p8, %p17859_p4 }
0x3860   : > { %p14422_p0 = por %p14421_p2, %p14420_p1 }
0x3861   : > { %p14418_p13 = pneg %p14417_p11 }
0x3862   : > { %p14424_p12 = por %p14423_p3, %p14422_p0 }
0x3864   : > { %p14425_p5 = pnand %p14424_p12, %p14418_p13 }
0x3866   : > { %14428 = shalt.err (!%p14425_p5)
}
0x3867   : > { %12961 = dma.vmem_to_hbm [thread:$0]  (%p17859_p4), %s17498_s2, 128, %s17496_s4, %s11338_s5  }
0x3868 PF: > { %s17860_s8 = sld [smem:[#allocation137_spill]]  ;;  %s17861_s6 = sld [smem:[#allocation141_spill]] }
0x3869   : > { %p13113_p6 = scmp.ge.s32.totalorder %s14523_s18, 2 }
0x386e   : > { %s11371_s1 = sand.u32 1, %s17860_s8   ;;  %p17862_p9 = scmp.ne.s32.totalorder %s17861_s6, 0 }
0x386f   : > { %s11372_s22 = scalar_lea.sflag [#allocation4], %s11371_s1 }
0x3870   : > { %p13052_p10 = pnand %p13113_p6, %p17862_p9 }
0x3872   : > { %14506 = dma.done.wait (!%p13052_p10), %s11372_s22, 128  }
0x3873   : > { %14508 = vsyncadd (!%p13052_p10), %s11372_s22, 4294967168  ;;  %s17863_s18 = sld [smem:[#allocation139_spill]]  ;;  %s17864_s3 = sld [smem:[#allocation138_spill]] }
0x3874   : > { %s17865_s16 = sld [smem:[#allocation140_spill]]  ;;  %s17866_s15 = smov %s14515_s0 }
0x3879   : > { %p191_p7 = scmp.ge.s32.totalorder %s17863_s18, 4   ;;  %s17867_s0 = smov %s17864_s3 }
0x387b   :  { %193 = sbr.rel (!%p191_p7) target bundleno = 177 (0xb1), region = 596 }
0x3882   :  { %11385 = vsyncpa [#allocation3], 1 }
0x3883   :  { %11387 = vsyncpa [#allocation3 + $0x1], 1 }
0x3884   :  { %11388 = vsyncpa [#allocation6], 1 }
0x3885   :  { %11389 = vsyncpa [#allocation9], 1 }
0x3886   :  { %11390 = vsyncpa [#allocation12], 1 }
0x3887   :  { %11391 = vsyncpa [#allocation15], 1 }
0x3888   :  { %11392 = vsyncpa [#allocation18], 1 }
0x3889   :  { %11393 = vsyncpa [#allocation21], 1 }
0x388a   :  { %11394 = vsyncpa [#allocation24], 1 }
0x388b   :  { %11395 = vsyncpa [#allocation27], 1 }
0x388c   :  { %11396 = vsyncpa [#allocation30], 1 }
0x388d   :  { %11397 = vsyncpa [#allocation33], 1 }
0x388e   :  { %11398 = vsyncpa [#allocation36], 1 }
0x388f   :  { %11399 = vsyncpa [#allocation39], 1 }
0x3890   :  { %11400 = vsyncpa [#allocation42], 1 }
0x3891   :  { %11401 = vsyncpa [#allocation45], 1 }
0x3892   :  { %11402 = vsyncpa [#allocation4], 1 }
0x3893   :  { %11404 = vsyncpa [#allocation4 + $0x1], 1 }

</bundles_post_ra>
